<compile_context>
chip_gen: v7x
topology: tpu7x:2x2x1
jax: 0.10.0
libtpu: 0.0.40
codegen_flags: <defaults>
</compile_context>

<pallas_src>
import jax
import jax.numpy as jnp
from jax import lax
from jax.experimental import pallas as pl
from jax.experimental.pallas import tpu as pltpu

_BF16 = jnp.bfloat16


def _round_bf16(x):
    """Round an f32 array to bf16-representable values (kept in f32)."""
    return x.astype(_BF16).astype(jnp.float32)


# ---------------------------------------------------------------------------
# In-kernel helpers (operate on VALUES only; refs are never sliced)
# ---------------------------------------------------------------------------
def _w_taps(x, stride):
    """Column (kw) taps of a 3x3 / pad=1 conv via sublane shifts only.

    x: (H, W, C).  Returns [t0, t1, t2], each (H, Wo, C) with
    t_kw[h, j, c] = x[h, stride*j + kw - 1, c], zero outside the image
    ('same' padding along W for free).
    """
    h, w, c = x.shape
    z = jnp.zeros((h, 1, c), x.dtype)
    if stride == 1:
        t0 = jnp.concatenate([z, x[:, :w - 1, :]], axis=1)   # col j-1
        t2 = jnp.concatenate([x[:, 1:, :], z], axis=1)        # col j+1
        return [t0, x, t2]
    assert stride == 2 and w % 2 == 0
    wo = w // 2
    r = x.reshape(h, wo, 2, c)            # sublane W -> (outer Wo, sublane 2)
    even = r[:, :, 0, :]                  # cols 0,2,...  -> kw = 1
    odd = r[:, :, 1, :]                   # cols 1,3,...  -> kw = 2
    t0 = jnp.concatenate([z, odd[:, :wo - 1, :]], axis=1)     # cols -1,1,3,...
    return [t0, even, odd]


def _h_taps(p, stride):
    """Row (kh) taps kh=0,1,2 using outer-dim slices/concats only.

    p: (H, Wo, C) -> 3 arrays of shape (Ho, Wo, C).
    """
    h, wo, c = p.shape
    z = jnp.zeros((1, wo, c), p.dtype)
    if stride == 1:
        return [jnp.concatenate([z, p[:h - 1]], axis=0),      # row h-1
                p,                                             # row h
                jnp.concatenate([p[1:], z], axis=0)]           # row h+1
    assert stride == 2 and h % 2 == 0
    ho = h // 2
    r = p.reshape(ho, 2, wo, c)                                # outer-dim split
    even = r[:, 0]                                             # rows 2i   -> kh=1
    odd = r[:, 1]                                              # rows 2i+1 -> kh=2
    kh0 = jnp.concatenate([z, odd[:ho - 1]], axis=0)           # rows 2i-1 -> kh=0
    return [kh0, even, odd]


def _conv3x3_bn_relu(x, w, bias, stride):
    """3x3 conv (pad=1, stride 1|2) + folded BN + ReLU.

    x:    (H, W, Cin) bf16
    w:    (3, 3*Cin, Cout) bf16, BN scale pre-folded; within each kh the rows
          are ordered (kw, ci).
    bias: (1, Cout) f32.
    Three K=3*Cin MXU matmuls accumulated in f32 (the 9-tap im2col slab is
    never materialised).
    """
    cin = x.shape[-1]
    cout = w.shape[-1]
    cols = _w_taps(x, stride)                       # [kw] -> (H, Wo, Cin)
    taps = [_h_taps(cw, stride) for cw in cols]     # taps[kw][kh] -> (Ho,Wo,Cin)
    ho, wo = taps[0][0].shape[0], taps[0][0].shape[1]
    acc = None
    for kh in range(3):
        slab = jnp.concatenate([taps[0][kh], taps[1][kh], taps[2][kh]], axis=-1)
        part = jnp.dot(slab.reshape(ho * wo, 3 * cin), w[kh],
                       preferred_element_type=jnp.float32)
        acc = part if acc is None else acc + part
    y = jnp.maximum(acc + bias, 0.0)
    return y.reshape(ho, wo, cout).astype(_BF16)


def _deconv_bn_relu(x, w, bias, k):
    """ConvTranspose2d(kernel=k, stride=k) + folded BN + ReLU.

    x:    (H, W, Cin) bf16
    w:    (Cin, k*k*Cout) bf16, BN scale pre-folded, columns ordered (a, b, co)
    bias: (1, k*k*Cout) f32
    One bf16 MXU matmul, then a pure relayout (lane slices + outer/sublane
    concats + lane-preserving reshapes) -- no scatter matmuls.  BN+ReLU before
    the spatial scatter is exact because kernel == stride (non-overlapping).
    Returns (k*H, k*W, Cout) bf16.
    """
    h, wd, cin = x.shape
    kkc = w.shape[1]
    cout = kkc // (k * k)
    y = jnp.dot(x.reshape(h * wd, cin), w, preferred_element_type=jnp.float32)
    y = jnp.maximum(y + bias, 0.0)
    if k == 1:
        return y.reshape(h, wd, cout).astype(_BF16)
    y3 = y.astype(_BF16).reshape(h, wd, kkc)
    rows = []
    for a in range(k):
        cols = []
        for b in range(k):
            tap = a * k + b
            cols.append(y3[:, :, tap * cout:(tap + 1) * cout][:, :, None, :])
        row = jnp.concatenate(cols, axis=2)             # (H, W, k, Cout)
        rows.append(row.reshape(h, 1, wd * k, cout))    # (H, 1, k*W, Cout)
    out = jnp.concatenate(rows, axis=1)                 # (H, k, k*W, Cout)
    return out.reshape(h * k, wd * k, cout)


# ---------------------------------------------------------------------------
class Cfg(dict):
    def __getattr__(self, key):
        return self[key]


class BaseBEVBackboneMultitaskPallas:
    """JAX/Pallas port of BaseBEVBackbone_multitask (inference forward)."""

    def __init__(self, model_cfg, input_channels, key):
        self.model_cfg = model_cfg
        layer_nums = model_cfg.get("LAYER_NUMS", None) or []
        layer_strides = model_cfg.get("LAYER_STRIDES", None) or []
        num_filters = model_cfg.get("NUM_FILTERS", None) or []
        upsample_strides = model_cfg.get("UPSAMPLE_STRIDES", None) or []
        num_upsample_filters = model_cfg.get("NUM_UPSAMPLE_FILTERS", None) or []
        assert not model_cfg.get("res_backbone", False)
        # TODO(synk): res_backbone residual variant not exercised by this config.
        num_levels = len(layer_nums)
        c_in_list = [input_channels, *num_filters[:-1]]
        assert len(upsample_strides) <= num_levels
        # TODO(synk): extra final deblock (len(UPSAMPLE_STRIDES) > num_levels)
        # and UPSAMPLE stride < 1 (strided-conv deblock) not instantiated.

        keys = iter(jax.random.split(key, 256))
        self.blocks = []
        self.deblocks = []
        for idx in range(num_levels):
            layers = []

            def conv_params(cin, cout, stride):
                w = _round_bf16(0.05 * jax.random.normal(
                    next(keys), (cout, cin, 3, 3), jnp.float32))
                s, b = self._init_bn(next(keys), cout)
                return {"w": w, "scale": s, "bias": b, "stride": int(stride)}

            layers.append(conv_params(c_in_list[idx], num_filters[idx],
                                      layer_strides[idx]))
            for _ in range(layer_nums[idx]):
                layers.append(conv_params(num_filters[idx], num_filters[idx], 1))
            self.blocks.append(layers)
            if len(upsample_strides) > 0:
                k = int(upsample_strides[idx])
                assert k >= 1
                w = _round_bf16(0.05 * jax.random.normal(
                    next(keys),
                    (num_filters[idx], num_upsample_filters[idx], k, k),
                    jnp.float32))
                s, b = self._init_bn(next(keys), num_upsample_filters[idx])
                self.deblocks.append({"w": w, "scale": s, "bias": b, "stride": k})

        self.num_bev_features = sum(num_upsample_filters)
        # TODO(synk): OTHER_TASKS 'seg'/'lane' branches rely on external modules
        # (Down/Up/MixSegNet) not defined in the reference snippet; disabled.

    @staticmethod
    def _init_bn(key, c, eps=1e-3):
        k1, k2, k3, k4 = jax.random.split(key, 4)
        gamma = 1.0 + 0.1 * jax.random.normal(k1, (c,), jnp.float32)
        beta = 0.1 * jax.random.normal(k2, (c,), jnp.float32)
        mean = 0.1 * jax.random.normal(k3, (c,), jnp.float32)
        var = 0.5 + jax.random.uniform(k4, (c,), jnp.float32)
        scale = gamma / jnp.sqrt(var + eps)
        bias = beta - mean * scale
        return scale, bias

    # ------------------------------------------------------------------
    def forward(self, data_dict):
        x = data_dict["spatial_features"] if isinstance(data_dict, dict) else data_dict
        x_nhwc = jnp.transpose(x, (0, 2, 3, 1))          # NCHW -> NHWC (lane = C)
        out_nhwc = self._fused_pallas(x_nhwc)
        out = jnp.transpose(out_nhwc, (0, 3, 1, 2))      # back to NCHW
        if isinstance(data_dict, dict):
            data_dict["spatial_features_2d"] = out
            return data_dict
        return out

    # ------------------------------------------------------------------
    def _fused_pallas(self, x_nhwc):
        b, h0, w0, c0 = x_nhwc.shape
        args = [x_nhwc.astype(_BF16)]
        in_specs = [pl.BlockSpec((1, h0, w0, c0), lambda i: (i, 0, 0, 0))]

        def add(arr):
            # TODO(synk): once tiles grow (production sizes), mark these
            # constant-index operands single-buffered to save VMEM.
            args.append(arr)
            nd = arr.ndim
            in_specs.append(pl.BlockSpec(arr.shape, lambda i, nd=nd: (0,) * nd))
            return len(args) - 1

        # --- pack weights (BN scale folded) + record static metadata -------
        levels = []
        hh, ww = h0, w0
        cout = c0
        for idx, layers in enumerate(self.blocks):
            convs = []
            for lay in layers:
                stride = lay["stride"]
                cout, cin = lay["w"].shape[0], lay["w"].shape[1]
                # (cout,cin,kh,kw) -> (kh,kw,ci,co), fold BN scale, group by kh.
                wmat = (jnp.transpose(lay["w"], (2, 3, 1, 0)) * lay["scale"]
                        ).reshape(3, 3 * cin, cout).astype(_BF16)
                bias = lay["bias"].reshape(1, cout).astype(jnp.float32)
                convs.append({"w": add(wmat), "b": add(bias), "stride": stride})
                hh = (hh - 1) // stride + 1
                ww = (ww - 1) // stride + 1
            deconv = None
            if len(self.deblocks) > idx:
                dl = self.deblocks[idx]
                k = dl["stride"]
                dcin, dcout = dl["w"].shape[0], dl["w"].shape[1]
                # (ci,co,a,b) -> (ci,a,b,co), fold BN scale, flatten taps.
                wmat = (jnp.transpose(dl["w"], (0, 2, 3, 1)) * dl["scale"]
                        ).reshape(dcin, k * k * dcout).astype(_BF16)
                bias = jnp.tile(dl["bias"], k * k).reshape(
                    1, k * k * dcout).astype(jnp.float32)
                deconv = {"w": add(wmat), "b": add(bias), "k": k}
                up_h, up_w, up_c = hh * k, ww * k, dcout
            else:
                up_h, up_w, up_c = hh, ww, cout
            levels.append({"convs": convs, "deconv": deconv,
                           "up_h": up_h, "up_w": up_w, "up_c": up_c})

        out_h, out_w = levels[0]["up_h"], levels[0]["up_w"]
        out_c = 0
        for lvl in levels:
            assert (lvl["up_h"], lvl["up_w"]) == (out_h, out_w)
            out_c += lvl["up_c"]
        pad_c = (-out_c) % 128          # lane-dense final store
        out_cp = out_c + pad_c

        # --- the fused kernel: whole backbone for one batch element --------
        def kernel(*refs):
            o_ref = refs[-1]
            cur = refs[0][...].reshape(h0, w0, c0)        # (H, W, C) bf16
            ups = []
            for lvl in levels:
                for cv in lvl["convs"]:
                    cur = _conv3x3_bn_relu(cur,
                                           refs[cv["w"]][...],
                                           refs[cv["b"]][...],
                                           cv["stride"])
                dc = lvl["deconv"]
                if dc is not None:
                    up = _deconv_bn_relu(cur, refs[dc["w"]][...],
                                         refs[dc["b"]][...], dc["k"])
                else:
                    up = cur
                ups.append(up)                            # bf16 residency
            out = ups[0] if len(ups) == 1 else jnp.concatenate(ups, axis=-1)
            if pad_c:
                out = jnp.concatenate(
                    [out, jnp.zeros((out_h, out_w, pad_c), out.dtype)], axis=-1)
            o_ref[...] = out[None].astype(jnp.float32)    # fused, lane-dense store

        out_p = pl.pallas_call(
            kernel,
            out_shape=jax.ShapeDtypeStruct((b, out_h, out_w, out_cp),
                                           jnp.float32),
            grid=(b,),
            in_specs=in_specs,
            out_specs=pl.BlockSpec((1, out_h, out_w, out_cp),
                                   lambda i: (i, 0, 0, 0)),
            compiler_params=pltpu.CompilerParams(
                dimension_semantics=("parallel",),        # megacore over batch
                # Sized generously for this config; re-derive from the per-step
                # working set once row tiling / production shapes land.
                vmem_limit_bytes=32 * 1024 * 1024),
        )(*args)
        return out_p[..., :out_c] if pad_c else out_p

    # ------------------------------------------------------------------
    # Pure-JAX (lax) f32 reference for correctness validation.
    # ------------------------------------------------------------------
    def forward_ref(self, x_nchw):
        x = jnp.transpose(x_nchw, (0, 2, 3, 1)).astype(jnp.float32)
        dn = ("NHWC", "HWIO", "NHWC")
        ups = []
        for i, layers in enumerate(self.blocks):
            for lay in layers:
                wh = jnp.transpose(lay["w"], (2, 3, 1, 0))  # HWIO
                y = lax.conv_general_dilated(
                    x, wh, (lay["stride"], lay["stride"]), ((1, 1), (1, 1)),
                    dimension_numbers=dn)
                x = jnp.maximum(y * lay["scale"] + lay["bias"], 0.0)
            if len(self.deblocks) > i:
                dl = self.deblocks[i]
                k = dl["stride"]
                bsz, hh, ww, _ = x.shape
                cout = dl["w"].shape[1]
                y = jnp.einsum("bhwc,cokl->bhkwlo", x, dl["w"])
                y = y.reshape(bsz, hh * k, ww * k, cout)
                ups.append(jnp.maximum(y * dl["scale"] + dl["bias"], 0.0))
            else:
                ups.append(x)
        xcat = jnp.concatenate(ups, axis=-1) if len(ups) > 1 else ups[0]
        return jnp.transpose(xcat, (0, 3, 1, 2))


# ---------------------------------------------------------------------------
if __name__ == "__main__":
    model_cfg = Cfg(
        LAYER_NUMS=[1, 1],
        LAYER_STRIDES=[1, 2],
        NUM_FILTERS=[32, 64],
        UPSAMPLE_STRIDES=[1, 2],
        NUM_UPSAMPLE_FILTERS=[32, 32],
    )
    key = jax.random.PRNGKey(0)
    k_param, k_data = jax.random.split(key)
    model = BaseBEVBackboneMultitaskPallas(model_cfg, input_channels=16,
                                           key=k_param)

    # NCHW 'spatial_features' input, bf16-representable values.
    x = _round_bf16(jax.random.normal(k_data, (2, 16, 16, 16), jnp.float32))
    data_dict = {"spatial_features": x}

    out = model.forward(data_dict)["spatial_features_2d"]
    out = jax.block_until_ready(out)

    ref = jax.block_until_ready(model.forward_ref(x))
    assert out.shape == (2, model.num_bev_features, 16, 16), out.shape
    max_err = float(jnp.max(jnp.abs(out - ref)))
    # bf16 MXU inputs with f32 accumulation; intermediate activations (and the
    # final per-level upsamples) are rounded to bf16 between fused layers, so
    # allow a few-e-2 deviation from the pure-f32 reference.
    assert jnp.allclose(out, ref, rtol=5e-2, atol=5e-2), max_err

    print("KERNEL_OK")
</pallas_src>

<mosaic_0001>
module attributes {stable_mosaic.version = 11 : i64} {
  func.func @kernel(%arg0: i32, %arg1: memref<1x16x16x16xbf16, #tpu.memory_space<vmem>>, %arg2: memref<3x48x32xbf16, #tpu.memory_space<vmem>>, %arg3: memref<1x32xf32, #tpu.memory_space<vmem>>, %arg4: memref<3x96x32xbf16, #tpu.memory_space<vmem>>, %arg5: memref<1x32xf32, #tpu.memory_space<vmem>>, %arg6: memref<32x32xbf16, #tpu.memory_space<vmem>>, %arg7: memref<1x32xf32, #tpu.memory_space<vmem>>, %arg8: memref<3x96x64xbf16, #tpu.memory_space<vmem>>, %arg9: memref<1x64xf32, #tpu.memory_space<vmem>>, %arg10: memref<3x192x64xbf16, #tpu.memory_space<vmem>>, %arg11: memref<1x64xf32, #tpu.memory_space<vmem>>, %arg12: memref<64x128xbf16, #tpu.memory_space<vmem>>, %arg13: memref<1x128xf32, #tpu.memory_space<vmem>>, %arg14: memref<1x16x16x128xf32, #tpu.memory_space<vmem>>) attributes {dimension_semantics = [#tpu.dimension_semantics<parallel>], iteration_bounds = array<i64: 2>, scalar_prefetch = 0 : i64, scratch_operands = 0 : i64, tpu.core_type = #tpu.core_type<tc>, window_params = [{transform_indices = @transform_0, window_bounds = array<i64: 1, 16, 16, 16>}, {pipeline_mode = #tpu.pipeline_mode<synchronous>, transform_indices = @transform_1, window_bounds = array<i64: 3, 48, 32>}, {pipeline_mode = #tpu.pipeline_mode<synchronous>, transform_indices = @transform_2, window_bounds = array<i64: 1, 32>}, {pipeline_mode = #tpu.pipeline_mode<synchronous>, transform_indices = @transform_3, window_bounds = array<i64: 3, 96, 32>}, {pipeline_mode = #tpu.pipeline_mode<synchronous>, transform_indices = @transform_4, window_bounds = array<i64: 1, 32>}, {pipeline_mode = #tpu.pipeline_mode<synchronous>, transform_indices = @transform_5, window_bounds = array<i64: 32, 32>}, {pipeline_mode = #tpu.pipeline_mode<synchronous>, transform_indices = @transform_6, window_bounds = array<i64: 1, 32>}, {pipeline_mode = #tpu.pipeline_mode<synchronous>, transform_indices = @transform_7, window_bounds = array<i64: 3, 96, 64>}, {pipeline_mode = #tpu.pipeline_mode<synchronous>, transform_indices = @transform_8, window_bounds = array<i64: 1, 64>}, {pipeline_mode = #tpu.pipeline_mode<synchronous>, transform_indices = @transform_9, window_bounds = array<i64: 3, 192, 64>}, {pipeline_mode = #tpu.pipeline_mode<synchronous>, transform_indices = @transform_10, window_bounds = array<i64: 1, 64>}, {pipeline_mode = #tpu.pipeline_mode<synchronous>, transform_indices = @transform_11, window_bounds = array<i64: 64, 128>}, {pipeline_mode = #tpu.pipeline_mode<synchronous>, transform_indices = @transform_12, window_bounds = array<i64: 1, 128>}, {transform_indices = @transform_13, window_bounds = array<i64: 1, 16, 16, 128>}]} {
    %c0 = arith.constant 0 : index
    %c0_0 = arith.constant 0 : index
    %c0_1 = arith.constant 0 : index
    %c0_2 = arith.constant 0 : index
    %0 = vector.load %arg1[%c0, %c0_0, %c0_1, %c0_2] : memref<1x16x16x16xbf16, #tpu.memory_space<vmem>>, vector<1x16x16x16xbf16>
    %1 = vector.shape_cast %0 : vector<1x16x16x16xbf16> to vector<16x16x16xbf16>
    %c0_3 = arith.constant 0 : index
    %c0_4 = arith.constant 0 : index
    %c0_5 = arith.constant 0 : index
    %2 = vector.load %arg2[%c0_3, %c0_4, %c0_5] : memref<3x48x32xbf16, #tpu.memory_space<vmem>>, vector<3x48x32xbf16>
    %c0_6 = arith.constant 0 : index
    %c0_7 = arith.constant 0 : index
    %3 = vector.load %arg3[%c0_6, %c0_7] : memref<1x32xf32, #tpu.memory_space<vmem>>, vector<1x32xf32>
    %cst = arith.constant 0.000000e+00 : bf16
    %4 = vector.broadcast %cst : bf16 to vector<16x1x16xbf16>
    %5 = vector.extract_strided_slice %1 {offsets = [0, 0, 0], sizes = [16, 15, 16], strides = [1, 1, 1]} : vector<16x16x16xbf16> to vector<16x15x16xbf16>
    %6 = tpu.concatenate %4, %5 in 1 : vector<16x1x16xbf16>, vector<16x15x16xbf16> -> vector<16x16x16xbf16>
    %7 = vector.extract_strided_slice %1 {offsets = [0, 1, 0], sizes = [16, 15, 16], strides = [1, 1, 1]} : vector<16x16x16xbf16> to vector<16x15x16xbf16>
    %8 = tpu.concatenate %7, %4 in 1 : vector<16x15x16xbf16>, vector<16x1x16xbf16> -> vector<16x16x16xbf16>
    %cst_8 = arith.constant 0.000000e+00 : bf16
    %9 = vector.broadcast %cst_8 : bf16 to vector<1x16x16xbf16>
    %10 = vector.extract_strided_slice %6 {offsets = [0, 0, 0], sizes = [15, 16, 16], strides = [1, 1, 1]} : vector<16x16x16xbf16> to vector<15x16x16xbf16>
    %11 = tpu.concatenate %9, %10 in 0 : vector<1x16x16xbf16>, vector<15x16x16xbf16> -> vector<16x16x16xbf16>
    %12 = vector.extract_strided_slice %6 {offsets = [1, 0, 0], sizes = [15, 16, 16], strides = [1, 1, 1]} : vector<16x16x16xbf16> to vector<15x16x16xbf16>
    %13 = tpu.concatenate %12, %9 in 0 : vector<15x16x16xbf16>, vector<1x16x16xbf16> -> vector<16x16x16xbf16>
    %cst_9 = arith.constant 0.000000e+00 : bf16
    %14 = vector.broadcast %cst_9 : bf16 to vector<1x16x16xbf16>
    %15 = vector.extract_strided_slice %1 {offsets = [0, 0, 0], sizes = [15, 16, 16], strides = [1, 1, 1]} : vector<16x16x16xbf16> to vector<15x16x16xbf16>
    %16 = tpu.concatenate %14, %15 in 0 : vector<1x16x16xbf16>, vector<15x16x16xbf16> -> vector<16x16x16xbf16>
    %17 = vector.extract_strided_slice %1 {offsets = [1, 0, 0], sizes = [15, 16, 16], strides = [1, 1, 1]} : vector<16x16x16xbf16> to vector<15x16x16xbf16>
    %18 = tpu.concatenate %17, %14 in 0 : vector<15x16x16xbf16>, vector<1x16x16xbf16> -> vector<16x16x16xbf16>
    %cst_10 = arith.constant 0.000000e+00 : bf16
    %19 = vector.broadcast %cst_10 : bf16 to vector<1x16x16xbf16>
    %20 = vector.extract_strided_slice %8 {offsets = [0, 0, 0], sizes = [15, 16, 16], strides = [1, 1, 1]} : vector<16x16x16xbf16> to vector<15x16x16xbf16>
    %21 = tpu.concatenate %19, %20 in 0 : vector<1x16x16xbf16>, vector<15x16x16xbf16> -> vector<16x16x16xbf16>
    %22 = vector.extract_strided_slice %8 {offsets = [1, 0, 0], sizes = [15, 16, 16], strides = [1, 1, 1]} : vector<16x16x16xbf16> to vector<15x16x16xbf16>
    %23 = tpu.concatenate %22, %19 in 0 : vector<15x16x16xbf16>, vector<1x16x16xbf16> -> vector<16x16x16xbf16>
    %24 = tpu.concatenate %11, %16, %21 in 2 : vector<16x16x16xbf16>, vector<16x16x16xbf16>, vector<16x16x16xbf16> -> vector<16x16x48xbf16>
    %25 = vector.shape_cast %24 : vector<16x16x48xbf16> to vector<256x48xbf16>
    %26 = vector.extract_strided_slice %2 {offsets = [0, 0, 0], sizes = [1, 48, 32], strides = [1, 1, 1]} : vector<3x48x32xbf16> to vector<1x48x32xbf16>
    %27 = vector.shape_cast %26 : vector<1x48x32xbf16> to vector<48x32xbf16>
    %cst_11 = arith.constant dense<0.000000e+00> : vector<256x32xf32>
    %28 = tpu.matmul %25, %27, %cst_11 {dimension_numbers = #tpu.dot_dimension_numbers<[1], [0], [0], [1], [0, 0, 1, 1], [], []>} : vector<256x48xbf16>, vector<48x32xbf16>, vector<256x32xf32> -> vector<256x32xf32>
    %29 = tpu.concatenate %6, %1, %8 in 2 : vector<16x16x16xbf16>, vector<16x16x16xbf16>, vector<16x16x16xbf16> -> vector<16x16x48xbf16>
    %30 = vector.shape_cast %29 : vector<16x16x48xbf16> to vector<256x48xbf16>
    %31 = vector.extract_strided_slice %2 {offsets = [1, 0, 0], sizes = [1, 48, 32], strides = [1, 1, 1]} : vector<3x48x32xbf16> to vector<1x48x32xbf16>
    %32 = vector.shape_cast %31 : vector<1x48x32xbf16> to vector<48x32xbf16>
    %cst_12 = arith.constant dense<0.000000e+00> : vector<256x32xf32>
    %33 = tpu.matmul %30, %32, %cst_12 {dimension_numbers = #tpu.dot_dimension_numbers<[1], [0], [0], [1], [0, 0, 1, 1], [], []>} : vector<256x48xbf16>, vector<48x32xbf16>, vector<256x32xf32> -> vector<256x32xf32>
    %34 = arith.addf %28, %33 : vector<256x32xf32>
    %35 = tpu.concatenate %13, %18, %23 in 2 : vector<16x16x16xbf16>, vector<16x16x16xbf16>, vector<16x16x16xbf16> -> vector<16x16x48xbf16>
    %36 = vector.shape_cast %35 : vector<16x16x48xbf16> to vector<256x48xbf16>
    %37 = vector.extract_strided_slice %2 {offsets = [2, 0, 0], sizes = [1, 48, 32], strides = [1, 1, 1]} : vector<3x48x32xbf16> to vector<1x48x32xbf16>
    %38 = vector.shape_cast %37 : vector<1x48x32xbf16> to vector<48x32xbf16>
    %cst_13 = arith.constant dense<0.000000e+00> : vector<256x32xf32>
    %39 = tpu.matmul %36, %38, %cst_13 {dimension_numbers = #tpu.dot_dimension_numbers<[1], [0], [0], [1], [0, 0, 1, 1], [], []>} : vector<256x48xbf16>, vector<48x32xbf16>, vector<256x32xf32> -> vector<256x32xf32>
    %40 = arith.addf %34, %39 : vector<256x32xf32>
    %41 = vector.broadcast %3 : vector<1x32xf32> to vector<256x32xf32>
    %42 = arith.addf %40, %41 : vector<256x32xf32>
    %cst_14 = arith.constant 0.000000e+00 : f32
    %43 = vector.broadcast %cst_14 : f32 to vector<256x32xf32>
    %44 = arith.maximumf %42, %43 : vector<256x32xf32>
    %45 = vector.shape_cast %44 : vector<256x32xf32> to vector<16x16x32xf32>
    %46 = arith.truncf %45 : vector<16x16x32xf32> to vector<16x16x32xbf16>
    %c0_15 = arith.constant 0 : index
    %c0_16 = arith.constant 0 : index
    %c0_17 = arith.constant 0 : index
    %47 = vector.load %arg4[%c0_15, %c0_16, %c0_17] : memref<3x96x32xbf16, #tpu.memory_space<vmem>>, vector<3x96x32xbf16>
    %c0_18 = arith.constant 0 : index
    %c0_19 = arith.constant 0 : index
    %48 = vector.load %arg5[%c0_18, %c0_19] : memref<1x32xf32, #tpu.memory_space<vmem>>, vector<1x32xf32>
    %cst_20 = arith.constant 0.000000e+00 : bf16
    %49 = vector.broadcast %cst_20 : bf16 to vector<16x1x32xbf16>
    %50 = vector.extract_strided_slice %46 {offsets = [0, 0, 0], sizes = [16, 15, 32], strides = [1, 1, 1]} : vector<16x16x32xbf16> to vector<16x15x32xbf16>
    %51 = tpu.concatenate %49, %50 in 1 : vector<16x1x32xbf16>, vector<16x15x32xbf16> -> vector<16x16x32xbf16>
    %52 = vector.extract_strided_slice %46 {offsets = [0, 1, 0], sizes = [16, 15, 32], strides = [1, 1, 1]} : vector<16x16x32xbf16> to vector<16x15x32xbf16>
    %53 = tpu.concatenate %52, %49 in 1 : vector<16x15x32xbf16>, vector<16x1x32xbf16> -> vector<16x16x32xbf16>
    %cst_21 = arith.constant 0.000000e+00 : bf16
    %54 = vector.broadcast %cst_21 : bf16 to vector<1x16x32xbf16>
    %55 = vector.extract_strided_slice %51 {offsets = [0, 0, 0], sizes = [15, 16, 32], strides = [1, 1, 1]} : vector<16x16x32xbf16> to vector<15x16x32xbf16>
    %56 = tpu.concatenate %54, %55 in 0 : vector<1x16x32xbf16>, vector<15x16x32xbf16> -> vector<16x16x32xbf16>
    %57 = vector.extract_strided_slice %51 {offsets = [1, 0, 0], sizes = [15, 16, 32], strides = [1, 1, 1]} : vector<16x16x32xbf16> to vector<15x16x32xbf16>
    %58 = tpu.concatenate %57, %54 in 0 : vector<15x16x32xbf16>, vector<1x16x32xbf16> -> vector<16x16x32xbf16>
    %cst_22 = arith.constant 0.000000e+00 : bf16
    %59 = vector.broadcast %cst_22 : bf16 to vector<1x16x32xbf16>
    %60 = vector.extract_strided_slice %46 {offsets = [0, 0, 0], sizes = [15, 16, 32], strides = [1, 1, 1]} : vector<16x16x32xbf16> to vector<15x16x32xbf16>
    %61 = tpu.concatenate %59, %60 in 0 : vector<1x16x32xbf16>, vector<15x16x32xbf16> -> vector<16x16x32xbf16>
    %62 = vector.extract_strided_slice %46 {offsets = [1, 0, 0], sizes = [15, 16, 32], strides = [1, 1, 1]} : vector<16x16x32xbf16> to vector<15x16x32xbf16>
    %63 = tpu.concatenate %62, %59 in 0 : vector<15x16x32xbf16>, vector<1x16x32xbf16> -> vector<16x16x32xbf16>
    %cst_23 = arith.constant 0.000000e+00 : bf16
    %64 = vector.broadcast %cst_23 : bf16 to vector<1x16x32xbf16>
    %65 = vector.extract_strided_slice %53 {offsets = [0, 0, 0], sizes = [15, 16, 32], strides = [1, 1, 1]} : vector<16x16x32xbf16> to vector<15x16x32xbf16>
    %66 = tpu.concatenate %64, %65 in 0 : vector<1x16x32xbf16>, vector<15x16x32xbf16> -> vector<16x16x32xbf16>
    %67 = vector.extract_strided_slice %53 {offsets = [1, 0, 0], sizes = [15, 16, 32], strides = [1, 1, 1]} : vector<16x16x32xbf16> to vector<15x16x32xbf16>
    %68 = tpu.concatenate %67, %64 in 0 : vector<15x16x32xbf16>, vector<1x16x32xbf16> -> vector<16x16x32xbf16>
    %69 = tpu.concatenate %56, %61, %66 in 2 : vector<16x16x32xbf16>, vector<16x16x32xbf16>, vector<16x16x32xbf16> -> vector<16x16x96xbf16>
    %70 = vector.shape_cast %69 : vector<16x16x96xbf16> to vector<256x96xbf16>
    %71 = vector.extract_strided_slice %47 {offsets = [0, 0, 0], sizes = [1, 96, 32], strides = [1, 1, 1]} : vector<3x96x32xbf16> to vector<1x96x32xbf16>
    %72 = vector.shape_cast %71 : vector<1x96x32xbf16> to vector<96x32xbf16>
    %cst_24 = arith.constant dense<0.000000e+00> : vector<256x32xf32>
    %73 = tpu.matmul %70, %72, %cst_24 {dimension_numbers = #tpu.dot_dimension_numbers<[1], [0], [0], [1], [0, 0, 1, 1], [], []>} : vector<256x96xbf16>, vector<96x32xbf16>, vector<256x32xf32> -> vector<256x32xf32>
    %74 = tpu.concatenate %51, %46, %53 in 2 : vector<16x16x32xbf16>, vector<16x16x32xbf16>, vector<16x16x32xbf16> -> vector<16x16x96xbf16>
    %75 = vector.shape_cast %74 : vector<16x16x96xbf16> to vector<256x96xbf16>
    %76 = vector.extract_strided_slice %47 {offsets = [1, 0, 0], sizes = [1, 96, 32], strides = [1, 1, 1]} : vector<3x96x32xbf16> to vector<1x96x32xbf16>
    %77 = vector.shape_cast %76 : vector<1x96x32xbf16> to vector<96x32xbf16>
    %cst_25 = arith.constant dense<0.000000e+00> : vector<256x32xf32>
    %78 = tpu.matmul %75, %77, %cst_25 {dimension_numbers = #tpu.dot_dimension_numbers<[1], [0], [0], [1], [0, 0, 1, 1], [], []>} : vector<256x96xbf16>, vector<96x32xbf16>, vector<256x32xf32> -> vector<256x32xf32>
    %79 = arith.addf %73, %78 : vector<256x32xf32>
    %80 = tpu.concatenate %58, %63, %68 in 2 : vector<16x16x32xbf16>, vector<16x16x32xbf16>, vector<16x16x32xbf16> -> vector<16x16x96xbf16>
    %81 = vector.shape_cast %80 : vector<16x16x96xbf16> to vector<256x96xbf16>
    %82 = vector.extract_strided_slice %47 {offsets = [2, 0, 0], sizes = [1, 96, 32], strides = [1, 1, 1]} : vector<3x96x32xbf16> to vector<1x96x32xbf16>
    %83 = vector.shape_cast %82 : vector<1x96x32xbf16> to vector<96x32xbf16>
    %cst_26 = arith.constant dense<0.000000e+00> : vector<256x32xf32>
    %84 = tpu.matmul %81, %83, %cst_26 {dimension_numbers = #tpu.dot_dimension_numbers<[1], [0], [0], [1], [0, 0, 1, 1], [], []>} : vector<256x96xbf16>, vector<96x32xbf16>, vector<256x32xf32> -> vector<256x32xf32>
    %85 = arith.addf %79, %84 : vector<256x32xf32>
    %86 = vector.broadcast %48 : vector<1x32xf32> to vector<256x32xf32>
    %87 = arith.addf %85, %86 : vector<256x32xf32>
    %cst_27 = arith.constant 0.000000e+00 : f32
    %88 = vector.broadcast %cst_27 : f32 to vector<256x32xf32>
    %89 = arith.maximumf %87, %88 : vector<256x32xf32>
    %90 = vector.shape_cast %89 : vector<256x32xf32> to vector<16x16x32xf32>
    %91 = arith.truncf %90 : vector<16x16x32xf32> to vector<16x16x32xbf16>
    %c0_28 = arith.constant 0 : index
    %c0_29 = arith.constant 0 : index
    %92 = vector.load %arg6[%c0_28, %c0_29] : memref<32x32xbf16, #tpu.memory_space<vmem>>, vector<32x32xbf16>
    %c0_30 = arith.constant 0 : index
    %c0_31 = arith.constant 0 : index
    %93 = vector.load %arg7[%c0_30, %c0_31] : memref<1x32xf32, #tpu.memory_space<vmem>>, vector<1x32xf32>
    %94 = vector.shape_cast %91 : vector<16x16x32xbf16> to vector<256x32xbf16>
    %cst_32 = arith.constant dense<0.000000e+00> : vector<256x32xf32>
    %95 = tpu.matmul %94, %92, %cst_32 {dimension_numbers = #tpu.dot_dimension_numbers<[1], [0], [0], [1], [0, 0, 1, 1], [], []>} : vector<256x32xbf16>, vector<32x32xbf16>, vector<256x32xf32> -> vector<256x32xf32>
    %96 = vector.broadcast %93 : vector<1x32xf32> to vector<256x32xf32>
    %97 = arith.addf %95, %96 : vector<256x32xf32>
    %cst_33 = arith.constant 0.000000e+00 : f32
    %98 = vector.broadcast %cst_33 : f32 to vector<256x32xf32>
    %99 = arith.maximumf %97, %98 : vector<256x32xf32>
    %100 = vector.shape_cast %99 : vector<256x32xf32> to vector<16x16x32xf32>
    %101 = arith.truncf %100 : vector<16x16x32xf32> to vector<16x16x32xbf16>
    %c0_34 = arith.constant 0 : index
    %c0_35 = arith.constant 0 : index
    %c0_36 = arith.constant 0 : index
    %102 = vector.load %arg8[%c0_34, %c0_35, %c0_36] : memref<3x96x64xbf16, #tpu.memory_space<vmem>>, vector<3x96x64xbf16>
    %c0_37 = arith.constant 0 : index
    %c0_38 = arith.constant 0 : index
    %103 = vector.load %arg9[%c0_37, %c0_38] : memref<1x64xf32, #tpu.memory_space<vmem>>, vector<1x64xf32>
    %cst_39 = arith.constant 0.000000e+00 : bf16
    %104 = vector.broadcast %cst_39 : bf16 to vector<16x1x32xbf16>
    %105 = vector.shape_cast %91 : vector<16x16x32xbf16> to vector<16x8x2x32xbf16>
    %106 = vector.extract_strided_slice %105 {offsets = [0, 0, 0, 0], sizes = [16, 8, 1, 32], strides = [1, 1, 1, 1]} : vector<16x8x2x32xbf16> to vector<16x8x1x32xbf16>
    %107 = vector.shape_cast %106 : vector<16x8x1x32xbf16> to vector<16x8x32xbf16>
    %108 = vector.extract_strided_slice %105 {offsets = [0, 0, 1, 0], sizes = [16, 8, 1, 32], strides = [1, 1, 1, 1]} : vector<16x8x2x32xbf16> to vector<16x8x1x32xbf16>
    %109 = vector.shape_cast %108 : vector<16x8x1x32xbf16> to vector<16x8x32xbf16>
    %110 = vector.extract_strided_slice %109 {offsets = [0, 0, 0], sizes = [16, 7, 32], strides = [1, 1, 1]} : vector<16x8x32xbf16> to vector<16x7x32xbf16>
    %111 = tpu.concatenate %104, %110 in 1 : vector<16x1x32xbf16>, vector<16x7x32xbf16> -> vector<16x8x32xbf16>
    %cst_40 = arith.constant 0.000000e+00 : bf16
    %112 = vector.broadcast %cst_40 : bf16 to vector<1x8x32xbf16>
    %113 = vector.shape_cast %111 : vector<16x8x32xbf16> to vector<8x2x8x32xbf16>
    %114 = vector.extract_strided_slice %113 {offsets = [0, 0, 0, 0], sizes = [8, 1, 8, 32], strides = [1, 1, 1, 1]} : vector<8x2x8x32xbf16> to vector<8x1x8x32xbf16>
    %115 = vector.shape_cast %114 : vector<8x1x8x32xbf16> to vector<8x8x32xbf16>
    %116 = vector.extract_strided_slice %113 {offsets = [0, 1, 0, 0], sizes = [8, 1, 8, 32], strides = [1, 1, 1, 1]} : vector<8x2x8x32xbf16> to vector<8x1x8x32xbf16>
    %117 = vector.shape_cast %116 : vector<8x1x8x32xbf16> to vector<8x8x32xbf16>
    %118 = vector.extract_strided_slice %117 {offsets = [0, 0, 0], sizes = [7, 8, 32], strides = [1, 1, 1]} : vector<8x8x32xbf16> to vector<7x8x32xbf16>
    %119 = tpu.concatenate %112, %118 in 0 : vector<1x8x32xbf16>, vector<7x8x32xbf16> -> vector<8x8x32xbf16>
    %cst_41 = arith.constant 0.000000e+00 : bf16
    %120 = vector.broadcast %cst_41 : bf16 to vector<1x8x32xbf16>
    %121 = vector.shape_cast %107 : vector<16x8x32xbf16> to vector<8x2x8x32xbf16>
    %122 = vector.extract_strided_slice %121 {offsets = [0, 0, 0, 0], sizes = [8, 1, 8, 32], strides = [1, 1, 1, 1]} : vector<8x2x8x32xbf16> to vector<8x1x8x32xbf16>
    %123 = vector.shape_cast %122 : vector<8x1x8x32xbf16> to vector<8x8x32xbf16>
    %124 = vector.extract_strided_slice %121 {offsets = [0, 1, 0, 0], sizes = [8, 1, 8, 32], strides = [1, 1, 1, 1]} : vector<8x2x8x32xbf16> to vector<8x1x8x32xbf16>
    %125 = vector.shape_cast %124 : vector<8x1x8x32xbf16> to vector<8x8x32xbf16>
    %126 = vector.extract_strided_slice %125 {offsets = [0, 0, 0], sizes = [7, 8, 32], strides = [1, 1, 1]} : vector<8x8x32xbf16> to vector<7x8x32xbf16>
    %127 = tpu.concatenate %120, %126 in 0 : vector<1x8x32xbf16>, vector<7x8x32xbf16> -> vector<8x8x32xbf16>
    %cst_42 = arith.constant 0.000000e+00 : bf16
    %128 = vector.broadcast %cst_42 : bf16 to vector<1x8x32xbf16>
    %129 = vector.shape_cast %109 : vector<16x8x32xbf16> to vector<8x2x8x32xbf16>
    %130 = vector.extract_strided_slice %129 {offsets = [0, 0, 0, 0], sizes = [8, 1, 8, 32], strides = [1, 1, 1, 1]} : vector<8x2x8x32xbf16> to vector<8x1x8x32xbf16>
    %131 = vector.shape_cast %130 : vector<8x1x8x32xbf16> to vector<8x8x32xbf16>
    %132 = vector.extract_strided_slice %129 {offsets = [0, 1, 0, 0], sizes = [8, 1, 8, 32], strides = [1, 1, 1, 1]} : vector<8x2x8x32xbf16> to vector<8x1x8x32xbf16>
    %133 = vector.shape_cast %132 : vector<8x1x8x32xbf16> to vector<8x8x32xbf16>
    %134 = vector.extract_strided_slice %133 {offsets = [0, 0, 0], sizes = [7, 8, 32], strides = [1, 1, 1]} : vector<8x8x32xbf16> to vector<7x8x32xbf16>
    %135 = tpu.concatenate %128, %134 in 0 : vector<1x8x32xbf16>, vector<7x8x32xbf16> -> vector<8x8x32xbf16>
    %136 = tpu.concatenate %119, %127, %135 in 2 : vector<8x8x32xbf16>, vector<8x8x32xbf16>, vector<8x8x32xbf16> -> vector<8x8x96xbf16>
    %137 = vector.shape_cast %136 : vector<8x8x96xbf16> to vector<64x96xbf16>
    %138 = vector.extract_strided_slice %102 {offsets = [0, 0, 0], sizes = [1, 96, 64], strides = [1, 1, 1]} : vector<3x96x64xbf16> to vector<1x96x64xbf16>
    %139 = vector.shape_cast %138 : vector<1x96x64xbf16> to vector<96x64xbf16>
    %cst_43 = arith.constant dense<0.000000e+00> : vector<64x64xf32>
    %140 = tpu.matmul %137, %139, %cst_43 {dimension_numbers = #tpu.dot_dimension_numbers<[1], [0], [0], [1], [0, 0, 1, 1], [], []>} : vector<64x96xbf16>, vector<96x64xbf16>, vector<64x64xf32> -> vector<64x64xf32>
    %141 = tpu.concatenate %115, %123, %131 in 2 : vector<8x8x32xbf16>, vector<8x8x32xbf16>, vector<8x8x32xbf16> -> vector<8x8x96xbf16>
    %142 = vector.shape_cast %141 : vector<8x8x96xbf16> to vector<64x96xbf16>
    %143 = vector.extract_strided_slice %102 {offsets = [1, 0, 0], sizes = [1, 96, 64], strides = [1, 1, 1]} : vector<3x96x64xbf16> to vector<1x96x64xbf16>
    %144 = vector.shape_cast %143 : vector<1x96x64xbf16> to vector<96x64xbf16>
    %cst_44 = arith.constant dense<0.000000e+00> : vector<64x64xf32>
    %145 = tpu.matmul %142, %144, %cst_44 {dimension_numbers = #tpu.dot_dimension_numbers<[1], [0], [0], [1], [0, 0, 1, 1], [], []>} : vector<64x96xbf16>, vector<96x64xbf16>, vector<64x64xf32> -> vector<64x64xf32>
    %146 = arith.addf %140, %145 : vector<64x64xf32>
    %147 = tpu.concatenate %117, %125, %133 in 2 : vector<8x8x32xbf16>, vector<8x8x32xbf16>, vector<8x8x32xbf16> -> vector<8x8x96xbf16>
    %148 = vector.shape_cast %147 : vector<8x8x96xbf16> to vector<64x96xbf16>
    %149 = vector.extract_strided_slice %102 {offsets = [2, 0, 0], sizes = [1, 96, 64], strides = [1, 1, 1]} : vector<3x96x64xbf16> to vector<1x96x64xbf16>
    %150 = vector.shape_cast %149 : vector<1x96x64xbf16> to vector<96x64xbf16>
    %cst_45 = arith.constant dense<0.000000e+00> : vector<64x64xf32>
    %151 = tpu.matmul %148, %150, %cst_45 {dimension_numbers = #tpu.dot_dimension_numbers<[1], [0], [0], [1], [0, 0, 1, 1], [], []>} : vector<64x96xbf16>, vector<96x64xbf16>, vector<64x64xf32> -> vector<64x64xf32>
    %152 = arith.addf %146, %151 : vector<64x64xf32>
    %153 = vector.broadcast %103 : vector<1x64xf32> to vector<64x64xf32>
    %154 = arith.addf %152, %153 : vector<64x64xf32>
    %cst_46 = arith.constant 0.000000e+00 : f32
    %155 = vector.broadcast %cst_46 : f32 to vector<64x64xf32>
    %156 = arith.maximumf %154, %155 : vector<64x64xf32>
    %157 = vector.shape_cast %156 : vector<64x64xf32> to vector<8x8x64xf32>
    %158 = arith.truncf %157 : vector<8x8x64xf32> to vector<8x8x64xbf16>
    %c0_47 = arith.constant 0 : index
    %c0_48 = arith.constant 0 : index
    %c0_49 = arith.constant 0 : index
    %159 = vector.load %arg10[%c0_47, %c0_48, %c0_49] : memref<3x192x64xbf16, #tpu.memory_space<vmem>>, vector<3x192x64xbf16>
    %c0_50 = arith.constant 0 : index
    %c0_51 = arith.constant 0 : index
    %160 = vector.load %arg11[%c0_50, %c0_51] : memref<1x64xf32, #tpu.memory_space<vmem>>, vector<1x64xf32>
    %cst_52 = arith.constant 0.000000e+00 : bf16
    %161 = vector.broadcast %cst_52 : bf16 to vector<8x1x64xbf16>
    %162 = vector.extract_strided_slice %158 {offsets = [0, 0, 0], sizes = [8, 7, 64], strides = [1, 1, 1]} : vector<8x8x64xbf16> to vector<8x7x64xbf16>
    %163 = tpu.concatenate %161, %162 in 1 : vector<8x1x64xbf16>, vector<8x7x64xbf16> -> vector<8x8x64xbf16>
    %164 = vector.extract_strided_slice %158 {offsets = [0, 1, 0], sizes = [8, 7, 64], strides = [1, 1, 1]} : vector<8x8x64xbf16> to vector<8x7x64xbf16>
    %165 = tpu.concatenate %164, %161 in 1 : vector<8x7x64xbf16>, vector<8x1x64xbf16> -> vector<8x8x64xbf16>
    %cst_53 = arith.constant 0.000000e+00 : bf16
    %166 = vector.broadcast %cst_53 : bf16 to vector<1x8x64xbf16>
    %167 = vector.extract_strided_slice %163 {offsets = [0, 0, 0], sizes = [7, 8, 64], strides = [1, 1, 1]} : vector<8x8x64xbf16> to vector<7x8x64xbf16>
    %168 = tpu.concatenate %166, %167 in 0 : vector<1x8x64xbf16>, vector<7x8x64xbf16> -> vector<8x8x64xbf16>
    %169 = vector.extract_strided_slice %163 {offsets = [1, 0, 0], sizes = [7, 8, 64], strides = [1, 1, 1]} : vector<8x8x64xbf16> to vector<7x8x64xbf16>
    %170 = tpu.concatenate %169, %166 in 0 : vector<7x8x64xbf16>, vector<1x8x64xbf16> -> vector<8x8x64xbf16>
    %cst_54 = arith.constant 0.000000e+00 : bf16
    %171 = vector.broadcast %cst_54 : bf16 to vector<1x8x64xbf16>
    %172 = vector.extract_strided_slice %158 {offsets = [0, 0, 0], sizes = [7, 8, 64], strides = [1, 1, 1]} : vector<8x8x64xbf16> to vector<7x8x64xbf16>
    %173 = tpu.concatenate %171, %172 in 0 : vector<1x8x64xbf16>, vector<7x8x64xbf16> -> vector<8x8x64xbf16>
    %174 = vector.extract_strided_slice %158 {offsets = [1, 0, 0], sizes = [7, 8, 64], strides = [1, 1, 1]} : vector<8x8x64xbf16> to vector<7x8x64xbf16>
    %175 = tpu.concatenate %174, %171 in 0 : vector<7x8x64xbf16>, vector<1x8x64xbf16> -> vector<8x8x64xbf16>
    %cst_55 = arith.constant 0.000000e+00 : bf16
    %176 = vector.broadcast %cst_55 : bf16 to vector<1x8x64xbf16>
    %177 = vector.extract_strided_slice %165 {offsets = [0, 0, 0], sizes = [7, 8, 64], strides = [1, 1, 1]} : vector<8x8x64xbf16> to vector<7x8x64xbf16>
    %178 = tpu.concatenate %176, %177 in 0 : vector<1x8x64xbf16>, vector<7x8x64xbf16> -> vector<8x8x64xbf16>
    %179 = vector.extract_strided_slice %165 {offsets = [1, 0, 0], sizes = [7, 8, 64], strides = [1, 1, 1]} : vector<8x8x64xbf16> to vector<7x8x64xbf16>
    %180 = tpu.concatenate %179, %176 in 0 : vector<7x8x64xbf16>, vector<1x8x64xbf16> -> vector<8x8x64xbf16>
    %181 = tpu.concatenate %168, %173, %178 in 2 : vector<8x8x64xbf16>, vector<8x8x64xbf16>, vector<8x8x64xbf16> -> vector<8x8x192xbf16>
    %182 = vector.shape_cast %181 : vector<8x8x192xbf16> to vector<64x192xbf16>
    %183 = vector.extract_strided_slice %159 {offsets = [0, 0, 0], sizes = [1, 192, 64], strides = [1, 1, 1]} : vector<3x192x64xbf16> to vector<1x192x64xbf16>
    %184 = vector.shape_cast %183 : vector<1x192x64xbf16> to vector<192x64xbf16>
    %cst_56 = arith.constant dense<0.000000e+00> : vector<64x64xf32>
    %185 = tpu.matmul %182, %184, %cst_56 {dimension_numbers = #tpu.dot_dimension_numbers<[1], [0], [0], [1], [0, 0, 1, 1], [], []>} : vector<64x192xbf16>, vector<192x64xbf16>, vector<64x64xf32> -> vector<64x64xf32>
    %186 = tpu.concatenate %163, %158, %165 in 2 : vector<8x8x64xbf16>, vector<8x8x64xbf16>, vector<8x8x64xbf16> -> vector<8x8x192xbf16>
    %187 = vector.shape_cast %186 : vector<8x8x192xbf16> to vector<64x192xbf16>
    %188 = vector.extract_strided_slice %159 {offsets = [1, 0, 0], sizes = [1, 192, 64], strides = [1, 1, 1]} : vector<3x192x64xbf16> to vector<1x192x64xbf16>
    %189 = vector.shape_cast %188 : vector<1x192x64xbf16> to vector<192x64xbf16>
    %cst_57 = arith.constant dense<0.000000e+00> : vector<64x64xf32>
    %190 = tpu.matmul %187, %189, %cst_57 {dimension_numbers = #tpu.dot_dimension_numbers<[1], [0], [0], [1], [0, 0, 1, 1], [], []>} : vector<64x192xbf16>, vector<192x64xbf16>, vector<64x64xf32> -> vector<64x64xf32>
    %191 = arith.addf %185, %190 : vector<64x64xf32>
    %192 = tpu.concatenate %170, %175, %180 in 2 : vector<8x8x64xbf16>, vector<8x8x64xbf16>, vector<8x8x64xbf16> -> vector<8x8x192xbf16>
    %193 = vector.shape_cast %192 : vector<8x8x192xbf16> to vector<64x192xbf16>
    %194 = vector.extract_strided_slice %159 {offsets = [2, 0, 0], sizes = [1, 192, 64], strides = [1, 1, 1]} : vector<3x192x64xbf16> to vector<1x192x64xbf16>
    %195 = vector.shape_cast %194 : vector<1x192x64xbf16> to vector<192x64xbf16>
    %cst_58 = arith.constant dense<0.000000e+00> : vector<64x64xf32>
    %196 = tpu.matmul %193, %195, %cst_58 {dimension_numbers = #tpu.dot_dimension_numbers<[1], [0], [0], [1], [0, 0, 1, 1], [], []>} : vector<64x192xbf16>, vector<192x64xbf16>, vector<64x64xf32> -> vector<64x64xf32>
    %197 = arith.addf %191, %196 : vector<64x64xf32>
    %198 = vector.broadcast %160 : vector<1x64xf32> to vector<64x64xf32>
    %199 = arith.addf %197, %198 : vector<64x64xf32>
    %cst_59 = arith.constant 0.000000e+00 : f32
    %200 = vector.broadcast %cst_59 : f32 to vector<64x64xf32>
    %201 = arith.maximumf %199, %200 : vector<64x64xf32>
    %202 = vector.shape_cast %201 : vector<64x64xf32> to vector<8x8x64xf32>
    %203 = arith.truncf %202 : vector<8x8x64xf32> to vector<8x8x64xbf16>
    %c0_60 = arith.constant 0 : index
    %c0_61 = arith.constant 0 : index
    %204 = vector.load %arg12[%c0_60, %c0_61] : memref<64x128xbf16, #tpu.memory_space<vmem>>, vector<64x128xbf16>
    %c0_62 = arith.constant 0 : index
    %c0_63 = arith.constant 0 : index
    %205 = vector.load %arg13[%c0_62, %c0_63] : memref<1x128xf32, #tpu.memory_space<vmem>>, vector<1x128xf32>
    %206 = vector.shape_cast %203 : vector<8x8x64xbf16> to vector<64x64xbf16>
    %cst_64 = arith.constant dense<0.000000e+00> : vector<64x128xf32>
    %207 = tpu.matmul %206, %204, %cst_64 {dimension_numbers = #tpu.dot_dimension_numbers<[1], [0], [0], [1], [0, 0, 1, 1], [], []>} : vector<64x64xbf16>, vector<64x128xbf16>, vector<64x128xf32> -> vector<64x128xf32>
    %208 = vector.broadcast %205 : vector<1x128xf32> to vector<64x128xf32>
    %209 = arith.addf %207, %208 : vector<64x128xf32>
    %cst_65 = arith.constant 0.000000e+00 : f32
    %210 = vector.broadcast %cst_65 : f32 to vector<64x128xf32>
    %211 = arith.maximumf %209, %210 : vector<64x128xf32>
    %212 = arith.truncf %211 : vector<64x128xf32> to vector<64x128xbf16>
    %213 = vector.shape_cast %212 : vector<64x128xbf16> to vector<8x8x128xbf16>
    %214 = vector.extract_strided_slice %213 {offsets = [0, 0, 0], sizes = [8, 8, 32], strides = [1, 1, 1]} : vector<8x8x128xbf16> to vector<8x8x32xbf16>
    %215 = vector.shape_cast %214 : vector<8x8x32xbf16> to vector<8x8x1x32xbf16>
    %216 = vector.extract_strided_slice %213 {offsets = [0, 0, 32], sizes = [8, 8, 32], strides = [1, 1, 1]} : vector<8x8x128xbf16> to vector<8x8x32xbf16>
    %217 = vector.shape_cast %216 : vector<8x8x32xbf16> to vector<8x8x1x32xbf16>
    %218 = tpu.concatenate %215, %217 in 2 : vector<8x8x1x32xbf16>, vector<8x8x1x32xbf16> -> vector<8x8x2x32xbf16>
    %219 = vector.shape_cast %218 : vector<8x8x2x32xbf16> to vector<8x1x16x32xbf16>
    %220 = vector.extract_strided_slice %213 {offsets = [0, 0, 64], sizes = [8, 8, 32], strides = [1, 1, 1]} : vector<8x8x128xbf16> to vector<8x8x32xbf16>
    %221 = vector.shape_cast %220 : vector<8x8x32xbf16> to vector<8x8x1x32xbf16>
    %222 = vector.extract_strided_slice %213 {offsets = [0, 0, 96], sizes = [8, 8, 32], strides = [1, 1, 1]} : vector<8x8x128xbf16> to vector<8x8x32xbf16>
    %223 = vector.shape_cast %222 : vector<8x8x32xbf16> to vector<8x8x1x32xbf16>
    %224 = tpu.concatenate %221, %223 in 2 : vector<8x8x1x32xbf16>, vector<8x8x1x32xbf16> -> vector<8x8x2x32xbf16>
    %225 = vector.shape_cast %224 : vector<8x8x2x32xbf16> to vector<8x1x16x32xbf16>
    %226 = tpu.concatenate %219, %225 in 1 : vector<8x1x16x32xbf16>, vector<8x1x16x32xbf16> -> vector<8x2x16x32xbf16>
    %227 = vector.shape_cast %226 : vector<8x2x16x32xbf16> to vector<16x16x32xbf16>
    %228 = tpu.concatenate %101, %227 in 2 : vector<16x16x32xbf16>, vector<16x16x32xbf16> -> vector<16x16x64xbf16>
    %cst_66 = arith.constant 0.000000e+00 : bf16
    %229 = vector.broadcast %cst_66 : bf16 to vector<16x16x64xbf16>
    %230 = tpu.concatenate %228, %229 in 2 : vector<16x16x64xbf16>, vector<16x16x64xbf16> -> vector<16x16x128xbf16>
    %231 = vector.shape_cast %230 : vector<16x16x128xbf16> to vector<1x16x16x128xbf16>
    %232 = arith.extf %231 : vector<1x16x16x128xbf16> to vector<1x16x16x128xf32>
    %c0_67 = arith.constant 0 : index
    %c0_68 = arith.constant 0 : index
    %c0_69 = arith.constant 0 : index
    %c0_70 = arith.constant 0 : index
    %233 = vector.load %arg14[%c0_67, %c0_68, %c0_69, %c0_70] : memref<1x16x16x128xf32, #tpu.memory_space<vmem>>, vector<1x16x16x128xf32>
    tpu.vector_store %arg14[%c0_67, %c0_68, %c0_69, %c0_70], %232 {strides = array<i32>} : memref<1x16x16x128xf32, #tpu.memory_space<vmem>>, vector<1x16x16x128xf32>,
    return
  }
  func.func @transform_0(%arg0: i32) -> (i32, i32, i32, i32) {
    %c0_i32 = arith.constant 0 : i32
    %c0_i32_0 = arith.constant 0 : i32
    %c0_i32_1 = arith.constant 0 : i32
    %c0_i32_2 = arith.constant 0 : i32
    return %arg0, %c0_i32, %c0_i32_0, %c0_i32_1 : i32, i32, i32, i32
  }
  func.func @transform_1(%arg0: i32) -> (i32, i32, i32) {
    %c0_i32 = arith.constant 0 : i32
    %c0_i32_0 = arith.constant 0 : i32
    %c0_i32_1 = arith.constant 0 : i32
    %c0_i32_2 = arith.constant 0 : i32
    return %c0_i32, %c0_i32_0, %c0_i32_1 : i32, i32, i32
  }
  func.func @transform_2(%arg0: i32) -> (i32, i32) {
    %c0_i32 = arith.constant 0 : i32
    %c0_i32_0 = arith.constant 0 : i32
    %c0_i32_1 = arith.constant 0 : i32
    return %c0_i32, %c0_i32_0 : i32, i32
  }
  func.func @transform_3(%arg0: i32) -> (i32, i32, i32) {
    %c0_i32 = arith.constant 0 : i32
    %c0_i32_0 = arith.constant 0 : i32
    %c0_i32_1 = arith.constant 0 : i32
    %c0_i32_2 = arith.constant 0 : i32
    return %c0_i32, %c0_i32_0, %c0_i32_1 : i32, i32, i32
  }
  func.func @transform_4(%arg0: i32) -> (i32, i32) {
    %c0_i32 = arith.constant 0 : i32
    %c0_i32_0 = arith.constant 0 : i32
    %c0_i32_1 = arith.constant 0 : i32
    return %c0_i32, %c0_i32_0 : i32, i32
  }
  func.func @transform_5(%arg0: i32) -> (i32, i32) {
    %c0_i32 = arith.constant 0 : i32
    %c0_i32_0 = arith.constant 0 : i32
    %c0_i32_1 = arith.constant 0 : i32
    return %c0_i32, %c0_i32_0 : i32, i32
  }
  func.func @transform_6(%arg0: i32) -> (i32, i32) {
    %c0_i32 = arith.constant 0 : i32
    %c0_i32_0 = arith.constant 0 : i32
    %c0_i32_1 = arith.constant 0 : i32
    return %c0_i32, %c0_i32_0 : i32, i32
  }
  func.func @transform_7(%arg0: i32) -> (i32, i32, i32) {
    %c0_i32 = arith.constant 0 : i32
    %c0_i32_0 = arith.constant 0 : i32
    %c0_i32_1 = arith.constant 0 : i32
    %c0_i32_2 = arith.constant 0 : i32
    return %c0_i32, %c0_i32_0, %c0_i32_1 : i32, i32, i32
  }
  func.func @transform_8(%arg0: i32) -> (i32, i32) {
    %c0_i32 = arith.constant 0 : i32
    %c0_i32_0 = arith.constant 0 : i32
    %c0_i32_1 = arith.constant 0 : i32
    return %c0_i32, %c0_i32_0 : i32, i32
  }
  func.func @transform_9(%arg0: i32) -> (i32, i32, i32) {
    %c0_i32 = arith.constant 0 : i32
    %c0_i32_0 = arith.constant 0 : i32
    %c0_i32_1 = arith.constant 0 : i32
    %c0_i32_2 = arith.constant 0 : i32
    return %c0_i32, %c0_i32_0, %c0_i32_1 : i32, i32, i32
  }
  func.func @transform_10(%arg0: i32) -> (i32, i32) {
    %c0_i32 = arith.constant 0 : i32
    %c0_i32_0 = arith.constant 0 : i32
    %c0_i32_1 = arith.constant 0 : i32
    return %c0_i32, %c0_i32_0 : i32, i32
  }
  func.func @transform_11(%arg0: i32) -> (i32, i32) {
    %c0_i32 = arith.constant 0 : i32
    %c0_i32_0 = arith.constant 0 : i32
    %c0_i32_1 = arith.constant 0 : i32
    return %c0_i32, %c0_i32_0 : i32, i32
  }
  func.func @transform_12(%arg0: i32) -> (i32, i32) {
    %c0_i32 = arith.constant 0 : i32
    %c0_i32_0 = arith.constant 0 : i32
    %c0_i32_1 = arith.constant 0 : i32
    return %c0_i32, %c0_i32_0 : i32, i32
  }
  func.func @transform_13(%arg0: i32) -> (i32, i32, i32, i32) {
    %c0_i32 = arith.constant 0 : i32
    %c0_i32_0 = arith.constant 0 : i32
    %c0_i32_1 = arith.constant 0 : i32
    %c0_i32_2 = arith.constant 0 : i32
    return %arg0, %c0_i32, %c0_i32_0, %c0_i32_1 : i32, i32, i32, i32
  }
}

</mosaic_0001>

<bundles_post_ra>
// kernel: tpu_custom_call.1
= control target key start
LH: loop header
LB: loop body
LE: loop exit
PB: predicated region body
PF: predicated region fallthrough
CT: control target
= control target key end

     0   :  { %18 = vsyncpa [#allocation3], 0  ;;  %s16264_s0 = inlined_call_operand.vmem [shape: bf16[2,16,16,16], index: 0, kind: input, shape index: {}]   ;;  %s16265_s1 = inlined_call_operand.vmem [shape: bf16[3,48,32], index: 1, kind: input, shape index: {}]   ;;  %s16266_s2 = inlined_call_operand.vmem [shape: f32[1,32], index: 2, kind: input, shape index: {}]   ;;  %s16267_s3 = inlined_call_operand.vmem [shape: bf16[3,96,32], index: 3, kind: input, shape index: {}]   ;;  %s16268_s4 = inlined_call_operand.vmem [shape: f32[1,32], index: 4, kind: input, shape index: {}]   ;;  %s16269_s5 = inlined_call_operand.vmem [shape: bf16[32,32], index: 5, kind: input, shape index: {}]   ;;  %s16270_s6 = inlined_call_operand.vmem [shape: f32[1,32], index: 6, kind: input, shape index: {}]   ;;  %s16271_s7 = inlined_call_operand.vmem [shape: bf16[3,96,64], index: 7, kind: input, shape index: {}]   ;;  %s16272_s8 = inlined_call_operand.vmem [shape: f32[1,64], index: 8, kind: input, shape index: {}]   ;;  %s16273_s9 = inlined_call_operand.vmem [shape: bf16[3,192,64], index: 9, kind: input, shape index: {}]   ;;  %s16274_s10 = inlined_call_operand.vmem [shape: f32[1,64], index: 10, kind: input, shape index: {}]   ;;  %s16275_s11 = inlined_call_operand.vmem [shape: bf16[64,128], index: 11, kind: input, shape index: {}]   ;;  %s16276_s12 = inlined_call_operand.vmem [shape: f32[1,128], index: 12, kind: input, shape index: {}]   ;;  %s16277_s13 = inlined_call_operand.hbm [shape: f32[2,16,16,128], index: 13, kind: output, shape index: {}]  }
   0x1   :  { %20 = vsyncpa [#allocation3 + $0x1], 0  ;;  %s11469_s25 = smov 0   ;;  %s11471_s26 = smov 0  }
   0x2   :  { %s11473_s27 = smov 0   ;;  %s11475_s28 = smov 0  }
   0x3 LB: > { %16447 = sst [smem:[#allocation5_spill]] %s11384_s27  ;;  %s11490_s29 = sadd.s32 4294967295, %s11388_s28   ;;  %s11388_s28 = sphi %s11475_s28, %s17032_s28   ;;  %s11384_s27 = sphi %s11473_s27, %s17034_s27   ;;  %s11380_s26 = sphi %s11471_s26, %s17036_s26   ;;  %s11376_s25 = sphi %s11469_s25, %s17035_s25  }
   0x4   : > { %s10120_s30 = sadd.s32 4294967294, %s11388_s28   ;;  %s11494_s14 = sadd.s32 1, %s11388_s28  }
   0x5   : > { %16448 = sst [smem:[#allocation6_spill]] %s11494_s14  ;;  %s311_s15 = sadd.s32 1, %s11384_s27 }
   0x6   : > { %s308_s16 = ssub.s32 %s11388_s28, %s11494_s14  ;;  %p321_p0 = scmp.ne.s32.totalorder %s11384_s27, %s11380_s26 }
   0x7   : > { %p309_p1 = scmp.eq.s32.totalorder %s308_s16, 0  ;;  %p322_p2 = scmp.eq.s32.totalorder %s11490_s29, 1 }
   0x8   : > { %p327_p3 = scmp.ne.s32.totalorder %s11380_s26, %s11376_s25  ;;  %p328_p4 = scmp.eq.s32.totalorder %s10120_s30, 1 }
   0x9   : > { %s11505_s17 = scalar_select %p309_p1, %s11384_s27, %s311_s15  }
   0xa   : > { %p11507_p5 = por %p322_p2, %p321_p0  ;;  %p11511_p6 = por %p328_p4, %p327_p3 }
   0xb   : > { %16449 = sst [smem:[#allocation7_spill]] %s11505_s17  ;;  %p10123_p7 = scmp.ge.s32.totalorder %s11388_s28, 1 }
   0xc   : > { %p390_p8 = scmp.lt.s32.totalorder %s11388_s28, 3 }
   0xe   : > { %p391_p9 = pnand %p10123_p7, %p390_p8 }
  0x10   : > { %394 = sbr.rel (%p391_p9) target bundleno = 2773 (0xad5), region = 72 }
  0x17   : > { %p434_p10 = scmp.lt.s32.totalorder %s11490_s29, 1  ;;  %v11238_v0 = vld [vmem:[%s16265_s1 + $0x18] sm:$0xff]   ;;  %v11239_v1 = vld [vmem:[%s16265_s1 + $0x20] sm:$0xff]   ;;  %vm767_vm0 = vsmask.f32 7424  ;;  %v11240_v2 = vld [vmem:[%s16265_s1 + $0x28] sm:$0xff]  }
  0x18   : > { %10665 = vmatprep.subr.bf16.mxu0 %v11238_v0  ;;  %vm766_vm1 = vcmask 1047552   ;;  %s11391_s27 = smov 32   ;;  %vm699_vm3 = vcmask 1040384   ;;  %vm700_vm4 = vsmask.f32 256  ;;  %vm865_vm6 = vcmask 130048  }
  0x19   : > { %s435_s20 = scalar_select %p434_p10, %s11490_s29, 1  ;;  %10666 = vmatpush3.bf16.msra.mxu0 %v11238_v0  ;;  %vm11539_vm2 = vmand %vm766_vm1, %vm767_vm0  ;;  %vm914_vm7 = vcmask 261120   ;;  %vm975_vm8 = vcmask 392192   ;;  %vm2039_vm9 = vcmask 523264   ;;  %vm2119_vm10 = vcmask 785408  }
  0x1a   : > { %10667 = vmatprep.subr.bf16.mxu0 %v11239_v1  ;;  %vm11698_vm5 = vmand %vm699_vm3, %vm700_vm4  ;;  %s11393_s16 = smov 64   ;;  %vm5625_vm11 = vcmask 1042434   ;;  %vm5975_vm12 = vcmask 1041409   ;;  %vm5628_vm13 = vcmask 1043459   ;;  %vm5631_vm14 = vcmask 1044484   ;;  %s11395_s17 = smov 96  }
  0x1b   : > { %s10472_s30 = sshll.u32 %s435_s20, 7  ;;  %s11390_s20 = smov 16   ;;  %vm5634_vm15 = vcmask 1045509   ;;  %vm5637_vm0 = vcmask 1046534   ;;  %vm5640_vm1 = vcmask 1047559  }
  0x1c   : > { %s11531_s14 = scalar_lea.vmem %s16264_s0, %s10472_s30  ;;  %vm7232_vm3 = vsmask.f32 3328 }
  0x1d   : > { %v11222_v3 = vld [vmem:[%s11531_s14] sm:$0xff]   ;;  %v11223_v4 = vld [vmem:[%s11531_s14 + $0x8] sm:$0xff]   ;;  %v11224_v7 = vld [vmem:[%s11531_s14 + $0x10] sm:$0xff]   ;;  %10668 = vmatpush3.bf16.msra.mxu0 %v11239_v1 }
  0x1e   : > { %788 = vrot.lane.b32.xlu0 %v11222_v3, %s11390_s20  ;;  %v572_v5 = vshrl.u32 %v11222_v3, 16  ;;  %v575_v6 = vshll.u32 %v11222_v3, 16  ;;  %v579_v8 = vshrl.u32 %v11223_v4, 16  ;;  %v582_v9 = vshll.u32 %v11223_v4, 16  ;;  %v11225_v10 = vld [vmem:[%s11531_s14 + $0x18] sm:$0xff]   ;;  %10669 = vmatprep.subr.bf16.mxu0 %v11240_v2  ;;  %v11226_v19 = vld [vmem:[%s11531_s14 + $0x20] sm:$0xff]  }
  0x1f   : > { %v586_v16 = vshrl.u32 %v11224_v7, 16  ;;  %v589_v17 = vshll.u32 %v11224_v7, 16  ;;  %v596_v20 = vshll.u32 %v11225_v10, 16  ;;  %v593_v28 = vshrl.u32 %v11225_v10, 16  ;;  %v11227_v31 = vld [vmem:[%s11531_s14 + $0x28] sm:$0xff]   ;;  %v11557_v34 = vld [vmem:[%s11531_s14 + $0x30] sm:$0xff]  }
  0x20   : > { %v718_v11 = vrot.slane %v575_v6, 1  ;;  %v574_v12 = vrot.slane %v572_v5, 7  ;;  %v581_v14 = vrot.slane %v579_v8, 7  ;;  %v720_v15 = vrot.slane %v582_v9, 1  ;;  %v11564_v38 = vld [vmem:[%s11531_s14 + $0x38] sm:$0xff]   ;;  %v11567_v39 = vld [vmem:[%s11531_s14 + $0x40] sm:$0xff]  }
  0x21   : > { %v588_v23 = vrot.slane %v586_v16, 7  ;;  %v722_v24 = vrot.slane %v589_v17, 1  ;;  %10670 = vmatpush3.bf16.msra.mxu0 %v11240_v2  ;;  %v724_v29 = vrot.slane %v596_v20, 1  ;;  %v603_v30 = vshll.u32 %v11226_v19, 16  ;;  %v11575_v48 = vld [vmem:[%s11531_s14 + $0x48] sm:$0xff]   ;;  %v11578_v51 = vld [vmem:[%s11531_s14 + $0x50] sm:$0xff]  }
  0x22   : > { %790 = vrot.lane.b32.xlu0 %v11223_v4, %s11390_s20  ;;  %v719_v18 = vor.u32 %v718_v11, %v572_v5  ;;  %v11545_v21 = vor.u32 %v575_v6, %v574_v12  ;;  %v721_v22 = vor.u32 %v720_v15, %v579_v8  ;;  %v11547_v25 = vor.u32 %v582_v9, %v581_v14  ;;  %v11595_v0 = vld [vmem:[%s11531_s14 + $0x58] sm:$0xff]   ;;  %v11234_v14 = vld [vmem:[%s11531_s14 + $0x60] sm:$0xff]  }
  0x23   : > { %v723_v27 = vor.u32 %v722_v24, %v586_v16  ;;  %v600_v33 = vshrl.u32 %v11226_v19, 16  ;;  %v11559_v35 = vor.u32 %v589_v17, %v588_v23  ;;  %v726_v37 = vrot.slane %v603_v30, 1  ;;  %v11608_v17 = vld [vmem:[%s11531_s14 + $0x68] sm:$0xff]  }
  0x24   : > { %v769_v26 = vsel %vm11539_vm2, %v719_v18, 0  ;;  %v770_v32 = vsel %vm11539_vm2, %v721_v22, 0  ;;  %v725_v40 = vor.u32 %v724_v29, %v593_v28  ;;  %v610_v41 = vshll.u32 %v11227_v31, 16  ;;  %v11613_v18 = vld [vmem:[%s16265_s1] sm:$0xff]  }
  0x25   : > { %835 = vrot.lane.b32.xlu1 %v769_v26, %s11391_s27  ;;  %v771_v36 = vsel %vm11539_vm2, %v723_v27, 0  ;;  %v595_v42 = vrot.slane %v593_v28, 7  ;;  %v607_v43 = vshrl.u32 %v11227_v31, 16  ;;  %v617_v44 = vshll.u32 %v11557_v34, 16  ;;  %10703 = vmatprep.subr.bf16.mxu0 %v11613_v18 }
  0x26   : > { %792 = vrot.lane.b32.xlu0 %v11224_v7, %s11390_s20  ;;  %v727_v45 = vor.u32 %v726_v37, %v600_v33  ;;  %v624_v46 = vshll.u32 %v11564_v38, 16  ;;  %v631_v47 = vshll.u32 %v11567_v39, 16  ;;  %v602_v49 = vrot.slane %v600_v33, 7 }
  0x27   : > { %v609_v50 = vrot.slane %v607_v43, 7  ;;  %v772_v52 = vsel %vm11539_vm2, %v725_v40, 0  ;;  %v728_v53 = vrot.slane %v610_v41, 1  ;;  %v614_v54 = vshrl.u32 %v11557_v34, 16 }
  0x28   : > { %v621_v55 = vshrl.u32 %v11564_v38, 16  ;;  %v730_v56 = vrot.slane %v617_v44, 1  ;;  %v628_v57 = vshrl.u32 %v11567_v39, 16  ;;  %v11587_v58 = vor.u32 %v596_v20, %v595_v42 }
  0x29   : > { %837 = vrot.lane.b32.xlu1 %v770_v32, %s11391_s27  ;;  %v773_v59 = vsel %vm11539_vm2, %v727_v45, 0  ;;  %v732_v60 = vrot.slane %v624_v46, 1  ;;  %v734_v61 = vrot.slane %v631_v47, 1  ;;  %v638_v62 = vshll.u32 %v11575_v48, 16 }
  0x2a   : > { %839 = vrot.lane.b32.xlu0 %v771_v36, %s11391_s27  ;;  %v645_v63 = vshll.u32 %v11578_v51, 16  ;;  %v11597_v1 = vor.u32 %v603_v30, %v602_v49  ;;  %v729_v2 = vor.u32 %v728_v53, %v607_v43  ;;  %v616_v3 = vrot.slane %v614_v54, 7  ;;  %v11236_v43 = vld [vmem:[%s11531_s14 + $0x70] sm:$0xff]  }
  0x2b   : > { %v731_v4 = vor.u32 %v730_v56, %v614_v54  ;;  %v635_v5 = vshrl.u32 %v11575_v48, 16  ;;  %v733_v6 = vor.u32 %v732_v60, %v621_v55  ;;  %v735_v7 = vor.u32 %v734_v61, %v628_v57 }
  0x2c   : > { %v736_v8 = vrot.slane %v638_v62, 1  ;;  %v11601_v9 = vor.u32 %v610_v41, %v609_v50  ;;  %v642_v11 = vshrl.u32 %v11578_v51, 16  ;;  %v738_v12 = vrot.slane %v645_v63, 1 }
  0x2d   : > { %794 = vrot.lane.b32.xlu1 %v11225_v10, %s11390_s20  ;;  %v623_v10 = vrot.slane %v621_v55, 7  ;;  %v630_v15 = vrot.slane %v628_v57, 7  ;;  %v652_v16 = vshll.u32 %v11595_v0, 16  ;;  %v775_v20 = vsel %vm11539_vm2, %v731_v4, 0  ;;  %v11237_v55 = vld [vmem:[%s11531_s14 + $0x78] sm:$0xff]  }
  0x2e   : > { %796 = vrot.lane.b32.xlu0 %v11226_v19, %s11390_s20  ;;  %v774_v19 = vsel %vm11539_vm2, %v729_v2, 0  ;;  %v637_v22 = vrot.slane %v635_v5, 7  ;;  %v649_v23 = vshrl.u32 %v11595_v0, 16  ;;  %v776_v24 = vsel %vm11539_vm2, %v733_v6, 0 }
  0x2f   : > { %v777_v26 = vsel %vm11539_vm2, %v735_v7, 0  ;;  %v737_v27 = vor.u32 %v736_v8, %v635_v5  ;;  %v644_v28 = vrot.slane %v642_v11, 7  ;;  %v739_v29 = vor.u32 %v738_v12, %v642_v11 }
  0x30   : > { %v651_v30 = vrot.slane %v649_v23, 7  ;;  %v659_v32 = vshll.u32 %v11234_v14, 16  ;;  %v740_v33 = vrot.slane %v652_v16, 1  ;;  %v11629_v36 = vor.u32 %v617_v44, %v616_v3 }
  0x31   : > { %841 = vrot.lane.b32.xlu1 %v772_v52, %s11391_s27  ;;  %v11632_v37 = vor.u32 %v624_v46, %v623_v10  ;;  %v11634_v40 = vor.u32 %v631_v47, %v630_v15  ;;  %v11636_v41 = vor.u32 %v638_v62, %v637_v22  ;;  %v663_v42 = vshrl.u32 %v11608_v17, 16 }
  0x32   : > { %843 = vrot.lane.b32.xlu0 %v773_v59, %s11391_s27  ;;  %v11640_v45 = vor.u32 %v645_v63, %v644_v28  ;;  %v778_v49 = vsel %vm11539_vm2, %v737_v27, 0  ;;  %v779_v44 = vsel %vm11539_vm2, %v739_v29, 0  ;;  %v742_v52 = vrot.slane %v659_v32, 1 }
  0x33   : > { %v665_v46 = vrot.slane %v663_v42, 7  ;;  %v11648_v53 = vor.u32 %v652_v16, %v651_v30  ;;  %v741_v54 = vor.u32 %v740_v33, %v649_v23  ;;  %v670_v56 = vshrl.u32 %v11236_v43, 16 }
  0x34   : > { %v673_v57 = vshll.u32 %v11236_v43, 16  ;;  %v677_v60 = vshrl.u32 %v11237_v55, 16  ;;  %v680_v63 = vshll.u32 %v11237_v55, 16  ;;  %v16281_v12 = vmov 0  }
  0x35   : > { %798 = vrot.lane.b32.xlu1 %v11227_v31, %s11390_s20  ;;  %v656_v31 = vshrl.u32 %v11234_v14, 16  ;;  %v672_v2 = vrot.slane %v670_v56, 7  ;;  %v16454_v15 = vmov 0  ;;  %v703_v22 = vsel %vm11698_vm5, 0, %v11547_v25  ;;  %v11242_v25 = vld [vmem:[%s16265_s1 + $0x8] sm:$0xff]  }
  0x36   : > { %800 = vrot.lane.b32.xlu0 %v11557_v34, %s11390_s20  ;;  %v666_v34 = vshll.u32 %v11608_v17, 16  ;;  %v679_v3 = vrot.slane %v677_v60, 7  ;;  %v746_v5 = vrot.slane %v673_v57, 1  ;;  %v16455_v15 = vsel %vm11698_vm5, 4294967295, %v16454_v15 }
  0x37   : > { %v658_v50 = vrot.slane %v656_v31, 7  ;;  %v743_v61 = vor.u32 %v742_v52, %v656_v31  ;;  %v11669_v4 = vor.u32 %v673_v57, %v672_v2  ;;  %16456 = vst [vmem:[#allocation8_spill] sm:$0xff] %v16455_v15  ;;  %v706_v33 = vsel %vm11698_vm5, 0, %v11597_v1  ;;  %v11747_v1 = vld [vmem:[%s16265_s1 + $0x30] sm:$0xff]  }
  0x38   : > { %v744_v47 = vrot.slane %v666_v34, 1  ;;  %v11661_v62 = vor.u32 %v666_v34, %v665_v46  ;;  %v11674_v6 = vor.u32 %v680_v63, %v679_v3  ;;  %v747_v8 = vor.u32 %v746_v5, %v670_v56  ;;  %v11243_v34 = vld [vmem:[%s16265_s1 + $0x10] sm:$0xff]  }
  0x39   : > { %845 = vrot.lane.b32.xlu1 %v774_v19, %s11391_s27  ;;  %v11653_v59 = vor.u32 %v659_v32, %v658_v50 }
  0x3a   : > { %847 = vrot.lane.b32.xlu0 %v775_v20, %s11391_s27 }
  0x3d   : > { %802 = vrot.lane.b32.xlu1 %v11564_v38, %s11390_s20  ;;  %v780_v38 = vsel %vm11539_vm2, %v741_v54, 0  ;;  %v707_v54 = vsel %vm11698_vm5, 0, %v11601_v9 }
  0x3e   : > { %804 = vrot.lane.b32.xlu0 %v11567_v39, %s11390_s20  ;;  %v781_v39 = vsel %vm11539_vm2, %v743_v61, 0 }
  0x41   : > { %849 = vrot.lane.b32.xlu1 %v776_v24, %s11391_s27  ;;  %v704_v24 = vsel %vm11698_vm5, 0, %v11559_v35 }
  0x42   : > { %851 = vrot.lane.b32.xlu0 %v777_v26, %s11391_s27 }
  0x45   : > { %806 = vrot.lane.b32.xlu1 %v11575_v48, %s11390_s20  ;;  %v745_v48 = vor.u32 %v744_v47, %v663_v42  ;;  %v705_v42 = vsel %vm11698_vm5, 0, %v11587_v58  ;;  %v708_v47 = vsel %vm11698_vm5, 0, %v11629_v36 }
  0x46   : > { %808 = vrot.lane.b32.xlu0 %v11578_v51, %s11390_s20  ;;  %v748_v51 = vrot.slane %v680_v63, 1  ;;  %v709_v63 = vsel %vm11698_vm5, 0, %v11632_v37 }
  0x47   : > { %v782_v7 = vsel %vm11539_vm2, %v745_v48, 0 }
  0x48   : > { %v749_v10 = vor.u32 %v748_v51, %v677_v60 }
  0x49   : > { %853 = vrot.lane.b32.xlu1 %v778_v49, %s11391_s27 }
  0x4a   : > { %855 = vrot.lane.b32.xlu0 %v779_v44, %s11391_s27  ;;  %v784_v11 = vsel %vm11539_vm2, %v749_v10, 0  ;;  %v711_v10 = vsel %vm11698_vm5, 0, %v11636_v41 }
  0x4d   : > { %810 = vrot.lane.b32.xlu1 %v11595_v0, %s11390_s20  ;;  %v783_v0 = vsel %vm11539_vm2, %v747_v8, 0 }
  0x4e   : > { %812 = vrot.lane.b32.xlu0 %v11234_v14, %s11390_s20  ;;  %v10181_v14 = vcombine.low %v16281_v12, %v16281_v12 }
  0x51   : > { %857 = vrot.lane.b32.xlu1 %v780_v38, %s11391_s27 }
  0x52   : > { %859 = vrot.lane.b32.xlu0 %v781_v39, %s11391_s27  ;;  %v710_v39 = vsel %vm11698_vm5, 0, %v11634_v40  ;;  %v712_v40 = vsel %vm11698_vm5, 0, %v11640_v45  ;;  %v714_v45 = vsel %vm11698_vm5, 0, %v11653_v59 }
  0x55   : > { %814 = vrot.lane.b32.xlu1 %v11608_v17, %s11390_s20  ;;  %v702_v17 = vsel %vm11698_vm5, 0, %v11545_v21 }
  0x56   : > { %816 = vrot.lane.b32.xlu0 %v11236_v43, %s11390_s20 }
  0x59   : > { %861 = vrot.lane.b32.xlu1 %v782_v7, %s11391_s27 }
  0x5a   : > { %947 = vrot.lane.b32.xlu0 %v11237_v55, %s11390_s20 }
  0x5d   : > { %863 = vrot.lane.b32.xlu1 %v783_v0, %s11391_s27 }
  0x5e   : > { %786 = vrot.lane.b32.xlu0 %v16281_v12, %s11390_s20 }
  0x61   : > { %950 = vrot.lane.b32.xlu1 %v784_v11, %s11391_s27 }
  0x62   : > { %1352 = vrot.lane.b32.xlu0 %v10181_v14, %s11390_s20  ;;  %s11396_s20 = smov [#allocation2]  }
  0x65   : > { %833 = vrot.lane.b32.xlu1 %v16281_v12, %s11391_s27 }
  0x90   : > { %v789_v16 = vpop.permute.xlu0 %788 }
  0x91   : > { %v871_v20 = vsel %vm865_vm6, %v702_v17, %v789_v16 }
  0x94   : > { %v791_v19 = vpop.permute.xlu0 %790 }
  0x95   : > { %v874_v21 = vsel %vm865_vm6, %v703_v22, %v791_v19  ;;  %v713_v22 = vsel %vm11698_vm5, 0, %v11648_v53  ;;  %v715_v53 = vsel %vm11698_vm5, 0, %v11661_v62 }
  0x97   : > { %v836_v23 = vpop.permute.xlu1 %835 }
  0x98   : > { %v11713_v26 = vsel %vm914_vm7, %v871_v20, %v836_v23  ;;  %v793_v27 = vpop.permute.xlu0 %792 }
  0x99   : > { %10671 = vmatprep.mubr.msk.bf16.mxu0 %vm975_vm8, %v11713_v26  ;;  %v877_v28 = vsel %vm865_vm6, %v704_v24, %v793_v27 }
  0x9b   : > { %v838_v29 = vpop.permute.xlu1 %837 }
  0x9c   : > { %v11723_v30 = vsel %vm914_vm7, %v874_v21, %v838_v29  ;;  %v840_v35 = vpop.permute.xlu0 %839 }
  0x9d   : > { %10672 = vmatmul.mubr.msk.bf16.vlgmr.msra.gmra.mrb[0].mxu0 %vm975_vm8, %v11723_v30  ;;  %v11728_v31 = vsel %vm914_vm7, %v877_v28, %v840_v35 }
  0x9e   : > { %10704 = vmatpush3.bf16.msra.mxu0 %v11613_v18  ;;  %10675 = vmatprep.mubr.msk.bf16.mxu0 %vm975_vm8, %v11728_v31 }
  0x9f   : > { %v795_v32 = vpop.permute.xlu1 %794  ;;  %10705 = vmatprep.subr.bf16.mxu0 %v11242_v25 }
  0xa0   : > { %v797_v43 = vpop.permute.xlu0 %796  ;;  %v880_v49 = vsel %vm865_vm6, %v705_v42, %v795_v32  ;;  %v716_v32 = vsel %vm11698_vm5, 0, %v11669_v4 }
  0xa1   : > { %v883_v18 = vsel %vm865_vm6, %v706_v33, %v797_v43 }
  0xa2   : > { %10706 = vmatpush3.bf16.msra.mxu0 %v11242_v25 }
  0xa3   : > { %v842_v44 = vpop.permute.xlu1 %841  ;;  %10707 = vmatprep.subr.bf16.mxu0 %v11243_v34 }
  0xa4   : > { %v11750_v50 = vsel %vm914_vm7, %v880_v49, %v842_v44  ;;  %v844_v52 = vpop.permute.xlu0 %843 }
  0xa5   : > { %10676 = vmatmul.mubr.msk.bf16.gmra.mrb[4].mxu0 %vm975_vm8, %v11750_v50  ;;  %v11755_v58 = vsel %vm914_vm7, %v883_v18, %v844_v52  ;;  %v717_v18 = vsel %vm11698_vm5, 0, %v11674_v6 }
  0xa6   : > { %10679 = vmatprep.mubr.msk.bf16.mxu0 %vm975_vm8, %v11755_v58  ;;  %10708 = vmatpush3.bf16.msra.mxu0 %v11243_v34 }
  0xa7   : > { %v799_v46 = vpop.permute.xlu1 %798  ;;  %10741 = vmatprep.subr.bf16.mxu0 %v11747_v1 }
  0xa8   : > { %v801_v55 = vpop.permute.xlu0 %800  ;;  %v886_v57 = vsel %vm865_vm6, %v707_v54, %v799_v46 }
  0xa9   : > { %v889_v56 = vsel %vm865_vm6, %v708_v47, %v801_v55 }
  0xab   : > { %v846_v38 = vpop.permute.xlu1 %845 }
  0xac   : > { %v11769_v60 = vsel %vm914_vm7, %v886_v57, %v846_v38  ;;  %v848_v61 = vpop.permute.xlu0 %847  ;;  %v11246_v57 = vld [vmem:[%s16265_s1 + $0x40] sm:$0xff]   ;;  %v11250_v38 = vld [vmem:[%s16267_s3 + $0x48] sm:$0xff]  }
  0xad   : > { %10680 = vmatmul.mubr.msk.bf16.gmra.mrb[8].mxu0 %vm975_vm8, %v11769_v60  ;;  %v11774_v36 = vsel %vm914_vm7, %v889_v56, %v848_v61  ;;  %v11245_v56 = vld [vmem:[%s16265_s1 + $0x38] sm:$0xff]  }
  0xae   : > { %10683 = vmatprep.mubr.msk.bf16.mxu0 %vm975_vm8, %v11774_v36  ;;  %v11252_v61 = vld [vmem:[%s16267_s3 + $0x58] sm:$0xff]  }
  0xaf   : > { %v803_v9 = vpop.permute.xlu1 %802 }
  0xb0   : > { %v805_v2 = vpop.permute.xlu0 %804  ;;  %v892_v48 = vsel %vm865_vm6, %v709_v63, %v803_v9 }
  0xb1   : > { %v895_v3 = vsel %vm865_vm6, %v710_v39, %v805_v2 }
  0xb3   : > { %v850_v5 = vpop.permute.xlu1 %849 }
  0xb4   : > { %v11787_v51 = vsel %vm914_vm7, %v892_v48, %v850_v5  ;;  %v852_v7 = vpop.permute.xlu0 %851 }
  0xb5   : > { %10684 = vmatmul.mubr.msk.bf16.gmra.mrb[12].mxu0 %vm975_vm8, %v11787_v51  ;;  %v11792_v8 = vsel %vm914_vm7, %v895_v3, %v852_v7 }
  0xb6   : > { %10687 = vmatprep.mubr.msk.bf16.mxu0 %vm975_vm8, %v11792_v8 }
  0xb7   : > { %v807_v37 = vpop.permute.xlu1 %806 }
  0xb8   : > { %v809_v0 = vpop.permute.xlu0 %808  ;;  %v898_v14 = vsel %vm865_vm6, %v711_v10, %v807_v37 }
  0xb9   : > { %v901_v11 = vsel %vm865_vm6, %v712_v40, %v809_v0 }
  0xbb   : > { %v854_v16 = vpop.permute.xlu1 %853 }
  0xbc   : > { %v11805_v17 = vsel %vm914_vm7, %v898_v14, %v854_v16  ;;  %v856_v19 = vpop.permute.xlu0 %855  ;;  %v11942_v14 = vld [vmem:[%s16267_s3] sm:$0xff]  }
  0xbd   : > { %10688 = vmatmul.mubr.msk.bf16.gmra.mrb[16].mxu0 %vm975_vm8, %v11805_v17  ;;  %v11810_v20 = vsel %vm914_vm7, %v901_v11, %v856_v19 }
  0xbe   : > { %10691 = vmatprep.mubr.msk.bf16.mxu0 %vm975_vm8, %v11810_v20 }
  0xbf   : > { %v811_v41 = vpop.permute.xlu1 %810 }
  0xc0   : > { %v813_v23 = vpop.permute.xlu0 %812  ;;  %v904_v27 = vsel %vm865_vm6, %v713_v22, %v811_v41 }
  0xc1   : > { %v907_v24 = vsel %vm865_vm6, %v714_v45, %v813_v23 }
  0xc3   : > { %v858_v21 = vpop.permute.xlu1 %857 }
  0xc4   : > { %v940_v28 = vsel %vm914_vm7, %v904_v27, %v858_v21  ;;  %v860_v29 = vpop.permute.xlu0 %859 }
  0xc5   : > { %10692 = vmatmul.mubr.msk.bf16.gmra.mrb[20].mxu0 %vm975_vm8, %v940_v28  ;;  %v942_v25 = vsel %vm914_vm7, %v907_v24, %v860_v29 }
  0xc6   : > { %10695 = vmatprep.mubr.msk.bf16.mxu0 %vm975_vm8, %v942_v25 }
  0xc7   : > { %v815_v59 = vpop.permute.xlu1 %814 }
  0xc8   : > { %v817_v35 = vpop.permute.xlu0 %816  ;;  %v910_v33 = vsel %vm865_vm6, %v715_v53, %v815_v59 }
  0xc9   : > { %v913_v43 = vsel %vm865_vm6, %v716_v32, %v817_v35 }
  0xcb   : > { %v862_v34 = vpop.permute.xlu1 %861 }
  0xcc   : > { %v944_v42 = vsel %vm914_vm7, %v910_v33, %v862_v34  ;;  %v948_v49 = vpop.permute.xlu0 %947 }
  0xcd   : > { %10696 = vmatmul.mubr.msk.bf16.gmra.mrb[24].mxu0 %vm975_vm8, %v944_v42  ;;  %v954_v52 = vsel %vm865_vm6, %v717_v18, %v948_v49 }
  0xcf   : > { %v864_v62 = vpop.permute.xlu1 %863 }
  0xd0   : > { %v946_v44 = vsel %vm914_vm7, %v913_v43, %v864_v62  ;;  %v787_v47 = vpop.permute.xlu0 %786 }
  0xd1   : > { %10699 = vmatprep.mubr.msk.bf16.mxu0 %vm975_vm8, %v946_v44  ;;  %v868_v54 = vsel %vm865_vm6, 0, %v787_v47 }
  0xd3   : > { %v951_v4 = vpop.permute.xlu1 %950 }
  0xd4   : > { %v956_v46 = vsel %vm914_vm7, %v954_v52, %v951_v4 }
  0xd5   : > { %10700 = vmatmul.mubr.msk.bf16.gmra.mrb[28].mxu0 %vm975_vm8, %v956_v46 }
  0xd7   : > { %v11845_v55 = vpop.permute.xlu1 %833 }
  0xd8   : > { %v916_v6 = vsel %vm914_vm7, %v868_v54, %v11845_v55 }
  0xd9   : > { %10709 = vmatprep.mubr.msk.bf16.mxu0 %vm975_vm8, %v916_v6 }
  0xdd   : > { %10710 = vmatmul.mubr.msk.bf16.vlgmr.msra.gmra.mrb[0].mxu0 %vm975_vm8, %v11713_v26  ;;  %v1353_v26 = vpop.permute.xlu0 %1352 }
  0xde   : > { %10742 = vmatpush3.bf16.msra.mxu0 %v11747_v1  ;;  %10713 = vmatprep.mubr.msk.bf16.mxu0 %vm975_vm8, %v11723_v30  ;;  %v11247_v1 = vld [vmem:[%s16267_s3 + $0x30] sm:$0xff]  }
  0xdf   : > { %10743 = vmatprep.subr.bf16.mxu0 %v11245_v56  ;;  %10779 = vmatprep.subr.bf16.mxu1 %v11247_v1 }
  0xe0   : > { %10780 = vmatpush3.bf16.msra.mxu1 %v11247_v1 }
  0xe2   : > { %10744 = vmatpush3.bf16.msra.mxu0 %v11245_v56 }
  0xe3   : > { %10745 = vmatprep.subr.bf16.mxu0 %v11246_v57 }
  0xe5   : > { %10714 = vmatmul.mubr.msk.bf16.gmra.mrb[4].mxu0 %vm975_vm8, %v11728_v31 }
  0xe6   : > { %10717 = vmatprep.mubr.msk.bf16.mxu0 %vm975_vm8, %v11750_v50  ;;  %10746 = vmatpush3.bf16.msra.mxu0 %v11246_v57 }
  0xed   : > { %10718 = vmatmul.mubr.msk.bf16.gmra.mrb[8].mxu0 %vm975_vm8, %v11755_v58 }
  0xee   : > { %10721 = vmatprep.mubr.msk.bf16.mxu0 %vm975_vm8, %v11769_v60 }
  0xf5   : > { %10722 = vmatmul.mubr.msk.bf16.gmra.mrb[12].mxu0 %vm975_vm8, %v11774_v36 }
  0xf6   : > { %10725 = vmatprep.mubr.msk.bf16.mxu0 %vm975_vm8, %v11787_v51 }
  0xfd   : > { %10726 = vmatmul.mubr.msk.bf16.gmra.mrb[16].mxu0 %vm975_vm8, %v11792_v8 }
  0xfe   : > { %10729 = vmatprep.mubr.msk.bf16.mxu0 %vm975_vm8, %v11805_v17 }
 0x105   : > { %10730 = vmatmul.mubr.msk.bf16.gmra.mrb[20].mxu0 %vm975_vm8, %v11810_v20 }
 0x106   : > { %10733 = vmatprep.mubr.msk.bf16.mxu0 %vm975_vm8, %v940_v28 }
 0x10d   : > { %10734 = vmatmul.mubr.msk.bf16.gmra.mrb[24].mxu0 %vm975_vm8, %v942_v25 }
 0x10e   : > { %10737 = vmatprep.mubr.msk.bf16.mxu0 %vm975_vm8, %v944_v42 }
 0x115   : > { %10738 = vmatmul.mubr.msk.bf16.gmra.mrb[28].mxu0 %vm975_vm8, %v946_v44 }
 0x116   : > { %10747 = vmatprep.mubr.msk.bf16.mxu0 %vm975_vm8, %v11723_v30  ;;  %v1355_v30 = vsel %vm865_vm6, 0, %v1353_v26 }
 0x11d   : > { %10748 = vmatmul.mubr.msk.bf16.vlgmr.msra.gmra.mrb[0].mxu0 %vm975_vm8, %v11728_v31  ;;  %v1356_v31 = vsel %vm914_vm7, %v1355_v30, %v11845_v55 }
 0x11e   : > { %10751 = vmatprep.mubr.msk.bf16.mxu0 %vm975_vm8, %v11750_v50  ;;  %v11248_v50 = vld [vmem:[%s16267_s3 + $0x38] sm:$0xff]  }
 0x11f   : > { %10781 = vmatprep.subr.bf16.mxu1 %v11248_v50 }
 0x120   : > { %10782 = vmatpush3.bf16.msra.mxu1 %v11248_v50 }
 0x125   : > { %10752 = vmatmul.mubr.msk.bf16.gmra.mrb[4].mxu0 %vm975_vm8, %v11755_v58  ;;  %v11249_v58 = vld [vmem:[%s16267_s3 + $0x40] sm:$0xff]  }
 0x126   : > { %10755 = vmatprep.mubr.msk.bf16.mxu0 %vm975_vm8, %v11769_v60  ;;  %10783 = vmatprep.subr.bf16.mxu1 %v11249_v58  ;;  %v11251_v60 = vld [vmem:[%s16267_s3 + $0x50] sm:$0xff]  }
 0x127   : > { %10784 = vmatpush3.bf16.msra.mxu1 %v11249_v58 }
 0x128   : > { %10785 = vmatprep.subr.bf16.mxu1 %v11250_v38 }
 0x12b   : > { %10786 = vmatpush3.bf16.msra.mxu1 %v11250_v38 }
 0x12c   : > { %10787 = vmatprep.subr.bf16.mxu1 %v11251_v60 }
 0x12d   : > { %10756 = vmatmul.mubr.msk.bf16.gmra.mrb[8].mxu0 %vm975_vm8, %v11774_v36  ;;  %v11933_v36 = vld [vmem:[%s16266_s2] ss:$0 sm:$0xff] }
 0x12e   : > { %10759 = vmatprep.mubr.msk.bf16.mxu0 %vm975_vm8, %v11787_v51 }
 0x12f   : > { %10788 = vmatpush3.bf16.msra.mxu1 %v11251_v60 }
 0x130   : > { %10789 = vmatprep.subr.bf16.mxu1 %v11252_v61 }
 0x133   : > { %10790 = vmatpush3.bf16.msra.mxu1 %v11252_v61 }
 0x134   : > { %10823 = vmatprep.subr.bf16.mxu1 %v11942_v14 }
 0x135   : > { %10760 = vmatmul.mubr.msk.bf16.gmra.mrb[12].mxu0 %vm975_vm8, %v11792_v8 }
 0x136   : > { %10763 = vmatprep.mubr.msk.bf16.mxu0 %vm975_vm8, %v11805_v17 }
 0x13d   : > { %10764 = vmatmul.mubr.msk.bf16.gmra.mrb[16].mxu0 %vm975_vm8, %v11810_v20 }
 0x13e   : > { %10767 = vmatprep.mubr.msk.bf16.mxu0 %vm975_vm8, %v940_v28 }
 0x145   : > { %10768 = vmatmul.mubr.msk.bf16.gmra.mrb[20].mxu0 %vm975_vm8, %v942_v25 }
 0x146   : > { %10771 = vmatprep.mubr.msk.bf16.mxu0 %vm975_vm8, %v944_v42 }
 0x14d   : > { %10772 = vmatmul.mubr.msk.bf16.gmra.mrb[24].mxu0 %vm975_vm8, %v946_v44 }
 0x14e   : > { %10775 = vmatprep.mubr.msk.bf16.mxu0 %vm975_vm8, %v956_v46 }
 0x155   : > { %10776 = vmatmul.mubr.msk.bf16.gmra.mrb[28].mxu0 %vm975_vm8, %v1356_v31 }
 0x1f0   : > { %v10749_v9 = vpop.f32.mrb[0].mxu0 }
 0x1f1   : > { %v1578_v39 = vadd.f32 %v10749_v9, %v11933_v36  ;;  %v1411_v63 = vpop.f32.mrb[1].mxu0 }
 0x1f2   : > { %v1576_v2 = vadd.f32 %v11933_v36, %v1411_v63  ;;  %v10750_v3 = vpop.f32.mrb[2].mxu0 }
 0x1f3   : > { %v1579_v48 = vadd.f32 %v10750_v3, %v11933_v36  ;;  %v1414_v5 = vpop.f32.mrb[3].mxu0  ;;  %v1610_v7 = vmax.f32 %v1578_v39, 0.0 }
 0x1f4   : > { %v1577_v51 = vadd.f32 %v11933_v36, %v1414_v5  ;;  %v1608_v37 = vmax.f32 %v1576_v2, 0.0 }
 0x1f5   : > { %v1611_v8 = vmax.f32 %v1579_v48, 0.0 }
 0x1f6   : > { %v1609_v40 = vmax.f32 %v1577_v51, 0.0 }
 0x1f7   : > { %v1641_v10 = vpack.c.bf16 %v1611_v8, %v1610_v7 }
 0x1f8   : > { %v1640_v0 = vpack.c.bf16 %v1609_v40, %v1608_v37  ;;  %v10753_v11 = vpop.f32.mrb[4].mxu0 }
 0x1f9   : > { %v1704_v16 = vshll.u32 %v1641_v10, 16  ;;  %v1582_v17 = vadd.f32 %v10753_v11, %v11933_v36  ;;  %1918 = vrot.lane.b32.xlu0 %v1641_v10, %s11391_s27  ;;  %v1427_v19 = vpop.f32.mrb[5].mxu0  ;;  %v1701_v20 = vshrl.u32 %v1641_v10, 16 }
 0x1fa   : > { %v1697_v41 = vshll.u32 %v1640_v0, 16  ;;  %v1580_v45 = vadd.f32 %v11933_v36, %v1427_v19  ;;  %1916 = vrot.lane.b32.xlu1 %v1640_v0, %s11391_s27  ;;  %v10754_v22 = vpop.f32.mrb[6].mxu0  ;;  %v1694_v23 = vshrl.u32 %v1640_v0, 16 }
 0x1fb   : > { %v1583_v24 = vadd.f32 %v10754_v22, %v11933_v36  ;;  %v1430_v27 = vpop.f32.mrb[7].mxu0  ;;  %v1839_v21 = vrot.slane %v1704_v16, 1  ;;  %v1703_v28 = vrot.slane %v1701_v20, 7  ;;  %v1614_v53 = vmax.f32 %v1582_v17, 0.0 }
 0x1fc   : > { %v1581_v29 = vadd.f32 %v11933_v36, %v1430_v27  ;;  %v1837_v25 = vrot.slane %v1697_v41, 1  ;;  %v1696_v59 = vrot.slane %v1694_v23, 7  ;;  %v1612_v34 = vmax.f32 %v1580_v45, 0.0 }
 0x1fd   : > { %v1615_v35 = vmax.f32 %v1583_v24, 0.0  ;;  %v1840_v32 = vor.u32 %v1839_v21, %v1701_v20  ;;  %v11951_v33 = vor.u32 %v1704_v16, %v1703_v28 }
 0x1fe   : > { %v1613_v42 = vmax.f32 %v1581_v29, 0.0  ;;  %v1838_v43 = vor.u32 %v1837_v25, %v1694_v23  ;;  %v11953_v18 = vor.u32 %v1697_v41, %v1696_v59 }
 0x1ff   : > { %v1643_v49 = vpack.c.bf16 %v1615_v35, %v1614_v53  ;;  %v1886_v62 = vsel %vm11539_vm2, %v1840_v32, 0 }
 0x200   : > { %v1642_v44 = vpack.c.bf16 %v1613_v42, %v1612_v34  ;;  %1965 = vrot.lane.b32.xlu0 %v1886_v62, %s11393_s16  ;;  %v10757_v52 = vpop.f32.mrb[8].mxu0  ;;  %v1885_v4 = vsel %vm11539_vm2, %v1838_v43, 0 }
 0x201   : > { %v1718_v46 = vshll.u32 %v1643_v49, 16  ;;  %v1586_v47 = vadd.f32 %v10757_v52, %v11933_v36  ;;  %1963 = vrot.lane.b32.xlu1 %v1885_v4, %s11393_s16  ;;  %v1443_v54 = vpop.f32.mrb[9].mxu0  ;;  %v1715_v6 = vshrl.u32 %v1643_v49, 16 }
 0x202   : > { %v1711_v56 = vshll.u32 %v1642_v44, 16  ;;  %v1584_v57 = vadd.f32 %v11933_v36, %v1443_v54  ;;  %v10758_v26 = vpop.f32.mrb[10].mxu0  ;;  %v1708_v30 = vshrl.u32 %v1642_v44, 16 }
 0x203   : > { %v1587_v31 = vadd.f32 %v10758_v26, %v11933_v36  ;;  %v1446_v1 = vpop.f32.mrb[11].mxu0  ;;  %v1843_v50 = vrot.slane %v1718_v46, 1  ;;  %v1717_v58 = vrot.slane %v1715_v6, 7  ;;  %v1618_v9 = vmax.f32 %v1586_v47, 0.0 }
 0x204   : > { %v1585_v38 = vadd.f32 %v11933_v36, %v1446_v1  ;;  %1922 = vrot.lane.b32.xlu0 %v1643_v49, %s11391_s27  ;;  %v1841_v60 = vrot.slane %v1711_v56, 1  ;;  %v1710_v61 = vrot.slane %v1708_v30, 7  ;;  %v1616_v3 = vmax.f32 %v1584_v57, 0.0 }
 0x205   : > { %v1619_v39 = vmax.f32 %v1587_v31, 0.0  ;;  %1920 = vrot.lane.b32.xlu1 %v1642_v44, %s11391_s27  ;;  %v1844_v63 = vor.u32 %v1843_v50, %v1715_v6  ;;  %v11967_v2 = vor.u32 %v1718_v46, %v1717_v58 }
 0x206   : > { %v1617_v48 = vmax.f32 %v1585_v38, 0.0  ;;  %v1842_v5 = vor.u32 %v1841_v60, %v1708_v30  ;;  %v11969_v51 = vor.u32 %v1711_v56, %v1710_v61 }
 0x207   : > { %v1645_v7 = vpack.c.bf16 %v1619_v39, %v1618_v9  ;;  %v1888_v8 = vsel %vm11539_vm2, %v1844_v63, 0 }
 0x208   : > { %v1644_v37 = vpack.c.bf16 %v1617_v48, %v1616_v3  ;;  %1969 = vrot.lane.b32.xlu0 %v1888_v8, %s11393_s16  ;;  %v10761_v40 = vpop.f32.mrb[12].mxu0  ;;  %v1887_v10 = vsel %vm11539_vm2, %v1842_v5, 0 }
 0x209   : > { %v1732_v0 = vshll.u32 %v1645_v7, 16  ;;  %v1590_v11 = vadd.f32 %v10761_v40, %v11933_v36  ;;  %1967 = vrot.lane.b32.xlu1 %v1887_v10, %s11393_s16  ;;  %v1459_v16 = vpop.f32.mrb[13].mxu0  ;;  %v1729_v17 = vshrl.u32 %v1645_v7, 16 }
 0x20a   : > { %v1725_v19 = vshll.u32 %v1644_v37, 16  ;;  %v1588_v20 = vadd.f32 %v11933_v36, %v1459_v16  ;;  %v10762_v41 = vpop.f32.mrb[14].mxu0  ;;  %v1722_v45 = vshrl.u32 %v1644_v37, 16 }
 0x20b   : > { %v1591_v22 = vadd.f32 %v10762_v41, %v11933_v36  ;;  %v1462_v23 = vpop.f32.mrb[15].mxu0  ;;  %v1847_v24 = vrot.slane %v1732_v0, 1  ;;  %v1731_v27 = vrot.slane %v1729_v17, 7  ;;  %v1622_v25 = vmax.f32 %v1590_v11, 0.0 }
 0x20c   : > { %v1589_v21 = vadd.f32 %v11933_v36, %v1462_v23  ;;  %1926 = vrot.lane.b32.xlu0 %v1645_v7, %s11391_s27  ;;  %v1845_v28 = vrot.slane %v1725_v19, 1  ;;  %v1724_v29 = vrot.slane %v1722_v45, 7  ;;  %v1620_v32 = vmax.f32 %v1588_v20, 0.0 }
 0x20d   : > { %v1623_v59 = vmax.f32 %v1591_v22, 0.0  ;;  %1924 = vrot.lane.b32.xlu1 %v1644_v37, %s11391_s27  ;;  %v1848_v53 = vor.u32 %v1847_v24, %v1729_v17  ;;  %v11983_v35 = vor.u32 %v1732_v0, %v1731_v27 }
 0x20e   : > { %v1621_v34 = vmax.f32 %v1589_v21, 0.0  ;;  %v1846_v42 = vor.u32 %v1845_v28, %v1722_v45  ;;  %v11985_v43 = vor.u32 %v1725_v19, %v1724_v29 }
 0x20f   : > { %v1647_v49 = vpack.c.bf16 %v1623_v59, %v1622_v25  ;;  %v1890_v62 = vsel %vm11539_vm2, %v1848_v53, 0 }
 0x210   : > { %v1646_v44 = vpack.c.bf16 %v1621_v34, %v1620_v32  ;;  %1973 = vrot.lane.b32.xlu0 %v1890_v62, %s11393_s16  ;;  %v10765_v52 = vpop.f32.mrb[16].mxu0  ;;  %v1889_v4 = vsel %vm11539_vm2, %v1846_v42, 0 }
 0x211   : > { %v1746_v46 = vshll.u32 %v1647_v49, 16  ;;  %v1594_v47 = vadd.f32 %v10765_v52, %v11933_v36  ;;  %1971 = vrot.lane.b32.xlu1 %v1889_v4, %s11393_s16  ;;  %v1475_v54 = vpop.f32.mrb[17].mxu0  ;;  %v1743_v6 = vshrl.u32 %v1647_v49, 16 }
 0x212   : > { %v1739_v56 = vshll.u32 %v1646_v44, 16  ;;  %v1592_v57 = vadd.f32 %v11933_v36, %v1475_v54  ;;  %v10766_v26 = vpop.f32.mrb[18].mxu0  ;;  %v1736_v30 = vshrl.u32 %v1646_v44, 16 }
 0x213   : > { %v1595_v31 = vadd.f32 %v10766_v26, %v11933_v36  ;;  %v1478_v1 = vpop.f32.mrb[19].mxu0  ;;  %v1851_v50 = vrot.slane %v1746_v46, 1  ;;  %v1745_v58 = vrot.slane %v1743_v6, 7  ;;  %v1626_v9 = vmax.f32 %v1594_v47, 0.0 }
 0x214   : > { %v1593_v38 = vadd.f32 %v11933_v36, %v1478_v1  ;;  %1930 = vrot.lane.b32.xlu0 %v1647_v49, %s11391_s27  ;;  %v1849_v60 = vrot.slane %v1739_v56, 1  ;;  %v1738_v61 = vrot.slane %v1736_v30, 7  ;;  %v1624_v48 = vmax.f32 %v1592_v57, 0.0 }
 0x215   : > { %v1627_v39 = vmax.f32 %v1595_v31, 0.0  ;;  %1928 = vrot.lane.b32.xlu1 %v1646_v44, %s11391_s27  ;;  %v1852_v63 = vor.u32 %v1851_v50, %v1743_v6  ;;  %v11999_v3 = vor.u32 %v1746_v46, %v1745_v58 }
 0x216   : > { %v1625_v5 = vmax.f32 %v1593_v38, 0.0  ;;  %v1850_v7 = vor.u32 %v1849_v60, %v1736_v30  ;;  %v12001_v8 = vor.u32 %v1739_v56, %v1738_v61 }
 0x217   : > { %v1649_v37 = vpack.c.bf16 %v1627_v39, %v1626_v9  ;;  %v1892_v40 = vsel %vm11539_vm2, %v1852_v63, 0 }
 0x218   : > { %v1648_v10 = vpack.c.bf16 %v1625_v5, %v1624_v48  ;;  %1977 = vrot.lane.b32.xlu0 %v1892_v40, %s11393_s16  ;;  %v10769_v0 = vpop.f32.mrb[20].mxu0  ;;  %v1891_v11 = vsel %vm11539_vm2, %v1850_v7, 0 }
 0x219   : > { %v1760_v16 = vshll.u32 %v1649_v37, 16  ;;  %v1598_v17 = vadd.f32 %v10769_v0, %v11933_v36  ;;  %1975 = vrot.lane.b32.xlu1 %v1891_v11, %s11393_s16  ;;  %v1491_v19 = vpop.f32.mrb[21].mxu0  ;;  %v1757_v20 = vshrl.u32 %v1649_v37, 16 }
 0x21a   : > { %v1753_v41 = vshll.u32 %v1648_v10, 16  ;;  %v1596_v45 = vadd.f32 %v11933_v36, %v1491_v19  ;;  %v10770_v22 = vpop.f32.mrb[22].mxu0  ;;  %v1750_v23 = vshrl.u32 %v1648_v10, 16 }
 0x21b   : > { %v1599_v24 = vadd.f32 %v10770_v22, %v11933_v36  ;;  %v1494_v27 = vpop.f32.mrb[23].mxu0  ;;  %v1855_v21 = vrot.slane %v1760_v16, 1  ;;  %v1759_v28 = vrot.slane %v1757_v20, 7  ;;  %v1630_v53 = vmax.f32 %v1598_v17, 0.0 }
 0x21c   : > { %v1597_v29 = vadd.f32 %v11933_v36, %v1494_v27  ;;  %1934 = vrot.lane.b32.xlu0 %v1649_v37, %s11391_s27  ;;  %v1853_v25 = vrot.slane %v1753_v41, 1  ;;  %v1752_v59 = vrot.slane %v1750_v23, 7  ;;  %v1628_v49 = vmax.f32 %v1596_v45, 0.0 }
 0x21d   : > { %v1631_v32 = vmax.f32 %v1599_v24, 0.0  ;;  %1932 = vrot.lane.b32.xlu1 %v1648_v10, %s11391_s27  ;;  %v1856_v34 = vor.u32 %v1855_v21, %v1757_v20  ;;  %v12015_v42 = vor.u32 %v1760_v16, %v1759_v28 }
 0x21e   : > { %v1629_v62 = vmax.f32 %v1597_v29, 0.0  ;;  %v1854_v44 = vor.u32 %v1853_v25, %v1750_v23  ;;  %v12017_v52 = vor.u32 %v1753_v41, %v1752_v59 }
 0x21f   : > { %v1651_v4 = vpack.c.bf16 %v1631_v32, %v1630_v53  ;;  %v1894_v46 = vsel %vm11539_vm2, %v1856_v34, 0 }
 0x220   : > { %v1650_v47 = vpack.c.bf16 %v1629_v62, %v1628_v49  ;;  %1981 = vrot.lane.b32.xlu0 %v1894_v46, %s11393_s16  ;;  %v10773_v54 = vpop.f32.mrb[24].mxu0  ;;  %v1893_v6 = vsel %vm11539_vm2, %v1854_v44, 0 }
 0x221   : > { %v1774_v56 = vshll.u32 %v1651_v4, 16  ;;  %v1602_v57 = vadd.f32 %v10773_v54, %v11933_v36  ;;  %1979 = vrot.lane.b32.xlu1 %v1893_v6, %s11393_s16  ;;  %v1507_v26 = vpop.f32.mrb[25].mxu0  ;;  %v1771_v30 = vshrl.u32 %v1651_v4, 16 }
 0x222   : > { %v1767_v31 = vshll.u32 %v1650_v47, 16  ;;  %v1600_v1 = vadd.f32 %v11933_v36, %v1507_v26  ;;  %v10774_v50 = vpop.f32.mrb[26].mxu0  ;;  %v1764_v58 = vshrl.u32 %v1650_v47, 16 }
 0x223   : > { %v1603_v38 = vadd.f32 %v10774_v50, %v11933_v36  ;;  %v1510_v60 = vpop.f32.mrb[27].mxu0  ;;  %v1859_v61 = vrot.slane %v1774_v56, 1  ;;  %v1773_v9 = vrot.slane %v1771_v30, 7  ;;  %v1634_v5 = vmax.f32 %v1602_v57, 0.0 }
 0x224   : > { %v1601_v39 = vadd.f32 %v11933_v36, %v1510_v60  ;;  %1938 = vrot.lane.b32.xlu0 %v1651_v4, %s11391_s27  ;;  %v1857_v63 = vrot.slane %v1767_v31, 1  ;;  %v1766_v48 = vrot.slane %v1764_v58, 7  ;;  %v1632_v10 = vmax.f32 %v1600_v1, 0.0 }
 0x225   : > { %v1635_v7 = vmax.f32 %v1603_v38, 0.0  ;;  %1936 = vrot.lane.b32.xlu1 %v1650_v47, %s11391_s27  ;;  %v1860_v37 = vor.u32 %v1859_v61, %v1771_v30  ;;  %v12031_v40 = vor.u32 %v1774_v56, %v1773_v9 }
 0x226   : > { %v1633_v0 = vmax.f32 %v1601_v39, 0.0  ;;  %v1858_v11 = vor.u32 %v1857_v63, %v1764_v58  ;;  %v12033_v16 = vor.u32 %v1767_v31, %v1766_v48 }
 0x227   : > { %v1653_v17 = vpack.c.bf16 %v1635_v7, %v1634_v5  ;;  %v1896_v19 = vsel %vm11539_vm2, %v1860_v37, 0 }
 0x228   : > { %v1652_v20 = vpack.c.bf16 %v1633_v0, %v1632_v10  ;;  %1985 = vrot.lane.b32.xlu0 %v1896_v19, %s11393_s16  ;;  %v10777_v41 = vpop.f32.mrb[28].mxu0  ;;  %v1895_v45 = vsel %vm11539_vm2, %v1858_v11, 0  ;;  %v1821_v19 = vsel %vm11698_vm5, 0, %v11953_v18 }
 0x229   : > { %v1788_v22 = vshll.u32 %v1653_v17, 16  ;;  %v1606_v23 = vadd.f32 %v10777_v41, %v11933_v36  ;;  %1983 = vrot.lane.b32.xlu1 %v1895_v45, %s11393_s16  ;;  %v1523_v24 = vpop.f32.mrb[29].mxu0  ;;  %v1785_v27 = vshrl.u32 %v1653_v17, 16  ;;  %v1822_v41 = vsel %vm11698_vm5, 0, %v11951_v33 }
 0x22a   : > { %v1781_v21 = vshll.u32 %v1652_v20, 16  ;;  %v1604_v28 = vadd.f32 %v11933_v36, %v1523_v24  ;;  %v10778_v29 = vpop.f32.mrb[30].mxu0  ;;  %v1778_v25 = vshrl.u32 %v1652_v20, 16  ;;  %v11254_v24 = vld [vmem:[%s16267_s3 + $0x8] sm:$0xff]  }
 0x22b   : > { %v1607_v59 = vadd.f32 %v10778_v29, %v11933_v36  ;;  %v1526_v53 = vpop.f32.mrb[31].mxu0  ;;  %v1863_v32 = vrot.slane %v1788_v22, 1  ;;  %v1787_v34 = vrot.slane %v1785_v27, 7  ;;  %v1638_v4 = vmax.f32 %v1606_v23, 0.0 }
 0x22c   : > { %v1605_v49 = vadd.f32 %v11933_v36, %v1526_v53  ;;  %1942 = vrot.lane.b32.xlu0 %v1653_v17, %s11391_s27  ;;  %v1861_v62 = vrot.slane %v1781_v21, 1  ;;  %v1780_v44 = vrot.slane %v1778_v25, 7  ;;  %v1636_v6 = vmax.f32 %v1604_v28, 0.0 }
 0x22d   : > { %v1639_v46 = vmax.f32 %v1607_v59, 0.0  ;;  %1940 = vrot.lane.b32.xlu1 %v1652_v20, %s11391_s27  ;;  %v1864_v47 = vor.u32 %v1863_v32, %v1785_v27  ;;  %v12047_v54 = vor.u32 %v1788_v22, %v1787_v34  ;;  %v1823_v28 = vsel %vm11698_vm5, 0, %v11969_v51  ;;  %v11256_v34 = vld [vmem:[%s16267_s3 + $0x18] sm:$0xff]  }
 0x22e   : > { %v1637_v56 = vmax.f32 %v1605_v49, 0.0  ;;  %v1862_v57 = vor.u32 %v1861_v62, %v1778_v25  ;;  %v12049_v26 = vor.u32 %v1781_v21, %v1780_v44  ;;  %v11255_v21 = vld [vmem:[%s16267_s3 + $0x10] sm:$0xff]   ;;  %v1824_v25 = vsel %vm11698_vm5, 0, %v11967_v2  ;;  %v11257_v62 = vld [vmem:[%s16267_s3 + $0x20] sm:$0xff]  }
 0x22f   : > { %v1655_v30 = vpack.c.bf16 %v1639_v46, %v1638_v4  ;;  %v1898_v36 = vsel %vm11539_vm2, %v1864_v47, 0  ;;  %v1825_v44 = vsel %vm11698_vm5, 0, %v11985_v43  ;;  %v1826_v46 = vsel %vm11698_vm5, 0, %v11983_v35 }
 0x230   : > { %v1654_v31 = vpack.c.bf16 %v1637_v56, %v1636_v6  ;;  %1989 = vrot.lane.b32.xlu0 %v1898_v36, %s11393_s16  ;;  %v1897_v1 = vsel %vm11539_vm2, %v1862_v57, 0 }
 0x231   : > { %v1802_v50 = vshll.u32 %v1655_v30, 16  ;;  %1987 = vrot.lane.b32.xlu1 %v1897_v1, %s11393_s16  ;;  %v1799_v58 = vshrl.u32 %v1655_v30, 16  ;;  %v1827_v1 = vsel %vm11698_vm5, 0, %v12001_v8 }
 0x232   : > { %v1795_v38 = vshll.u32 %v1654_v31, 16  ;;  %v1792_v60 = vshrl.u32 %v1654_v31, 16 }
 0x233   : > { %v1801_v61 = vrot.slane %v1799_v58, 7  ;;  %v1867_v63 = vrot.slane %v1802_v50, 1 }
 0x234   : > { %v1865_v9 = vrot.slane %v1795_v38, 1  ;;  %v1794_v39 = vrot.slane %v1792_v60, 7 }
 0x235   : > { %1944 = vrot.lane.b32.xlu1 %v1654_v31, %s11391_s27  ;;  %v12058_v48 = vor.u32 %v1802_v50, %v1801_v61  ;;  %v1868_v10 = vor.u32 %v1867_v63, %v1799_v58  ;;  %v12144_v31 = vld [vmem:[%s16267_s3 + $0x60] sm:$0xff]   ;;  %v1828_v58 = vsel %vm11698_vm5, 0, %v11999_v3  ;;  %v1829_v63 = vsel %vm11698_vm5, 0, %v12017_v52 }
 0x236   : > { %v1866_v5 = vor.u32 %v1865_v9, %v1792_v60  ;;  %v12060_v7 = vor.u32 %v1795_v38, %v1794_v39 }
 0x237   : > { %v1900_v0 = vsel %vm11539_vm2, %v1868_v10, 0 }
 0x238   : > { %v1899_v37 = vsel %vm11539_vm2, %v1866_v5, 0  ;;  %vm7231_vm2 = vcmask 1043456  }
 0x239   : > { %2073 = vrot.lane.b32.xlu1 %v1655_v30, %s11391_s27  ;;  %1991 = vrot.lane.b32.xlu0 %v1899_v37, %s11393_s16  ;;  %v11258_v30 = vld [vmem:[%s16267_s3 + $0x28] sm:$0xff]   ;;  %v1830_v37 = vsel %vm11698_vm5, 0, %v12015_v42  ;;  %v1831_v42 = vsel %vm11698_vm5, 0, %v12033_v16  ;;  %vm14874_vm4 = vmand %vm7231_vm2, %vm7232_vm3 }
 0x23d   : > { %1961 = vrot.lane.b32.xlu1 %v16281_v12, %s11393_s16  ;;  %2076 = vrot.lane.b32.xlu0 %v1900_v0, %s11393_s16 }
 0x26b   : > { %v1919_v11 = vpop.permute.xlu0 %1918 }
 0x26c   : > { %v1917_v17 = vpop.permute.xlu1 %1916  ;;  %v1999_v22 = vsel %vm914_vm7, %v1822_v41, %v1919_v11 }
 0x26d   : > { %v1996_v13 = vsel %vm914_vm7, %v1821_v19, %v1917_v17 }
 0x272   : > { %v1966_v20 = vpop.permute.xlu0 %1965 }
 0x273   : > { %v1964_v45 = vpop.permute.xlu1 %1963  ;;  %v12086_v18 = vsel %vm2039_vm9, %v1999_v22, %v1966_v20 }
 0x274   : > { %v12080_v23 = vsel %vm2039_vm9, %v1996_v13, %v1964_v45  ;;  %v1832_v13 = vsel %vm11698_vm5, 0, %v12031_v40  ;;  %v1833_v40 = vsel %vm11698_vm5, 0, %v12049_v26  ;;  %v1835_v26 = vsel %vm11698_vm5, 0, %v12060_v7 }
 0x275   : > { %10791 = vmatprep.mubr.msk.bf16.mxu1 %vm2119_vm10, %v12080_v23  ;;  %v1993_v7 = vsel %vm914_vm7, 0, %v11845_v55  ;;  %v11261_v55 = vld [vmem:[%s16267_s3 + $0x70] sm:$0xff]  }
 0x276   : > { %10792 = vmatmul.mubr.msk.bf16.vlgmr.msra.gmra.mrb[0].mxu1 %vm2119_vm10, %v12086_v18  ;;  %v1923_v33 = vpop.permute.xlu0 %1922 }
 0x277   : > { %v1921_v27 = vpop.permute.xlu1 %1920  ;;  %10824 = vmatpush3.bf16.msra.mxu1 %v11942_v14  ;;  %v2005_v14 = vsel %vm914_vm7, %v1824_v25, %v1923_v33 }
 0x278   : > { %10825 = vmatprep.subr.bf16.mxu1 %v11254_v24  ;;  %v2002_v59 = vsel %vm914_vm7, %v1823_v28, %v1921_v27 }
 0x27a   : > { %v1970_v29 = vpop.permute.xlu0 %1969 }
 0x27b   : > { %v1968_v53 = vpop.permute.xlu1 %1967  ;;  %10826 = vmatpush3.bf16.msra.mxu1 %v11254_v24  ;;  %v12111_v51 = vsel %vm2039_vm9, %v2005_v14, %v1970_v29  ;;  %v1834_v29 = vsel %vm11698_vm5, 0, %v12047_v54 }
 0x27c   : > { %v12105_v32 = vsel %vm2039_vm9, %v2002_v59, %v1968_v53  ;;  %10827 = vmatprep.subr.bf16.mxu1 %v11255_v21 }
 0x27d   : > { %10795 = vmatprep.mubr.msk.bf16.mxu1 %vm2119_vm10, %v12105_v32 }
 0x27e   : > { %10796 = vmatmul.mubr.msk.bf16.gmra.mrb[4].mxu1 %vm2119_vm10, %v12111_v51  ;;  %v1927_v2 = vpop.permute.xlu0 %1926 }
 0x27f   : > { %v1925_v49 = vpop.permute.xlu1 %1924  ;;  %10828 = vmatpush3.bf16.msra.mxu1 %v11255_v21  ;;  %v2011_v56 = vsel %vm914_vm7, %v1826_v46, %v1927_v2 }
 0x280   : > { %10829 = vmatprep.subr.bf16.mxu1 %v11256_v34  ;;  %v2008_v47 = vsel %vm914_vm7, %v1825_v44, %v1925_v49 }
 0x282   : > { %v1974_v4 = vpop.permute.xlu0 %1973 }
 0x283   : > { %v1972_v6 = vpop.permute.xlu1 %1971  ;;  %10830 = vmatpush3.bf16.msra.mxu1 %v11256_v34  ;;  %v12135_v43 = vsel %vm2039_vm9, %v2011_v56, %v1974_v4  ;;  %v1836_v4 = vsel %vm11698_vm5, 0, %v12058_v48  ;;  %v11260_v48 = vld [vmem:[%s16267_s3 + $0x68] sm:$0xff]  }
 0x284   : > { %v12129_v57 = vsel %vm2039_vm9, %v2008_v47, %v1972_v6  ;;  %10831 = vmatprep.subr.bf16.mxu1 %v11257_v62 }
 0x285   : > { %10799 = vmatprep.mubr.msk.bf16.mxu1 %vm2119_vm10, %v12129_v57 }
 0x286   : > { %10800 = vmatmul.mubr.msk.bf16.gmra.mrb[8].mxu1 %vm2119_vm10, %v12135_v43  ;;  %v1931_v35 = vpop.permute.xlu0 %1930 }
 0x287   : > { %v1929_v36 = vpop.permute.xlu1 %1928  ;;  %10832 = vmatpush3.bf16.msra.mxu1 %v11257_v62  ;;  %v2017_v61 = vsel %vm914_vm7, %v1828_v58, %v1931_v35  ;;  %v11262_v35 = vld [vmem:[%s16267_s3 + $0x78] sm:$0xff]  }
 0x288   : > { %10833 = vmatprep.subr.bf16.mxu1 %v11258_v30  ;;  %v2014_v38 = vsel %vm914_vm7, %v1827_v1, %v1929_v36  ;;  %v11264_v36 = vld [vmem:[%s16267_s3 + $0x88] sm:$0xff]  }
 0x28a   : > { %v1978_v50 = vpop.permute.xlu0 %1977 }
 0x28b   : > { %v1976_v60 = vpop.permute.xlu1 %1975  ;;  %10834 = vmatpush3.bf16.msra.mxu1 %v11258_v30  ;;  %v12159_v39 = vsel %vm2039_vm9, %v2017_v61, %v1978_v50 }
 0x28c   : > { %v12155_v9 = vsel %vm2039_vm9, %v2014_v38, %v1976_v60  ;;  %10867 = vmatprep.subr.bf16.mxu1 %v12144_v31 }
 0x28d   : > { %10803 = vmatprep.mubr.msk.bf16.mxu1 %vm2119_vm10, %v12155_v9 }
 0x28e   : > { %10804 = vmatmul.mubr.msk.bf16.gmra.mrb[12].mxu1 %vm2119_vm10, %v12159_v39  ;;  %v1935_v3 = vpop.permute.xlu0 %1934 }
 0x28f   : > { %v1933_v8 = vpop.permute.xlu1 %1932  ;;  %v2023_v11 = vsel %vm914_vm7, %v1830_v37, %v1935_v3 }
 0x290   : > { %v2020_v10 = vsel %vm914_vm7, %v1829_v63, %v1933_v8 }
 0x292   : > { %v1982_v5 = vpop.permute.xlu0 %1981 }
 0x293   : > { %v1980_v0 = vpop.permute.xlu1 %1979  ;;  %v12177_v19 = vsel %vm2039_vm9, %v2023_v11, %v1982_v5 }
 0x294   : > { %v12174_v17 = vsel %vm2039_vm9, %v2020_v10, %v1980_v0 }
 0x295   : > { %10807 = vmatprep.mubr.msk.bf16.mxu1 %vm2119_vm10, %v12174_v17 }
 0x296   : > { %10808 = vmatmul.mubr.msk.bf16.gmra.mrb[16].mxu1 %vm2119_vm10, %v12177_v19  ;;  %v1939_v52 = vpop.permute.xlu0 %1938 }
 0x297   : > { %v1937_v20 = vpop.permute.xlu1 %1936  ;;  %v2029_v24 = vsel %vm914_vm7, %v1832_v13, %v1939_v52 }
 0x298   : > { %v2026_v45 = vsel %vm914_vm7, %v1831_v42, %v1937_v20 }
 0x29a   : > { %v1986_v41 = vpop.permute.xlu0 %1985 }
 0x29b   : > { %v1984_v22 = vpop.permute.xlu1 %1983  ;;  %v12195_v27 = vsel %vm2039_vm9, %v2029_v24, %v1986_v41 }
 0x29c   : > { %v12192_v33 = vsel %vm2039_vm9, %v2026_v45, %v1984_v22 }
 0x29d   : > { %10811 = vmatprep.mubr.msk.bf16.mxu1 %vm2119_vm10, %v12192_v33 }
 0x29e   : > { %10812 = vmatmul.mubr.msk.bf16.gmra.mrb[20].mxu1 %vm2119_vm10, %v12195_v27  ;;  %v1943_v16 = vpop.permute.xlu0 %1942 }
 0x29f   : > { %v1941_v21 = vpop.permute.xlu1 %1940  ;;  %v2035_v53 = vsel %vm914_vm7, %v1834_v29, %v1943_v16 }
 0x2a0   : > { %v2032_v25 = vsel %vm914_vm7, %v1833_v40, %v1941_v21 }
 0x2a2   : > { %v1990_v28 = vpop.permute.xlu0 %1989 }
 0x2a3   : > { %v1988_v59 = vpop.permute.xlu1 %1987  ;;  %v2069_v34 = vsel %vm2039_vm9, %v2035_v53, %v1990_v28 }
 0x2a4   : > { %v2067_v14 = vsel %vm2039_vm9, %v2032_v25, %v1988_v59 }
 0x2a5   : > { %10815 = vmatprep.mubr.msk.bf16.mxu1 %vm2119_vm10, %v2067_v14 }
 0x2a6   : > { %10816 = vmatmul.mubr.msk.bf16.gmra.mrb[24].mxu1 %vm2119_vm10, %v2069_v34 }
 0x2a7   : > { %v1945_v2 = vpop.permute.xlu1 %1944 }
 0x2a8   : > { %v2038_v54 = vsel %vm914_vm7, %v1835_v26, %v1945_v2 }
 0x2ab   : > { %v2074_v49 = vpop.permute.xlu1 %2073  ;;  %v1992_v62 = vpop.permute.xlu0 %1991 }
 0x2ac   : > { %v2071_v44 = vsel %vm2039_vm9, %v2038_v54, %v1992_v62  ;;  %v2080_v46 = vsel %vm914_vm7, %v1836_v4, %v2074_v49 }
 0x2ad   : > { %10819 = vmatprep.mubr.msk.bf16.mxu1 %vm2119_vm10, %v2071_v44 }
 0x2af   : > { %v12223_v47 = vpop.permute.xlu1 %1961  ;;  %v2077_v6 = vpop.permute.xlu0 %2076 }
 0x2b0   : > { %16457 = vst [vmem:[#allocation9_spill] sm:$0xff] %v12223_v47  ;;  %v2082_v56 = vsel %vm2039_vm9, %v2080_v46, %v2077_v6  ;;  %v12230_v30 = vsel %vm2039_vm9, %v1993_v7, %v12223_v47 }
 0x2b1   : > { %16458 = vst [vmem:[#allocation10_spill] sm:$0xff] %v12230_v30  ;;  %10820 = vmatmul.mubr.msk.bf16.gmra.mrb[28].mxu1 %vm2119_vm10, %v2082_v56 }
 0x2b2   : > { %10835 = vmatprep.mubr.msk.bf16.mxu1 %vm2119_vm10, %v12230_v30 }
 0x2b9   : > { %10836 = vmatmul.mubr.msk.bf16.vlgmr.msra.gmra.mrb[0].mxu1 %vm2119_vm10, %v12080_v23  ;;  %v11263_v23 = vld [vmem:[%s16267_s3 + $0x80] sm:$0xff]  }
 0x2ba   : > { %10868 = vmatpush3.bf16.msra.mxu1 %v12144_v31  ;;  %10839 = vmatprep.mubr.msk.bf16.mxu1 %vm2119_vm10, %v12086_v18  ;;  %v12316_v31 = vld [vmem:[%s16268_s4] ss:$0 sm:$0xff] }
 0x2bb   : > { %10869 = vmatprep.subr.bf16.mxu1 %v11260_v48 }
 0x2be   : > { %10870 = vmatpush3.bf16.msra.mxu1 %v11260_v48 }
 0x2bf   : > { %10871 = vmatprep.subr.bf16.mxu1 %v11261_v55 }
 0x2c1   : > { %10840 = vmatmul.mubr.msk.bf16.gmra.mrb[4].mxu1 %vm2119_vm10, %v12105_v32 }
 0x2c2   : > { %10843 = vmatprep.mubr.msk.bf16.mxu1 %vm2119_vm10, %v12111_v51  ;;  %10872 = vmatpush3.bf16.msra.mxu1 %v11261_v55 }
 0x2c3   : > { %10873 = vmatprep.subr.bf16.mxu1 %v11262_v35 }
 0x2c6   : > { %10874 = vmatpush3.bf16.msra.mxu1 %v11262_v35 }
 0x2c7   : > { %10875 = vmatprep.subr.bf16.mxu1 %v11263_v23 }
 0x2c9   : > { %10844 = vmatmul.mubr.msk.bf16.gmra.mrb[8].mxu1 %vm2119_vm10, %v12129_v57 }
 0x2ca   : > { %10847 = vmatprep.mubr.msk.bf16.mxu1 %vm2119_vm10, %v12135_v43  ;;  %10876 = vmatpush3.bf16.msra.mxu1 %v11263_v23 }
 0x2cb   : > { %10877 = vmatprep.subr.bf16.mxu1 %v11264_v36 }
 0x2ce   : > { %10878 = vmatpush3.bf16.msra.mxu1 %v11264_v36 }
 0x2d1   : > { %10848 = vmatmul.mubr.msk.bf16.gmra.mrb[12].mxu1 %vm2119_vm10, %v12155_v9 }
 0x2d2   : > { %10851 = vmatprep.mubr.msk.bf16.mxu1 %vm2119_vm10, %v12159_v39 }
 0x2d9   : > { %10852 = vmatmul.mubr.msk.bf16.gmra.mrb[16].mxu1 %vm2119_vm10, %v12174_v17 }
 0x2da   : > { %10855 = vmatprep.mubr.msk.bf16.mxu1 %vm2119_vm10, %v12177_v19 }
 0x2e1   : > { %10856 = vmatmul.mubr.msk.bf16.gmra.mrb[20].mxu1 %vm2119_vm10, %v12192_v33 }
 0x2e2   : > { %10859 = vmatprep.mubr.msk.bf16.mxu1 %vm2119_vm10, %v12195_v27 }
 0x2e9   : > { %10860 = vmatmul.mubr.msk.bf16.gmra.mrb[24].mxu1 %vm2119_vm10, %v2067_v14 }
 0x2ea   : > { %10863 = vmatprep.mubr.msk.bf16.mxu1 %vm2119_vm10, %v2069_v34 }
 0x2f1   : > { %10864 = vmatmul.mubr.msk.bf16.gmra.mrb[28].mxu1 %vm2119_vm10, %v2071_v44 }
 0x2f2   : > { %10879 = vmatprep.mubr.msk.bf16.mxu1 %vm2119_vm10, %v12086_v18  ;;  %v11265_v18 = vld [vmem:[%s16269_s5] sm:$0xff]  }
 0x2f3   : > { %10911 = vmatprep.subr.bf16.mxu0 %v11265_v18 }
 0x2f4   : > { %10912 = vmatpush3.bf16.msra.mxu0 %v11265_v18 }
 0x2f9   : > { %10880 = vmatmul.mubr.msk.bf16.vlgmr.msra.gmra.mrb[0].mxu1 %vm2119_vm10, %v12105_v32  ;;  %v11266_v32 = vld [vmem:[%s16269_s5 + $0x8] sm:$0xff]  }
 0x2fa   : > { %10883 = vmatprep.mubr.msk.bf16.mxu1 %vm2119_vm10, %v12111_v51  ;;  %10913 = vmatprep.subr.bf16.mxu0 %v11266_v32  ;;  %v11394_v51 = vmov 1966171168  }
 0x2fb   : > { %10914 = vmatpush3.bf16.msra.mxu0 %v11266_v32 }
 0x2fc   : > { %7421 = vmatprep.subr.bf16.mxu0 %v16281_v12 }
 0x301   : > { %10884 = vmatmul.mubr.msk.bf16.gmra.mrb[4].mxu1 %vm2119_vm10, %v12129_v57  ;;  %v3162_v57 = vunpack.c.l.s4 %v11394_v51 }
 0x302   : > { %10887 = vmatprep.mubr.msk.bf16.mxu1 %vm2119_vm10, %v12135_v43  ;;  %v3164_v43 = vlaneseq }
 0x303   : > { %v3163_v38 = vunpack.c.0.s8 %v3162_v57 }
 0x304   : > { %v12319_v60 = vshrl.u32 %v3164_v43, 7 }
 0x306   : > { %16459 = vst [vmem:[#allocation11_spill] sm:$0xff] %v12319_v60  ;;  %v12325_v37 = vsub.s32 %v3163_v38, %v12319_v60 }
 0x308   : > { %16460 = vst [vmem:[#allocation12_spill] sm:$0xff] %v12325_v37 }
 0x309   : > { %10888 = vmatmul.mubr.msk.bf16.gmra.mrb[8].mxu1 %vm2119_vm10, %v12155_v9 }
 0x30a   : > { %10891 = vmatprep.mubr.msk.bf16.mxu1 %vm2119_vm10, %v12159_v39 }
 0x311   : > { %10892 = vmatmul.mubr.msk.bf16.gmra.mrb[12].mxu1 %vm2119_vm10, %v12174_v17 }
 0x312   : > { %10895 = vmatprep.mubr.msk.bf16.mxu1 %vm2119_vm10, %v12177_v19 }
 0x319   : > { %10896 = vmatmul.mubr.msk.bf16.gmra.mrb[16].mxu1 %vm2119_vm10, %v12192_v33 }
 0x31a   : > { %10899 = vmatprep.mubr.msk.bf16.mxu1 %vm2119_vm10, %v12195_v27 }
 0x321   : > { %10900 = vmatmul.mubr.msk.bf16.gmra.mrb[20].mxu1 %vm2119_vm10, %v2067_v14 }
 0x322   : > { %10903 = vmatprep.mubr.msk.bf16.mxu1 %vm2119_vm10, %v2069_v34 }
 0x329   : > { %10904 = vmatmul.mubr.msk.bf16.gmra.mrb[24].mxu1 %vm2119_vm10, %v2071_v44 }
 0x32a   : > { %10907 = vmatprep.mubr.msk.bf16.mxu1 %vm2119_vm10, %v2082_v56 }
 0x331   : > { %10908 = vmatmul.mubr.msk.bf16.gmra.mrb[28].mxu1 %vm2119_vm10, %v12230_v30 }
 0x3cc   : > { %v10881_v1 = vpop.f32.mrb[0].mxu1 }
 0x3cd   : > { %v2749_v50 = vadd.f32 %v10881_v1, %v12316_v31  ;;  %v2582_v58 = vpop.f32.mrb[1].mxu1 }
 0x3ce   : > { %v2747_v61 = vadd.f32 %v12316_v31, %v2582_v58  ;;  %v10882_v9 = vpop.f32.mrb[2].mxu1 }
 0x3cf   : > { %v2750_v39 = vadd.f32 %v10882_v9, %v12316_v31  ;;  %v2585_v3 = vpop.f32.mrb[3].mxu1  ;;  %v2781_v63 = vmax.f32 %v2749_v50, 0.0 }
 0x3d0   : > { %v2748_v8 = vadd.f32 %v12316_v31, %v2585_v3  ;;  %v2779_v10 = vmax.f32 %v2747_v61, 0.0 }
 0x3d1   : > { %v2782_v5 = vmax.f32 %v2750_v39, 0.0 }
 0x3d2   : > { %v2780_v0 = vmax.f32 %v2748_v8, 0.0 }
 0x3d3   : > { %v2812_v11 = vpack.c.bf16 %v2782_v5, %v2781_v63  ;;  %v10289_v17 = vpack.c.bf16 %v2782_v5, %v2782_v5 }
 0x3d4   : > { %v2811_v19 = vpack.c.bf16 %v2780_v0, %v2779_v10  ;;  %v10288_v52 = vpack.c.bf16 %v2780_v0, %v2780_v0  ;;  %v10885_v20 = vpop.f32.mrb[4].mxu1 }
 0x3d5   : > { %v3216_v42 = vrot.slane %v2812_v11, %v12325_v37  ;;  %v3223_v41 = vrot.slane %v10289_v17, %v12325_v37  ;;  %v2598_v13 = vpop.f32.mrb[5].mxu1  ;;  %v12340_v25 = vadd.f32 %v10885_v20, %v12316_v31 }
 0x3d6   : > { %v3167_v45 = vrot.slane %v2811_v19, %v12325_v37  ;;  %v3174_v22 = vrot.slane %v10288_v52, %v12325_v37  ;;  %v12331_v24 = vpop.f32.mrb[6].mxu1  ;;  %10915 = vmatprep.mubr.msk.bf16.mxu0 %vm914_vm7, %v2811_v19  ;;  %v12343_v59 = vadd.f32 %v12316_v31, %v2598_v13 }
 0x3d7   : > { %v3224_v33 = vcombine.high %v3216_v42, %v3216_v42  ;;  %v3225_v27 = vcombine.high %v3223_v41, %v3223_v41  ;;  %v3232_v16 = vrot.slane %v3216_v42, %v12325_v37  ;;  %v3239_v21 = vrot.slane %v3223_v41, %v12325_v37  ;;  %v12336_v40 = vpop.f32.mrb[7].mxu1  ;;  %10916 = vmatmul.mubr.msk.bf16.vlgmr.msra.gmra.mrb[32].mxu0 %vm914_vm7, %v2812_v11 }
 0x3d8   : > { %v3175_v28 = vcombine.high %v3167_v45, %v3167_v45  ;;  %v3176_v29 = vcombine.high %v3174_v22, %v3174_v22  ;;  %v3183_v49 = vrot.slane %v3167_v45, %v12325_v37  ;;  %v3190_v62 = vrot.slane %v3174_v22, %v12325_v37 }
 0x3d9   : > { %v3246_v53 = vrot.slane %v3224_v33, %v12325_v37  ;;  %v3253_v14 = vrot.slane %v3225_v27, %v12325_v37  ;;  %v3254_v34 = vcombine.high %v3232_v16, %v3232_v16  ;;  %v3255_v2 = vcombine.high %v3239_v21, %v3239_v21 }
 0x3da   : > { %v4048_v26 = vrot.slane %v3232_v16, %v12325_v37  ;;  %v4104_v54 = vrot.slane %v3239_v21, %v12325_v37  ;;  %v3197_v32 = vrot.slane %v3175_v28, %v12325_v37  ;;  %v3204_v50 = vrot.slane %v3176_v29, %v12325_v37 }
 0x3db   : > { %v3256_v44 = vcombine.high %v3246_v53, %v3246_v53  ;;  %v3257_v4 = vcombine.high %v3253_v14, %v3253_v14  ;;  %v4062_v46 = vrot.slane %v3246_v53, %v12325_v37  ;;  %v4076_v6 = vrot.slane %v3254_v34, %v12325_v37 }
 0x3dc   : > { %v4055_v7 = vrot.slane %v4048_v26, %v12325_v37  ;;  %v4111_v56 = vrot.slane %v4104_v54, %v12325_v37  ;;  %v4118_v48 = vrot.slane %v3253_v14, %v12325_v37  ;;  %v12357_v55 = vrot.slane %v3255_v2, %v12325_v37  ;;  %v12359_v35 = vpop.f32.mrb[8].mxu1 }
 0x3dd   : > { %v12362_v23 = vrot.slane %v4062_v46, %v12325_v37  ;;  %v4083_v36 = vrot.slane %v4076_v6, %v12325_v37  ;;  %v4090_v18 = vrot.slane %v3256_v44, %v12325_v37  ;;  %v12367_v51 = vpop.f32.mrb[9].mxu1  ;;  %v12382_v39 = vrot.slane %v3257_v4, %v12325_v37 }
 0x3de   : > { %v12370_v57 = vrot.slane %v4118_v48, %v12325_v37  ;;  %v12372_v43 = vunpack.c.l.b16 %v4055_v7  ;;  %v5523_v1 = vunpack.c.l.b16 %v4111_v56  ;;  %v12375_v58 = vpop.f32.mrb[10].mxu1  ;;  %v3205_v10 = vcombine.high %v3183_v49, %v3183_v49 }
 0x3df   : > { %16461 = vst [vmem:[#allocation13_spill] sm:$0xff] %v12362_v23  ;;  %v4097_v38 = vrot.slane %v4090_v18, %v12325_v37  ;;  %v16283_v61 = vunpack.c.l.b16 %v12362_v23  ;;  %v12379_v9 = vunpack.c.l.b16 %v4083_v36  ;;  %v12384_v3 = vpop.f32.mrb[11].mxu1  ;;  %v3206_v20 = vcombine.high %v3190_v62, %v3190_v62 }
 0x3e0   : > { %16462 = vst [vmem:[#allocation14_spill] sm:$0xff] %v12370_v57  ;;  %16463 = vst [vmem:[#allocation15_spill] sm:$0xff] %v12372_v43  ;;  %v12389_v5 = vrot.slane %v5523_v1, 4  ;;  %v12396_v19 = vrot.slane %v5523_v1, 5  ;;  %v3207_v42 = vcombine.high %v3197_v32, %v3197_v32  ;;  %v3950_v41 = vrot.slane %v3183_v49, %v12325_v37 }
 0x3e1   : > { %16464 = vst [vmem:[#allocation16_spill] sm:$0xff] %v12379_v9  ;;  %v12391_v0 = vunpack.c.l.b16 %v4097_v38  ;;  %v5642_v11 = vrot.slane %v16283_v61, 7  ;;  %v3208_v33 = vcombine.high %v3204_v50, %v3204_v50  ;;  %v3964_v16 = vrot.slane %v3197_v32, %v12325_v37 }
 0x3e2   : > { %16465 = vst [vmem:[#allocation17_spill] sm:$0xff] %v12389_v5  ;;  %16467 = vst [vmem:[#allocation19_spill] sm:$0xff] %v12396_v19  ;;  %v3957_v27 = vrot.slane %v3950_v41, %v12325_v37  ;;  %v3978_v21 = vrot.slane %v3205_v10, %v12325_v37  ;;  %v3992_v28 = vrot.slane %v3207_v42, %v12325_v37  ;;  %v2785_v10 = vmax.f32 %v12340_v25, 0.0 }
 0x3e3   : > { %16466 = vst [vmem:[#allocation18_spill] sm:$0xff] %v12391_v0  ;;  %v12402_v13 = vsel %vm5625_vm11, %v5642_v11, %v12372_v43  ;;  %v12412_v53 = vsel %vm5975_vm12, %v5642_v11, %v12372_v43  ;;  %v4006_v14 = vrot.slane %v3190_v62, %v12325_v37  ;;  %v4020_v34 = vrot.slane %v3204_v50, %v12325_v37 }
 0x3e4   : > { %16468 = vst [vmem:[#allocation20_spill] sm:$0xff] %v12402_v13  ;;  %v10893_v29 = vpop.f32.mrb[12].mxu1  ;;  %v12417_v2 = vrot.slane %v3206_v20, %v12325_v37  ;;  %v12422_v54 = vrot.slane %v3964_v16, %v12325_v37  ;;  %v3985_v49 = vrot.slane %v3978_v21, %v12325_v37  ;;  %v3999_v44 = vrot.slane %v3992_v28, %v12325_v37 }
 0x3e5   : > { %v12419_v26 = vpop.f32.mrb[13].mxu1  ;;  %v12426_v4 = vunpack.c.l.b16 %v3957_v27  ;;  %v4013_v6 = vrot.slane %v4006_v14, %v12325_v37  ;;  %v12433_v7 = vrot.slane %v4020_v34, %v12325_v37  ;;  %v12436_v56 = vrot.slane %v3208_v33, %v12325_v37 }
 0x3e6   : > { %v12428_v46 = vpop.f32.mrb[14].mxu1  ;;  %v16284_v18 = vunpack.c.l.b16 %v12422_v54  ;;  %v12443_v32 = vunpack.c.l.b16 %v3985_v49  ;;  %v12445_v1 = vunpack.c.l.b16 %v3999_v44  ;;  %v2754_v11 = vadd.f32 %v12331_v24, %v12316_v31 }
 0x3e7   : > { %v12438_v48 = vpop.f32.mrb[15].mxu1  ;;  %v5516_v50 = vunpack.c.l.b16 %v4013_v6  ;;  %v2783_v33 = vmax.f32 %v12343_v59, 0.0  ;;  %v2752_v14 = vadd.f32 %v12316_v31, %v12336_v40  ;;  %v2757_v34 = vadd.f32 %v12359_v35, %v12316_v31 }
 0x3e8   : > { %16469 = vst [vmem:[#allocation21_spill] sm:$0xff] %v12443_v32  ;;  %16470 = vst [vmem:[#allocation22_spill] sm:$0xff] %v12445_v1  ;;  %v5624_v42 = vrot.slane %v16284_v18, 7  ;;  %v2786_v28 = vmax.f32 %v2754_v11, 0.0  ;;  %v12473_v6 = vadd.f32 %v12316_v31, %v12367_v51  ;;  %v2758_v11 = vadd.f32 %v12375_v58, %v12316_v31 }
 0x3e9   : > { %v12457_v16 = vrot.slane %v5516_v50, 4  ;;  %v12479_v62 = vrot.slane %v5516_v50, 5  ;;  %v2784_v22 = vmax.f32 %v2752_v14, 0.0  ;;  %v2756_v40 = vadd.f32 %v12316_v31, %v12384_v3 }
 0x3ea   : > { %v12462_v25 = vsel %vm5625_vm11, %v5624_v42, %v12426_v4  ;;  %v2814_v49 = vpack.c.bf16 %v2786_v28, %v2785_v10  ;;  %v10291_v44 = vpack.c.bf16 %v2786_v28, %v2786_v28  ;;  %v12484_v35 = vadd.f32 %v10893_v29, %v12316_v31 }
 0x3eb   : > { %16471 = vst [vmem:[#allocation23_spill] sm:$0xff] %v12457_v16  ;;  %16472 = vst [vmem:[#allocation24_spill] sm:$0xff] %v12462_v25  ;;  %v12490_v51 = vsel %vm5975_vm12, %v5624_v42, %v12426_v4  ;;  %v12494_v61 = vmax.f32 %v2758_v11, 0.0  ;;  %v2813_v14 = vpack.c.bf16 %v2784_v22, %v2783_v33  ;;  %v10290_v17 = vpack.c.bf16 %v2784_v22, %v2784_v22 }
 0x3ec   : > { %v12469_v59 = vpop.f32.mrb[16].mxu1  ;;  %v3314_v28 = vrot.slane %v2814_v49, %v12325_v37  ;;  %v3321_v58 = vrot.slane %v10291_v44, %v12325_v37  ;;  %v2789_v3 = vmax.f32 %v2757_v34, 0.0  ;;  %v12506_v44 = vmax.f32 %v2756_v40, 0.0 }
 0x3ed   : > { %v12477_v12 = vpop.f32.mrb[17].mxu1  ;;  %v3265_v18 = vrot.slane %v2813_v14, %v12325_v37  ;;  %10919 = vmatprep.mubr.msk.bf16.mxu0 %vm914_vm7, %v2813_v14 }
 0x3ee   : > { %v12486_v10 = vpop.f32.mrb[18].mxu1  ;;  %v3322_v24 = vcombine.high %v3314_v28, %v3314_v28  ;;  %v3323_v21 = vcombine.high %v3321_v58, %v3321_v58  ;;  %v3330_v27 = vrot.slane %v3314_v28, %v12325_v37  ;;  %v3337_v42 = vrot.slane %v3321_v58, %v12325_v37  ;;  %10920 = vmatmul.mubr.msk.bf16.gmra.mrb[36].mxu0 %vm914_vm7, %v2814_v49 }
 0x3ef   : > { %v12496_v50 = vpop.f32.mrb[19].mxu1  ;;  %v12503_v38 = vpack.c.bf16 %v12494_v61, %v2789_v3  ;;  %v3272_v3 = vrot.slane %v10290_v17, %v12325_v37  ;;  %v3273_v8 = vcombine.high %v3265_v18, %v3265_v18 }
 0x3f0   : > { %v3344_v33 = vrot.slane %v3322_v24, %v12325_v37  ;;  %v3351_v34 = vrot.slane %v3323_v21, %v12325_v37  ;;  %v3352_v11 = vcombine.high %v3330_v27, %v3330_v27  ;;  %v3353_v41 = vcombine.high %v3337_v42, %v3337_v42 }
 0x3f1   : > { %v4244_v28 = vrot.slane %v3330_v27, %v12325_v37  ;;  %v4300_v58 = vrot.slane %v3337_v42, %v12325_v37 }
 0x3f2   : > { %v3354_v20 = vcombine.high %v3344_v33, %v3344_v33  ;;  %v3355_v36 = vcombine.high %v3351_v34, %v3351_v34  ;;  %v4258_v24 = vrot.slane %v3344_v33, %v12325_v37  ;;  %v4272_v21 = vrot.slane %v3352_v11, %v12325_v37 }
 0x3f3   : > { %v4251_v49 = vrot.slane %v4244_v28, %v12325_v37  ;;  %v4307_v27 = vrot.slane %v4300_v58, %v12325_v37  ;;  %v4314_v42 = vrot.slane %v3351_v34, %v12325_v37  ;;  %v12527_v17 = vrot.slane %v3353_v41, %v12325_v37 }
 0x3f4   : > { %v12517_v14 = vpop.f32.mrb[20].mxu1  ;;  %v12532_v52 = vrot.slane %v4258_v24, %v12325_v37  ;;  %v4279_v33 = vrot.slane %v4272_v21, %v12325_v37  ;;  %v4286_v11 = vrot.slane %v3354_v20, %v12325_v37  ;;  %v3274_v41 = vcombine.high %v3272_v3, %v3272_v3 }
 0x3f5   : > { %v12521_v45 = vpop.f32.mrb[21].mxu1  ;;  %v12539_v28 = vrot.slane %v4314_v42, %v12325_v37  ;;  %v12541_v58 = vunpack.c.l.b16 %v4251_v49  ;;  %v5537_v34 = vunpack.c.l.b16 %v4307_v27  ;;  %v3281_v21 = vrot.slane %v3265_v18, %v12325_v37 }
 0x3f6   : > { %v12529_v63 = vpop.f32.mrb[22].mxu1  ;;  %16473 = vst [vmem:[#allocation25_spill] sm:$0xff] %v12532_v52  ;;  %v4293_v29 = vrot.slane %v4286_v11, %v12325_v37  ;;  %v16288_v40 = vunpack.c.l.b16 %v12532_v52  ;;  %v12545_v24 = vunpack.c.l.b16 %v4279_v33  ;;  %v12554_v49 = vrot.slane %v3355_v36, %v12325_v37 }
 0x3f7   : > { %v12536_v22 = vpop.f32.mrb[23].mxu1  ;;  %16474 = vst [vmem:[#allocation26_spill] sm:$0xff] %v12541_v58  ;;  %v12551_v47 = vrot.slane %v5537_v34, 4  ;;  %v12561_v11 = vrot.slane %v5537_v34, 5  ;;  %v3288_v18 = vrot.slane %v3272_v3, %v12325_v37  ;;  %v3295_v20 = vrot.slane %v3273_v8, %v12325_v37 }
 0x3f8   : > { %16475 = vst [vmem:[#allocation27_spill] sm:$0xff] %v12545_v24  ;;  %v12556_v27 = vunpack.c.l.b16 %v4293_v29  ;;  %v5666_v42 = vrot.slane %v16288_v40, 7  ;;  %v3302_v60 = vrot.slane %v3274_v41, %v12325_v37  ;;  %v3303_v30 = vcombine.high %v3281_v21, %v3281_v21 }
 0x3f9   : > { %16476 = vst [vmem:[#allocation28_spill] sm:$0xff] %v12551_v47  ;;  %16478 = vst [vmem:[#allocation30_spill] sm:$0xff] %v12561_v11  ;;  %v3304_v33 = vcombine.high %v3288_v18, %v3288_v18  ;;  %v3305_v15 = vcombine.high %v3295_v20, %v3295_v20  ;;  %v4146_v8 = vrot.slane %v3281_v21, %v12325_v37 }
 0x3fa   : > { %16477 = vst [vmem:[#allocation29_spill] sm:$0xff] %v12556_v27  ;;  %v12570_v36 = vsel %vm5625_vm11, %v5666_v42, %v12541_v58  ;;  %v3306_v3 = vcombine.high %v3302_v60, %v3302_v60  ;;  %v4160_v41 = vrot.slane %v3295_v20, %v12325_v37  ;;  %v4174_v25 = vrot.slane %v3303_v30, %v12325_v37 }
 0x3fb   : > { %16480 = vst [vmem:[#allocation32_spill] sm:$0xff] %v12570_v36  ;;  %v4202_v19 = vrot.slane %v3288_v18, %v12325_v37  ;;  %v4216_v23 = vrot.slane %v3302_v60, %v12325_v37  ;;  %v12582_v29 = vsel %vm5975_vm12, %v5666_v42, %v12541_v58  ;;  %v4153_v40 = vrot.slane %v4146_v8, %v12325_v37 }
 0x3fc   : > { %v12566_v13 = vpop.f32.mrb[24].mxu1  ;;  %v4188_v34 = vrot.slane %v3305_v15, %v12325_v37  ;;  %v12587_v36 = vrot.slane %v3304_v33, %v12325_v37  ;;  %v12590_v21 = vrot.slane %v4160_v41, %v12325_v37  ;;  %v4181_v30 = vrot.slane %v4174_v25, %v12325_v37 }
 0x3fd   : > { %16479 = vst [vmem:[#allocation31_spill] sm:$0xff] %v12566_v13  ;;  %v4209_v20 = vrot.slane %v4202_v19, %v12325_v37  ;;  %v12595_v60 = vrot.slane %v4216_v23, %v12325_v37  ;;  %v12597_v18 = vpop.f32.mrb[25].mxu1  ;;  %v12601_v15 = vunpack.c.l.b16 %v4153_v40  ;;  %v3412_v33 = vrot.slane %v12503_v38, %v12325_v37 }
 0x3fe   : > { %16481 = vst [vmem:[#allocation33_spill] sm:$0xff] %v12590_v21  ;;  %16482 = vst [vmem:[#allocation34_spill] sm:$0xff] %v12597_v18  ;;  %v4195_v8 = vrot.slane %v4188_v34, %v12325_v37  ;;  %v12605_v41 = vpop.f32.mrb[26].mxu1  ;;  %v16295_v25 = vunpack.c.l.b16 %v12590_v21  ;;  %v12608_v43 = vunpack.c.l.b16 %v4181_v30  ;;  %v12611_v23 = vrot.slane %v3306_v3, %v12325_v37 }
 0x3ff   : > { %16483 = vst [vmem:[#allocation35_spill] sm:$0xff] %v12601_v15  ;;  %16484 = vst [vmem:[#allocation36_spill] sm:$0xff] %v12605_v41  ;;  %v5530_v19 = vunpack.c.l.b16 %v4209_v20  ;;  %v16487_v40 = vpack.c.bf16 %v12494_v61, %v12494_v61  ;;  %v3420_v52 = vcombine.high %v3412_v33, %v3412_v33  ;;  %v3428_v58 = vrot.slane %v3412_v33, %v12325_v37 }
 0x400   : > { %16485 = vst [vmem:[#allocation37_spill] sm:$0xff] %v12608_v43  ;;  %v12615_v11 = vunpack.c.l.b16 %v4195_v8  ;;  %v5654_v30 = vrot.slane %v16295_v25, 7  ;;  %v16491_v13 = vmax.f32 %v12473_v6, 0.0 }
 0x401   : > { %v3419_v34 = vrot.slane %v16487_v40, %v12325_v37  ;;  %v12627_v42 = vrot.slane %v5530_v19, 4  ;;  %v12637_v20 = vrot.slane %v5530_v19, 5  ;;  %v3442_v3 = vrot.slane %v3420_v52, %v12325_v37 }
 0x402   : > { %16486 = vst [vmem:[#allocation38_spill] sm:$0xff] %v12615_v11  ;;  %v12632_v61 = vsel %vm5625_vm11, %v5654_v30, %v12601_v15  ;;  %v2815_v8 = vpack.c.bf16 %v12506_v44, %v16491_v13 }
 0x403   : > { %16488 = vst [vmem:[#allocation39_spill] sm:$0xff] %v12627_v42  ;;  %v3421_v18 = vcombine.high %v3419_v34, %v3419_v34  ;;  %16489 = vst [vmem:[#allocation40_spill] sm:$0xff] %v12632_v61  ;;  %v3435_v25 = vrot.slane %v3419_v34, %v12325_v37  ;;  %v3450_v42 = vcombine.high %v3428_v58, %v3428_v58 }
 0x404   : > { %16490 = vst [vmem:[#allocation41_spill] sm:$0xff] %v12637_v20  ;;  %v4440_v61 = vrot.slane %v3428_v58, %v12325_v37  ;;  %v3452_v11 = vcombine.high %v3442_v3, %v3442_v3  ;;  %v4454_v34 = vrot.slane %v3442_v3, %v12325_v37  ;;  %10923 = vmatprep.mubr.msk.bf16.mxu0 %vm914_vm7, %v2815_v8  ;;  %v12657_v58 = vpop.f32.mrb[27].mxu1 }
 0x405   : > { %v3449_v41 = vrot.slane %v3421_v18, %v12325_v37  ;;  %v3451_v21 = vcombine.high %v3435_v25, %v3435_v25  ;;  %v4496_v40 = vrot.slane %v3435_v25, %v12325_v37  ;;  %v4468_v6 = vrot.slane %v3450_v42, %v12325_v37  ;;  %10924 = vmatmul.mubr.msk.bf16.gmra.mrb[40].mxu0 %vm914_vm7, %v12503_v38 }
 0x406   : > { %v4447_v52 = vrot.slane %v4440_v61, %v12325_v37  ;;  %16493 = vst [vmem:[#allocation43_spill] sm:$0xff] %v12657_v58  ;;  %v12660_v25 = vrot.slane %v4454_v34, %v12325_v37  ;;  %v10292_v42 = vpack.c.bf16 %v12506_v44, %v12506_v44  ;;  %v2762_v44 = vadd.f32 %v12428_v46, %v12316_v31 }
 0x407   : > { %v3453_v33 = vcombine.high %v3449_v41, %v3449_v41  ;;  %v4510_v19 = vrot.slane %v3449_v41, %v12325_v37  ;;  %v4503_v13 = vrot.slane %v4496_v40, %v12325_v37  ;;  %v12653_v18 = vrot.slane %v3451_v21, %v12325_v37 }
 0x408   : > { %16494 = vst [vmem:[#allocation44_spill] sm:$0xff] %v12660_v25  ;;  %v4482_v41 = vrot.slane %v3452_v11, %v12325_v37  ;;  %v12670_v21 = vsel %vm5975_vm12, %v5654_v30, %v12601_v15  ;;  %v4475_v61 = vrot.slane %v4468_v6, %v12325_v37  ;;  %v12673_v38 = vunpack.c.l.b16 %v4447_v52 }
 0x409   : > { %16492 = vst [vmem:[#allocation42_spill] sm:$0xff] %v12653_v18  ;;  %v12664_v3 = vrot.slane %v4510_v19, %v12325_v37  ;;  %v5551_v40 = vunpack.c.l.b16 %v4503_v13  ;;  %v16301_v58 = vunpack.c.l.b16 %v12660_v25  ;;  %v12678_v11 = vrot.slane %v3453_v33, %v12325_v37 }
 0x40a   : > { %16496 = vst [vmem:[#allocation46_spill] sm:$0xff] %v12673_v38  ;;  %v4489_v34 = vrot.slane %v4482_v41, %v12325_v37  ;;  %v3363_v19 = vrot.slane %v2815_v8, %v12325_v37  ;;  %v12683_v20 = vunpack.c.l.b16 %v4475_v61  ;;  %v3370_v41 = vrot.slane %v10292_v42, %v12325_v37 }
 0x40b   : > { %16495 = vst [vmem:[#allocation45_spill] sm:$0xff] %v12664_v3  ;;  %16497 = vst [vmem:[#allocation47_spill] sm:$0xff] %v12678_v11  ;;  %v12686_v6 = vrot.slane %v5551_v40, 4  ;;  %v5690_v13 = vrot.slane %v16301_v58, 7  ;;  %v12695_v15 = vrot.slane %v5551_v40, 5  ;;  %v2759_v42 = vadd.f32 %v12316_v31, %v12419_v26 }
 0x40c   : > { %16498 = vst [vmem:[#allocation48_spill] sm:$0xff] %v12683_v20  ;;  %v12688_v52 = vunpack.c.l.b16 %v4489_v34  ;;  %v3371_v33 = vcombine.high %v3363_v19, %v3363_v19  ;;  %v3379_v61 = vrot.slane %v3363_v19, %v12325_v37  ;;  %v3372_v58 = vcombine.high %v3370_v41, %v3370_v41 }
 0x40d   : > { %16499 = vst [vmem:[#allocation49_spill] sm:$0xff] %v12686_v6  ;;  %16501 = vst [vmem:[#allocation51_spill] sm:$0xff] %v12695_v15  ;;  %v12700_v30 = vsel %vm5625_vm11, %v5690_v13, %v12673_v38  ;;  %v3386_v11 = vrot.slane %v3370_v41, %v12325_v37  ;;  %v12710_v19 = vsel %vm5975_vm12, %v5690_v13, %v12673_v38  ;;  %v2794_v38 = vmax.f32 %v2762_v44, 0.0 }
 0x40e   : > { %16500 = vst [vmem:[#allocation50_spill] sm:$0xff] %v12688_v52  ;;  %16502 = vst [vmem:[#allocation52_spill] sm:$0xff] %v12700_v30  ;;  %v3393_v8 = vrot.slane %v3371_v33, %v12325_v37  ;;  %v3401_v40 = vcombine.high %v3379_v61, %v3379_v61  ;;  %v4342_v30 = vrot.slane %v3379_v61, %v12325_v37 }
 0x40f   : > { %16503 = vst [vmem:[#allocation53_spill] sm:$0xff] %v12710_v19  ;;  %v3400_v34 = vrot.slane %v3372_v58, %v12325_v37  ;;  %v3402_v26 = vcombine.high %v3386_v11, %v3386_v11  ;;  %v4398_v13 = vrot.slane %v3386_v11, %v12325_v37  ;;  %v12733_v11 = vpop.f32.mrb[28].mxu1 }
 0x410   : > { %v3403_v25 = vcombine.high %v3393_v8, %v3393_v8  ;;  %v4356_v41 = vrot.slane %v3393_v8, %v12325_v37  ;;  %v4349_v33 = vrot.slane %v4342_v30, %v12325_v37  ;;  %v4370_v6 = vrot.slane %v3401_v40, %v12325_v37  ;;  %16506 = vst [vmem:[#allocation56_spill] sm:$0xff] %v12733_v11 }
 0x411   : > { %v3404_v20 = vcombine.high %v3400_v34, %v3400_v34  ;;  %v4412_v46 = vrot.slane %v3400_v34, %v12325_v37  ;;  %v4405_v52 = vrot.slane %v4398_v13, %v12325_v37  ;;  %v12729_v8 = vrot.slane %v3402_v26, %v12325_v37 }
 0x412   : > { %v12722_v15 = vrot.slane %v4356_v41, %v12325_v37  ;;  %v4384_v61 = vrot.slane %v3403_v25, %v12325_v37  ;;  %v4377_v58 = vrot.slane %v4370_v6, %v12325_v37  ;;  %v12731_v30 = vunpack.c.l.b16 %v4349_v33 }
 0x413   : > { %v12737_v40 = vrot.slane %v4412_v46, %v12325_v37  ;;  %v2791_v34 = vmax.f32 %v2759_v42, 0.0  ;;  %v5544_v6 = vunpack.c.l.b16 %v4405_v52  ;;  %v12743_v13 = vrot.slane %v3404_v20, %v12325_v37 }
 0x414   : > { %16504 = vst [vmem:[#allocation54_spill] sm:$0xff] %v12722_v15  ;;  %16505 = vst [vmem:[#allocation55_spill] sm:$0xff] %v12731_v30  ;;  %v4391_v44 = vrot.slane %v4384_v61, %v12325_v37  ;;  %v16311_v25 = vunpack.c.l.b16 %v12722_v15  ;;  %v12740_v41 = vunpack.c.l.b16 %v4377_v58  ;;  %v2760_v26 = vadd.f32 %v12316_v31, %v12438_v48 }
 0x415   : > { %v16509_v46 = vmax.f32 %v12484_v35, 0.0  ;;  %v12757_v20 = vrot.slane %v5544_v6, 4  ;;  %v10295_v35 = vpack.c.bf16 %v2794_v38, %v2794_v38  ;;  %v16513_v52 = vrot.slane %v12357_v55, %v12325_v37 }
 0x416   : > { %16507 = vst [vmem:[#allocation57_spill] sm:$0xff] %v12740_v41  ;;  %v12749_v19 = vunpack.c.l.b16 %v4391_v44  ;;  %v5678_v61 = vrot.slane %v16311_v25, 7  ;;  %v12766_v25 = vrot.slane %v5544_v6, 5  ;;  %v2792_v58 = vmax.f32 %v2760_v26, 0.0  ;;  %v12785_v26 = vpop.f32.mrb[29].mxu1 }
 0x417   : > { %v2818_v42 = vpack.c.bf16 %v2794_v38, %v16509_v46  ;;  %16510 = vst [vmem:[#allocation59_spill] sm:$0xff] %v12757_v20  ;;  %v12772_v18 = vunpack.c.l.b16 %v16513_v52  ;;  %v5883_v6 = vrot.slane %v12382_v39, %v12325_v37  ;;  %v16515_v38 = vrot.slane %v12379_v9, 6  ;;  %16516 = vst [vmem:[#allocation63_spill] sm:$0xff] %v12785_v26 }
 0x418   : > { %16508 = vst [vmem:[#allocation58_spill] sm:$0xff] %v12749_v19  ;;  %v12762_v48 = vsel %vm5625_vm11, %v5678_v61, %v12731_v30  ;;  %16512 = vst [vmem:[#allocation61_spill] sm:$0xff] %v12766_v25  ;;  %v12776_v3 = vsel %vm5975_vm12, %v5678_v61, %v12731_v30  ;;  %v3517_v55 = vrot.slane %v10295_v35, %v12325_v37  ;;  %v12789_v61 = vpop.f32.mrb[30].mxu1  ;;  %v16518_v44 = vunpack.c.l.b16 %v12370_v57 }
 0x419   : > { %16511 = vst [vmem:[#allocation60_spill] sm:$0xff] %v12762_v48  ;;  %v3510_v46 = vrot.slane %v2818_v42, %v12325_v37  ;;  %16514 = vst [vmem:[#allocation62_spill] sm:$0xff] %v12772_v18  ;;  %v5977_v33 = vsel %vm5625_vm11, %v16515_v38, %v12412_v53  ;;  %v2817_v11 = vpack.c.bf16 %v2792_v58, %v2791_v34  ;;  %v16521_v39 = vrot.slane %v12391_v0, 5  ;;  %v12813_v26 = vpop.f32.mrb[31].mxu1 }
 0x41a   : > { %16517 = vst [vmem:[#allocation64_spill] sm:$0xff] %v12789_v61  ;;  %v10294_v25 = vpack.c.bf16 %v2792_v58, %v2792_v58  ;;  %v12793_v15 = vrot.slane %v16518_v44, 3  ;;  %v12798_v53 = vadd.f32 %v12469_v59, %v12316_v31  ;;  %v3519_v38 = vcombine.high %v3517_v55, %v3517_v55  ;;  %16522 = vst [vmem:[#allocation67_spill] sm:$0xff] %v12813_v26 }
 0x41b   : > { %v3518_v52 = vcombine.high %v3510_v46, %v3510_v46  ;;  %v3526_v48 = vrot.slane %v3510_v46, %v12325_v37  ;;  %v3533_v35 = vrot.slane %v3517_v55, %v12325_v37  ;;  %10927 = vmatprep.mubr.msk.bf16.mxu0 %vm914_vm7, %v2817_v11  ;;  %v3461_v58 = vrot.slane %v2817_v11, %v12325_v37 }
 0x41c   : > { %16519 = vst [vmem:[#allocation65_spill] sm:$0xff] %v12793_v15  ;;  %v12805_v44 = vunpack.c.l.b16 %v5883_v6  ;;  %v5978_v59 = vsel %vm5628_vm13, %v16521_v39, %v5977_v33  ;;  %10928 = vmatmul.mubr.msk.bf16.gmra.mrb[44].mxu0 %vm914_vm7, %v2818_v42  ;;  %v3547_v55 = vrot.slane %v3519_v38, %v12325_v37  ;;  %v3468_v0 = vrot.slane %v10294_v25, %v12325_v37 }
 0x41d   : > { %v3540_v9 = vrot.slane %v3518_v52, %v12325_v37  ;;  %v3548_v46 = vcombine.high %v3526_v48, %v3526_v48  ;;  %v4636_v34 = vrot.slane %v3526_v48, %v12325_v37  ;;  %v3549_v57 = vcombine.high %v3533_v35, %v3533_v35 }
 0x41e   : > { %16520 = vst [vmem:[#allocation66_spill] sm:$0xff] %v12805_v44  ;;  %v4692_v6 = vrot.slane %v3533_v35, %v12325_v37  ;;  %v3551_v30 = vcombine.high %v3547_v55, %v3547_v55  ;;  %v4706_v39 = vrot.slane %v3547_v55, %v12325_v37  ;;  %v5979_v55 = vsel %vm5631_vm14, %v12389_v5, %v5978_v59 }
 0x41f   : > { %v3550_v52 = vcombine.high %v3540_v9, %v3540_v9  ;;  %v4650_v61 = vrot.slane %v3540_v9, %v12325_v37  ;;  %v4643_v48 = vrot.slane %v4636_v34, %v12325_v37  ;;  %v4664_v11 = vrot.slane %v3548_v46, %v12325_v37 }
 0x420   : > { %v4699_v38 = vrot.slane %v4692_v6, %v12325_v37  ;;  %v12827_v34 = vrot.slane %v3549_v57, %v12325_v37  ;;  %v12833_v25 = vrot.slane %v4706_v39, %v12325_v37  ;;  %v12841_v6 = vrot.slane %v3551_v30, %v12325_v37 }
 0x421   : > { %v12820_v33 = vrot.slane %v4650_v61, %v12325_v37  ;;  %v4678_v42 = vrot.slane %v3550_v52, %v12325_v37  ;;  %v4671_v9 = vrot.slane %v4664_v11, %v12325_v37  ;;  %v12829_v46 = vunpack.c.l.b16 %v4643_v48 }
 0x422   : > { %16524 = vst [vmem:[#allocation69_spill] sm:$0xff] %v12827_v34  ;;  %16526 = vst [vmem:[#allocation71_spill] sm:$0xff] %v12833_v25  ;;  %v5565_v11 = vunpack.c.l.b16 %v4699_v38  ;;  %v3469_v57 = vcombine.high %v3461_v58, %v3461_v58  ;;  %v3470_v26 = vcombine.high %v3468_v0, %v3468_v0  ;;  %v3484_v20 = vrot.slane %v3468_v0, %v12325_v37 }
 0x423   : > { %16523 = vst [vmem:[#allocation68_spill] sm:$0xff] %v12820_v33  ;;  %16525 = vst [vmem:[#allocation70_spill] sm:$0xff] %v12829_v46  ;;  %v4685_v35 = vrot.slane %v4678_v42, %v12325_v37  ;;  %v16322_v61 = vunpack.c.l.b16 %v12820_v33  ;;  %v12838_v52 = vunpack.c.l.b16 %v4671_v9 }
 0x424   : > { %16528 = vst [vmem:[#allocation73_spill] sm:$0xff] %v12841_v6  ;;  %v12851_v9 = vrot.slane %v5565_v11, 4  ;;  %v12860_v5 = vrot.slane %v5565_v11, 5  ;;  %v3491_v59 = vrot.slane %v3469_v57, %v12325_v37  ;;  %v3498_v33 = vrot.slane %v3470_v26, %v12325_v37 }
 0x425   : > { %16527 = vst [vmem:[#allocation72_spill] sm:$0xff] %v12838_v52  ;;  %v12845_v42 = vunpack.c.l.b16 %v4685_v35  ;;  %v5714_v39 = vrot.slane %v16322_v61, 7  ;;  %v3477_v61 = vrot.slane %v3461_v58, %v12325_v37  ;;  %v5980_v35 = vsel %vm5634_vm15, %v12793_v15, %v5979_v55 }
 0x426   : > { %16530 = vst [vmem:[#allocation75_spill] sm:$0xff] %v12851_v9  ;;  %16532 = vst [vmem:[#allocation77_spill] sm:$0xff] %v12860_v5  ;;  %v5982_v11 = vrot.slane %v12805_v44, 1  ;;  %v3500_v5 = vcombine.high %v3484_v20, %v3484_v20  ;;  %v3501_v58 = vcombine.high %v3491_v59, %v3491_v59  ;;  %v3502_v9 = vcombine.high %v3498_v33, %v3498_v33 }
 0x427   : > { %16529 = vst [vmem:[#allocation74_spill] sm:$0xff] %v12845_v42  ;;  %v12856_v38 = vsel %vm5625_vm11, %v5714_v39, %v12829_v46  ;;  %v12868_v30 = vsel %vm5975_vm12, %v5714_v39, %v12829_v46  ;;  %v3499_v48 = vcombine.high %v3477_v61, %v3477_v61  ;;  %v4538_v0 = vrot.slane %v3477_v61, %v12325_v37 }
 0x428   : > { %16531 = vst [vmem:[#allocation76_spill] sm:$0xff] %v12856_v38  ;;  %16533 = vst [vmem:[#allocation78_spill] sm:$0xff] %v12868_v30  ;;  %v4552_v57 = vrot.slane %v3491_v59, %v12325_v37  ;;  %v4594_v26 = vrot.slane %v3484_v20, %v12325_v37  ;;  %v4608_v39 = vrot.slane %v3498_v33, %v12325_v37 }
 0x429   : > { %v4566_v46 = vrot.slane %v3499_v48, %v12325_v37  ;;  %v4580_v38 = vrot.slane %v3501_v58, %v12325_v37  ;;  %v12881_v55 = vrot.slane %v3500_v5, %v12325_v37  ;;  %v2763_v15 = vadd.f32 %v12316_v31, %v12477_v12 }
 0x42a   : > { %v4545_v44 = vrot.slane %v4538_v0, %v12325_v37  ;;  %v12887_v61 = vrot.slane %v4552_v57, %v12325_v37  ;;  %v4601_v59 = vrot.slane %v4594_v26, %v12325_v37  ;;  %v12891_v20 = vrot.slane %v4608_v39, %v12325_v37 }
 0x42b   : > { %v4573_v33 = vrot.slane %v4566_v46, %v12325_v37  ;;  %v4587_v48 = vrot.slane %v4580_v38, %v12325_v37  ;;  %v16534_v5 = vrot.slane %v12772_v18, 2  ;;  %v2797_v12 = vmax.f32 %v12798_v53, 0.0 }
 0x42c   : > { %v12899_v42 = vunpack.c.l.b16 %v4545_v44  ;;  %v16332_v0 = vunpack.c.l.b16 %v12887_v61  ;;  %v5558_v57 = vunpack.c.l.b16 %v4601_v59  ;;  %v12903_v26 = vrot.slane %v3502_v9, %v12325_v37 }
 0x42d   : > { %v5981_v58 = vsel %vm5637_vm0, %v16534_v5, %v5980_v35  ;;  %v12907_v46 = vunpack.c.l.b16 %v4573_v33  ;;  %v12909_v38 = vunpack.c.l.b16 %v4587_v48  ;;  %v2795_v59 = vmax.f32 %v2763_v15, 0.0 }
 0x42e   : > { %v5983_v18 = vsel %vm5640_vm1, %v5982_v11, %v5981_v58  ;;  %v5702_v53 = vrot.slane %v16332_v0, 7  ;;  %v12915_v44 = vrot.slane %v5558_v57, 4  ;;  %v12920_v33 = vrot.slane %v5558_v57, 5 }
 0x42f   : > { %16535 = vst [vmem:[#allocation79_spill] sm:$0xff] %v12907_v46  ;;  %16536 = vst [vmem:[#allocation80_spill] sm:$0xff] %v12909_v38  ;;  %v6032_v58 = vpack.c.b16 %v5983_v18, %v5983_v18  ;;  %v2766_v0 = vadd.f32 %v12486_v10, %v12316_v31  ;;  %v2764_v9 = vadd.f32 %v12316_v31, %v12496_v50  ;;  %v16541_v18 = vunpack.c.l.b16 %v12433_v7 }
 0x430   : > { %16537 = vst [vmem:[#allocation81_spill] sm:$0xff] %v12915_v44  ;;  %v12924_v48 = vsel %vm5625_vm11, %v5702_v53, %v12899_v42  ;;  %v16539_v39 = vrot.slane %v12417_v2, %v12325_v37  ;;  %v6220_v5 = vrot.slane %v12436_v56, %v12325_v37  ;;  %v16543_v10 = vrot.slane %v12443_v32, 6 }
 0x431   : > { %16538 = vst [vmem:[#allocation82_spill] sm:$0xff] %v12924_v48  ;;  %6144 = vrot.lane.b32.xlu0 %v6032_v58, %s11391_s27  ;;  %v2798_v11 = vmax.f32 %v2766_v0, 0.0  ;;  %v12942_v35 = vrot.slane %v16541_v18, 3  ;;  %v16544_v50 = vrot.slane %v12426_v4, 1  ;;  %v16545_v2 = vunpack.c.l.b16 %v12422_v54 }
 0x432   : > { %v12935_v57 = vunpack.c.l.b16 %v16539_v39  ;;  %v6328_v31 = vsel %vm5625_vm11, %v16543_v10, %v12490_v51  ;;  %v2796_v15 = vmax.f32 %v2764_v9, 0.0  ;;  %v12954_v58 = vunpack.c.l.b16 %v6220_v5 }
 0x433   : > { %16542 = vst [vmem:[#allocation84_spill] sm:$0xff] %v12942_v35  ;;  %v6416_v39 = vsel %vm5975_vm12, %v16545_v2, %v16544_v50  ;;  %v16546_v0 = vrot.slane %v12445_v1, 5  ;;  %v2820_v48 = vpack.c.bf16 %v2798_v11, %v2797_v12  ;;  %v10297_v52 = vpack.c.bf16 %v2798_v11, %v2798_v11 }
 0x434   : > { %16540 = vst [vmem:[#allocation83_spill] sm:$0xff] %v12935_v57  ;;  %v16335_v56 = vrot.slane %v12935_v57, 2  ;;  %v16547_v4 = vrot.slane %v12443_v32, 7  ;;  %v2819_v10 = vpack.c.bf16 %v2796_v15, %v2795_v59  ;;  %v10296_v50 = vpack.c.bf16 %v2796_v15, %v2796_v15 }
 0x435   : > { %v6329_v18 = vsel %vm5628_vm13, %v16546_v0, %v6328_v31  ;;  %v6333_v5 = vrot.slane %v12954_v58, 1  ;;  %v3608_v2 = vrot.slane %v2820_v48, %v12325_v37  ;;  %v3615_v31 = vrot.slane %v10297_v52, %v12325_v37 }
 0x436   : > { %v6330_v51 = vsel %vm5631_vm14, %v12457_v16, %v6329_v18  ;;  %v6418_v54 = vsel %vm5625_vm11, %v16547_v4, %v6416_v39  ;;  %v16548_v11 = vrot.slane %v12445_v1, 6  ;;  %v3559_v59 = vrot.slane %v2819_v10, %v12325_v37  ;;  %10931 = vmatprep.mubr.msk.bf16.mxu0 %vm914_vm7, %v2819_v10 }
 0x437   : > { %v6331_v9 = vsel %vm5634_vm15, %v12942_v35, %v6330_v51  ;;  %v3566_v15 = vrot.slane %v10296_v50, %v12325_v37  ;;  %v3616_v52 = vcombine.high %v3608_v2, %v3608_v2  ;;  %v3617_v51 = vcombine.high %v3615_v31, %v3615_v31  ;;  %10932 = vmatmul.mubr.msk.bf16.gmra.mrb[48].mxu0 %vm914_vm7, %v2820_v48 }
 0x438   : > { %v6332_v12 = vsel %vm5637_vm0, %v16335_v56, %v6331_v9  ;;  %v6420_v0 = vsel %vm5628_vm13, %v16548_v11, %v6418_v54  ;;  %v3624_v4 = vrot.slane %v3608_v2, %v12325_v37  ;;  %v3631_v9 = vrot.slane %v3615_v31, %v12325_v37 }
 0x439   : > { %v12978_v39 = vsel %vm5640_vm1, %v6333_v5, %v6332_v12  ;;  %v12982_v18 = vsel %vm5631_vm14, %v12479_v62, %v6420_v0  ;;  %v12990_v54 = vsel %vm5975_vm12, %v5702_v53, %v12899_v42  ;;  %v3567_v50 = vcombine.high %v3559_v59, %v3559_v59 }
 0x43a   : > { %v3568_v5 = vcombine.high %v3566_v15, %v3566_v15  ;;  %v16549_v12 = vunpack.c.l.b16 %v12433_v7  ;;  %v3638_v10 = vrot.slane %v3616_v52, %v12325_v37  ;;  %v3645_v11 = vrot.slane %v3617_v51, %v12325_v37 }
 0x43b   : > { %v3646_v0 = vcombine.high %v3624_v4, %v3624_v4  ;;  %v3647_v2 = vcombine.high %v3631_v9, %v3631_v9  ;;  %v4832_v31 = vrot.slane %v3624_v4, %v12325_v37  ;;  %v4888_v48 = vrot.slane %v3631_v9, %v12325_v37 }
 0x43c   : > { %v12994_v62 = vrot.slane %v16549_v12, 4  ;;  %v3575_v56 = vrot.slane %v3559_v59, %v12325_v37  ;;  %v3582_v53 = vrot.slane %v3566_v15, %v12325_v37  ;;  %v3648_v35 = vcombine.high %v3638_v10, %v3638_v10 }
 0x43d   : > { %v3649_v16 = vcombine.high %v3645_v11, %v3645_v11  ;;  %v4846_v7 = vrot.slane %v3638_v10, %v12325_v37  ;;  %v4860_v12 = vrot.slane %v3646_v0, %v12325_v37  ;;  %v4839_v52 = vrot.slane %v4832_v31, %v12325_v37 }
 0x43e   : > { %v4895_v51 = vrot.slane %v4888_v48, %v12325_v37  ;;  %v4902_v1 = vrot.slane %v3645_v11, %v12325_v37  ;;  %v13008_v4 = vrot.slane %v3647_v2, %v12325_v37  ;;  %v4874_v15 = vrot.slane %v3648_v35, %v12325_v37 }
 0x43f   : > { %v13011_v9 = vrot.slane %v4846_v7, %v12325_v37  ;;  %v4867_v59 = vrot.slane %v4860_v12, %v12325_v37  ;;  %v3589_v10 = vrot.slane %v3567_v50, %v12325_v37  ;;  %v13019_v31 = vunpack.c.l.b16 %v4839_v52 }
 0x440   : > { %16550 = vst [vmem:[#allocation85_spill] sm:$0xff] %v13008_v4  ;;  %v13017_v0 = vrot.slane %v4902_v1, %v12325_v37  ;;  %v5579_v48 = vunpack.c.l.b16 %v4895_v51  ;;  %v3596_v11 = vrot.slane %v3568_v5, %v12325_v37  ;;  %v4881_v2 = vrot.slane %v4874_v15, %v12325_v37 }
 0x441   : > { %16551 = vst [vmem:[#allocation86_spill] sm:$0xff] %v13011_v9  ;;  %16553 = vst [vmem:[#allocation88_spill] sm:$0xff] %v13019_v31  ;;  %v16342_v32 = vunpack.c.l.b16 %v13011_v9  ;;  %v13024_v7 = vunpack.c.l.b16 %v4867_v59  ;;  %v13027_v12 = vrot.slane %v3649_v16, %v12325_v37  ;;  %v3597_v52 = vcombine.high %v3575_v56, %v3575_v56 }
 0x442   : > { %16552 = vst [vmem:[#allocation87_spill] sm:$0xff] %v13017_v0  ;;  %v13032_v50 = vrot.slane %v5579_v48, 4  ;;  %v13034_v51 = vunpack.c.l.b16 %v4881_v2  ;;  %v13039_v59 = vrot.slane %v5579_v48, 5  ;;  %v3599_v30 = vcombine.high %v3589_v10, %v3589_v10 }
 0x443   : > { %16554 = vst [vmem:[#allocation89_spill] sm:$0xff] %v13024_v7  ;;  %16555 = vst [vmem:[#allocation90_spill] sm:$0xff] %v13027_v12  ;;  %v5738_v5 = vrot.slane %v16342_v32, 7  ;;  %v3598_v12 = vcombine.high %v3582_v53, %v3582_v53  ;;  %v4734_v35 = vrot.slane %v3575_v56, %v12325_v37  ;;  %v3600_v9 = vcombine.high %v3596_v11, %v3596_v11 }
 0x444   : > { %16556 = vst [vmem:[#allocation91_spill] sm:$0xff] %v13032_v50  ;;  %16557 = vst [vmem:[#allocation92_spill] sm:$0xff] %v13034_v51  ;;  %v4748_v48 = vrot.slane %v3589_v10, %v12325_v37  ;;  %v4762_v15 = vrot.slane %v3597_v52, %v12325_v37  ;;  %v4776_v16 = vrot.slane %v3599_v30, %v12325_v37 }
 0x445   : > { %16558 = vst [vmem:[#allocation93_spill] sm:$0xff] %v13039_v59  ;;  %v13045_v1 = vsel %vm5625_vm11, %v5738_v5, %v13019_v31  ;;  %v4741_v32 = vrot.slane %v4734_v35, %v12325_v37  ;;  %v13055_v56 = vsel %vm5975_vm12, %v5738_v5, %v13019_v31  ;;  %v4790_v59 = vrot.slane %v3582_v53, %v12325_v37 }
 0x446   : > { %16559 = vst [vmem:[#allocation94_spill] sm:$0xff] %v13045_v1  ;;  %16560 = vst [vmem:[#allocation95_spill] sm:$0xff] %v13055_v56  ;;  %v4804_v1 = vrot.slane %v3596_v11, %v12325_v37  ;;  %v13060_v2 = vrot.slane %v3598_v12, %v12325_v37  ;;  %v13063_v50 = vrot.slane %v4748_v48, %v12325_v37 }
 0x447   : > { %v4769_v10 = vrot.slane %v4762_v15, %v12325_v37  ;;  %v4783_v35 = vrot.slane %v4776_v16, %v12325_v37  ;;  %v13067_v52 = vunpack.c.l.b16 %v4741_v32  ;;  %v13071_v5 = vrot.slane %v4790_v59, %v12325_v37 }
 0x448   : > { %v13074_v53 = vrot.slane %v4804_v1, %v12325_v37  ;;  %v6391_v11 = vpack.c.b16 %v12978_v39, %v12978_v39  ;;  %v16344_v12 = vunpack.c.l.b16 %v13063_v50  ;;  %v13084_v32 = vrot.slane %v3600_v9, %v12325_v37 }
 0x449   : > { %v13079_v48 = vunpack.c.l.b16 %v4769_v10  ;;  %v13081_v15 = vunpack.c.l.b16 %v4783_v35  ;;  %v5572_v59 = vunpack.c.l.b16 %v13071_v5  ;;  %v6424_v39 = vsel %vm5634_vm15, %v12994_v62, %v12982_v18 }
 0x44a   : > { %6399 = vrot.lane.b32.xlu0 %v6391_v11, %s11391_s27  ;;  %v6425_v1 = vrot.slane %v12935_v57, 3  ;;  %v5726_v35 = vrot.slane %v16344_v12, 7  ;;  %v6427_v12 = vrot.slane %v12954_v58, 2  ;;  %v16565_v9 = vrot.slane %v12527_v17, %v12325_v37  ;;  %v13128_v58 = vld [vmem:[%s16268_s4] ss:$0 sm:$0xff] }
 0x44b   : > { %16561 = vst [vmem:[#allocation96_spill] sm:$0xff] %v13079_v48  ;;  %16562 = vst [vmem:[#allocation97_spill] sm:$0xff] %v13081_v15  ;;  %v13100_v5 = vrot.slane %v5572_v59, 4  ;;  %v16567_v16 = vunpack.c.l.b16 %v12539_v28  ;;  %v2769_v17 = vadd.f32 %v13128_v58, %v12517_v14  ;;  %v16570_v62 = vrot.slane %v12556_v27, 5 }
 0x44c   : > { %v6426_v31 = vsel %vm5637_vm0, %v6425_v1, %v6424_v39  ;;  %v13106_v18 = vsel %vm5625_vm11, %v5726_v35, %v13067_v52  ;;  %v13113_v30 = vunpack.c.l.b16 %v16565_v9  ;;  %v5897_v39 = vrot.slane %v12554_v49, %v12325_v37 }
 0x44d   : > { %16563 = vst [vmem:[#allocation98_spill] sm:$0xff] %v13100_v5  ;;  %16564 = vst [vmem:[#allocation99_spill] sm:$0xff] %v13106_v18  ;;  %v13117_v10 = vrot.slane %v16567_v16, 3  ;;  %v16569_v1 = vrot.slane %v12545_v24, 6  ;;  %v6428_v9 = vsel %vm5640_vm1, %v6427_v12, %v6426_v31  ;;  %v2767_v18 = vadd.f32 %v13128_v58, %v12521_v45 }
 0x44e   : > { %16566 = vst [vmem:[#allocation100_spill] sm:$0xff] %v13113_v30  ;;  %v16348_v16 = vrot.slane %v13113_v30, 2  ;;  %v2801_v51 = vmax.f32 %v2769_v17, 0.0  ;;  %v2770_v12 = vadd.f32 %v13128_v58, %v12529_v63 }
 0x44f   : > { %16568 = vst [vmem:[#allocation101_spill] sm:$0xff] %v13117_v10  ;;  %v5985_v11 = vsel %vm5625_vm11, %v16569_v1, %v12582_v29  ;;  %v6527_v29 = vpack.c.b16 %v6428_v9, %v6428_v9  ;;  %v13139_v1 = vunpack.c.l.b16 %v5897_v39  ;;  %v2799_v31 = vmax.f32 %v2767_v18, 0.0 }
 0x450   : > { %v5986_v49 = vsel %vm5628_vm13, %v16570_v62, %v5985_v11  ;;  %v2768_v11 = vadd.f32 %v13128_v58, %v12536_v22  ;;  %v16571_v39 = vrot.slane %v12587_v36, %v12325_v37  ;;  %v2802_v63 = vmax.f32 %v2770_v12, 0.0  ;;  %v16580_v12 = vld [vmem:[#allocation33_spill] sm:$0xff] }
 0x451   : > { %v5987_v57 = vsel %vm5631_vm14, %v12551_v47, %v5986_v49  ;;  %6535 = vrot.lane.b32.xlu0 %v6527_v29, %s11393_s16  ;;  %v5990_v62 = vrot.slane %v13139_v1, 1  ;;  %v6234_v22 = vrot.slane %v12611_v23, %v12325_v37  ;;  %v16575_v49 = vrot.slane %v12608_v43, 6 }
 0x452   : > { %v5988_v14 = vsel %vm5634_vm15, %v13117_v10, %v5987_v57  ;;  %v13157_v17 = vunpack.c.l.b16 %v16571_v39  ;;  %v16573_v57 = vunpack.c.l.b16 %v12595_v60  ;;  %v2800_v9 = vmax.f32 %v2768_v11, 0.0  ;;  %v16576_v39 = vld [vmem:[#allocation38_spill] sm:$0xff] }
 0x453   : > { %v5989_v45 = vsel %vm5637_vm0, %v16348_v16, %v5988_v14  ;;  %v6336_v29 = vsel %vm5625_vm11, %v16575_v49, %v12670_v21  ;;  %v16577_v16 = vrot.slane %v16576_v39, 5  ;;  %v16581_v11 = vunpack.c.l.b16 %v16580_v12 }
 0x454   : > { %16572 = vst [vmem:[#allocation102_spill] sm:$0xff] %v13157_v17  ;;  %v13161_v18 = vrot.slane %v16573_v57, 3  ;;  %v5991_v14 = vsel %vm5640_vm1, %v5990_v62, %v5989_v45  ;;  %v16356_v36 = vrot.slane %v13157_v17, 2  ;;  %v16578_v57 = vld [vmem:[#allocation35_spill] sm:$0xff]  ;;  %v2822_v56 = vpack.c.bf16 %v2802_v63, %v2801_v51 }
 0x455   : > { %v6337_v10 = vsel %vm5628_vm13, %v16577_v16, %v6336_v29  ;;  %v16579_v47 = vrot.slane %v16578_v57, 1  ;;  %v6033_v23 = vpack.c.b16 %v5991_v14, %v5991_v14  ;;  %v10299_v0 = vpack.c.bf16 %v2802_v63, %v2802_v63  ;;  %v16582_v45 = vld [vmem:[#allocation39_spill] sm:$0xff] }
 0x456   : > { %16574 = vst [vmem:[#allocation103_spill] sm:$0xff] %v13161_v18  ;;  %v2821_v4 = vpack.c.bf16 %v2800_v9, %v2799_v31  ;;  %v10298_v6 = vpack.c.bf16 %v2800_v9, %v2800_v9  ;;  %v13179_v21 = vunpack.c.l.b16 %v6234_v22  ;;  %v6338_v62 = vsel %vm5631_vm14, %v16582_v45, %v6337_v10 }
 0x457   : > { %v6430_v7 = vsel %vm5975_vm12, %v16581_v11, %v16579_v47  ;;  %v16583_v49 = vrot.slane %v12608_v43, 7  ;;  %6146 = vrot.lane.b32.xlu1 %v6033_v23, %s11391_s27  ;;  %v3706_v29 = vrot.slane %v2822_v56, %v12325_v37  ;;  %v3713_v47 = vrot.slane %v10299_v0, %v12325_v37 }
 0x458   : > { %v3657_v51 = vrot.slane %v2821_v4, %v12325_v37  ;;  %v6339_v31 = vsel %vm5634_vm15, %v13161_v18, %v6338_v62  ;;  %v13194_v63 = vsel %vm5975_vm12, %v5726_v35, %v13067_v52  ;;  %v13196_v10 = vrot.slane %v5572_v59, 5  ;;  %10935 = vmatprep.mubr.msk.bf16.mxu0 %vm914_vm7, %v2821_v4 }
 0x459   : > { %v6432_v16 = vsel %vm5625_vm11, %v16583_v49, %v6430_v7  ;;  %v3664_v9 = vrot.slane %v10298_v6, %v12325_v37  ;;  %v13202_v7 = vsel %vm5637_vm0, %v16356_v36, %v6339_v31  ;;  %v3714_v0 = vcombine.high %v3706_v29, %v3706_v29  ;;  %10936 = vmatmul.mubr.msk.bf16.gmra.mrb[52].mxu0 %vm914_vm7, %v2822_v56 }
 0x45a   : > { %v3715_v22 = vcombine.high %v3713_v47, %v3713_v47  ;;  %v3722_v14 = vrot.slane %v3706_v29, %v12325_v37  ;;  %v3729_v57 = vrot.slane %v3713_v47, %v12325_v37  ;;  %v3665_v35 = vcombine.high %v3657_v51, %v3657_v51 }
 0x45b   : > { %v3666_v59 = vcombine.high %v3664_v9, %v3664_v9  ;;  %v6341_v12 = vrot.slane %v13179_v21, 1  ;;  %v16584_v6 = vrot.slane %v16576_v39, 6  ;;  %v3736_v23 = vrot.slane %v3714_v0, %v12325_v37 }
 0x45c   : > { %v3743_v4 = vrot.slane %v3715_v22, %v12325_v37  ;;  %v3744_v62 = vcombine.high %v3722_v14, %v3722_v14  ;;  %v3745_v49 = vcombine.high %v3729_v57, %v3729_v57  ;;  %v5028_v29 = vrot.slane %v3722_v14, %v12325_v37 }
 0x45d   : > { %v13212_v11 = vsel %vm5628_vm13, %v16584_v6, %v6432_v16  ;;  %v5084_v47 = vrot.slane %v3729_v57, %v12325_v37  ;;  %v3673_v56 = vrot.slane %v3657_v51, %v12325_v37  ;;  %v3680_v31 = vrot.slane %v3664_v9, %v12325_v37 }
 0x45e   : > { %v3746_v36 = vcombine.high %v3736_v23, %v3736_v23  ;;  %v3747_v18 = vcombine.high %v3743_v4, %v3743_v4  ;;  %v5042_v45 = vrot.slane %v3736_v23, %v12325_v37  ;;  %v5056_v16 = vrot.slane %v3744_v62, %v12325_v37 }
 0x45f   : > { %v5035_v0 = vrot.slane %v5028_v29, %v12325_v37  ;;  %v5091_v22 = vrot.slane %v5084_v47, %v12325_v37  ;;  %v5098_v6 = vrot.slane %v3743_v4, %v12325_v37  ;;  %v13226_v14 = vrot.slane %v3745_v49, %v12325_v37 }
 0x460   : > { %v13229_v57 = vrot.slane %v5042_v45, %v12325_v37  ;;  %v5063_v51 = vrot.slane %v5056_v16, %v12325_v37  ;;  %v5070_v9 = vrot.slane %v3746_v36, %v12325_v37  ;;  %v3687_v23 = vrot.slane %v3665_v35, %v12325_v37 }
 0x461   : > { %16585 = vst [vmem:[#allocation35_spill] sm:$0xff] %v13226_v14  ;;  %v13235_v62 = vrot.slane %v5098_v6, %v12325_v37  ;;  %v13237_v29 = vunpack.c.l.b16 %v5035_v0  ;;  %v5593_v47 = vunpack.c.l.b16 %v5091_v22  ;;  %v3694_v4 = vrot.slane %v3666_v59, %v12325_v37  ;;  %v16615_v14 = vld [vmem:[#allocation54_spill] sm:$0xff] }
 0x462   : > { %16586 = vst [vmem:[#allocation33_spill] sm:$0xff] %v13229_v57  ;;  %v5077_v49 = vrot.slane %v5070_v9, %v12325_v37  ;;  %v16362_v39 = vunpack.c.l.b16 %v13229_v57  ;;  %v13242_v45 = vunpack.c.l.b16 %v5063_v51  ;;  %v13245_v16 = vrot.slane %v3747_v18, %v12325_v37 }
 0x463   : > { %16587 = vst [vmem:[#allocation104_spill] sm:$0xff] %v13235_v62  ;;  %16588 = vst [vmem:[#allocation105_spill] sm:$0xff] %v13237_v29  ;;  %v13250_v6 = vrot.slane %v5593_v47, 4  ;;  %v3695_v0 = vcombine.high %v3673_v56, %v3673_v56  ;;  %v13257_v51 = vrot.slane %v5593_v47, 5  ;;  %v3696_v43 = vcombine.high %v3680_v31, %v3680_v31 }
 0x464   : > { %16589 = vst [vmem:[#allocation106_spill] sm:$0xff] %v13242_v45  ;;  %16590 = vst [vmem:[#allocation107_spill] sm:$0xff] %v13245_v16  ;;  %v13252_v22 = vunpack.c.l.b16 %v5077_v49  ;;  %v5762_v59 = vrot.slane %v16362_v39, 7  ;;  %v3697_v16 = vcombine.high %v3687_v23, %v3687_v23  ;;  %v4930_v36 = vrot.slane %v3673_v56, %v12325_v37 }
 0x465   : > { %16591 = vst [vmem:[#allocation108_spill] sm:$0xff] %v13250_v6  ;;  %16593 = vst [vmem:[#allocation110_spill] sm:$0xff] %v13257_v51  ;;  %v3698_v57 = vcombine.high %v3694_v4, %v3694_v4  ;;  %v4944_v47 = vrot.slane %v3687_v23, %v12325_v37  ;;  %v4958_v9 = vrot.slane %v3695_v0, %v12325_v37 }
 0x466   : > { %16592 = vst [vmem:[#allocation109_spill] sm:$0xff] %v13252_v22  ;;  %v13263_v35 = vsel %vm5625_vm11, %v5762_v59, %v13237_v29  ;;  %v4937_v39 = vrot.slane %v4930_v36, %v12325_v37  ;;  %v4972_v18 = vrot.slane %v3697_v16, %v12325_v37  ;;  %v13273_v56 = vsel %vm5975_vm12, %v5762_v59, %v13237_v29 }
 0x467   : > { %16594 = vst [vmem:[#allocation111_spill] sm:$0xff] %v13263_v35  ;;  %16595 = vst [vmem:[#allocation112_spill] sm:$0xff] %v13273_v56  ;;  %v4986_v51 = vrot.slane %v3680_v31, %v12325_v37  ;;  %v5000_v35 = vrot.slane %v3694_v4, %v12325_v37  ;;  %v13278_v49 = vrot.slane %v3696_v43, %v12325_v37  ;;  %v16610_v56 = vld [vmem:[#allocation59_spill] sm:$0xff] }
 0x468   : > { %v13281_v6 = vrot.slane %v4944_v47, %v12325_v37  ;;  %v4965_v23 = vrot.slane %v4958_v9, %v12325_v37  ;;  %v4979_v36 = vrot.slane %v4972_v18, %v12325_v37  ;;  %v13285_v0 = vunpack.c.l.b16 %v4937_v39 }
 0x469   : > { %v4993_v59 = vrot.slane %v4986_v51, %v12325_v37  ;;  %v13290_v31 = vrot.slane %v5000_v35, %v12325_v37  ;;  %v6342_v43 = vsel %vm5640_vm1, %v6341_v12, %v13202_v7  ;;  %v13300_v9 = vrot.slane %v3698_v57, %v12325_v37  ;;  %v16598_v35 = vld [vmem:[#allocation41_spill] sm:$0xff]  ;;  %v16602_v7 = vld [vmem:[#allocation31_spill] sm:$0xff] }
 0x46a   : > { %v16366_v4 = vunpack.c.l.b16 %v13281_v6  ;;  %v13295_v47 = vunpack.c.l.b16 %v4965_v23  ;;  %v13297_v29 = vunpack.c.l.b16 %v4979_v36  ;;  %v6392_v51 = vpack.c.b16 %v6342_v43, %v6342_v43 }
 0x46b   : > { %v5586_v18 = vunpack.c.l.b16 %v4993_v59  ;;  %v6436_v16 = vsel %vm5631_vm14, %v16598_v35, %v13212_v11  ;;  %v16600_v11 = vunpack.c.l.b16 %v12595_v60  ;;  %v6439_v57 = vrot.slane %v13157_v17, 3 }
 0x46c   : > { %16596 = vst [vmem:[#allocation113_spill] sm:$0xff] %v13295_v47  ;;  %16597 = vst [vmem:[#allocation114_spill] sm:$0xff] %v13297_v29  ;;  %v13310_v12 = vrot.slane %v16366_v4, 7  ;;  %6401 = vrot.lane.b32.xlu1 %v6392_v51, %s11391_s27  ;;  %v6441_v59 = vrot.slane %v13179_v21, 2  ;;  %v2773_v51 = vadd.f32 %v13128_v58, %v16602_v7  ;;  %v16603_v60 = vrot.slane %v12729_v8, %v12325_v37 }
 0x46d   : > { %v13315_v22 = vrot.slane %v5586_v18, 4  ;;  %v6437_v43 = vrot.slane %v16600_v11, 4  ;;  %v13327_v23 = vrot.slane %v5586_v18, 5  ;;  %v6248_v18 = vrot.slane %v12743_v13, %v12325_v37 }
 0x46e   : > { %v13324_v35 = vsel %vm5625_vm11, %v13310_v12, %v13285_v0  ;;  %v13337_v11 = vunpack.c.l.b16 %v16603_v60  ;;  %v16605_v4 = vrot.slane %v12740_v41, 6  ;;  %v16607_v8 = vunpack.c.l.b16 %v12737_v40 }
 0x46f   : > { %16599 = vst [vmem:[#allocation41_spill] sm:$0xff] %v13315_v22  ;;  %16601 = vst [vmem:[#allocation115_spill] sm:$0xff] %v13324_v35  ;;  %v6438_v36 = vsel %vm5634_vm15, %v6437_v43, %v6436_v16  ;;  %v16606_v43 = vld [vmem:[#allocation34_spill] sm:$0xff]  ;;  %v2805_v35 = vmax.f32 %v2773_v51, 0.0  ;;  %v6321_v45 = vunpack.c.l.b16 %v6248_v18  ;;  %v16612_v51 = vld [vmem:[#allocation43_spill] sm:$0xff] }
 0x470   : > { %16604 = vst [vmem:[#allocation31_spill] sm:$0xff] %v13337_v11  ;;  %v6440_v39 = vsel %vm5637_vm0, %v6439_v57, %v6438_v36  ;;  %v6344_v16 = vsel %vm5625_vm11, %v16605_v4, %v12776_v3  ;;  %v2771_v21 = vadd.f32 %v13128_v58, %v16606_v43  ;;  %v13351_v60 = vrot.slane %v16607_v8, 3  ;;  %v16613_v8 = vld [vmem:[#allocation55_spill] sm:$0xff] }
 0x471   : > { %v6442_v7 = vsel %vm5640_vm1, %v6441_v59, %v6440_v39  ;;  %v16609_v57 = vrot.slane %v12749_v19, 5  ;;  %v16374_v17 = vrot.slane %v13337_v11, 2  ;;  %v16611_v39 = vld [vmem:[#allocation36_spill] sm:$0xff]  ;;  %v2772_v43 = vadd.f32 %v13128_v58, %v16612_v51 }
 0x472   : > { %16608 = vst [vmem:[#allocation34_spill] sm:$0xff] %v13351_v60  ;;  %v6528_v13 = vpack.c.b16 %v6442_v7, %v6442_v7  ;;  %v2774_v59 = vadd.f32 %v13128_v58, %v16611_v39  ;;  %v16614_v62 = vrot.slane %v16613_v8, 1  ;;  %v16618_v8 = vrot.slane %v12749_v19, 6 }
 0x473   : > { %v6345_v36 = vsel %vm5628_vm13, %v16609_v57, %v6344_v16  ;;  %v16616_v16 = vunpack.c.l.b16 %v16615_v14  ;;  %v6349_v57 = vrot.slane %v6321_v45, 1  ;;  %v2804_v51 = vmax.f32 %v2772_v43, 0.0 }
 0x474   : > { %v6346_v3 = vsel %vm5631_vm14, %v16610_v56, %v6345_v36  ;;  %6537 = vrot.lane.b32.xlu1 %v6528_v13, %s11393_s16  ;;  %v2803_v36 = vmax.f32 %v2771_v21, 0.0  ;;  %v11267_v13 = vld [vmem:[%s16271_s7 + $0x30] sm:$0xff]   ;;  %v16620_v21 = vld [vmem:[#allocation61_spill] sm:$0xff] }
 0x475   : > { %v6347_v4 = vsel %vm5634_vm15, %v13351_v60, %v6346_v3  ;;  %v6444_v7 = vsel %vm5975_vm12, %v16616_v16, %v16614_v62  ;;  %v16617_v3 = vrot.slane %v12740_v41, 7  ;;  %v2806_v60 = vmax.f32 %v2774_v59, 0.0  ;;  %v16621_v59 = vld [vmem:[#allocation56_spill] sm:$0xff]  ;;  %10947 = vmatprep.subr.bf16.mxu1 %v11267_v13 }
 0x476   : > { %v6348_v18 = vsel %vm5637_vm0, %v16374_v17, %v6347_v4  ;;  %v16619_v62 = vunpack.c.l.b16 %v12737_v40  ;;  %v13391_v43 = vadd.f32 %v13128_v58, %v16621_v59  ;;  %v11268_v40 = vld [vmem:[%s16271_s7 + $0x38] sm:$0xff]   ;;  %v10300_v56 = vpack.c.bf16 %v2804_v51, %v2804_v51  ;;  %10948 = vmatpush3.bf16.msra.mxu1 %v11267_v13 }
 0x477   : > { %v6446_v39 = vsel %vm5625_vm11, %v16617_v3, %v6444_v7  ;;  %v6350_v4 = vsel %vm5640_vm1, %v6349_v57, %v6348_v18  ;;  %v6453_v7 = vrot.slane %v13337_v11, 3  ;;  %v6455_v57 = vrot.slane %v6321_v45, 2  ;;  %10949 = vmatprep.subr.bf16.mxu1 %v11268_v40 }
 0x478   : > { %v6448_v14 = vsel %vm5628_vm13, %v16618_v8, %v6446_v39  ;;  %v6451_v16 = vrot.slane %v16619_v62, 4  ;;  %v6393_v3 = vpack.c.b16 %v6350_v4, %v6350_v4  ;;  %v2824_v39 = vpack.c.bf16 %v2806_v60, %v2805_v35 }
 0x479   : > { %v6450_v17 = vsel %vm5631_vm14, %v16620_v21, %v6448_v14  ;;  %v10301_v8 = vpack.c.bf16 %v2806_v60, %v2806_v60  ;;  %v2823_v62 = vpack.c.bf16 %v2804_v51, %v2803_v36  ;;  %v16622_v14 = vrot.slane %v12881_v55, %v12325_v37 }
 0x47a   : > { %v6452_v18 = vsel %vm5634_vm15, %v6451_v16, %v6450_v17  ;;  %6403 = vrot.lane.b32.xlu0 %v6393_v3, %s11391_s27  ;;  %v3804_v59 = vrot.slane %v2824_v39, %v12325_v37  ;;  %v11269_v17 = vld [vmem:[%s16271_s7 + $0x40] sm:$0xff]   ;;  %v13413_v55 = vsel %vm5975_vm12, %v13310_v12, %v13285_v0  ;;  %v3762_v45 = vrot.slane %v10300_v56, %v12325_v37 }
 0x47b   : > { %v13400_v21 = vunpack.c.l.b16 %v16622_v14  ;;  %v3811_v4 = vrot.slane %v10301_v8, %v12325_v37  ;;  %v3755_v35 = vrot.slane %v2823_v62, %v12325_v37  ;;  %v6454_v60 = vsel %vm5637_vm0, %v6453_v7, %v6452_v18  ;;  %10939 = vmatprep.mubr.msk.bf16.mxu0 %vm914_vm7, %v2823_v62  ;;  %10950 = vmatpush3.bf16.msra.mxu1 %v11268_v40 }
 0x47c   : > { %v13417_v36 = vsel %vm5640_vm1, %v6455_v57, %v6454_v60  ;;  %v3812_v16 = vcombine.high %v3804_v59, %v3804_v59  ;;  %v3820_v7 = vrot.slane %v3804_v59, %v12325_v37  ;;  %10940 = vmatmul.mubr.msk.bf16.gmra.mrb[56].mxu0 %vm914_vm7, %v2824_v39  ;;  %v3764_v8 = vcombine.high %v3762_v45, %v3762_v45  ;;  %v11270_v39 = vld [vmem:[%s16271_s7 + $0x48] sm:$0xff]  }
 0x47d   : > { %16623 = vst [vmem:[#allocation36_spill] sm:$0xff] %v13400_v21  ;;  %v3813_v13 = vcombine.high %v3811_v4, %v3811_v4  ;;  %v3827_v3 = vrot.slane %v3811_v4, %v12325_v37  ;;  %v3763_v12 = vcombine.high %v3755_v35, %v3755_v35  ;;  %v16624_v56 = vunpack.c.l.b16 %v12891_v20  ;;  %10951 = vmatprep.subr.bf16.mxu1 %v11269_v17 }
 0x47e   : > { %v3834_v62 = vrot.slane %v3812_v16, %v12325_v37  ;;  %v3842_v60 = vcombine.high %v3820_v7, %v3820_v7  ;;  %v5224_v59 = vrot.slane %v3820_v7, %v12325_v37  ;;  %v3778_v57 = vrot.slane %v3762_v45, %v12325_v37 }
 0x47f   : > { %v13426_v18 = vrot.slane %v16624_v56, 3  ;;  %v3841_v14 = vrot.slane %v3813_v13, %v12325_v37  ;;  %v3843_v51 = vcombine.high %v3827_v3, %v3827_v3  ;;  %v5280_v4 = vrot.slane %v3827_v3, %v12325_v37  ;;  %10952 = vmatpush3.bf16.msra.mxu1 %v11269_v17 }
 0x480   : > { %v3771_v56 = vrot.slane %v3755_v35, %v12325_v37  ;;  %v3844_v40 = vcombine.high %v3834_v62, %v3834_v62  ;;  %v5238_v16 = vrot.slane %v3834_v62, %v12325_v37  ;;  %v5252_v13 = vrot.slane %v3842_v60, %v12325_v37  ;;  %10953 = vmatprep.subr.bf16.mxu1 %v11270_v39  ;;  %v11271_v60 = vld [vmem:[%s16271_s7 + $0x50] sm:$0xff]  }
 0x481   : > { %16625 = vst [vmem:[#allocation43_spill] sm:$0xff] %v13426_v18  ;;  %v3845_v11 = vcombine.high %v3841_v14, %v3841_v14  ;;  %v5231_v19 = vrot.slane %v5224_v59, %v12325_v37  ;;  %v5287_v41 = vrot.slane %v5280_v4, %v12325_v37  ;;  %v5294_v25 = vrot.slane %v3841_v14, %v12325_v37 }
 0x482   : > { %v13444_v7 = vrot.slane %v3843_v51, %v12325_v37  ;;  %v13447_v35 = vrot.slane %v5238_v16, %v12325_v37  ;;  %v5259_v45 = vrot.slane %v5252_v13, %v12325_v37  ;;  %v5266_v3 = vrot.slane %v3844_v40, %v12325_v37 }
 0x483   : > { %v3785_v62 = vrot.slane %v3763_v12, %v12325_v37  ;;  %v13456_v14 = vrot.slane %v5294_v25, %v12325_v37  ;;  %v13458_v51 = vunpack.c.l.b16 %v5231_v19  ;;  %v5607_v17 = vunpack.c.l.b16 %v5287_v41  ;;  %10954 = vmatpush3.bf16.msra.mxu1 %v11270_v39 }
 0x484   : > { %16626 = vst [vmem:[#allocation55_spill] sm:$0xff] %v13444_v7  ;;  %16627 = vst [vmem:[#allocation54_spill] sm:$0xff] %v13447_v35  ;;  %v3792_v59 = vrot.slane %v3764_v8, %v12325_v37  ;;  %v5273_v4 = vrot.slane %v5266_v3, %v12325_v37  ;;  %v16382_v16 = vunpack.c.l.b16 %v13447_v35  ;;  %v13463_v40 = vunpack.c.l.b16 %v5259_v45  ;;  %10955 = vmatprep.subr.bf16.mxu1 %v11271_v60  ;;  %v16643_v35 = vld [vmem:[#allocation63_spill] sm:$0xff] }
 0x485   : > { %16628 = vst [vmem:[#allocation61_spill] sm:$0xff] %v13456_v14  ;;  %16629 = vst [vmem:[#allocation56_spill] sm:$0xff] %v13458_v51  ;;  %v13466_v12 = vrot.slane %v3845_v11, %v12325_v37  ;;  %v13471_v34 = vrot.slane %v5607_v17, 4  ;;  %v3793_v19 = vcombine.high %v3771_v56, %v3771_v56  ;;  %v13478_v3 = vrot.slane %v5607_v17, 5 }
 0x486   : > { %16630 = vst [vmem:[#allocation116_spill] sm:$0xff] %v13463_v40  ;;  %v13473_v41 = vunpack.c.l.b16 %v5273_v4  ;;  %v5786_v8 = vrot.slane %v16382_v16, 7  ;;  %v3795_v13 = vcombine.high %v3785_v62, %v3785_v62  ;;  %v5126_v25 = vrot.slane %v3771_v56, %v12325_v37 }
 0x487   : > { %16631 = vst [vmem:[#allocation117_spill] sm:$0xff] %v13466_v12  ;;  %16632 = vst [vmem:[#allocation118_spill] sm:$0xff] %v13471_v34  ;;  %v3794_v12 = vcombine.high %v3778_v57, %v3778_v57  ;;  %v3796_v16 = vcombine.high %v3792_v59, %v3792_v59  ;;  %v5140_v17 = vrot.slane %v3785_v62, %v12325_v37  ;;  %10956 = vmatpush3.bf16.msra.mxu1 %v11271_v60  ;;  %v11272_v60 = vld [vmem:[%s16271_s7 + $0x58] sm:$0xff]  }
 0x488   : > { %16633 = vst [vmem:[#allocation119_spill] sm:$0xff] %v13473_v41  ;;  %16634 = vst [vmem:[#allocation120_spill] sm:$0xff] %v13478_v3  ;;  %v13484_v34 = vsel %vm5625_vm11, %v5786_v8, %v13458_v51  ;;  %v5133_v45 = vrot.slane %v5126_v25, %v12325_v37  ;;  %v5154_v3 = vrot.slane %v3793_v19, %v12325_v37  ;;  %10957 = vmatprep.subr.bf16.mxu1 %v11272_v60  ;;  %v16645_v41 = vld [vmem:[#allocation67_spill] sm:$0xff] }
 0x489   : > { %16635 = vst [vmem:[#allocation121_spill] sm:$0xff] %v13484_v34  ;;  %v5168_v11 = vrot.slane %v3795_v13, %v12325_v37  ;;  %v13494_v56 = vsel %vm5975_vm12, %v5786_v8, %v13458_v51  ;;  %v5182_v34 = vrot.slane %v3778_v57, %v12325_v37  ;;  %v5196_v39 = vrot.slane %v3792_v59, %v12325_v37 }
 0x48a   : > { %16636 = vst [vmem:[#allocation122_spill] sm:$0xff] %v13494_v56  ;;  %v13499_v4 = vrot.slane %v3794_v12, %v12325_v37  ;;  %v13502_v25 = vrot.slane %v5140_v17, %v12325_v37  ;;  %v5161_v62 = vrot.slane %v5154_v3, %v12325_v37  ;;  %v13506_v13 = vunpack.c.l.b16 %v5133_v45 }
 0x48b   : > { %v5175_v19 = vrot.slane %v5168_v11, %v12325_v37  ;;  %v5189_v59 = vrot.slane %v5182_v34, %v12325_v37  ;;  %v13514_v12 = vrot.slane %v5196_v39, %v12325_v37  ;;  %v6529_v8 = vpack.c.b16 %v13417_v36, %v13417_v36  ;;  %10958 = vmatpush3.bf16.msra.mxu1 %v11272_v60 }
 0x48c   : > { %v16385_v3 = vunpack.c.l.b16 %v13502_v25  ;;  %v13519_v17 = vunpack.c.l.b16 %v5161_v62  ;;  %v13524_v11 = vrot.slane %v3796_v16, %v12325_v37  ;;  %v6262_v39 = vrot.slane %v12903_v26, %v12325_v37 }
 0x48d   : > { %v13521_v45 = vunpack.c.l.b16 %v5175_v19  ;;  %v5600_v34 = vunpack.c.l.b16 %v5189_v59  ;;  %6539 = vrot.lane.b32.xlu0 %v6529_v8, %s11393_s16  ;;  %v16639_v36 = vrot.slane %v12907_v46, 6  ;;  %v2775_v59 = vadd.f32 %v13128_v58, %v16643_v35 }
 0x48e   : > { %16637 = vst [vmem:[#allocation123_spill] sm:$0xff] %v13519_v17  ;;  %v5774_v16 = vrot.slane %v16385_v3, 7  ;;  %v13544_v51 = vunpack.c.l.b16 %v6262_v39  ;;  %v16644_v39 = vld [vmem:[#allocation64_spill] sm:$0xff]  ;;  %v16647_v35 = vunpack.c.l.b16 %v12887_v61  ;;  %v16650_v61 = vrot.slane %v12909_v38, 6 }
 0x48f   : > { %16638 = vst [vmem:[#allocation124_spill] sm:$0xff] %v13521_v45  ;;  %v6352_v62 = vsel %vm5625_vm11, %v16639_v36, %v12990_v54  ;;  %v13541_v57 = vrot.slane %v5600_v34, 4  ;;  %v16642_v36 = vrot.slane %v12909_v38, 5  ;;  %v13556_v8 = vrot.slane %v5600_v34, 5 }
 0x490   : > { %v13548_v54 = vsel %vm5625_vm11, %v5774_v16, %v13506_v13  ;;  %v2778_v19 = vadd.f32 %v13128_v58, %v16644_v39  ;;  %v6357_v40 = vrot.slane %v13544_v51, 1 }
 0x491   : > { %16640 = vst [vmem:[#allocation125_spill] sm:$0xff] %v13541_v57  ;;  %16641 = vst [vmem:[#allocation126_spill] sm:$0xff] %v13548_v54  ;;  %v6353_v3 = vsel %vm5628_vm13, %v16642_v36, %v6352_v62  ;;  %v2776_v54 = vadd.f32 %v13128_v58, %v16645_v41  ;;  %v2807_v62 = vmax.f32 %v2775_v59, 0.0  ;;  %v16646_v36 = vrot.slane %v12899_v42, 1 }
 0x492   : > { %v6354_v26 = vsel %vm5631_vm14, %v12915_v44, %v6353_v3  ;;  %v16648_v3 = vrot.slane %v13400_v21, 2  ;;  %v2810_v39 = vmax.f32 %v2778_v19, 0.0  ;;  %v16649_v58 = vrot.slane %v12907_v46, 7 }
 0x493   : > { %v6355_v60 = vsel %vm5634_vm15, %v13426_v18, %v6354_v26  ;;  %v6458_v34 = vsel %vm5975_vm12, %v16647_v35, %v16646_v36  ;;  %v2808_v56 = vmax.f32 %v2776_v54, 0.0  ;;  %v13580_v26 = vsel %vm5975_vm12, %v5774_v16, %v13506_v13 }
 0x494   : > { %v6356_v44 = vsel %vm5637_vm0, %v16648_v3, %v6355_v60  ;;  %v6460_v41 = vsel %vm5625_vm11, %v16649_v58, %v6458_v34  ;;  %v16651_v36 = vunpack.c.l.b16 %v12891_v20  ;;  %v16652_v19 = vmax.f32 %v13391_v43, 0.0 }
 0x495   : > { %v6358_v42 = vsel %vm5640_vm1, %v6357_v40, %v6356_v44  ;;  %v6462_v59 = vsel %vm5628_vm13, %v16650_v61, %v6460_v41  ;;  %v10303_v3 = vpack.c.bf16 %v2810_v39, %v2810_v39  ;;  %v2825_v18 = vpack.c.bf16 %v2808_v56, %v2807_v62 }
 0x496   : > { %v6465_v35 = vrot.slane %v16651_v36, 4  ;;  %v6394_v60 = vpack.c.b16 %v6358_v42, %v6358_v42  ;;  %v2826_v54 = vpack.c.bf16 %v2810_v39, %v16652_v19  ;;  %v10302_v34 = vpack.c.bf16 %v2808_v56, %v2808_v56 }
 0x497   : > { %v6464_v16 = vsel %vm5631_vm14, %v12920_v33, %v6462_v59  ;;  %v6467_v58 = vrot.slane %v13400_v21, 3  ;;  %v16653_v44 = vrot.slane %v13060_v2, %v12325_v37  ;;  %v3909_v43 = vrot.slane %v10303_v3, %v12325_v37  ;;  %10943 = vmatprep.mubr.msk.bf16.mxu0 %vm914_vm7, %v2825_v18 }
 0x498   : > { %6405 = vrot.lane.b32.xlu1 %v6394_v60, %s11391_s27  ;;  %v3902_v20 = vrot.slane %v2826_v54, %v12325_v37  ;;  %v3853_v39 = vrot.slane %v2825_v18, %v12325_v37  ;;  %v6466_v56 = vsel %vm5634_vm15, %v6465_v35, %v6464_v16  ;;  %v3860_v62 = vrot.slane %v10302_v34, %v12325_v37 }
 0x499   : > { %v13596_v40 = vunpack.c.l.b16 %v16653_v44  ;;  %v13605_v33 = vsel %vm5637_vm0, %v6467_v58, %v6466_v56  ;;  %v16655_v2 = vunpack.c.l.b16 %v13074_v53  ;;  %v3911_v59 = vcombine.high %v3909_v43, %v3909_v43  ;;  %10944 = vmatmul.mubr.msk.bf16.gmra.mrb[60].mxu0 %vm914_vm7, %v2826_v54 }
 0x49a   : > { %v3910_v61 = vcombine.high %v3902_v20, %v3902_v20  ;;  %v3918_v36 = vrot.slane %v3902_v20, %v12325_v37  ;;  %v3925_v60 = vrot.slane %v3909_v43, %v12325_v37  ;;  %v3861_v35 = vcombine.high %v3853_v39, %v3853_v39 }
 0x49b   : > { %16654 = vst [vmem:[#allocation63_spill] sm:$0xff] %v13596_v40  ;;  %v13610_v42 = vrot.slane %v16655_v2, 3  ;;  %v3862_v19 = vcombine.high %v3860_v62, %v3860_v62  ;;  %v3939_v58 = vrot.slane %v3911_v59, %v12325_v37  ;;  %v3869_v43 = vrot.slane %v3853_v39, %v12325_v37 }
 0x49c   : > { %v3932_v16 = vrot.slane %v3910_v61, %v12325_v37  ;;  %v3940_v18 = vcombine.high %v3918_v36, %v3918_v36  ;;  %v3941_v44 = vcombine.high %v3925_v60, %v3925_v60  ;;  %v5420_v56 = vrot.slane %v3918_v36, %v12325_v37 }
 0x49d   : > { %16656 = vst [vmem:[#allocation64_spill] sm:$0xff] %v13610_v42  ;;  %v5476_v20 = vrot.slane %v3925_v60, %v12325_v37  ;;  %v3876_v54 = vrot.slane %v3860_v62, %v12325_v37  ;;  %v3943_v41 = vcombine.high %v3939_v58, %v3939_v58  ;;  %v5490_v21 = vrot.slane %v3939_v58, %v12325_v37 }
 0x49e   : > { %v3942_v2 = vcombine.high %v3932_v16, %v3932_v16  ;;  %v5434_v3 = vrot.slane %v3932_v16, %v12325_v37  ;;  %v5448_v34 = vrot.slane %v3940_v18, %v12325_v37  ;;  %v5427_v61 = vrot.slane %v5420_v56, %v12325_v37 }
 0x49f   : > { %v5483_v59 = vrot.slane %v5476_v20, %v12325_v37  ;;  %v5504_v36 = vrot.slane %v3941_v44, %v12325_v37  ;;  %v3883_v38 = vrot.slane %v3861_v35, %v12325_v37  ;;  %v13636_v16 = vrot.slane %v5490_v21, %v12325_v37 }
 0x4a0   : > { %v5441_v60 = vrot.slane %v5434_v3, %v12325_v37  ;;  %v5455_v39 = vrot.slane %v5448_v34, %v12325_v37  ;;  %v5462_v62 = vrot.slane %v3942_v2, %v12325_v37  ;;  %v5617_v56 = vunpack.c.l.b16 %v5427_v61 }
 0x4a1   : > { %16657 = vst [vmem:[#allocation67_spill] sm:$0xff] %v13636_v16  ;;  %v5511_v18 = vrot.slane %v5504_v36, %v12325_v37  ;;  %v5621_v46 = vunpack.c.l.b16 %v5483_v59  ;;  %v3890_v3 = vrot.slane %v3862_v19, %v12325_v37  ;;  %v16399_v34 = vunpack.c.l.b16 %v13636_v16 }
 0x4a2   : > { %v5469_v20 = vrot.slane %v5462_v62, %v12325_v37  ;;  %v5618_v58 = vunpack.c.l.b16 %v5441_v60  ;;  %v13640_v14 = vunpack.c.l.b16 %v5455_v39  ;;  %v13645_v44 = vrot.slane %v3943_v41, %v12325_v37 }
 0x4a3   : > { %v6883_v35 = vrot.slane %v5617_v56, 1  ;;  %v3891_v2 = vcombine.high %v3869_v43, %v3869_v43  ;;  %v13649_v7 = vunpack.c.l.b16 %v5511_v18  ;;  %v13652_v36 = vrot.slane %v5621_v46, 4 }
 0x4a4   : > { %16658 = vst [vmem:[#allocation127_spill] sm:$0xff] %v13640_v14  ;;  %v13647_v21 = vunpack.c.l.b16 %v5469_v20  ;;  %v5810_v61 = vrot.slane %v5618_v58, 7  ;;  %v16401_v59 = vrot.slane %v13640_v14, 6  ;;  %v13656_v60 = vrot.slane %v16399_v34, 3 }
 0x4a5   : > { %16659 = vst [vmem:[#allocation128_spill] sm:$0xff] %v13652_v36  ;;  %v13659_v19 = vsel %vm5975_vm12, %v5618_v58, %v6883_v35  ;;  %v13667_v20 = vrot.slane %v5621_v46, 5  ;;  %v3892_v34 = vcombine.high %v3876_v54, %v3876_v54  ;;  %v3894_v58 = vcombine.high %v3890_v3, %v3890_v3 }
 0x4a6   : > { %16660 = vst [vmem:[#allocation129_spill] sm:$0xff] %v13656_v60  ;;  %16661 = vst [vmem:[#allocation130_spill] sm:$0xff] %v13659_v19  ;;  %v13663_v39 = vsel %vm5625_vm11, %v5810_v61, %v5617_v56  ;;  %v6872_v18 = vsel %vm5975_vm12, %v5810_v61, %v5617_v56  ;;  %v3893_v60 = vcombine.high %v3883_v38, %v3883_v38 }
 0x4a7   : > { %16662 = vst [vmem:[#allocation131_spill] sm:$0xff] %v13663_v39  ;;  %16663 = vst [vmem:[#allocation132_spill] sm:$0xff] %v13667_v20  ;;  %v13672_v16 = vsel %vm5625_vm11, %v16401_v59, %v6872_v18  ;;  %v5322_v35 = vrot.slane %v3869_v43, %v12325_v37  ;;  %v5336_v41 = vrot.slane %v3883_v38, %v12325_v37 }
 0x4a8   : > { %v5350_v39 = vrot.slane %v3891_v2, %v12325_v37  ;;  %v5378_v62 = vrot.slane %v3876_v54, %v12325_v37  ;;  %v5364_v56 = vrot.slane %v3893_v60, %v12325_v37  ;;  %v5392_v46 = vrot.slane %v3890_v3, %v12325_v37 }
 0x4a9   : > { %v13681_v61 = vrot.slane %v3892_v34, %v12325_v37  ;;  %v13684_v18 = vrot.slane %v3894_v58, %v12325_v37  ;;  %v5329_v59 = vrot.slane %v5322_v35, %v12325_v37  ;;  %v13688_v43 = vrot.slane %v5336_v41, %v12325_v37 }
 0x4aa   : > { %v5357_v38 = vrot.slane %v5350_v39, %v12325_v37  ;;  %v5385_v2 = vrot.slane %v5378_v62, %v12325_v37  ;;  %v5371_v54 = vrot.slane %v5364_v56, %v12325_v37  ;;  %v13694_v60 = vrot.slane %v5392_v46, %v12325_v37 }
 0x4ab   : > { %v16664_v34 = vrot.slane %v13544_v51, 2  ;;  %v13702_v35 = vunpack.c.l.b16 %v5329_v59  ;;  %v16404_v41 = vunpack.c.l.b16 %v13688_v43  ;;  %v16665_v3 = vrot.slane %v13084_v32, %v12325_v37 }
 0x4ac   : > { %v13705_v39 = vunpack.c.l.b16 %v5357_v38  ;;  %v5614_v62 = vunpack.c.l.b16 %v5385_v2  ;;  %v13707_v20 = vunpack.c.l.b16 %v5371_v54  ;;  %v16670_v2 = vunpack.c.l.b16 %v13063_v50 }
 0x4ad   : > { %v6470_v58 = vsel %vm5640_vm1, %v16664_v34, %v13605_v33  ;;  %v6323_v14 = vunpack.c.l.b16 %v16665_v3  ;;  %v5798_v51 = vrot.slane %v16404_v41, 7  ;;  %v16667_v41 = vrot.slane %v13079_v48, 6 }
 0x4ae   : > { %v6530_v46 = vpack.c.b16 %v6470_v58, %v6470_v58  ;;  %v13716_v59 = vrot.slane %v5614_v62, 4  ;;  %v13722_v58 = vrot.slane %v5614_v62, 5  ;;  %v16668_v34 = vrot.slane %v13081_v15, 5 }
 0x4af   : > { %v13727_v32 = vsel %vm5625_vm11, %v5798_v51, %v13702_v35  ;;  %v13731_v3 = vsel %vm5975_vm12, %v5798_v51, %v13702_v35  ;;  %v6360_v38 = vsel %vm5625_vm11, %v16667_v41, %v13194_v63  ;;  %v6365_v54 = vrot.slane %v6323_v14, 1 }
 0x4b0   : > { %6541 = vrot.lane.b32.xlu1 %v6530_v46, %s11393_s16  ;;  %16666 = vst [vmem:[#allocation133_spill] sm:$0xff] %v13727_v32  ;;  %v6361_v62 = vsel %vm5628_vm13, %v16668_v34, %v6360_v38  ;;  %v16669_v46 = vrot.slane %v13067_v52, 1  ;;  %v16671_v56 = vunpack.c.l.b16 %v13074_v53  ;;  %v6481_v32 = vrot.slane %v13596_v40, 3 }
 0x4b1   : > { %v6362_v19 = vsel %vm5631_vm14, %v13100_v5, %v6361_v62  ;;  %v16672_v63 = vrot.slane %v13079_v48, 7  ;;  %v6483_v36 = vrot.slane %v6323_v14, 2  ;;  %v16673_v52 = vrot.slane %v13278_v49, %v12325_v37 }
 0x4b2   : > { %v6472_v33 = vsel %vm5975_vm12, %v16670_v2, %v16669_v46  ;;  %v6479_v51 = vrot.slane %v16671_v56, 4  ;;  %v6363_v50 = vsel %vm5634_vm15, %v13610_v42, %v6362_v19  ;;  %v16675_v53 = vrot.slane %v13081_v15, 6 }
 0x4b3   : > { %v6474_v41 = vsel %vm5625_vm11, %v16672_v63, %v6472_v33  ;;  %v13756_v38 = vunpack.c.l.b16 %v16673_v52  ;;  %v16676_v2 = vunpack.c.l.b16 %v13290_v31  ;;  %v6290_v33 = vrot.slane %v13300_v9, %v12325_v37 }
 0x4b4   : > { %v6476_v56 = vsel %vm5628_vm13, %v16675_v53, %v6474_v41  ;;  %v16678_v14 = vrot.slane %v13596_v40, 2  ;;  %v16679_v46 = vrot.slane %v13295_v47, 6  ;;  %v16680_v9 = vrot.slane %v13297_v29, 5  ;;  %v16802_v40 = vld [vmem:[#allocation117_spill] sm:$0xff] }
 0x4b5   : > { %16674 = vst [vmem:[#allocation134_spill] sm:$0xff] %v13756_v38  ;;  %v13765_v34 = vrot.slane %v16676_v2, 3  ;;  %v6478_v62 = vsel %vm5631_vm14, %v13196_v10, %v6476_v56  ;;  %v6324_v53 = vunpack.c.l.b16 %v6290_v33  ;;  %v16681_v56 = vrot.slane %v13285_v0, 1 }
 0x4b6   : > { %v6364_v49 = vsel %vm5637_vm0, %v16678_v14, %v6363_v50  ;;  %v6368_v63 = vsel %vm5625_vm11, %v16679_v46, %v13413_v55  ;;  %v6480_v52 = vsel %vm5634_vm15, %v6479_v51, %v6478_v62  ;;  %v16682_v19 = vunpack.c.l.b16 %v13281_v6 }
 0x4b7   : > { %16677 = vst [vmem:[#allocation135_spill] sm:$0xff] %v13765_v34  ;;  %v6366_v41 = vsel %vm5640_vm1, %v6365_v54, %v6364_v49  ;;  %v6369_v2 = vsel %vm5628_vm13, %v16680_v9, %v6368_v63  ;;  %v6482_v14 = vsel %vm5637_vm0, %v6481_v32, %v6480_v52  ;;  %v13795_v54 = vld [vmem:[%s16271_s7] sm:$0xff]   ;;  %v6373_v32 = vrot.slane %v6324_v53, 1 }
 0x4b8   : > { %v6395_v50 = vpack.c.b16 %v6366_v41, %v6366_v41  ;;  %v6370_v10 = vsel %vm5631_vm14, %v13315_v22, %v6369_v2  ;;  %v6486_v55 = vsel %vm5975_vm12, %v16682_v19, %v16681_v56  ;;  %16683 = vst [vmem:[#allocation136_spill] sm:$0xff] %v13795_v54  ;;  %v6484_v51 = vsel %vm5640_vm1, %v6483_v36, %v6482_v14 }
 0x4b9   : > { %v6371_v33 = vsel %vm5634_vm15, %v13765_v34, %v6370_v10  ;;  %v16684_v49 = vrot.slane %v13295_v47, 7  ;;  %v6531_v6 = vpack.c.b16 %v6484_v51, %v6484_v51  ;;  %v16685_v0 = vrot.slane %v13756_v38, 2  ;;  %10967 = vmatprep.subr.bf16.mxu1 %v13795_v54  ;;  %v16814_v54 = vld [vmem:[#allocation128_spill] sm:$0xff]  ;;  %v16824_v47 = vld [vmem:[#allocation67_spill] sm:$0xff] }
 0x4ba   : > { %6407 = vrot.lane.b32.xlu0 %v6395_v50, %s11391_s27  ;;  %v16686_v46 = vrot.slane %v13297_v29, 6  ;;  %v16687_v36 = vunpack.c.l.b16 %v13290_v31  ;;  %v6495_v2 = vrot.slane %v13756_v38, 3  ;;  %v6497_v50 = vrot.slane %v6324_v53, 2 }
 0x4bb   : > { %v6488_v62 = vsel %vm5625_vm11, %v16684_v49, %v6486_v55  ;;  %v6372_v19 = vsel %vm5637_vm0, %v16685_v0, %v6371_v33  ;;  %v16688_v56 = vrot.slane %v13499_v4, %v12325_v37  ;;  %v16690_v31 = vunpack.c.l.b16 %v13514_v12 }
 0x4bc   : > { %v6490_v63 = vsel %vm5628_vm13, %v16686_v46, %v6488_v62  ;;  %v6493_v41 = vrot.slane %v16687_v36, 4  ;;  %v6374_v52 = vsel %vm5640_vm1, %v6373_v32, %v6372_v19  ;;  %v16692_v53 = vrot.slane %v13519_v17, 6 }
 0x4bd   : > { %v6492_v9 = vsel %vm5631_vm14, %v13327_v23, %v6490_v63  ;;  %v6396_v14 = vpack.c.b16 %v6374_v52, %v6374_v52  ;;  %v13821_v55 = vunpack.c.l.b16 %v16688_v56  ;;  %v13825_v51 = vrot.slane %v16690_v31, 3 }
 0x4be   : > { %v6494_v10 = vsel %vm5634_vm15, %v6493_v41, %v6492_v9  ;;  %v6304_v23 = vrot.slane %v13524_v11, %v12325_v37  ;;  %v6376_v32 = vsel %vm5625_vm11, %v16692_v53, %v13580_v26  ;;  %v16693_v49 = vrot.slane %v13506_v13, 1  ;;  %6543 = vrot.lane.b32.xlu0 %v6531_v6, %s11393_s16 }
 0x4bf   : > { %16689 = vst [vmem:[#allocation137_spill] sm:$0xff] %v13821_v55  ;;  %16691 = vst [vmem:[#allocation138_spill] sm:$0xff] %v13825_v51  ;;  %v6496_v33 = vsel %vm5637_vm0, %v6495_v2, %v6494_v10  ;;  %v16694_v4 = vunpack.c.l.b16 %v13502_v25  ;;  %6409 = vrot.lane.b32.xlu1 %v6396_v14, %s11391_s27  ;;  %v16406_v19 = vrot.slane %v13821_v55, 2  ;;  %v16695_v11 = vrot.slane %v13521_v45, 5 }
 0x4c0   : > { %v6498_v0 = vsel %vm5640_vm1, %v6497_v50, %v6496_v33  ;;  %v16696_v26 = vrot.slane %v13519_v17, 7  ;;  %v6325_v25 = vunpack.c.l.b16 %v6304_v23  ;;  %v16697_v6 = vrot.slane %v13521_v45, 6  ;;  %v16699_v33 = vld [vmem:[#allocation42_spill] sm:$0xff] }
 0x4c1   : > { %v6500_v62 = vsel %vm5975_vm12, %v16694_v4, %v16693_v49  ;;  %v6377_v46 = vsel %vm5628_vm13, %v16695_v11, %v6376_v32  ;;  %v6532_v63 = vpack.c.b16 %v6498_v0, %v6498_v0  ;;  %v16698_v2 = vmov %v16690_v31  ;;  %v16701_v32 = vld [vmem:[#allocation45_spill] sm:$0xff]  ;;  %v16703_v4 = vld [vmem:[#allocation47_spill] sm:$0xff]  ;;  %v16705_v11 = vld [vmem:[#allocation48_spill] sm:$0xff] }
 0x4c2   : > { %v6502_v13 = vsel %vm5625_vm11, %v16696_v26, %v6500_v62  ;;  %v6378_v36 = vsel %vm5631_vm14, %v13541_v57, %v6377_v46  ;;  %v6507_v50 = vrot.slane %v16698_v2, 4  ;;  %v6509_v14 = vrot.slane %v13821_v55, 3  ;;  %v16704_v0 = vld [vmem:[#allocation53_spill] sm:$0xff] }
 0x4c3   : > { %v6504_v41 = vsel %vm5628_vm13, %v16697_v6, %v6502_v13  ;;  %v6379_v52 = vsel %vm5634_vm15, %v13825_v51, %v6378_v36  ;;  %v6381_v56 = vrot.slane %v6325_v25, 1  ;;  %v6511_v31 = vrot.slane %v6325_v25, 2  ;;  %6545 = vrot.lane.b32.xlu1 %v6532_v63, %s11393_s16  ;;  %v16707_v36 = vld [vmem:[#allocation50_spill] sm:$0xff] }
 0x4c4   : > { %v6506_v9 = vsel %vm5631_vm14, %v13556_v8, %v6504_v41  ;;  %v6380_v10 = vsel %vm5637_vm0, %v16406_v19, %v6379_v52  ;;  %v16700_v23 = vrot.slane %v16699_v33, %v12325_v37  ;;  %v16702_v12 = vunpack.c.l.b16 %v16701_v32 }
 0x4c5   : > { %v6508_v8 = vsel %vm5634_vm15, %v6507_v50, %v6506_v9  ;;  %v5911_v62 = vrot.slane %v16703_v4, %v12325_v37  ;;  %v16706_v46 = vrot.slane %v16705_v11, 6  ;;  %v6382_v13 = vsel %vm5640_vm1, %v6381_v56, %v6380_v10  ;;  %v16709_v50 = vld [vmem:[#allocation49_spill] sm:$0xff] }
 0x4c6   : > { %v13867_v53 = vunpack.c.l.b16 %v16700_v23  ;;  %v13873_v49 = vrot.slane %v16702_v12, 3  ;;  %v6510_v25 = vsel %vm5637_vm0, %v6509_v14, %v6508_v8  ;;  %v16708_v6 = vrot.slane %v16707_v36, 5 }
 0x4c7   : > { %v5993_v26 = vsel %vm5625_vm11, %v16706_v46, %v16704_v0  ;;  %v6397_v52 = vpack.c.b16 %v6382_v13, %v6382_v13  ;;  %v6512_v9 = vsel %vm5640_vm1, %v6511_v31, %v6510_v25  ;;  %v13888_v2 = vunpack.c.l.b16 %v5911_v62  ;;  %v16714_v25 = vld [vmem:[#allocation26_spill] sm:$0xff] }
 0x4c8   : > { %v16408_v63 = vrot.slane %v13867_v53, 2  ;;  %v5994_v41 = vsel %vm5628_vm13, %v16708_v6, %v5993_v26  ;;  %v6533_v23 = vpack.c.b16 %v6512_v9, %v6512_v9  ;;  %v16710_v14 = vrot.slane %v13681_v61, %v12325_v37 }
 0x4c9   : > { %v5995_v33 = vsel %vm5631_vm14, %v16709_v50, %v5994_v41  ;;  %v16711_v8 = vunpack.c.l.b16 %v13694_v60  ;;  %6411 = vrot.lane.b32.xlu0 %v6397_v52, %s11391_s27  ;;  %v5998_v4 = vrot.slane %v13888_v2, 1  ;;  %v6318_v62 = vrot.slane %v13684_v18, %v12325_v37  ;;  %v16716_v41 = vld [vmem:[#allocation25_spill] sm:$0xff] }
 0x4ca   : > { %v5996_v10 = vsel %vm5634_vm15, %v13873_v49, %v5995_v33  ;;  %v13897_v56 = vunpack.c.l.b16 %v16710_v14  ;;  %v16712_v61 = vrot.slane %v13705_v39, 6  ;;  %v16713_v26 = vrot.slane %v13707_v20, 5 }
 0x4cb   : > { %v13901_v12 = vrot.slane %v16711_v8, 3  ;;  %v5997_v31 = vsel %vm5637_vm0, %v16408_v63, %v5996_v10  ;;  %v16715_v6 = vrot.slane %v16714_v25, 1  ;;  %v16717_v52 = vunpack.c.l.b16 %v16716_v41 }
 0x4cc   : > { %v6384_v0 = vsel %vm5625_vm11, %v16712_v61, %v13731_v3  ;;  %v16407_v46 = vrot.slane %v13897_v56, 2  ;;  %v16718_v33 = vunpack.c.l.b16 %v12539_v28  ;;  %v5999_v10 = vsel %vm5640_vm1, %v5998_v4, %v5997_v31 }
 0x4cd   : > { %v6385_v13 = vsel %vm5628_vm13, %v16713_v26, %v6384_v0  ;;  %v6054_v9 = vsel %vm5975_vm12, %v16717_v52, %v16715_v6  ;;  %v6326_v14 = vunpack.c.l.b16 %v6318_v62  ;;  %v16719_v8 = vrot.slane %v12545_v24, 7  ;;  %6547 = vrot.lane.b32.xlu0 %v6533_v23, %s11393_s16  ;;  %v16721_v62 = vld [vmem:[#allocation30_spill] sm:$0xff]  ;;  %v16788_v24 = vld [vmem:[#allocation33_spill] sm:$0xff] }
 0x4ce   : > { %v6061_v18 = vrot.slane %v16718_v33, 4  ;;  %v6386_v3 = vsel %vm5631_vm14, %v13716_v59, %v6385_v13  ;;  %v6034_v0 = vpack.c.b16 %v5999_v10, %v5999_v10  ;;  %v16720_v25 = vrot.slane %v12556_v27, 6 }
 0x4cf   : > { %v6056_v61 = vsel %vm5625_vm11, %v16719_v8, %v6054_v9  ;;  %v6387_v26 = vsel %vm5634_vm15, %v13901_v12, %v6386_v3  ;;  %v6063_v28 = vrot.slane %v13113_v30, 3  ;;  %v6389_v4 = vrot.slane %v6326_v14, 1  ;;  %v16757_v30 = vld [vmem:[#allocation106_spill] sm:$0xff] }
 0x4d0   : > { %v6058_v6 = vsel %vm5628_vm13, %v16720_v25, %v6056_v61  ;;  %v6388_v31 = vsel %vm5637_vm0, %v16407_v46, %v6387_v26  ;;  %v6065_v41 = vrot.slane %v13139_v1, 2  ;;  %v16722_v9 = vrot.slane %v13702_v35, 1 }
 0x4d1   : > { %v6060_v13 = vsel %vm5631_vm14, %v16721_v62, %v6058_v6  ;;  %v16723_v33 = vunpack.c.l.b16 %v13688_v43  ;;  %v16724_v23 = vunpack.c.l.b16 %v13694_v60  ;;  %v6523_v8 = vrot.slane %v13897_v56, 3  ;;  %v16727_v60 = vld [vmem:[#allocation69_spill] sm:$0xff]  ;;  %6148 = vrot.lane.b32.xlu0 %v6034_v0, %s11391_s27 }
 0x4d2   : > { %v6062_v52 = vsel %vm5634_vm15, %v6061_v18, %v6060_v13  ;;  %v6390_v61 = vsel %vm5640_vm1, %v6389_v4, %v6388_v31  ;;  %v16725_v25 = vrot.slane %v13705_v39, 7  ;;  %v6525_v18 = vrot.slane %v6326_v14, 2  ;;  %v16729_v4 = vld [vmem:[#allocation71_spill] sm:$0xff] }
 0x4d3   : > { %v6514_v10 = vsel %vm5975_vm12, %v16723_v33, %v16722_v9  ;;  %v6521_v3 = vrot.slane %v16724_v23, 4  ;;  %v6064_v26 = vsel %vm5637_vm0, %v6063_v28, %v6062_v52  ;;  %v6398_v6 = vpack.c.b16 %v6390_v61, %v6390_v61  ;;  %v16732_v61 = vld [vmem:[#allocation78_spill] sm:$0xff] }
 0x4d4   : > { %v6516_v1 = vsel %vm5625_vm11, %v16725_v25, %v6514_v10  ;;  %v6066_v35 = vsel %vm5640_vm1, %v6065_v41, %v6064_v26  ;;  %v16726_v43 = vrot.slane %v13707_v20, 6  ;;  %v16728_v13 = vrot.slane %v16727_v60, %v12325_v37  ;;  %v16731_v41 = vld [vmem:[#allocation73_spill] sm:$0xff]  ;;  %v16733_v26 = vld [vmem:[#allocation72_spill] sm:$0xff] }
 0x4d5   : > { %v6138_v28 = vpack.c.b16 %v6066_v35, %v6066_v35  ;;  %v16730_v14 = vunpack.c.l.b16 %v16729_v4  ;;  %v5925_v33 = vrot.slane %v16731_v41, %v12325_v37  ;;  %6413 = vrot.lane.b32.xlu1 %v6398_v6, %s11391_s27  ;;  %v16734_v0 = vrot.slane %v16733_v26, 6  ;;  %v16737_v35 = vld [vmem:[#allocation13_spill] sm:$0xff]  ;;  %v16739_v6 = vld [vmem:[#allocation74_spill] sm:$0xff] }
 0x4d6   : > { %v6518_v62 = vsel %vm5628_vm13, %v16726_v43, %v6516_v1  ;;  %v13965_v9 = vunpack.c.l.b16 %v16728_v13  ;;  %v16735_v1 = vld [vmem:[#allocation15_spill] sm:$0xff]  ;;  %v16738_v43 = vunpack.c.l.b16 %v16737_v35  ;;  %v16744_v35 = vld [vmem:[#allocation18_spill] sm:$0xff]  ;;  %v16774_v57 = vrot.slane %v16733_v26, 7 }
 0x4d7   : > { %v6520_v31 = vsel %vm5631_vm14, %v13722_v58, %v6518_v62  ;;  %v13972_v52 = vrot.slane %v16730_v14, 3  ;;  %v6001_v25 = vsel %vm5625_vm11, %v16734_v0, %v16732_v61  ;;  %v16736_v58 = vrot.slane %v16735_v1, 1  ;;  %v16743_v0 = vld [vmem:[#allocation75_spill] sm:$0xff]  ;;  %6160 = vrot.lane.b32.xlu0 %v6138_v28, %s11393_s16 }
 0x4d8   : > { %v6522_v10 = vsel %vm5634_vm15, %v6521_v3, %v6520_v31  ;;  %v16409_v23 = vrot.slane %v13965_v9, 2  ;;  %v13989_v13 = vunpack.c.l.b16 %v5925_v33  ;;  %v16740_v14 = vrot.slane %v16739_v6, 5  ;;  %v16741_v31 = vld [vmem:[#allocation16_spill] sm:$0xff] }
 0x4d9   : > { %v6040_v62 = vsel %vm5975_vm12, %v16738_v43, %v16736_v58  ;;  %v6524_v60 = vsel %vm5637_vm0, %v6523_v8, %v6522_v10  ;;  %v16742_v41 = vrot.slane %v16741_v31, 7  ;;  %v16745_v46 = vrot.slane %v16744_v35, 6  ;;  %v16746_v8 = vld [vmem:[#allocation14_spill] sm:$0xff] }
 0x4da   : > { %v6002_v3 = vsel %vm5628_vm13, %v16740_v14, %v6001_v25  ;;  %v6526_v61 = vsel %vm5640_vm1, %v6525_v18, %v6524_v60  ;;  %v16747_v33 = vunpack.c.l.b16 %v16746_v8  ;;  %v16748_v14 = vld [vmem:[#allocation19_spill] sm:$0xff]  ;;  %v16792_v31 = vrot.slane %v16757_v30, 7 }
 0x4db   : > { %v6042_v19 = vsel %vm5625_vm11, %v16742_v41, %v6040_v62  ;;  %v6003_v1 = vsel %vm5631_vm14, %v16743_v0, %v6002_v3  ;;  %v6534_v43 = vpack.c.b16 %v6526_v61, %v6526_v61  ;;  %v6006_v62 = vrot.slane %v13989_v13, 1  ;;  %v16750_v41 = vld [vmem:[#allocation66_spill] sm:$0xff]  ;;  %v16751_v61 = vld [vmem:[#allocation35_spill] sm:$0xff] }
 0x4dc   : > { %v6044_v58 = vsel %vm5628_vm13, %v16745_v46, %v6042_v19  ;;  %v6047_v10 = vrot.slane %v16747_v33, 4  ;;  %v6004_v25 = vsel %vm5634_vm15, %v13972_v52, %v6003_v1  ;;  %v16749_v46 = vld [vmem:[#allocation62_spill] sm:$0xff]  ;;  %v6051_v8 = vrot.slane %v16750_v41, 2  ;;  %v16756_v41 = vld [vmem:[#allocation112_spill] sm:$0xff] }
 0x4dd   : > { %v6046_v18 = vsel %vm5631_vm14, %v16748_v14, %v6044_v58  ;;  %v6005_v60 = vsel %vm5637_vm0, %v16409_v23, %v6004_v25  ;;  %v6049_v3 = vrot.slane %v16749_v46, 3  ;;  %6549 = vrot.lane.b32.xlu1 %v6534_v43, %s11393_s16  ;;  %v16752_v1 = vrot.slane %v16751_v61, %v12325_v37  ;;  %v16753_v58 = vld [vmem:[#allocation104_spill] sm:$0xff]  ;;  %v16755_v25 = vld [vmem:[#allocation107_spill] sm:$0xff] }
 0x4de   : > { %v6048_v19 = vsel %vm5634_vm15, %v6047_v10, %v6046_v18  ;;  %v6007_v28 = vsel %vm5640_vm1, %v6006_v62, %v6005_v60  ;;  %v16754_v14 = vunpack.c.l.b16 %v16753_v58  ;;  %v5953_v10 = vrot.slane %v16755_v25, %v12325_v37  ;;  %v16759_v60 = vld [vmem:[#allocation46_spill] sm:$0xff]  ;;  %v16761_v61 = vld [vmem:[#allocation44_spill] sm:$0xff] }
 0x4df   : > { %v14022_v33 = vunpack.c.l.b16 %v16752_v1  ;;  %v6035_v18 = vpack.c.b16 %v6007_v28, %v6007_v28  ;;  %v6050_v23 = vsel %vm5637_vm0, %v6049_v3, %v6048_v19  ;;  %v16758_v43 = vrot.slane %v16757_v30, 6  ;;  %v16763_v28 = vld [vmem:[#allocation109_spill] sm:$0xff] }
 0x4e0   : > { %v14026_v63 = vrot.slane %v16754_v14, 3  ;;  %v16760_v46 = vrot.slane %v16759_v60, 1  ;;  %v16762_v1 = vunpack.c.l.b16 %v16761_v61  ;;  %v6052_v14 = vsel %vm5640_vm1, %v6051_v8, %v6050_v23 }
 0x4e1   : > { %v6017_v62 = vsel %vm5625_vm11, %v16758_v43, %v16756_v41  ;;  %v16415_v51 = vrot.slane %v14022_v33, 2  ;;  %v14042_v27 = vunpack.c.l.b16 %v5953_v10  ;;  %v16764_v25 = vrot.slane %v16763_v28, 5  ;;  %6150 = vrot.lane.b32.xlu0 %v6035_v18, %s11391_s27  ;;  %v16765_v41 = vld [vmem:[#allocation108_spill] sm:$0xff] }
 0x4e2   : > { %v6068_v55 = vsel %vm5975_vm12, %v16762_v1, %v16760_v46  ;;  %v6137_v3 = vpack.c.b16 %v6052_v14, %v6052_v14  ;;  %v16766_v60 = vrot.slane %v16705_v11, 7  ;;  %v16767_v23 = vunpack.c.l.b16 %v16701_v32  ;;  %v16769_v14 = vld [vmem:[#allocation51_spill] sm:$0xff] }
 0x4e3   : > { %v6018_v19 = vsel %vm5628_vm13, %v16764_v25, %v6017_v62  ;;  %v6022_v61 = vrot.slane %v14042_v27, 1  ;;  %v16768_v62 = vrot.slane %v16707_v36, 6  ;;  %v6077_v1 = vrot.slane %v13867_v53, 3 }
 0x4e4   : > { %v6019_v43 = vsel %vm5631_vm14, %v16765_v41, %v6018_v19  ;;  %v6070_v46 = vsel %vm5625_vm11, %v16766_v60, %v6068_v55  ;;  %v6075_v8 = vrot.slane %v16767_v23, 4  ;;  %6158 = vrot.lane.b32.xlu1 %v6137_v3, %s11393_s16  ;;  %v6079_v25 = vrot.slane %v13888_v2, 2  ;;  %v16770_v19 = vld [vmem:[#allocation70_spill] sm:$0xff]  ;;  %v16772_v60 = vld [vmem:[#allocation68_spill] sm:$0xff] }
 0x4e5   : > { %v6020_v10 = vsel %vm5634_vm15, %v14026_v63, %v6019_v43  ;;  %v6072_v18 = vsel %vm5628_vm13, %v16768_v62, %v6070_v46  ;;  %v16771_v43 = vrot.slane %v16770_v19, 1  ;;  %v16773_v23 = vunpack.c.l.b16 %v16772_v60  ;;  %v14074_v46 = vpop.f32.mrb[32].mxu0 }
 0x4e6   : > { %v6021_v55 = vsel %vm5637_vm0, %v16415_v51, %v6020_v10  ;;  %v6074_v32 = vsel %vm5631_vm14, %v16769_v14, %v6072_v18  ;;  %v16775_v18 = vunpack.c.l.b16 %v16729_v4  ;;  %v14083_v2 = vpop.f32.mrb[33].mxu0  ;;  %v16778_v4 = vld [vmem:[#allocation85_spill] sm:$0xff]  ;;  %v16820_v5 = vrot.slane %v13649_v7, 2 }
 0x4e7   : > { %v6082_v35 = vsel %vm5975_vm12, %v16773_v23, %v16771_v43  ;;  %v6023_v62 = vsel %vm5640_vm1, %v6022_v61, %v6021_v55  ;;  %v6076_v3 = vsel %vm5634_vm15, %v6075_v8, %v6074_v32  ;;  %v16776_v43 = vrot.slane %v16739_v6, 6  ;;  %v16777_v55 = vld [vmem:[#allocation77_spill] sm:$0xff] }
 0x4e8   : > { %v6084_v10 = vsel %vm5625_vm11, %v16774_v57, %v6082_v35  ;;  %v6089_v14 = vrot.slane %v16775_v18, 4  ;;  %v6037_v19 = vpack.c.b16 %v6023_v62, %v6023_v62  ;;  %v6078_v60 = vsel %vm5637_vm0, %v6077_v1, %v6076_v3  ;;  %v16780_v3 = vld [vmem:[#allocation87_spill] sm:$0xff] }
 0x4e9   : > { %v6086_v23 = vsel %vm5628_vm13, %v16776_v43, %v6084_v10  ;;  %v6091_v61 = vrot.slane %v13965_v9, 3  ;;  %v6080_v8 = vsel %vm5640_vm1, %v6079_v25, %v6078_v60  ;;  %v6093_v57 = vrot.slane %v13989_v13, 2  ;;  %v16782_v25 = vld [vmem:[#allocation90_spill] sm:$0xff] }
 0x4ea   : > { %v6088_v32 = vsel %vm5631_vm14, %v16777_v55, %v6086_v23  ;;  %v16779_v35 = vrot.slane %v16778_v4, %v12325_v37  ;;  %6154 = vrot.lane.b32.xlu0 %v6037_v19, %s11391_s27  ;;  %v6139_v1 = vpack.c.b16 %v6080_v8, %v6080_v8  ;;  %v16781_v10 = vunpack.c.l.b16 %v16780_v3  ;;  %v16783_v55 = vld [vmem:[#allocation95_spill] sm:$0xff]  ;;  %v16784_v4 = vld [vmem:[#allocation89_spill] sm:$0xff] }
 0x4eb   : > { %v6090_v62 = vsel %vm5634_vm15, %v6089_v14, %v6088_v32  ;;  %v5939_v60 = vrot.slane %v16782_v25, %v12325_v37  ;;  %v16786_v19 = vld [vmem:[#allocation105_spill] sm:$0xff]  ;;  %v16789_v14 = vunpack.c.l.b16 %v16788_v24  ;;  %v16793_v24 = vld [vmem:[#allocation91_spill] sm:$0xff] }
 0x4ec   : > { %v14097_v18 = vunpack.c.l.b16 %v16779_v35  ;;  %v14103_v43 = vrot.slane %v16781_v10, 3  ;;  %v6092_v23 = vsel %vm5637_vm0, %v6091_v61, %v6090_v62  ;;  %v16785_v35 = vrot.slane %v16784_v4, 6  ;;  %6162 = vrot.lane.b32.xlu1 %v6139_v1, %s11393_s16  ;;  %v16790_v61 = vld [vmem:[#allocation92_spill] sm:$0xff] }
 0x4ed   : > { %v16787_v8 = vrot.slane %v16786_v19, 1  ;;  %v6094_v10 = vsel %vm5640_vm1, %v6093_v57, %v6092_v23  ;;  %v14120_v25 = vunpack.c.l.b16 %v5939_v60  ;;  %v16791_v62 = vrot.slane %v16790_v61, 5 }
 0x4ee   : > { %v6009_v51 = vsel %vm5625_vm11, %v16785_v35, %v16783_v55  ;;  %v14128_v35 = vpop.f32.mrb[34].mxu0  ;;  %v6140_v19 = vpack.c.b16 %v6094_v10, %v6094_v10  ;;  %v16794_v1 = vrot.slane %v16763_v28, 6  ;;  %v16795_v60 = vunpack.c.l.b16 %v16753_v58 }
 0x4ef   : > { %v6110_v32 = vsel %vm5975_vm12, %v16789_v14, %v16787_v8  ;;  %v6010_v13 = vsel %vm5628_vm13, %v16791_v62, %v6009_v51  ;;  %v14137_v14 = vpop.f32.mrb[35].mxu0  ;;  %v6119_v62 = vrot.slane %v14022_v33, 3 }
 0x4f0   : > { %v6112_v55 = vsel %vm5625_vm11, %v16792_v31, %v6110_v32  ;;  %v6011_v8 = vsel %vm5631_vm14, %v16793_v24, %v6010_v13  ;;  %v6117_v23 = vrot.slane %v16795_v60, 4  ;;  %v6014_v31 = vrot.slane %v14120_v25, 1  ;;  %v16796_v32 = vld [vmem:[#allocation110_spill] sm:$0xff]  ;;  %6164 = vrot.lane.b32.xlu0 %v6140_v19, %s11393_s16  ;;  %v16798_v60 = vld [vmem:[#allocation55_spill] sm:$0xff] }
 0x4f1   : > { %v6114_v57 = vsel %vm5628_vm13, %v16794_v1, %v6112_v55  ;;  %v6012_v51 = vsel %vm5634_vm15, %v14103_v43, %v6011_v8  ;;  %v16797_v13 = vrot.slane %v14097_v18, 2  ;;  %v6121_v1 = vrot.slane %v14042_v27, 2 }
 0x4f2   : > { %v6116_v10 = vsel %vm5631_vm14, %v16796_v32, %v6114_v57  ;;  %v16799_v8 = vrot.slane %v16798_v60, %v12325_v37  ;;  %v16800_v32 = vld [vmem:[#allocation61_spill] sm:$0xff]  ;;  %v16804_v60 = vld [vmem:[#allocation116_spill] sm:$0xff] }
 0x4f3   : > { %v6013_v55 = vsel %vm5637_vm0, %v16797_v13, %v6012_v51  ;;  %v6118_v58 = vsel %vm5634_vm15, %v6117_v23, %v6116_v10  ;;  %v16801_v38 = vunpack.c.l.b16 %v16800_v32  ;;  %v5967_v51 = vrot.slane %v16802_v40, %v12325_v37  ;;  %v16803_v10 = vld [vmem:[#allocation122_spill] sm:$0xff] }
 0x4f4   : > { %v14154_v45 = vunpack.c.l.b16 %v16799_v8  ;;  %v6015_v17 = vsel %vm5640_vm1, %v6014_v31, %v6013_v55  ;;  %v6120_v57 = vsel %vm5637_vm0, %v6119_v62, %v6118_v58  ;;  %v16805_v8 = vrot.slane %v16804_v60, 6  ;;  %v14170_v31 = vpop.f32.mrb[36].mxu0 }
 0x4f5   : > { %v14160_v19 = vrot.slane %v16801_v38, 3  ;;  %v6036_v13 = vpack.c.b16 %v6015_v17, %v6015_v17  ;;  %v6122_v23 = vsel %vm5640_vm1, %v6121_v1, %v6120_v57  ;;  %v14172_v55 = vunpack.c.l.b16 %v5967_v51  ;;  %v16806_v38 = vld [vmem:[#allocation119_spill] sm:$0xff]  ;;  %v14178_v40 = vpop.f32.mrb[37].mxu0  ;;  %v16808_v1 = vld [vmem:[#allocation118_spill] sm:$0xff] }
 0x4f6   : > { %v6025_v34 = vsel %vm5625_vm11, %v16805_v8, %v16803_v10  ;;  %v6142_v62 = vpack.c.b16 %v6122_v23, %v6122_v23  ;;  %v16807_v58 = vrot.slane %v16806_v38, 5  ;;  %v6870_v10 = vrot.slane %v13645_v44, %v12325_v37  ;;  %v16810_v8 = vld [vmem:[#allocation88_spill] sm:$0xff]  ;;  %v14211_v22 = vpop.f32.mrb[38].mxu0 }
 0x4f7   : > { %6152 = vrot.lane.b32.xlu1 %v6036_v13, %s11391_s27  ;;  %v16809_v51 = vrot.slane %v13647_v21, 5  ;;  %v16811_v27 = vrot.slane %v16810_v8, 1  ;;  %v16815_v37 = vrot.slane %v16784_v4, 7  ;;  %16819 = vst [vmem:[#allocation42_spill] sm:$0xff] %v14211_v22  ;;  %v16830_v22 = vrot.slane %v16804_v60, 7 }
 0x4f8   : > { %v6026_v42 = vsel %vm5628_vm13, %v16807_v58, %v6025_v34  ;;  %v16812_v34 = vld [vmem:[#allocation86_spill] sm:$0xff]  ;;  %6168 = vrot.lane.b32.xlu0 %v6142_v62, %s11393_s16 }
 0x4f9   : > { %v6027_v57 = vsel %vm5631_vm14, %v16808_v1, %v6026_v42  ;;  %v6874_v23 = vsel %vm5628_vm13, %v16809_v51, %v13672_v16  ;;  %v16813_v58 = vunpack.c.l.b16 %v16812_v34  ;;  %v6030_v42 = vrot.slane %v14172_v55, 1 }
 0x4fa   : > { %v6028_v13 = vsel %vm5634_vm15, %v14160_v19, %v6027_v57  ;;  %v6875_v44 = vsel %vm5631_vm14, %v16814_v54, %v6874_v23  ;;  %v16816_v51 = vrot.slane %v14154_v45, 2  ;;  %v6871_v34 = vunpack.c.l.b16 %v6870_v10 }
 0x4fb   : > { %v6096_v17 = vsel %vm5975_vm12, %v16813_v58, %v16811_v27  ;;  %v16817_v27 = vld [vmem:[#allocation129_spill] sm:$0xff]  ;;  %v16818_v58 = vrot.slane %v16790_v61, 6  ;;  %v16822_v10 = vunpack.c.l.b16 %v16780_v3 }
 0x4fc   : > { %v6098_v16 = vsel %vm5625_vm11, %v16815_v37, %v6096_v17  ;;  %v6029_v8 = vsel %vm5637_vm0, %v16816_v51, %v6028_v13  ;;  %v6876_v62 = vsel %vm5634_vm15, %v16817_v27, %v6875_v44  ;;  %v16821_v17 = vld [vmem:[#allocation93_spill] sm:$0xff]  ;;  %v14221_v51 = vpop.f32.mrb[39].mxu0  ;;  %v6887_v44 = vrot.slane %v13647_v21, 6 }
 0x4fd   : > { %v6100_v57 = vsel %vm5628_vm13, %v16818_v58, %v6098_v16  ;;  %v6031_v23 = vsel %vm5640_vm1, %v6030_v42, %v6029_v8  ;;  %v6877_v37 = vsel %vm5637_vm0, %v16820_v5, %v6876_v62  ;;  %v6103_v13 = vrot.slane %v16822_v10, 4  ;;  %16823 = vst [vmem:[#allocation45_spill] sm:$0xff] %v14221_v51  ;;  %v16826_v62 = vld [vmem:[#allocation56_spill] sm:$0xff] }
 0x4fe   : > { %v6102_v29 = vsel %vm5631_vm14, %v16821_v17, %v6100_v57  ;;  %v6038_v15 = vpack.c.b16 %v6031_v23, %v6031_v23  ;;  %v6878_v16 = vrot.slane %v6871_v34, 1  ;;  %v6105_v58 = vrot.slane %v14097_v18, 3  ;;  %v16828_v17 = vld [vmem:[#allocation54_spill] sm:$0xff] }
 0x4ff   : > { %v16825_v42 = vunpack.c.l.b16 %v16824_v47  ;;  %v6104_v48 = vsel %vm5634_vm15, %v6103_v13, %v6102_v29  ;;  %v6107_v5 = vrot.slane %v14120_v25, 2  ;;  %v16827_v57 = vrot.slane %v16826_v62, 1  ;;  %v14242_v25 = vpop.f32.mrb[40].mxu0 }
 0x500   : > { %v16829_v3 = vunpack.c.l.b16 %v16828_v17  ;;  %6156 = vrot.lane.b32.xlu1 %v6038_v15, %s11391_s27  ;;  %v6879_v23 = vsel %vm5640_vm1, %v6878_v16, %v6877_v37  ;;  %v6106_v51 = vsel %vm5637_vm0, %v6105_v58, %v6104_v48  ;;  %v16831_v29 = vunpack.c.l.b16 %v16800_v32  ;;  %v16833_v17 = vld [vmem:[#allocation130_spill] sm:$0xff]  ;;  %v16834_v37 = vld [vmem:[#allocation127_spill] sm:$0xff]  ;;  %v14252_v58 = vpop.permute.xlu0 %6144 }
 0x501   : > { %v6891_v8 = vrot.slane %v16825_v42, 4  ;;  %v6880_v42 = vpack.c.b16 %v6879_v23, %v6879_v23  ;;  %v6108_v62 = vsel %vm5640_vm1, %v6107_v5, %v6106_v51  ;;  %v16835_v16 = vrot.slane %v16834_v37, 7  ;;  %16836 = vst [vmem:[#allocation47_spill] sm:$0xff] %v14252_v58  ;;  %v14260_v5 = vpop.permute.xlu1 %6146 }
 0x502   : > { %v6124_v10 = vsel %vm5975_vm12, %v16829_v3, %v16827_v57  ;;  %v6131_v13 = vrot.slane %v16831_v29, 4  ;;  %v16832_v57 = vrot.slane %v16806_v38, 6  ;;  %v6141_v32 = vpack.c.b16 %v6108_v62, %v6108_v62  ;;  %v16837_v3 = vld [vmem:[#allocation120_spill] sm:$0xff]  ;;  %16838 = vst [vmem:[#allocation53_spill] sm:$0xff] %v14260_v5 }
 0x503   : > { %v6126_v47 = vsel %vm5625_vm11, %v16830_v22, %v6124_v10  ;;  %v6886_v48 = vsel %vm5625_vm11, %v16835_v16, %v16833_v17  ;;  %v14254_v22 = vpop.f32.mrb[41].mxu0  ;;  %v6133_v23 = vrot.slane %v14154_v45, 3  ;;  %6881 = vrot.lane.b32.xlu0 %v6880_v42, %s11391_s27  ;;  %v16840_v17 = vld [vmem:[#allocation132_spill] sm:$0xff]  ;;  %v6893_v16 = vrot.slane %v13649_v7, 3  ;;  %v16843_v42 = vld [vmem:[#allocation21_spill] sm:$0xff] }
 0x504   : > { %v6128_v15 = vsel %vm5628_vm13, %v16832_v57, %v6126_v47  ;;  %v6888_v51 = vsel %vm5628_vm13, %v6887_v44, %v6886_v48  ;;  %v14262_v47 = vpop.f32.mrb[42].mxu0  ;;  %v6135_v57 = vrot.slane %v14172_v55, 2  ;;  %6166 = vrot.lane.b32.xlu1 %v6141_v32, %s11393_s16  ;;  %v16842_v5 = vld [vmem:[#allocation24_spill] sm:$0xff]  ;;  %v16844_v58 = vrot.slane %v16843_v42, 6 }
 0x505   : > { %v6130_v10 = vsel %vm5631_vm14, %v16837_v3, %v6128_v15  ;;  %16839 = vst [vmem:[#allocation48_spill] sm:$0xff] %v14262_v47  ;;  %v6890_v62 = vsel %vm5631_vm14, %v16840_v17, %v6888_v51  ;;  %v14270_v15 = vpop.f32.mrb[43].mxu0  ;;  %v6895_v3 = vrot.slane %v6871_v34, 2  ;;  %v16845_v51 = vld [vmem:[#allocation22_spill] sm:$0xff]  ;;  %v6400_v34 = vpop.permute.xlu0 %6399 }
 0x506   : > { %v6132_v29 = vsel %vm5634_vm15, %v6131_v13, %v6130_v10  ;;  %16841 = vst [vmem:[#allocation50_spill] sm:$0xff] %v14270_v15  ;;  %v6892_v48 = vsel %vm5634_vm15, %v6891_v8, %v6890_v62  ;;  %v5629_v13 = vsel %vm5628_vm13, %v16844_v58, %v16842_v5  ;;  %v16846_v17 = vrot.slane %v16845_v51, 5  ;;  %v14289_v42 = vpop.f32.mrb[44].mxu0  ;;  %v16849_v58 = vld [vmem:[#allocation83_spill] sm:$0xff] }
 0x507   : > { %v6134_v44 = vsel %vm5637_vm0, %v6133_v23, %v6132_v29  ;;  %v6894_v10 = vsel %vm5637_vm0, %v6893_v16, %v6892_v48  ;;  %v16847_v23 = vld [vmem:[#allocation23_spill] sm:$0xff]  ;;  %v16848_v29 = vld [vmem:[#allocation84_spill] sm:$0xff]  ;;  %v16850_v5 = vrot.slane %v16849_v58, 2 }
 0x508   : > { %v6136_v55 = vsel %vm5640_vm1, %v6135_v57, %v6134_v44  ;;  %v5632_v15 = vsel %vm5631_vm14, %v16846_v17, %v5629_v13  ;;  %v6896_v32 = vsel %vm5640_vm1, %v6895_v3, %v6894_v10  ;;  %v16851_v16 = vld [vmem:[#allocation40_spill] sm:$0xff]  ;;  %v16852_v44 = vld [vmem:[#allocation37_spill] sm:$0xff]  ;;  %v6402_v13 = vpop.permute.xlu1 %6401  ;;  %v16858_v58 = vld [vmem:[#allocation103_spill] sm:$0xff] }
 0x509   : > { %v6143_v47 = vpack.c.b16 %v6136_v55, %v6136_v55  ;;  %v5635_v8 = vsel %vm5634_vm15, %v16847_v23, %v5632_v15  ;;  %v16853_v48 = vrot.slane %v16852_v44, 6  ;;  %v14299_v55 = vpop.f32.mrb[45].mxu0  ;;  %v16854_v15 = vld [vmem:[#allocation38_spill] sm:$0xff]  ;;  %v6897_v23 = vpack.c.b16 %v6896_v32, %v6896_v32 }
 0x50a   : > { %v5638_v62 = vsel %vm5637_vm0, %v16848_v29, %v5635_v8  ;;  %v16855_v10 = vrot.slane %v16854_v15, 5  ;;  %v14304_v17 = vpop.f32.mrb[46].mxu0 }
 0x50b   : > { %6170 = vrot.lane.b32.xlu1 %v6143_v47, %s11393_s16  ;;  %v5641_v57 = vsel %vm5640_vm1, %v16850_v5, %v5638_v62  ;;  %v5657_v3 = vsel %vm5628_vm13, %v16853_v48, %v16851_v16  ;;  %16856 = vst [vmem:[#allocation49_spill] sm:$0xff] %v14304_v17  ;;  %v16857_v47 = vld [vmem:[#allocation39_spill] sm:$0xff]  ;;  %v14308_v29 = vpop.f32.mrb[47].mxu0  ;;  %v16859_v16 = vld [vmem:[#allocation102_spill] sm:$0xff] }
 0x50c   : > { %v5659_v51 = vsel %vm5631_vm14, %v16855_v10, %v5657_v3  ;;  %v5822_v62 = vpack.c.b16 %v5641_v57, %v5641_v57  ;;  %v16860_v44 = vrot.slane %v16859_v16, 2  ;;  %v6536_v3 = vpop.permute.xlu0 %6535  ;;  %v6538_v10 = vpop.permute.xlu1 %6537  ;;  %v16862_v16 = vld [vmem:[#allocation52_spill] sm:$0xff] }
 0x50d   : > { %v5661_v8 = vsel %vm5634_vm15, %v16857_v47, %v5659_v51 }
 0x50e   : > { %v5663_v5 = vsel %vm5637_vm0, %v16858_v58, %v5661_v8  ;;  %v5854_v32 = vsel %vm11698_vm5, 0, %v5822_v62  ;;  %v16864_v62 = vrot.slane %v16707_v36, 5  ;;  %v16868_v36 = vrot.slane %v13707_v20, 5 }
 0x50f   : > { %6898 = vrot.lane.b32.xlu1 %v6897_v23, %s11393_s16  ;;  %v5665_v48 = vsel %vm5640_vm1, %v16860_v44, %v5663_v5  ;;  %v6553_v57 = vsel %vm914_vm7, %v5854_v32, %v6400_v34  ;;  %v16863_v5 = vrot.slane %v16705_v11, 6  ;;  %v16866_v34 = vrot.slane %v13705_v39, 6 }
 0x510   : > { %v5824_v15 = vpack.c.b16 %v5665_v48, %v5665_v48  ;;  %v6576_v8 = vsel %vm2039_vm9, %v6553_v57, %v6536_v3  ;;  %v16867_v11 = vrot.slane %v13867_v53, 2  ;;  %v16869_v57 = vld [vmem:[#allocation76_spill] sm:$0xff]  ;;  %v16870_v39 = vrot.slane %v16733_v26, 6 }
 0x511   : > { %v5693_v44 = vsel %vm5628_vm13, %v16863_v5, %v16862_v16  ;;  %v14368_v16 = vld [vmem:[%s16270_s6] ss:$0 sm:$0xff] }
 0x512   : > { %v5856_v51 = vsel %vm11698_vm5, 0, %v5824_v15  ;;  %v5695_v48 = vsel %vm5631_vm14, %v16864_v62, %v5693_v44  ;;  %v16865_v15 = vld [vmem:[#allocation133_spill] sm:$0xff] }
 0x513   : > { %v6556_v47 = vsel %vm914_vm7, %v5856_v51, %v6402_v13  ;;  %v5801_v13 = vsel %vm5628_vm13, %v16866_v34, %v16865_v15  ;;  %v5697_v3 = vsel %vm5634_vm15, %v16709_v50, %v5695_v48  ;;  %v16877_v48 = vld [vmem:[#allocation94_spill] sm:$0xff] }
 0x514   : > { %v6578_v23 = vsel %vm2039_vm9, %v6556_v47, %v6538_v10  ;;  %v5699_v10 = vsel %vm5637_vm0, %v13873_v49, %v5697_v3  ;;  %v5803_v51 = vsel %vm5631_vm14, %v16868_v36, %v5801_v13  ;;  %v5717_v47 = vsel %vm5628_vm13, %v16870_v39, %v16869_v57  ;;  %v16880_v13 = vld [vmem:[#allocation60_spill] sm:$0xff]  ;;  %v16881_v3 = vld [vmem:[#allocation57_spill] sm:$0xff]  ;;  %v16884_v36 = vld [vmem:[#allocation79_spill] sm:$0xff] }
 0x515   : > { %v10304_v58 = vcombine.low %v6576_v8, %v6578_v23  ;;  %v14343_v32 = vsel %vm5640_vm1, %v16867_v11, %v5699_v10  ;;  %v5805_v50 = vsel %vm5634_vm15, %v13716_v59, %v5803_v51  ;;  %v16871_v8 = vrot.slane %v16739_v6, 5  ;;  %v16872_v23 = vld [vmem:[#allocation111_spill] sm:$0xff]  ;;  %v16883_v11 = vld [vmem:[#allocation82_spill] sm:$0xff] }
 0x516   : > { %v5807_v53 = vsel %vm5637_vm0, %v13901_v12, %v5805_v50  ;;  %v16874_v59 = vrot.slane %v13897_v56, 2  ;;  %v16878_v56 = vrot.slane %v16784_v4, 6  ;;  %v16882_v10 = vrot.slane %v16881_v3, 6  ;;  %v16901_v3 = vld [vmem:[#allocation81_spill] sm:$0xff] }
 0x517   : > { %10959 = vmatprep.mubr.msk.bf16.mxu1 %vm2119_vm10, %v10304_v58  ;;  %v5719_v49 = vsel %vm5631_vm14, %v16871_v8, %v5717_v47  ;;  %v16873_v58 = vrot.slane %v16757_v30, 6  ;;  %v16876_v30 = vrot.slane %v13965_v9, 2  ;;  %v2941_v9 = vadd.f32 %v14074_v46, %v14368_v16  ;;  %v16888_v8 = vld [vmem:[#allocation121_spill] sm:$0xff] }
 0x518   : > { %v5721_v20 = vsel %vm5634_vm15, %v16743_v0, %v5719_v49  ;;  %v14373_v6 = vsel %vm5640_vm1, %v16874_v59, %v5807_v53  ;;  %v16875_v0 = vrot.slane %v16763_v28, 5  ;;  %v5741_v15 = vsel %vm5628_vm13, %v16878_v56, %v16877_v48 }
 0x519   : > { %v5765_v26 = vsel %vm5628_vm13, %v16873_v58, %v16872_v23  ;;  %v5723_v12 = vsel %vm5637_vm0, %v13972_v52, %v5721_v20  ;;  %v16879_v28 = vrot.slane %v16790_v61, 5  ;;  %v16885_v4 = vrot.slane %v16884_v36, 6  ;;  %v16892_v23 = vld [vmem:[#allocation80_spill] sm:$0xff] }
 0x51a   : > { %v5767_v5 = vsel %vm5631_vm14, %v16875_v0, %v5765_v26  ;;  %v14383_v44 = vsel %vm5640_vm1, %v16876_v30, %v5723_v12  ;;  %v16886_v57 = vrot.slane %v14022_v33, 2  ;;  %v2933_v39 = vadd.f32 %v14368_v16, %v14083_v2  ;;  %v16895_v0 = vld [vmem:[#allocation131_spill] sm:$0xff] }
 0x51b   : > { %v5769_v62 = vsel %vm5634_vm15, %v16765_v41, %v5767_v5  ;;  %v5743_v34 = vsel %vm5631_vm14, %v16879_v28, %v5741_v15  ;;  %v5681_v41 = vsel %vm5628_vm13, %v16882_v10, %v16880_v13  ;;  %v5705_v51 = vsel %vm5628_vm13, %v16885_v4, %v16883_v11  ;;  %v16900_v13 = vld [vmem:[#allocation59_spill] sm:$0xff]  ;;  %v16904_v4 = vld [vmem:[#allocation42_spill] sm:$0xff] }
 0x51c   : > { %v5771_v52 = vsel %vm5637_vm0, %v14026_v63, %v5769_v62  ;;  %v5745_v61 = vsel %vm5634_vm15, %v16793_v24, %v5743_v34  ;;  %v16887_v47 = vrot.slane %v14097_v18, 2  ;;  %v16889_v33 = vrot.slane %v16804_v60, 6  ;;  %v16890_v24 = vld [vmem:[#allocation58_spill] sm:$0xff]  ;;  %v10933_v62 = vpop.f32.mrb[48].mxu0 }
 0x51d   : > { %v14409_v63 = vsel %vm5640_vm1, %v16886_v57, %v5771_v52  ;;  %v5747_v46 = vsel %vm5637_vm0, %v14103_v43, %v5745_v61  ;;  %v2944_v53 = vadd.f32 %v14128_v35, %v14368_v16  ;;  %v16891_v20 = vrot.slane %v16890_v24, 5  ;;  %v2996_v52 = vpop.f32.mrb[49].mxu0  ;;  %v16905_v57 = vld [vmem:[#allocation45_spill] sm:$0xff]  ;;  %v16908_v24 = vld [vmem:[#allocation43_spill] sm:$0xff] }
 0x51e   : > { %v14420_v50 = vsel %vm5640_vm1, %v16887_v47, %v5747_v46  ;;  %v5789_v49 = vsel %vm5628_vm13, %v16889_v33, %v16888_v8  ;;  %v16893_v58 = vrot.slane %v16892_v23, 5  ;;  %v3061_v18 = vmax.f32 %v2941_v9, 0.0 }
 0x51f   : > { %v5683_v43 = vsel %vm5631_vm14, %v16891_v20, %v5681_v41  ;;  %v16894_v26 = vrot.slane %v16806_v38, 5  ;;  %v3062_v12 = vmax.f32 %v2944_v53, 0.0  ;;  %v2936_v35 = vadd.f32 %v14368_v16, %v14137_v14 }
 0x520   : > { %v5707_v2 = vsel %vm5631_vm14, %v16893_v58, %v5705_v51  ;;  %v16896_v5 = vrot.slane %v16834_v37, 6  ;;  %v3059_v48 = vmax.f32 %v2933_v39, 0.0  ;;  %v16897_v38 = vrot.slane %v13647_v21, 5 }
 0x521   : > { %v5791_v59 = vsel %vm5631_vm14, %v16894_v26, %v5789_v49  ;;  %v16898_v14 = vrot.slane %v14154_v45, 2  ;;  %v14457_v37 = vpack.c.bf16 %v3062_v12, %v3061_v18  ;;  %v3060_v34 = vmax.f32 %v2936_v35, 0.0  ;;  %v16907_v49 = vld [vmem:[#allocation34_spill] sm:$0xff]  ;;  %v16912_v12 = vld [vmem:[#allocation49_spill] sm:$0xff] }
 0x522   : > { %v5793_v60 = vsel %vm5634_vm15, %v16808_v1, %v5791_v59  ;;  %v5813_v30 = vsel %vm5628_vm13, %v16896_v5, %v16895_v0  ;;  %v2957_v1 = vadd.f32 %v14170_v31, %v14368_v16  ;;  %v5685_v21 = vsel %vm5634_vm15, %v16900_v13, %v5683_v43  ;;  %v16909_v43 = vld [vmem:[#allocation50_spill] sm:$0xff] }
 0x523   : > { %v5795_v56 = vsel %vm5637_vm0, %v14160_v19, %v5793_v60  ;;  %v5815_v15 = vsel %vm5631_vm14, %v16897_v38, %v5813_v30  ;;  %16899 = vst [vmem:[#allocation26_spill] sm:$0xff] %v14457_v37  ;;  %v10934_v19 = vpop.f32.mrb[50].mxu0  ;;  %v5709_v10 = vsel %vm5634_vm15, %v16901_v3, %v5707_v2  ;;  %v2949_v45 = vadd.f32 %v14368_v16, %v14178_v40 }
 0x524   : > { %v14455_v28 = vsel %vm5640_vm1, %v16898_v14, %v5795_v56  ;;  %v5817_v9 = vsel %vm5634_vm15, %v16814_v54, %v5815_v15  ;;  %v2999_v41 = vpop.f32.mrb[51].mxu0  ;;  %v14469_v11 = vpack.c.bf16 %v3060_v34, %v3059_v48  ;;  %v16903_v36 = vrot.slane %v13649_v7, 2  ;;  %v16906_v7 = vld [vmem:[#allocation48_spill] sm:$0xff] }
 0x525   : > { %v5819_v31 = vsel %vm5637_vm0, %v16817_v27, %v5817_v9  ;;  %v2960_v51 = vadd.f32 %v16904_v4, %v14368_v16  ;;  %v2952_v61 = vadd.f32 %v14368_v16, %v16905_v57  ;;  %v3065_v46 = vmax.f32 %v2957_v1, 0.0  ;;  %v16915_v1 = vld [vmem:[#allocation31_spill] sm:$0xff]  ;;  %v6406_v4 = vpop.permute.xlu1 %6405 }
 0x526   : > { %16902 = vst [vmem:[#allocation25_spill] sm:$0xff] %v14469_v11  ;;  %v14474_v54 = vsel %vm5640_vm1, %v16903_v36, %v5819_v31  ;;  %v3063_v39 = vmax.f32 %v2949_v45, 0.0  ;;  %v2973_v27 = vadd.f32 %v14242_v25, %v14368_v16  ;;  %v2965_v8 = vadd.f32 %v14368_v16, %v14254_v22 }
 0x527   : > { %v3066_v40 = vmax.f32 %v2960_v51, 0.0  ;;  %v3064_v47 = vmax.f32 %v2952_v61, 0.0  ;;  %v2976_v33 = vadd.f32 %v16906_v7, %v14368_v16  ;;  %v5687_v53 = vsel %vm5637_vm0, %v16907_v49, %v5685_v21  ;;  %v6404_v21 = vpop.permute.xlu0 %6403 }
 0x528   : > { %v5711_v20 = vsel %vm5637_vm0, %v16908_v24, %v5709_v10  ;;  %v2968_v23 = vadd.f32 %v14368_v16, %v16909_v43  ;;  %v2989_v25 = vadd.f32 %v14289_v42, %v14368_v16  ;;  %v3069_v22 = vmax.f32 %v2973_v27, 0.0 }
 0x529   : > { %v14494_v58 = vpack.c.bf16 %v3066_v40, %v3065_v46  ;;  %v14496_v2 = vpack.c.bf16 %v3064_v47, %v3063_v39  ;;  %v3070_v18 = vmax.f32 %v2976_v33, 0.0  ;;  %v3067_v26 = vmax.f32 %v2965_v8, 0.0  ;;  %v16924_v39 = vld [vmem:[#allocation96_spill] sm:$0xff]  ;;  %v16926_v47 = vld [vmem:[#allocation115_spill] sm:$0xff]  ;;  %v16927_v8 = vld [vmem:[#allocation113_spill] sm:$0xff] }
 0x52a   : > { %v3068_v59 = vmax.f32 %v2968_v23, 0.0  ;;  %v2981_v60 = vadd.f32 %v14368_v16, %v14299_v55  ;;  %v2992_v35 = vadd.f32 %v16912_v12, %v14368_v16  ;;  %v2984_v5 = vadd.f32 %v14368_v16, %v14308_v29  ;;  %v16917_v29 = vld [vmem:[#allocation36_spill] sm:$0xff]  ;;  %v6542_v23 = vpop.permute.xlu1 %6541 }
 0x52b   : > { %16910 = vst [vmem:[#allocation30_spill] sm:$0xff] %v14494_v58  ;;  %16911 = vst [vmem:[#allocation69_spill] sm:$0xff] %v14496_v2  ;;  %v14502_v0 = vpack.c.bf16 %v3070_v18, %v3069_v22  ;;  %v3005_v42 = vadd.f32 %v10933_v62, %v14368_v16  ;;  %v2997_v30 = vadd.f32 %v14368_v16, %v2996_v52  ;;  %v3073_v56 = vmax.f32 %v2989_v25, 0.0  ;;  %v6540_v49 = vpop.permute.xlu0 %6539  ;;  %v16929_v25 = vld [vmem:[#allocation97_spill] sm:$0xff] }
 0x52c   : > { %v14508_v48 = vpack.c.bf16 %v3068_v59, %v3067_v26  ;;  %v3074_v38 = vmax.f32 %v2992_v35, 0.0  ;;  %v3008_v15 = vadd.f32 %v10934_v19, %v14368_v16  ;;  %v16916_v55 = vrot.slane %v16915_v1, 2  ;;  %v16931_v26 = vld [vmem:[#allocation114_spill] sm:$0xff]  ;;  %v16935_v1 = vld [vmem:[#allocation136_spill] sm:$0xff] }
 0x52d   : > { %16913 = vst [vmem:[#allocation71_spill] sm:$0xff] %v14502_v0  ;;  %v3071_v34 = vmax.f32 %v2981_v60, 0.0  ;;  %v3072_v9 = vmax.f32 %v2984_v5, 0.0  ;;  %v3000_v13 = vadd.f32 %v14368_v16, %v2999_v41  ;;  %v16918_v3 = vrot.slane %v16917_v29, 2  ;;  %v16923_v41 = vld [vmem:[#allocation99_spill] sm:$0xff] }
 0x52e   : > { %16914 = vst [vmem:[#allocation73_spill] sm:$0xff] %v14508_v48  ;;  %v5689_v14 = vsel %vm5640_vm1, %v16916_v55, %v5687_v53  ;;  %v14518_v52 = vpack.c.bf16 %v3074_v38, %v3073_v56  ;;  %v3077_v10 = vmax.f32 %v3005_v42, 0.0  ;;  %v3078_v31 = vmax.f32 %v3008_v15, 0.0  ;;  %v11274_v42 = vld [vmem:[%s16271_s7 + $0x8] sm:$0xff]   ;;  %v16936_v55 = vld [vmem:[#allocation64_spill] sm:$0xff]  ;;  %v16938_v29 = vld [vmem:[#allocation63_spill] sm:$0xff] }
 0x52f   : > { %v5713_v62 = vsel %vm5640_vm1, %v16918_v3, %v5711_v20  ;;  %v14520_v45 = vpack.c.bf16 %v3072_v9, %v3071_v34  ;;  %v3075_v19 = vmax.f32 %v2997_v30, 0.0  ;;  %v3076_v36 = vmax.f32 %v3000_v13, 0.0  ;;  %v16933_v30 = vld [vmem:[#allocation98_spill] sm:$0xff]  ;;  %v16934_v38 = vld [vmem:[#allocation41_spill] sm:$0xff]  ;;  %v16937_v34 = vld [vmem:[#allocation135_spill] sm:$0xff] }
 0x530   : > { %16919 = vst [vmem:[#allocation78_spill] sm:$0xff] %v14518_v52  ;;  %v14522_v51 = vpack.c.bf16 %v3078_v31, %v3077_v10  ;;  %v5826_v57 = vpack.c.b16 %v5689_v14, %v5689_v14  ;;  %v5828_v61 = vpack.c.b16 %v5713_v62, %v5713_v62  ;;  %v16925_v27 = vrot.slane %v16924_v39, 6  ;;  %v11275_v13 = vld [vmem:[%s16271_s7 + $0x10] sm:$0xff]  }
 0x531   : > { %16920 = vst [vmem:[#allocation72_spill] sm:$0xff] %v14520_v45  ;;  %v14524_v46 = vpack.c.bf16 %v3076_v36, %v3075_v19  ;;  %v16928_v7 = vrot.slane %v16927_v8, 6  ;;  %v16930_v22 = vrot.slane %v16929_v25, 5  ;;  %v16932_v59 = vrot.slane %v16931_v26, 5  ;;  %v16940_v10 = vld [vmem:[#allocation134_spill] sm:$0xff]  ;;  %v11276_v36 = vld [vmem:[%s16271_s7 + $0x18] sm:$0xff]  }
 0x532   : > { %16921 = vst [vmem:[#allocation15_spill] sm:$0xff] %v14522_v51  ;;  %v5729_v40 = vsel %vm5628_vm13, %v16925_v27, %v16923_v41  ;;  %v5858_v53 = vsel %vm11698_vm5, 0, %v5826_v57  ;;  %v5860_v24 = vsel %vm11698_vm5, 0, %v5828_v61  ;;  %v16939_v3 = vrot.slane %v16938_v29, 2  ;;  %v10937_v61 = vpop.f32.mrb[52].mxu0  ;;  %v6410_v41 = vpop.permute.xlu1 %6409  ;;  %v16942_v39 = vld [vmem:[#allocation126_spill] sm:$0xff] }
 0x533   : > { %16922 = vst [vmem:[#allocation13_spill] sm:$0xff] %v14524_v46  ;;  %v5753_v33 = vsel %vm5628_vm13, %v16928_v7, %v16926_v47  ;;  %v6559_v20 = vsel %vm914_vm7, %v5858_v53, %v6404_v21  ;;  %v6562_v43 = vsel %vm914_vm7, %v5860_v24, %v6406_v4  ;;  %v5731_v18 = vsel %vm5631_vm14, %v16930_v22, %v5729_v40  ;;  %v6408_v21 = vpop.permute.xlu0 %6407  ;;  %v16943_v27 = vld [vmem:[#allocation123_spill] sm:$0xff]  ;;  %v11277_v8 = vld [vmem:[%s16271_s7 + $0x20] sm:$0xff]  }
 0x534   : > { %v5755_v60 = vsel %vm5631_vm14, %v16932_v59, %v5753_v33  ;;  %v6580_v12 = vsel %vm2039_vm9, %v6559_v20, %v6540_v49  ;;  %v6582_v35 = vsel %vm2039_vm9, %v6562_v43, %v6542_v23  ;;  %v5733_v56 = vsel %vm5634_vm15, %v16933_v30, %v5731_v18  ;;  %v3012_v33 = vpop.f32.mrb[53].mxu0  ;;  %v16945_v59 = vld [vmem:[#allocation124_spill] sm:$0xff]  ;;  %v11278_v30 = vld [vmem:[%s16271_s7 + $0x28] sm:$0xff]   ;;  %v16951_v29 = vld [vmem:[#allocation27_spill] sm:$0xff] }
 0x535   : > { %v10305_v5 = vcombine.low %v6580_v12, %v6582_v35  ;;  %v5757_v15 = vsel %vm5634_vm15, %v16934_v38, %v5755_v60  ;;  %v5735_v14 = vsel %vm5637_vm0, %v16936_v55, %v5733_v56  ;;  %v16941_v31 = vrot.slane %v16940_v10, 2  ;;  %v10938_v24 = vpop.f32.mrb[54].mxu0 }
 0x536   : > { %v5759_v9 = vsel %vm5637_vm0, %v16937_v34, %v5757_v15  ;;  %v5737_v62 = vsel %vm5640_vm1, %v16939_v3, %v5735_v14  ;;  %v16944_v40 = vrot.slane %v16943_v27, 6  ;;  %v3021_v7 = vadd.f32 %v10937_v61, %v14368_v16  ;;  %v3015_v25 = vpop.f32.mrb[55].mxu0  ;;  %v6546_v26 = vpop.permute.xlu1 %6545  ;;  %v16947_v14 = vld [vmem:[#allocation20_spill] sm:$0xff]  ;;  %v16956_v61 = vld [vmem:[#allocation18_spill] sm:$0xff]  ;;  %v16958_v27 = vld [vmem:[#allocation29_spill] sm:$0xff] }
 0x537   : > { %10960 = vmatmul.mubr.msk.bf16.vlgmr.msra.gmra.mrb[32].mxu1 %vm2119_vm10, %v10305_v5  ;;  %v5761_v19 = vsel %vm5640_vm1, %v16941_v31, %v5759_v9  ;;  %v5830_v4 = vpack.c.b16 %v5737_v62, %v5737_v62  ;;  %v6544_v49 = vpop.permute.xlu0 %6543  ;;  %v3013_v53 = vadd.f32 %v14368_v16, %v3012_v33  ;;  %v3024_v23 = vadd.f32 %v10938_v24, %v14368_v16  ;;  %v16948_v34 = vld [vmem:[#allocation16_spill] sm:$0xff] }
 0x538   : > { %10968 = vmatpush3.bf16.msra.mxu1 %v16935_v1  ;;  %v5832_v57 = vpack.c.b16 %v5761_v19, %v5761_v19  ;;  %v5777_v47 = vsel %vm5628_vm13, %v16944_v40, %v16942_v39  ;;  %v16946_v60 = vrot.slane %v16945_v59, 5  ;;  %v3016_v35 = vadd.f32 %v14368_v16, %v3015_v25  ;;  %v16954_v19 = vld [vmem:[#allocation125_spill] sm:$0xff]  ;;  %v16962_v24 = vld [vmem:[#allocation28_spill] sm:$0xff] }
 0x539   : > { %10969 = vmatprep.subr.bf16.mxu1 %v11274_v42  ;;  %v5862_v20 = vsel %vm11698_vm5, 0, %v5830_v4  ;;  %v3081_v56 = vmax.f32 %v3021_v7, 0.0  ;;  %v3082_v38 = vmax.f32 %v3024_v23, 0.0  ;;  %v3079_v1 = vmax.f32 %v3013_v53, 0.0  ;;  %v16960_v7 = vld [vmem:[#allocation138_spill] sm:$0xff] }
 0x53a   : > { %v5864_v43 = vsel %vm11698_vm5, 0, %v5832_v57  ;;  %v6565_v22 = vsel %vm914_vm7, %v5862_v20, %v6408_v21  ;;  %v5779_v12 = vsel %vm5631_vm14, %v16946_v60, %v5777_v47  ;;  %v3080_v55 = vmax.f32 %v3016_v35, 0.0  ;;  %v16950_v21 = vld [vmem:[#allocation32_spill] sm:$0xff] }
 0x53b   : > { %v6568_v18 = vsel %vm914_vm7, %v5864_v43, %v6410_v41  ;;  %v6584_v5 = vsel %vm2039_vm9, %v6565_v22, %v6544_v49  ;;  %v16949_v9 = vrot.slane %v16948_v34, 6  ;;  %v16952_v3 = vrot.slane %v16951_v29, 6  ;;  %v6412_v31 = vpop.permute.xlu0 %6411  ;;  %v14616_v57 = vld [vmem:[%s16271_s7 + $0x60] sm:$0xff]   ;;  %v16961_v49 = vld [vmem:[#allocation17_spill] sm:$0xff] }
 0x53c   : > { %10970 = vmatpush3.bf16.msra.mxu1 %v11274_v42  ;;  %v6586_v42 = vsel %vm2039_vm9, %v6568_v18, %v6546_v26  ;;  %v14606_v10 = vpack.c.bf16 %v3082_v38, %v3081_v56  ;;  %v14611_v4 = vpack.c.bf16 %v3080_v55, %v3079_v1  ;;  %v16957_v41 = vrot.slane %v16956_v61, 5  ;;  %v16963_v43 = vld [vmem:[#allocation137_spill] sm:$0xff]  ;;  %v16969_v38 = vld [vmem:[#allocation100_spill] sm:$0xff] }
 0x53d   : > { %10971 = vmatprep.subr.bf16.mxu1 %v11275_v13  ;;  %v10306_v15 = vcombine.low %v6584_v5, %v6586_v42  ;;  %v5669_v62 = vsel %vm5628_vm13, %v16952_v3, %v16950_v21  ;;  %v16959_v40 = vrot.slane %v16958_v27, 5  ;;  %v16964_v23 = vrot.slane %v16963_v43, 2  ;;  %v16965_v22 = vld [vmem:[#allocation65_spill] sm:$0xff]  ;;  %v16967_v42 = vld [vmem:[#allocation62_spill] sm:$0xff] }
 0x53e   : > { %16953 = vst [vmem:[#allocation74_spill] sm:$0xff] %v14606_v10  ;;  %16955 = vst [vmem:[#allocation75_spill] sm:$0xff] %v14611_v4  ;;  %v16966_v26 = vld [vmem:[#allocation101_spill] sm:$0xff]  ;;  %v5836_v5 = vpack.c.b16 %v14373_v6, %v14373_v6 }
 0x53f   : > { %10963 = vmatprep.mubr.msk.bf16.mxu1 %vm2119_vm10, %v10306_v15  ;;  %v5671_v47 = vsel %vm5631_vm14, %v16959_v40, %v5669_v62  ;;  %v16970_v15 = vrot.slane %v16969_v38, 2  ;;  %v16972_v27 = vld [vmem:[#allocation53_spill] sm:$0xff] }
 0x540   : > { %10972 = vmatpush3.bf16.msra.mxu1 %v11275_v13  ;;  %v5645_v13 = vsel %vm5628_vm13, %v16949_v9, %v16947_v14  ;;  %v5673_v20 = vsel %vm5634_vm15, %v16962_v24, %v5671_v47  ;;  %v5868_v34 = vsel %vm11698_vm5, 0, %v5836_v5 }
 0x541   : > { %10973 = vmatprep.subr.bf16.mxu1 %v11276_v36  ;;  %v5647_v39 = vsel %vm5631_vm14, %v16957_v41, %v5645_v13  ;;  %v5675_v59 = vsel %vm5637_vm0, %v16966_v26, %v5673_v20  ;;  %v5829_v20 = vpack.c.b16 %v14383_v44, %v14383_v44 }
 0x542   : > { %v5649_v53 = vsel %vm5634_vm15, %v16961_v49, %v5647_v39  ;;  %v5677_v1 = vsel %vm5640_vm1, %v16970_v15, %v5675_v59  ;;  %v16971_v39 = vld [vmem:[#allocation47_spill] sm:$0xff]  ;;  %v16973_v49 = vld [vmem:[#allocation10_spill] sm:$0xff] }
 0x543   : > { %v5651_v18 = vsel %vm5637_vm0, %v16965_v22, %v5649_v53  ;;  %v5825_v13 = vpack.c.b16 %v5677_v1, %v5677_v1 }
 0x544   : > { %10974 = vmatpush3.bf16.msra.mxu1 %v11276_v36  ;;  %v5781_v36 = vsel %vm5634_vm15, %v16954_v19, %v5779_v12 }
 0x545   : > { %10975 = vmatprep.subr.bf16.mxu1 %v11277_v8  ;;  %v5783_v33 = vsel %vm5637_vm0, %v16960_v7, %v5781_v36  ;;  %v5857_v41 = vsel %vm11698_vm5, 0, %v5825_v13  ;;  %v5827_v7 = vpack.c.b16 %v14343_v32, %v14343_v32 }
 0x546   : > { %v5785_v25 = vsel %vm5640_vm1, %v16964_v23, %v5783_v33  ;;  %v6177_v40 = vsel %vm914_vm7, %v5857_v41, %v16972_v27 }
 0x547   : > { %v5834_v12 = vpack.c.b16 %v5785_v25, %v5785_v25  ;;  %v6414_v35 = vpop.permute.xlu1 %6413  ;;  %v5859_v32 = vsel %vm11698_vm5, 0, %v5827_v7 }
 0x548   : > { %10976 = vmatpush3.bf16.msra.mxu1 %v11277_v8  ;;  %v6548_v8 = vpop.permute.xlu0 %6547  ;;  %v6574_v6 = vsel %vm914_vm7, %v5868_v34, %v6414_v35  ;;  %v11280_v35 = vld [vmem:[%s16271_s7 + $0x68] sm:$0xff]  }
 0x549   : > { %10977 = vmatprep.subr.bf16.mxu1 %v11278_v30  ;;  %v5866_v14 = vsel %vm11698_vm5, 0, %v5834_v12  ;;  %v5861_v12 = vsel %vm11698_vm5, 0, %v5829_v20 }
 0x54a   : > { %v6571_v21 = vsel %vm914_vm7, %v5866_v14, %v6412_v31 }
 0x54b   : > { %v6588_v3 = vsel %vm2039_vm9, %v6571_v21, %v6548_v8 }
 0x54c   : > { %10978 = vmatpush3.bf16.msra.mxu1 %v11278_v30  ;;  %v6149_v60 = vpop.permute.xlu0 %6148  ;;  %v16968_v30 = vrot.slane %v16967_v42, 2 }
 0x54d   : > { %10987 = vmatprep.subr.bf16.mxu1 %v14616_v57  ;;  %v6180_v23 = vsel %vm914_vm7, %v5859_v32, %v6149_v60 }
 0x54e   : > { %v5653_v56 = vsel %vm5640_vm1, %v16968_v30, %v5651_v18 }
 0x54f   : > { %v5823_v9 = vpack.c.b16 %v5653_v56, %v5653_v56  ;;  %v6550_v29 = vpop.permute.xlu1 %6549  ;;  %v10941_v22 = vpop.f32.mrb[56].mxu0 }
 0x550   : > { %v6161_v55 = vpop.permute.xlu0 %6160  ;;  %v6590_v62 = vsel %vm2039_vm9, %v6574_v6, %v6550_v29  ;;  %v3037_v26 = vadd.f32 %v10941_v22, %v14368_v16  ;;  %v3028_v59 = vpop.f32.mrb[57].mxu0 }
 0x551   : > { %v10307_v19 = vcombine.low %v6588_v3, %v6590_v62  ;;  %v5855_v61 = vsel %vm11698_vm5, 0, %v5823_v9  ;;  %v14666_v33 = vsel %vm2039_vm9, %v6177_v40, %v6161_v55  ;;  %v3029_v60 = vadd.f32 %v14368_v16, %v3028_v59  ;;  %v10942_v5 = vpop.f32.mrb[58].mxu0  ;;  %v11281_v9 = vld [vmem:[%s16271_s7 + $0x70] sm:$0xff]  }
 0x552   : > { %v6174_v31 = vsel %vm914_vm7, %v5855_v61, %v16971_v39  ;;  %v3040_v56 = vadd.f32 %v10942_v5, %v14368_v16  ;;  %v3031_v38 = vpop.f32.mrb[59].mxu0  ;;  %v3085_v14 = vmax.f32 %v3037_v26, 0.0  ;;  %v5833_v62 = vpack.c.b16 %v14409_v63, %v14409_v63  ;;  %v11283_v61 = vld [vmem:[%s16271_s7 + $0x80] sm:$0xff]  }
 0x553   : > { %10964 = vmatmul.mubr.msk.bf16.gmra.mrb[36].mxu1 %vm2119_vm10, %v10307_v19  ;;  %v3032_v1 = vadd.f32 %v14368_v16, %v3031_v38  ;;  %v3083_v13 = vmax.f32 %v3029_v60, 0.0  ;;  %v5831_v19 = vpack.c.b16 %v14420_v50, %v14420_v50  ;;  %v5835_v63 = vpack.c.b16 %v14455_v28, %v14455_v28 }
 0x554   : > { %v6151_v36 = vpop.permute.xlu0 %6150  ;;  %v3086_v34 = vmax.f32 %v3040_v56, 0.0  ;;  %v5865_v39 = vsel %vm11698_vm5, 0, %v5833_v62  ;;  %v11289_v62 = vld [vmem:[%s16273_s9 + $0x78] sm:$0xff]  }
 0x555   : > { %v6183_v42 = vsel %vm914_vm7, %v5861_v12, %v6151_v36  ;;  %v3084_v21 = vmax.f32 %v3032_v1, 0.0  ;;  %v5867_v28 = vsel %vm11698_vm5, 0, %v5835_v63  ;;  %v11299_v63 = vld [vmem:[%s16273_s9 + $0x30] sm:$0xff]  }
 0x556   : > { %v6159_v47 = vpop.permute.xlu1 %6158  ;;  %v14703_v29 = vpack.c.bf16 %v3086_v34, %v3085_v14 }
 0x557   : > { %v14669_v8 = vsel %vm2039_vm9, %v6174_v31, %v6159_v47  ;;  %v14705_v3 = vpack.c.bf16 %v3084_v21, %v3083_v13  ;;  %v5863_v31 = vsel %vm11698_vm5, 0, %v5831_v19  ;;  %v11288_v13 = vld [vmem:[%s16273_s9] sm:$0xff]   ;;  %v11290_v21 = vld [vmem:[%s16273_s9 + $0x8] sm:$0xff]   ;;  %v11294_v19 = vld [vmem:[%s16273_s9 + $0x18] sm:$0xff]  }
 0x558   : > { %v10318_v53 = vcombine.low %v16973_v49, %v14669_v8  ;;  %v10332_v24 = vcombine.low %v14669_v8, %v14666_v33  ;;  %16974 = vst [vmem:[#allocation14_spill] sm:$0xff] %v14703_v29  ;;  %v11284_v49 = vld [vmem:[%s16271_s7 + $0x88] sm:$0xff]  }
 0x559   : > { %16975 = vst [vmem:[#allocation19_spill] sm:$0xff] %v14705_v3 }
 0x55a   : > { %10979 = vmatprep.mubr.msk.bf16.mxu1 %vm2119_vm10, %v10318_v53 }
 0x55c   : > { %v6155_v43 = vpop.permute.xlu0 %6154 }
 0x55d   : > { %v6189_v27 = vsel %vm914_vm7, %v5865_v39, %v6155_v43  ;;  %v5837_v43 = vpack.c.b16 %v14474_v54, %v14474_v54  ;;  %v11297_v39 = vld [vmem:[%s16273_s9 + $0x28] sm:$0xff]  }
 0x55e   : > { %v6163_v25 = vpop.permute.xlu1 %6162 }
 0x55f   : > { %v14682_v18 = vsel %vm2039_vm9, %v6180_v23, %v6163_v25  ;;  %v5869_v26 = vsel %vm11698_vm5, 0, %v5837_v43  ;;  %v11308_v43 = vld [vmem:[%s16273_s9 + $0x58] sm:$0xff]  }
 0x560   : > { %v10319_v44 = vcombine.low %v14666_v33, %v14682_v18 }
 0x562   : > { %v6165_v30 = vpop.permute.xlu0 %6164  ;;  %10980 = vmatmul.mubr.msk.bf16.vlgmr.msra.gmra.mrb[32].mxu1 %vm2119_vm10, %v10319_v44 }
 0x563   : > { %v6200_v15 = vsel %vm2039_vm9, %v6183_v42, %v6165_v30  ;;  %10988 = vmatpush3.bf16.msra.mxu1 %v14616_v57  ;;  %v11282_v57 = vld [vmem:[%s16271_s7 + $0x78] sm:$0xff]  }
 0x564   : > { %v10333_v55 = vcombine.low %v14682_v18, %v6200_v15  ;;  %10989 = vmatprep.subr.bf16.mxu1 %v11280_v35 }
 0x567   : > { %10990 = vmatpush3.bf16.msra.mxu1 %v11280_v35  ;;  %v16976_v35 = vmov 0  }
 0x568   : > { %10991 = vmatprep.subr.bf16.mxu1 %v11281_v9 }
 0x569   : > { %v6153_v6 = vpop.permute.xlu1 %6152 }
 0x56a   : > { %v6169_v41 = vpop.permute.xlu0 %6168  ;;  %v6186_v50 = vsel %vm914_vm7, %v5863_v31, %v6153_v6  ;;  %v11287_v6 = vld [vmem:[%s16273_s9 + $0x70] sm:$0xff]  }
 0x56b   : > { %10992 = vmatpush3.bf16.msra.mxu1 %v11281_v9  ;;  %v6204_v47 = vsel %vm2039_vm9, %v6189_v27, %v6169_v41  ;;  %v11293_v41 = vld [vmem:[%s16273_s9 + $0x88] sm:$0xff]   ;;  %v11296_v31 = vld [vmem:[%s16273_s9 + $0x90] sm:$0xff]   ;;  %v11298_v27 = vld [vmem:[%s16273_s9 + $0x98] sm:$0xff]  }
 0x56c   : > { %10993 = vmatprep.subr.bf16.mxu1 %v11282_v57  ;;  %v10945_v60 = vpop.f32.mrb[60].mxu0 }
 0x56d   : > { %v3053_v5 = vadd.f32 %v10945_v60, %v14368_v16  ;;  %v3044_v42 = vpop.f32.mrb[61].mxu0 }
 0x56e   : > { %v3045_v30 = vadd.f32 %v14368_v16, %v3044_v42  ;;  %v10946_v56 = vpop.f32.mrb[62].mxu0 }
 0x56f   : > { %10994 = vmatpush3.bf16.msra.mxu1 %v11282_v57  ;;  %v3056_v38 = vadd.f32 %v10946_v56, %v14368_v16  ;;  %v3089_v8 = vmax.f32 %v3053_v5, 0.0  ;;  %v11292_v57 = vld [vmem:[%s16273_s9 + $0x10] sm:$0xff]  }
 0x570   : > { %10995 = vmatprep.subr.bf16.mxu1 %v11283_v61  ;;  %v3087_v1 = vmax.f32 %v3045_v30, 0.0 }
 0x572   : > { %v6157_v36 = vpop.permute.xlu1 %6156 }
 0x573   : > { %v6192_v32 = vsel %vm914_vm7, %v5867_v28, %v6157_v36  ;;  %10996 = vmatpush3.bf16.msra.mxu1 %v11283_v61  ;;  %v11291_v36 = vld [vmem:[%s16273_s9 + $0x80] sm:$0xff]   ;;  %v11307_v28 = vld [vmem:[%s16273_s9 + $0xb8] sm:$0xff]  }
 0x574   : > { %10997 = vmatprep.subr.bf16.mxu1 %v11284_v49  ;;  %v11295_v61 = vld [vmem:[%s16273_s9 + $0x20] sm:$0xff]  }
 0x575   : > { %v6882_v25 = vpop.permute.xlu0 %6881 }
 0x576   : > { %v6167_v40 = vpop.permute.xlu1 %6166  ;;  %v6902_v59 = vsel %vm914_vm7, %v5869_v26, %v6882_v25 }
 0x577   : > { %v6202_v7 = vsel %vm2039_vm9, %v6186_v50, %v6167_v40  ;;  %10998 = vmatpush3.bf16.msra.mxu1 %v11284_v49  ;;  %v11301_v50 = vld [vmem:[%s16273_s9 + $0x38] sm:$0xff]   ;;  %v11300_v40 = vld [vmem:[%s16273_s9 + $0xa0] sm:$0xff]   ;;  %v11304_v49 = vld [vmem:[%s16273_s9 + $0x48] sm:$0xff]  }
 0x578   : > { %v10320_v53 = vcombine.low %v6200_v15, %v6202_v7  ;;  %v10334_v20 = vcombine.low %v6202_v7, %v6204_v47  ;;  %7582 = vmatprep.subr.bf16.mxu1 %v16976_v35  ;;  %v3047_v15 = vpop.f32.mrb[63].mxu0  ;;  %v11303_v7 = vld [vmem:[%s16273_s9 + $0xa8] sm:$0xff]  }
 0x579   : > { %v3048_v33 = vadd.f32 %v14368_v16, %v3047_v15  ;;  %v11286_v16 = vld [vmem:[%s16273_s9 + $0x68] sm:$0xff]  }
 0x57a   : > { %10983 = vmatprep.mubr.msk.bf16.mxu1 %vm2119_vm10, %v10320_v53  ;;  %v11305_v53 = vld [vmem:[%s16273_s9 + $0xb0] sm:$0xff]  }
 0x57b   : > { %v3088_v14 = vmax.f32 %v3048_v33, 0.0 }
 0x57d   : > { %v6171_v23 = vpop.permute.xlu1 %6170  ;;  %v14755_v9 = vpack.c.bf16 %v3088_v14, %v3087_v1 }
 0x57e   : > { %v6206_v22 = vsel %vm2039_vm9, %v6192_v32, %v6171_v23  ;;  %v10346_v32 = vld [vmem:[%s16272_s8] ss:$0 sm:$0xff] }
 0x57f   : > { %v10321_v18 = vcombine.low %v6204_v47, %v6206_v22  ;;  %16978 = vst [vmem:[#allocation35_spill] sm:$0xff] %v14755_v9  ;;  %v11302_v47 = vld [vmem:[%s16273_s9 + $0x40] sm:$0xff]  }
 0x581   : > { %v6899_v12 = vpop.permute.xlu1 %6898  ;;  %10984 = vmatmul.mubr.msk.bf16.gmra.mrb[36].mxu1 %vm2119_vm10, %v10321_v18 }
 0x582   : > { %v6904_v54 = vsel %vm2039_vm9, %v6902_v59, %v6899_v12  ;;  %10999 = vmatprep.mubr.msk.bf16.mxu1 %vm2119_vm10, %v10332_v24  ;;  %v3090_v24 = vmax.f32 %v3056_v38, 0.0 }
 0x583   : > { %v10335_v44 = vcombine.low %v6206_v22, %v6904_v54 }
 0x584   : > { %v14753_v34 = vpack.c.bf16 %v3090_v24, %v3089_v8 }
 0x586   : > { %16977 = vst [vmem:[#allocation66_spill] sm:$0xff] %v14753_v34 }
 0x589   : > { %11000 = vmatmul.mubr.msk.bf16.vlgmr.msra.gmra.mrb[32].mxu1 %vm2119_vm10, %v10333_v55  ;;  %v11285_v55 = vld [vmem:[%s16273_s9 + $0x60] sm:$0xff]  }
 0x58a   : > { %11003 = vmatprep.mubr.msk.bf16.mxu1 %vm2119_vm10, %v10334_v20  ;;  %7422 = vmatpush1.bf16.msra.mxu0 %v11285_v55  ;;  %v11306_v20 = vld [vmem:[%s16273_s9 + $0x50] sm:$0xff]  }
 0x58b   : > { %7423 = vmatprep.subr.bf16.mxu0 %v16976_v35  ;;  %7583 = vmatpush1.bf16.msra.mxu1 %v11288_v13 }
 0x58c   : > { %7584 = vmatprep.subr.bf16.mxu1 %v16976_v35 }
 0x58e   : > { %7424 = vmatpush1.bf16.msra.mxu0 %v11286_v16 }
 0x58f   : > { %7425 = vmatprep.subr.bf16.mxu0 %v16976_v35  ;;  %7585 = vmatpush1.bf16.msra.mxu1 %v11290_v21 }
 0x590   : > { %7586 = vmatprep.subr.bf16.mxu1 %v16976_v35 }
 0x591   : > { %11004 = vmatmul.mubr.msk.bf16.gmra.mrb[36].mxu1 %vm2119_vm10, %v10335_v44 }
 0x592   : > { %7426 = vmatpush1.bf16.msra.mxu0 %v11287_v6 }
 0x593   : > { %7427 = vmatprep.subr.bf16.mxu0 %v16976_v35  ;;  %7587 = vmatpush1.bf16.msra.mxu1 %v11292_v57 }
 0x594   : > { %7588 = vmatprep.subr.bf16.mxu1 %v16976_v35 }
 0x596   : > { %7428 = vmatpush1.bf16.msra.mxu0 %v11289_v62 }
 0x597   : > { %7429 = vmatprep.subr.bf16.mxu0 %v16976_v35  ;;  %7589 = vmatpush1.bf16.msra.mxu1 %v11294_v19 }
 0x598   : > { %7590 = vmatprep.subr.bf16.mxu1 %v16976_v35 }
 0x59a   : > { %7430 = vmatpush1.bf16.msra.mxu0 %v11291_v36 }
 0x59b   : > { %7431 = vmatprep.subr.bf16.mxu0 %v16976_v35  ;;  %7591 = vmatpush1.bf16.msra.mxu1 %v11295_v61 }
 0x59c   : > { %7592 = vmatprep.subr.bf16.mxu1 %v16976_v35 }
 0x59e   : > { %7432 = vmatpush1.bf16.msra.mxu0 %v11293_v41 }
 0x59f   : > { %7433 = vmatprep.subr.bf16.mxu0 %v16976_v35  ;;  %7593 = vmatpush1.bf16.msra.mxu1 %v11297_v39 }
 0x5a0   : > { %7594 = vmatprep.subr.bf16.mxu1 %v16976_v35 }
 0x5a2   : > { %7434 = vmatpush1.bf16.msra.mxu0 %v11296_v31 }
 0x5a3   : > { %7435 = vmatprep.subr.bf16.mxu0 %v16976_v35  ;;  %7595 = vmatpush1.bf16.msra.mxu1 %v11299_v63 }
 0x5a4   : > { %7596 = vmatprep.subr.bf16.mxu1 %v16976_v35 }
 0x5a6   : > { %7436 = vmatpush1.bf16.msra.mxu0 %v11298_v27 }
 0x5a7   : > { %7437 = vmatprep.subr.bf16.mxu0 %v16976_v35  ;;  %7597 = vmatpush1.bf16.msra.mxu1 %v11301_v50 }
 0x5a8   : > { %7598 = vmatprep.subr.bf16.mxu1 %v16976_v35 }
 0x5aa   : > { %7438 = vmatpush1.bf16.msra.mxu0 %v11300_v40 }
 0x5ab   : > { %7439 = vmatprep.subr.bf16.mxu0 %v16976_v35  ;;  %7599 = vmatpush1.bf16.msra.mxu1 %v11302_v47 }
 0x5ac   : > { %7600 = vmatprep.subr.bf16.mxu1 %v16976_v35 }
 0x5ae   : > { %7440 = vmatpush1.bf16.msra.mxu0 %v11303_v7 }
 0x5af   : > { %7601 = vmatpush1.bf16.msra.mxu1 %v11304_v49  ;;  %7441 = vmatprep.subr.bf16.mxu0 %v16976_v35 }
 0x5b0   : > { %7602 = vmatprep.subr.bf16.mxu1 %v16976_v35 }
 0x5b2   : > { %7442 = vmatpush1.bf16.msra.mxu0 %v11305_v53 }
 0x5b3   : > { %7603 = vmatpush1.bf16.msra.mxu1 %v11306_v20  ;;  %7443 = vmatprep.subr.bf16.mxu0 %v16976_v35 }
 0x5b4   : > { %7604 = vmatprep.subr.bf16.mxu1 %v16976_v35 }
 0x5b6   : > { %7444 = vmatpush1.bf16.msra.mxu0 %v11307_v28 }
 0x5b7   : > { %7605 = vmatpush1.bf16.msra.mxu1 %v11308_v43  ;;  %7725 = vmatprep.subr.bf16.mxu0 %v16976_v35 }
 0x65c   : > { %v11001_v23 = vpop.f32.mrb[32].mxu1 }
 0x65d   : > { %v7040_v25 = vadd.f32 %v11001_v23, %v10346_v32  ;;  %v6993_v22 = vpop.f32.mrb[33].mxu1 }
 0x65e   : > { %v7038_v18 = vadd.f32 %v10346_v32, %v6993_v22  ;;  %v11002_v26 = vpop.f32.mrb[34].mxu1 }
 0x65f   : > { %v7048_v59 = vmax.f32 %v7040_v25, 0.0  ;;  %v7041_v12 = vadd.f32 %v11002_v26, %v10346_v32  ;;  %v6996_v54 = vpop.f32.mrb[35].mxu1 }
 0x660   : > { %v7046_v44 = vmax.f32 %v7038_v18, 0.0  ;;  %v7039_v60 = vadd.f32 %v10346_v32, %v6996_v54 }
 0x661   : > { %v14856_v5 = vpack.c.bf16 %v7048_v59, %v7048_v59  ;;  %v7049_v42 = vmax.f32 %v7041_v12, 0.0 }
 0x662   : > { %v7054_v30 = vpack.c.bf16 %v7046_v44, %v7046_v44  ;;  %v7047_v56 = vmax.f32 %v7039_v60, 0.0 }
 0x663   : > { %v7153_v38 = vshll.u32 %v14856_v5, 16  ;;  %v14859_v15 = vpack.c.bf16 %v7049_v42, %v7049_v42  ;;  %v7150_v16 = vshrl.u32 %v14856_v5, 16 }
 0x664   : > { %v7139_v33 = vshll.u32 %v7054_v30, 16  ;;  %v14861_v8 = vpack.c.bf16 %v7047_v56, %v7047_v56  ;;  %7249 = vrot.lane.b32.xlu0 %v7054_v30, %s11393_s16  ;;  %v11005_v24 = vpop.f32.mrb[36].mxu1  ;;  %v7136_v1 = vshrl.u32 %v7054_v30, 16 }
 0x665   : > { %v7160_v14 = vshll.u32 %v14859_v15, 16  ;;  %v7044_v55 = vadd.f32 %v11005_v24, %v10346_v32  ;;  %v7009_v13 = vpop.f32.mrb[37].mxu1  ;;  %v7211_v19 = vrot.slane %v7153_v38, 1  ;;  %v7157_v23 = vshrl.u32 %v14859_v15, 16 }
 0x666   : > { %v7207_v21 = vrot.slane %v7139_v33, 1  ;;  %v7146_v6 = vshll.u32 %v14861_v8, 16  ;;  %v7042_v57 = vadd.f32 %v10346_v32, %v7009_v13  ;;  %7251 = vrot.lane.b32.xlu1 %v14861_v8, %s11393_s16  ;;  %v11006_v62 = vpop.f32.mrb[38].mxu1  ;;  %v7143_v36 = vshrl.u32 %v14861_v8, 16 }
 0x667   : > { %v7052_v61 = vmax.f32 %v7044_v55, 0.0  ;;  %v7045_v41 = vadd.f32 %v11006_v62, %v10346_v32  ;;  %v7012_v39 = vpop.f32.mrb[39].mxu1  ;;  %v7213_v47 = vrot.slane %v7160_v14, 1  ;;  %v7138_v53 = vrot.slane %v7136_v1, 7 }
 0x668   : > { %v7208_v63 = vor.u32 %v7207_v21, %v7136_v1  ;;  %v7209_v27 = vrot.slane %v7146_v6, 1  ;;  %v7050_v50 = vmax.f32 %v7042_v57, 0.0  ;;  %v7043_v40 = vadd.f32 %v10346_v32, %v7012_v39  ;;  %7253 = vrot.lane.b32.xlu0 %v14856_v5, %s11393_s16 }
 0x669   : > { %v14882_v7 = vpack.c.bf16 %v7052_v61, %v7052_v61  ;;  %v7053_v49 = vmax.f32 %v7045_v41, 0.0  ;;  %v7212_v26 = vor.u32 %v7211_v19, %v7150_v16  ;;  %v7214_v44 = vor.u32 %v7213_v47, %v7157_v23 }
 0x66a   : > { %v7210_v20 = vor.u32 %v7209_v27, %v7143_v36  ;;  %v14884_v28 = vpack.c.bf16 %v7050_v50, %v7050_v50  ;;  %v7051_v43 = vmax.f32 %v7043_v40, 0.0  ;;  %7255 = vrot.lane.b32.xlu1 %v14859_v15, %s11393_s16  ;;  %v7234_v32 = vsel %vm14874_vm4, %v7208_v63, 0 }
 0x66b   : > { %v7181_v25 = vshll.u32 %v14882_v7, 16  ;;  %v14892_v22 = vpack.c.bf16 %v7053_v49, %v7053_v49  ;;  %v10372_v18 = vcombine.low %v16976_v35, %v7234_v32  ;;  %v7141_v24 = vor.u32 %v7139_v33, %v7138_v53 }
 0x66c   : > { %v7167_v59 = vshll.u32 %v14884_v28, 16  ;;  %v14898_v12 = vpack.c.bf16 %v7051_v43, %v7051_v43  ;;  %7257 = vrot.lane.b32.xlu0 %v14884_v28, %s11393_s16  ;;  %v7235_v54 = vsel %vm14874_vm4, %v7210_v20, 0  ;;  %v7164_v30 = vshrl.u32 %v14884_v28, 16 }
 0x66d   : > { %v7188_v60 = vshll.u32 %v14892_v22, 16  ;;  %10391 = vmatprep.mubr.msk.bf16.mxu1 %vm2039_vm9, %v10372_v18  ;;  %v10348_v42 = vcombine.low %v7234_v32, %v7235_v54  ;;  %v7219_v1 = vrot.slane %v7181_v25, 1  ;;  %v7145_v13 = vrot.slane %v7143_v36, 7 }
 0x66e   : > { %v7215_v56 = vrot.slane %v7167_v59, 1  ;;  %v7174_v8 = vshll.u32 %v14898_v12, 16  ;;  %7259 = vrot.lane.b32.xlu1 %v14898_v12, %s11393_s16  ;;  %v7171_v57 = vshrl.u32 %v14898_v12, 16  ;;  %v7236_v19 = vsel %vm14874_vm4, %v7212_v26, 0 }
 0x66f   : > { %v7221_v55 = vrot.slane %v7188_v60, 1  ;;  %10367 = vmatprep.mubr.msk.bf16.mxu0 %vm2039_vm9, %v10348_v42  ;;  %v7178_v33 = vshrl.u32 %v14882_v7, 16  ;;  %v7185_v61 = vshrl.u32 %v14892_v22, 16  ;;  %v7148_v41 = vor.u32 %v7146_v6, %v7145_v13  ;;  %v16981_v42 = vld [vmem:[#allocation9_spill] sm:$0xff] }
 0x670   : > { %v7216_v21 = vor.u32 %v7215_v56, %v7164_v30  ;;  %v7217_v62 = vrot.slane %v7174_v8, 1  ;;  %7261 = vrot.lane.b32.xlu0 %v14882_v7, %s11393_s16  ;;  %v14922_v39 = vcombine.low %v7235_v54, %v7236_v19  ;;  %v7237_v36 = vsel %vm14874_vm4, %v7214_v44, 0 }
 0x671   : > { %v7220_v27 = vor.u32 %v7219_v1, %v7178_v33  ;;  %v7222_v50 = vor.u32 %v7221_v55, %v7185_v61  ;;  %v10350_v40 = vcombine.low %v7236_v19, %v7237_v36  ;;  %v7152_v18 = vrot.slane %v7150_v16, 7 }
 0x672   : > { %v7218_v63 = vor.u32 %v7217_v62, %v7171_v57  ;;  %7316 = vrot.lane.b32.xlu1 %v14892_v22, %s11393_s16  ;;  %v14930_v47 = vsel %vm14874_vm4, %v7216_v21, 0  ;;  %v7159_v26 = vrot.slane %v7157_v23, 7  ;;  %v7199_v54 = vsel %vm11698_vm5, 0, %v7141_v24 }
 0x673   : > { %v14933_v49 = vcombine.low %v7237_v36, %v14930_v47  ;;  %v14943_v20 = vsel %vm14874_vm4, %v7220_v27, 0  ;;  %v14947_v28 = vsel %vm14874_vm4, %v7222_v50, 0  ;;  %v7155_v31 = vor.u32 %v7153_v38, %v7152_v18  ;;  %v11309_v38 = vld [vmem:[%s16273_s9 + $0xc0] sm:$0xff]  }
 0x674   : > { %v14937_v6 = vsel %vm14874_vm4, %v7218_v63, 0  ;;  %v10354_v32 = vcombine.low %v14943_v20, %v14947_v28  ;;  %v7166_v44 = vrot.slane %v7164_v30, 7  ;;  %v14963_v56 = vsel %vm2039_vm9, 0, %v16981_v42  ;;  %v11311_v42 = vld [vmem:[%s16273_s9 + $0xd0] sm:$0xff]  }
 0x675   : > { %v10352_v53 = vcombine.low %v14930_v47, %v14937_v6  ;;  %v14951_v43 = vcombine.low %v14937_v6, %v14943_v20  ;;  %v7200_v16 = vsel %vm11698_vm5, 0, %v7148_v41  ;;  %v7162_v23 = vor.u32 %v7160_v14, %v7159_v26  ;;  %v11314_v47 = vld [vmem:[%s16273_s9 + $0xe8] sm:$0xff]   ;;  %v11315_v6 = vld [vmem:[%s16273_s9 + $0xf0] sm:$0xff]   ;;  %v11317_v20 = vld [vmem:[%s16273_s9 + $0x100] sm:$0xff]  }
 0x676   : > { %v7173_v24 = vrot.slane %v7171_v57, 7  ;;  %v7201_v21 = vsel %vm11698_vm5, 0, %v7155_v31  ;;  %v7169_v19 = vor.u32 %v7167_v59, %v7166_v44  ;;  %v7180_v63 = vrot.slane %v7178_v33, 7  ;;  %v11310_v59 = vld [vmem:[%s16273_s9 + $0xc8] sm:$0xff]  }
 0x677   : > { %v7202_v14 = vsel %vm11698_vm5, 0, %v7162_v23  ;;  %v7187_v27 = vrot.slane %v7185_v61, 7  ;;  %v11312_v23 = vld [vmem:[%s16273_s9 + $0xd8] sm:$0xff]  }
 0x678   : > { %v7176_v36 = vor.u32 %v7174_v8, %v7173_v24  ;;  %v7203_v26 = vsel %vm11698_vm5, 0, %v7169_v19  ;;  %v7183_v8 = vor.u32 %v7181_v25, %v7180_v63 }
 0x679   : > { %v7190_v31 = vor.u32 %v7188_v60, %v7187_v27 }
 0x67a   : > { %v7205_v7 = vsel %vm11698_vm5, 0, %v7183_v8 }
 0x67b   : > { %v7206_v60 = vsel %vm11698_vm5, 0, %v7190_v31 }
 0x6d6   : > { %v7250_v12 = vpop.permute.xlu0 %7249 }
 0x6d7   : > { %v7266_v1 = vsel %vm2039_vm9, %v7199_v54, %v7250_v12 }
 0x6d8   : > { %v10371_v55 = vcombine.low %v14963_v56, %v7266_v1  ;;  %v7252_v13 = vpop.permute.xlu1 %7251 }
 0x6d9   : > { %v7269_v5 = vsel %vm2039_vm9, %v7200_v16, %v7252_v13 }
 0x6da   : > { %v10347_v30 = vcombine.low %v7266_v1, %v7269_v5  ;;  %v7254_v62 = vpop.permute.xlu0 %7253  ;;  %7615 = vmatmul.mubr.bf16.vlgmr.msra.gmra.mrb[40].mxu1 %v10371_v55 }
 0x6db   : > { %v7272_v41 = vsel %vm2039_vm9, %v7201_v21, %v7254_v62  ;;  %10392 = vmatprep.mubr.msk.bf16.mxu1 %vm2039_vm9, %v14922_v39  ;;  %v11321_v21 = vld [vmem:[%s16275_s11] sm:$0xff]   ;;  %v11322_v62 = vld [vmem:[%s16275_s11 + $0x8] sm:$0xff]  }
 0x6dc   : > { %v14980_v15 = vcombine.low %v7269_v5, %v7272_v41  ;;  %v7256_v57 = vpop.permute.xlu1 %7255  ;;  %7454 = vmatmul.mubr.bf16.vlgmr.msra.gmra.mrb[64].mxu0 %v10347_v30  ;;  %v10396_v30 = vcombine.low %v14947_v28, %v16976_v35  ;;  %11023 = vmatprep.subr.bf16.mxu1 %v11321_v21 }
 0x6dd   : > { %v7275_v50 = vsel %vm2039_vm9, %v7202_v14, %v7256_v57  ;;  %7726 = vmatpush1.bf16.msra.mxu0 %v11309_v38  ;;  %10368 = vmatprep.mubr.msk.bf16.mxu0 %vm2039_vm9, %v10350_v40  ;;  %v7204_v40 = vsel %vm11698_vm5, 0, %v7176_v36  ;;  %v11313_v38 = vld [vmem:[%s16273_s9 + $0xe0] sm:$0xff]  }
 0x6de   : > { %v10349_v33 = vcombine.low %v7272_v41, %v7275_v50  ;;  %v7258_v18 = vpop.permute.xlu0 %7257  ;;  %7727 = vmatprep.subr.bf16.mxu0 %v16976_v35  ;;  %11027 = vmatpush3.bf16.msra.mxu1 %v11321_v21 }
 0x6df   : > { %v7278_v61 = vsel %vm2039_vm9, %v7203_v26, %v7258_v18  ;;  %11024 = vmatprep.subr.bf16.mxu1 %v11322_v62 }
 0x6e0   : > { %v10375_v12 = vcombine.low %v7275_v50, %v7278_v61  ;;  %v7260_v54 = vpop.permute.xlu1 %7259 }
 0x6e1   : > { %v7281_v44 = vsel %vm2039_vm9, %v7204_v40, %v7260_v54  ;;  %7728 = vmatpush1.bf16.msra.mxu0 %v11310_v59 }
 0x6e2   : > { %v10351_v1 = vcombine.low %v7278_v61, %v7281_v44  ;;  %7623 = vmatmul.mubr.bf16.gmra.mrb[44].mxu1 %v14980_v15  ;;  %v7262_v25 = vpop.permute.xlu0 %7261  ;;  %7729 = vmatprep.subr.bf16.mxu0 %v16976_v35 }
 0x6e3   : > { %v7284_v55 = vsel %vm2039_vm9, %v7205_v7, %v7262_v25  ;;  %10393 = vmatprep.mubr.msk.bf16.mxu1 %vm2039_vm9, %v14933_v49  ;;  %11028 = vmatpush3.bf16.msra.mxu1 %v11322_v62 }
 0x6e4   : > { %v10377_v22 = vcombine.low %v7281_v44, %v7284_v55  ;;  %v7317_v13 = vpop.permute.xlu1 %7316  ;;  %7462 = vmatmul.mubr.bf16.gmra.mrb[68].mxu0 %v10349_v33 }
 0x6e5   : > { %v7320_v16 = vsel %vm2039_vm9, %v7206_v60, %v7317_v13  ;;  %7730 = vmatpush1.bf16.msra.mxu0 %v11311_v42  ;;  %10369 = vmatprep.mubr.msk.bf16.mxu0 %vm2039_vm9, %v10352_v53  ;;  %v11316_v53 = vld [vmem:[%s16273_s9 + $0xf8] sm:$0xff]  }
 0x6e6   : > { %v10353_v24 = vcombine.low %v7284_v55, %v7320_v16  ;;  %v10395_v5 = vcombine.low %v7320_v16, %v14963_v56  ;;  %7731 = vmatprep.subr.bf16.mxu0 %v16976_v35  ;;  %v11320_v56 = vld [vmem:[%s16273_s9 + $0x118] sm:$0xff]  }
 0x6e9   : > { %7732 = vmatpush1.bf16.msra.mxu0 %v11312_v23 }
 0x6ea   : > { %7631 = vmatmul.mubr.bf16.gmra.mrb[48].mxu1 %v10375_v12  ;;  %7733 = vmatprep.subr.bf16.mxu0 %v16976_v35 }
 0x6eb   : > { %10394 = vmatprep.mubr.msk.bf16.mxu1 %vm2039_vm9, %v14951_v43 }
 0x6ec   : > { %7470 = vmatmul.mubr.bf16.gmra.mrb[72].mxu0 %v10351_v1 }
 0x6ed   : > { %7734 = vmatpush1.bf16.msra.mxu0 %v11313_v38  ;;  %10370 = vmatprep.mubr.msk.bf16.mxu0 %vm2039_vm9, %v10354_v32  ;;  %v11318_v32 = vld [vmem:[%s16273_s9 + $0x108] sm:$0xff]  }
 0x6ee   : > { %7735 = vmatprep.subr.bf16.mxu0 %v16976_v35 }
 0x6f1   : > { %7736 = vmatpush1.bf16.msra.mxu0 %v11314_v47 }
 0x6f2   : > { %7639 = vmatmul.mubr.bf16.gmra.mrb[52].mxu1 %v10377_v22  ;;  %7737 = vmatprep.subr.bf16.mxu0 %v16976_v35 }
 0x6f4   : > { %7478 = vmatmul.mubr.bf16.gmra.mrb[76].mxu0 %v10353_v24 }
 0x6f5   : > { %7738 = vmatpush1.bf16.msra.mxu0 %v11315_v6  ;;  %10409 = vmatprep.mubr.msk.bf16.mxu0 %vm2039_vm9, %v14922_v39  ;;  %v11319_v39 = vld [vmem:[%s16273_s9 + $0x110] sm:$0xff]  }
 0x6f6   : > { %7739 = vmatprep.subr.bf16.mxu0 %v16976_v35 }
 0x6f9   : > { %7740 = vmatpush1.bf16.msra.mxu0 %v11316_v53 }
 0x6fa   : > { %7741 = vmatprep.subr.bf16.mxu0 %v16976_v35 }
 0x6fd   : > { %7742 = vmatpush1.bf16.msra.mxu0 %v11317_v20 }
 0x6fe   : > { %7743 = vmatprep.subr.bf16.mxu0 %v16976_v35 }
 0x701   : > { %7744 = vmatpush1.bf16.msra.mxu0 %v11318_v32 }
 0x702   : > { %7745 = vmatprep.subr.bf16.mxu0 %v16976_v35 }
 0x705   : > { %7746 = vmatpush1.bf16.msra.mxu0 %v11319_v39  ;;  %v10413_v39 = vld [vmem:[%s16274_s10] ss:$0 sm:$0xff] }
 0x706   : > { %7747 = vmatprep.subr.bf16.mxu0 %v16976_v35  ;;  %v11323_v35 = vld [vmem:[%s16275_s11 + $0x10] sm:$0xff]  }
 0x707   : > { %11025 = vmatprep.subr.bf16.mxu1 %v11323_v35 }
 0x708   : > { %11029 = vmatpush3.bf16.msra.mxu1 %v11323_v35 }
 0x709   : > { %7748 = vmatpush1.bf16.msra.mxu0 %v11320_v56 }
 0x70a   : > { %11007 = vmatprep.subr.bf16.mxu0 %v11321_v21 }
 0x70c   : > { %7758 = vmatmul.mubr.bf16.vlgmr.msra.gmra.mrb[80].mxu0 %v14980_v15 }
 0x70d   : > { %10410 = vmatprep.mubr.msk.bf16.mxu0 %vm2039_vm9, %v14933_v49  ;;  %11008 = vmatpush3.bf16.msra.mxu0 %v11321_v21  ;;  %v11324_v49 = vld [vmem:[%s16275_s11 + $0x18] sm:$0xff]  }
 0x70e   : > { %11009 = vmatprep.subr.bf16.mxu0 %v11322_v62  ;;  %11026 = vmatprep.subr.bf16.mxu1 %v11324_v49 }
 0x70f   : > { %11030 = vmatpush3.bf16.msra.mxu1 %v11324_v49 }
 0x711   : > { %11010 = vmatpush3.bf16.msra.mxu0 %v11322_v62 }
 0x712   : > { %11011 = vmatprep.subr.bf16.mxu0 %v11323_v35 }
 0x714   : > { %7766 = vmatmul.mubr.bf16.gmra.mrb[84].mxu0 %v10375_v12 }
 0x715   : > { %10411 = vmatprep.mubr.msk.bf16.mxu0 %vm2039_vm9, %v14951_v43  ;;  %11012 = vmatpush3.bf16.msra.mxu0 %v11323_v35 }
 0x716   : > { %11013 = vmatprep.subr.bf16.mxu0 %v11324_v49 }
 0x719   : > { %11014 = vmatpush3.bf16.msra.mxu0 %v11324_v49 }
 0x71c   : > { %7774 = vmatmul.mubr.bf16.gmra.mrb[88].mxu0 %v10377_v22 }
 0x71d   : > { %10412 = vmatprep.mubr.msk.bf16.mxu0 %vm2039_vm9, %v10396_v30 }
 0x724   : > { %7782 = vmatmul.mubr.bf16.gmra.mrb[92].mxu0 %v10395_v5 }
 0x7ad   : > { %v7616_v28 = vpop.f32.mrb[40].mxu1 }
 0x7ae   : > { %v7618_v43 = vpop.f32.mrb[41].mxu1 }
 0x7af   : > { %v7455_v19 = vpop.f32.mrb[64].mxu0  ;;  %v7619_v63 = vpop.f32.mrb[42].mxu1 }
 0x7b0   : > { %v7617_v41 = vadd.f32 %v7616_v28, %v7455_v19  ;;  %v7457_v15 = vpop.f32.mrb[65].mxu0  ;;  %v7621_v14 = vpop.f32.mrb[43].mxu1 }
 0x7b1   : > { %v7458_v57 = vpop.f32.mrb[66].mxu0 }
 0x7b2   : > { %v7620_v36 = vadd.f32 %v7619_v63, %v7458_v57  ;;  %v7460_v27 = vpop.f32.mrb[67].mxu0 }
 0x7b5   : > { %v7624_v50 = vpop.f32.mrb[44].mxu1 }
 0x7b6   : > { %v7626_v59 = vpop.f32.mrb[45].mxu1 }
 0x7b7   : > { %v7463_v33 = vpop.f32.mrb[68].mxu0  ;;  %v7627_v18 = vpop.f32.mrb[46].mxu1 }
 0x7b8   : > { %v7625_v26 = vadd.f32 %v7624_v50, %v7463_v33  ;;  %v7465_v8 = vpop.f32.mrb[69].mxu0  ;;  %v7629_v61 = vpop.f32.mrb[47].mxu1 }
 0x7b9   : > { %v7466_v12 = vpop.f32.mrb[70].mxu0 }
 0x7ba   : > { %v7628_v54 = vadd.f32 %v7627_v18, %v7466_v12  ;;  %v7468_v40 = vpop.f32.mrb[71].mxu0 }
 0x7bd   : > { %v7632_v31 = vpop.f32.mrb[48].mxu1 }
 0x7be   : > { %v7634_v44 = vpop.f32.mrb[49].mxu1 }
 0x7bf   : > { %v7471_v42 = vpop.f32.mrb[72].mxu0  ;;  %v7635_v1 = vpop.f32.mrb[50].mxu1 }
 0x7c0   : > { %v7633_v7 = vadd.f32 %v7632_v31, %v7471_v42  ;;  %v7473_v25 = vpop.f32.mrb[73].mxu0  ;;  %v7637_v55 = vpop.f32.mrb[51].mxu1 }
 0x7c1   : > { %v7474_v22 = vpop.f32.mrb[74].mxu0 }
 0x7c2   : > { %v7636_v60 = vadd.f32 %v7635_v1, %v7474_v22  ;;  %v7476_v13 = vpop.f32.mrb[75].mxu0 }
 0x7c5   : > { %v7640_v16 = vpop.f32.mrb[52].mxu1 }
 0x7c6   : > { %v7642_v23 = vpop.f32.mrb[53].mxu1 }
 0x7c7   : > { %v7479_v24 = vpop.f32.mrb[76].mxu0  ;;  %v7643_v5 = vpop.f32.mrb[54].mxu1 }
 0x7c8   : > { %v7641_v38 = vadd.f32 %v7640_v16, %v7479_v24  ;;  %v7481_v47 = vpop.f32.mrb[77].mxu0  ;;  %v7645_v6 = vpop.f32.mrb[55].mxu1 }
 0x7c9   : > { %v7482_v53 = vpop.f32.mrb[78].mxu0 }
 0x7ca   : > { %v7644_v20 = vadd.f32 %v7643_v5, %v7482_v53  ;;  %v7484_v32 = vpop.f32.mrb[79].mxu0 }
 0x7df   : > { %v7759_v56 = vpop.f32.mrb[80].mxu0 }
 0x7e0   : > { %v7790_v30 = vadd.f32 %v7759_v56, %v7617_v41  ;;  %v7761_v21 = vpop.f32.mrb[81].mxu0  ;;  %v10414_v56 = vld [vmem:[%s16276_s12] ss:$0 sm:$0xff] }
 0x7e1   : > { %v7762_v62 = vpop.f32.mrb[82].mxu0 }
 0x7e2   : > { %v7804_v35 = vadd.f32 %v10413_v39, %v7790_v30  ;;  %v7791_v49 = vadd.f32 %v7762_v62, %v7620_v36  ;;  %v7764_v28 = vpop.f32.mrb[83].mxu0 }
 0x7e4   : > { %v7805_v43 = vadd.f32 %v10413_v39, %v7791_v49  ;;  %v7812_v19 = vmax.f32 %v7804_v35, 0.0 }
 0x7e6   : > { %v7813_v63 = vmax.f32 %v7805_v43, 0.0 }
 0x7e7   : > { %v7767_v15 = vpop.f32.mrb[84].mxu0 }
 0x7e8   : > { %v10473_v14 = vpack.c.bf16 %v7813_v63, %v7812_v19  ;;  %v7792_v57 = vadd.f32 %v7767_v15, %v7625_v26  ;;  %v7769_v27 = vpop.f32.mrb[85].mxu0 }
 0x7e9   : > { %v7770_v50 = vpop.f32.mrb[86].mxu0 }
 0x7ea   : > { %v7806_v59 = vadd.f32 %v10413_v39, %v7792_v57  ;;  %v7793_v33 = vadd.f32 %v7770_v50, %v7628_v54  ;;  %v7772_v18 = vpop.f32.mrb[87].mxu0  ;;  %11015 = vmatprep.mubr.msk.bf16.mxu0 %vm2039_vm9, %v10473_v14  ;;  %v16982_v14 = vld [vmem:[#allocation12_spill] sm:$0xff] }
 0x7ec   : > { %v7807_v8 = vadd.f32 %v10413_v39, %v7793_v33  ;;  %v7814_v41 = vmax.f32 %v7806_v59, 0.0 }
 0x7ee   : > { %v7815_v61 = vmax.f32 %v7807_v8, 0.0 }
 0x7ef   : > { %v7775_v12 = vpop.f32.mrb[88].mxu0 }
 0x7f0   : > { %v10474_v40 = vpack.c.bf16 %v7815_v61, %v7814_v41  ;;  %v7794_v36 = vadd.f32 %v7775_v12, %v7633_v7  ;;  %v7777_v31 = vpop.f32.mrb[89].mxu0  ;;  %v16983_v41 = vld [vmem:[#allocation11_spill] sm:$0xff] }
 0x7f1   : > { %v7778_v44 = vpop.f32.mrb[90].mxu0  ;;  %v15097_v61 = vsub.s32 0, %v16983_v41 }
 0x7f2   : > { %v7808_v42 = vadd.f32 %v10413_v39, %v7794_v36  ;;  %v7795_v1 = vadd.f32 %v7778_v44, %v7636_v60  ;;  %v7780_v25 = vpop.f32.mrb[91].mxu0  ;;  %11016 = vmatmul.mubr.msk.bf16.vlgmr.msra.gmra.mrb[96].mxu0 %vm2039_vm9, %v10474_v40 }
 0x7f4   : > { %v7809_v26 = vadd.f32 %v10413_v39, %v7795_v1  ;;  %v7816_v55 = vmax.f32 %v7808_v42, 0.0 }
 0x7f6   : > { %v7817_v22 = vmax.f32 %v7809_v26, 0.0 }
 0x7f7   : > { %v7783_v54 = vpop.f32.mrb[92].mxu0 }
 0x7f8   : > { %v10475_v13 = vpack.c.bf16 %v7817_v22, %v7816_v55  ;;  %v7796_v16 = vadd.f32 %v7783_v54, %v7641_v38  ;;  %v7785_v23 = vpop.f32.mrb[93].mxu0 }
 0x7f9   : > { %v7786_v24 = vpop.f32.mrb[94].mxu0 }
 0x7fa   : > { %v7810_v5 = vadd.f32 %v10413_v39, %v7796_v16  ;;  %v7797_v47 = vadd.f32 %v7786_v24, %v7644_v20  ;;  %v7788_v6 = vpop.f32.mrb[95].mxu0  ;;  %11019 = vmatprep.mubr.msk.bf16.mxu1 %vm2039_vm9, %v10475_v13 }
 0x7fc   : > { %v7811_v7 = vadd.f32 %v10413_v39, %v7797_v47  ;;  %v7818_v53 = vmax.f32 %v7810_v5, 0.0 }
 0x7fe   : > { %v7819_v32 = vmax.f32 %v7811_v7, 0.0 }
 0x800   : > { %v10476_v60 = vpack.c.bf16 %v7819_v32, %v7818_v53 }
 0x802   : > { %11020 = vmatmul.mubr.msk.bf16.vlgmr.msra.gmra.mrb[56].mxu1 %vm2039_vm9, %v10476_v60 }
 0x8c5   : > { %v11017_v30 = vpop.f32.mrb[96].mxu0 }
 0x8c6   : > { %v7942_v21 = vadd.f32 %v11017_v30, %v10414_v56  ;;  %v7933_v38 = vpop.f32.mrb[97].mxu0 }
 0x8c7   : > { %v7934_v62 = vadd.f32 %v10414_v56, %v7933_v38  ;;  %v11018_v35 = vpop.f32.mrb[98].mxu0 }
 0x8c8   : > { %v7966_v49 = vmax.f32 %v7942_v21, 0.0  ;;  %v7945_v20 = vadd.f32 %v11018_v35, %v10414_v56  ;;  %v7936_v28 = vpop.f32.mrb[99].mxu0 }
 0x8c9   : > { %v7964_v43 = vmax.f32 %v7934_v62, 0.0  ;;  %v7937_v15 = vadd.f32 %v10414_v56, %v7936_v28 }
 0x8ca   : > { %v10479_v19 = vpack.c.bf16 %v7966_v49, %v7966_v49  ;;  %v7967_v63 = vmax.f32 %v7945_v20, 0.0 }
 0x8cb   : > { %v10477_v39 = vpack.c.bf16 %v7964_v43, %v7964_v43  ;;  %v7965_v8 = vmax.f32 %v7937_v15, 0.0 }
 0x8cc   : > { %v8050_v57 = vrot.slane %v10479_v19, %v16982_v14  ;;  %v10480_v18 = vpack.c.bf16 %v7967_v63, %v7967_v63 }
 0x8cd   : > { %v8002_v27 = vrot.slane %v10477_v39, %v16982_v14  ;;  %v10478_v44 = vpack.c.bf16 %v7965_v8, %v7965_v8 }
 0x8ce   : > { %v8051_v50 = vcombine.high %v8050_v57, %v8050_v57  ;;  %v8058_v59 = vrot.slane %v8050_v57, %v16982_v14  ;;  %v8074_v31 = vrot.slane %v10480_v18, %v16982_v14 }
 0x8cf   : > { %v8010_v33 = vrot.slane %v8002_v27, %v16982_v14  ;;  %v8003_v22 = vcombine.high %v8002_v27, %v8002_v27  ;;  %v8026_v6 = vrot.slane %v10478_v44, %v16982_v14 }
 0x8d0   : > { %v15100_v12 = vrot.slane %v8051_v50, %v16982_v14  ;;  %v10443_v40 = vpack.i.b16 %v8058_v59, %v8058_v59  ;;  %v8205_v36 = vunpack.i.h.s16 %v8058_v59  ;;  %v8066_v55 = vcombine.high %v8058_v59, %v8058_v59 }
 0x8d1   : > { %v8189_v42 = vunpack.i.h.s16 %v8010_v33  ;;  %v10435_v26 = vpack.i.b16 %v8010_v33, %v8010_v33  ;;  %v8082_v47 = vrot.slane %v8074_v31, %v16982_v14  ;;  %v15122_v62 = vrot.slane %v8003_v22, %v16982_v14 }
 0x8d2   : > { %v15104_v1 = vrot.slane %v10443_v40, %v15097_v61  ;;  %v8269_v25 = vpack.i.b16 %v8205_v36, %v8205_v36  ;;  %v8207_v5 = vunpack.i.h.s16 %v15100_v12  ;;  %v10444_v38 = vpack.i.b16 %v15100_v12, %v15100_v12 }
 0x8d3   : > { %v8253_v24 = vpack.i.b16 %v8189_v42, %v8189_v42  ;;  %v15117_v21 = vrot.slane %v10435_v26, %v15097_v61  ;;  %v8209_v20 = vunpack.i.h.s16 %v8066_v55  ;;  %v8018_v63 = vcombine.high %v8010_v33, %v8010_v33 }
 0x8d4   : > { %8668 = vrot.lane.b32.xlu0 %v15104_v1, %s11395_s17  ;;  %v15109_v23 = vrot.slane %v8269_v25, %v15097_v61  ;;  %v8271_v39 = vpack.i.b16 %v8207_v5, %v8207_v5  ;;  %v8075_v15 = vcombine.high %v8074_v31, %v8074_v31  ;;  %v8213_v27 = vunpack.i.h.s16 %v8082_v47 }
 0x8d5   : > { %v11021_v54 = vpop.f32.mrb[56].mxu1  ;;  %v15127_v19 = vrot.slane %v8253_v24, %v15097_v61  ;;  %v8027_v50 = vcombine.high %v8026_v6, %v8026_v6  ;;  %v10445_v18 = vpack.i.b16 %v8066_v55, %v8066_v55  ;;  %v15135_v8 = vrot.slane %v8026_v6, %v16982_v14 }
 0x8d6   : > { %v7958_v13 = vadd.f32 %v11021_v54, %v10414_v56  ;;  %v7949_v16 = vpop.f32.mrb[57].mxu1  ;;  %8670 = vrot.lane.b32.xlu1 %v15109_v23, %s11395_s17  ;;  %v8273_v40 = vpack.i.b16 %v8209_v20, %v8209_v20  ;;  %v8191_v33 = vunpack.i.h.s16 %v15122_v62  ;;  %v15142_v44 = vrot.slane %v8271_v39, %v15097_v61 }
 0x8d7   : > { %v7950_v7 = vadd.f32 %v10414_v56, %v7949_v16  ;;  %v11022_v53 = vpop.f32.mrb[58].mxu1  ;;  %v10447_v42 = vpack.i.b16 %v8082_v47, %v8082_v47  ;;  %v15145_v25 = vrot.slane %v8075_v15, %v16982_v14  ;;  %v15147_v26 = vcombine.high %v8082_v47, %v8082_v47 }
 0x8d8   : > { %v7970_v32 = vmax.f32 %v7958_v13, 0.0  ;;  %v7961_v60 = vadd.f32 %v11022_v53, %v10414_v56  ;;  %v7952_v30 = vpop.f32.mrb[59].mxu1  ;;  %8636 = vrot.lane.b32.xlu0 %v15117_v21, %s11395_s17  ;;  %v8277_v55 = vpack.i.b16 %v8213_v27, %v8213_v27  ;;  %v10436_v22 = vpack.i.b16 %v15122_v62, %v15122_v62 }
 0x8d9   : > { %v7968_v35 = vmax.f32 %v7950_v7, 0.0  ;;  %v7953_v49 = vadd.f32 %v10414_v56, %v7952_v30  ;;  %v15132_v56 = vrot.slane %v10444_v38, %v15097_v61  ;;  %v15152_v54 = vrot.slane %v8027_v50, %v16982_v14 }
 0x8da   : > { %v10483_v28 = vpack.c.bf16 %v7970_v32, %v7970_v32  ;;  %v7971_v43 = vmax.f32 %v7961_v60, 0.0  ;;  %8638 = vrot.lane.b32.xlu1 %v15127_v19, %s11395_s17  ;;  %v15158_v16 = vrot.slane %v10445_v18, %v15097_v61  ;;  %v10437_v24 = vpack.i.b16 %v8018_v63, %v8018_v63 }
 0x8db   : > { %v7969_v57 = vmax.f32 %v7953_v49, 0.0  ;;  %v10481_v59 = vpack.c.bf16 %v7968_v35, %v7968_v35  ;;  %v15162_v5 = vcombine.high %v15135_v8, %v15135_v8  ;;  %v8255_v7 = vpack.i.b16 %v8191_v33, %v8191_v33 }
 0x8dc   : > { %v8146_v41 = vrot.slane %v10483_v28, %v16982_v14  ;;  %v10484_v36 = vpack.c.bf16 %v7971_v43, %v7971_v43  ;;  %8672 = vrot.lane.b32.xlu0 %v15132_v56, %s11395_s17  ;;  %v15172_v60 = vrot.slane %v8273_v40, %v15097_v61  ;;  %v15175_v30 = vrot.slane %v10447_v42, %v15097_v61 }
 0x8dd   : > { %v10482_v31 = vpack.c.bf16 %v7969_v57, %v7969_v57  ;;  %v8098_v13 = vrot.slane %v10481_v59, %v16982_v14  ;;  %v15178_v38 = vrot.slane %v8277_v55, %v15097_v61  ;;  %v15181_v35 = vrot.slane %v10436_v22, %v15097_v61 }
 0x8de   : > { %8674 = vrot.lane.b32.xlu1 %v15142_v44, %s11395_s17  ;;  %v8147_v47 = vcombine.high %v8146_v41, %v8146_v41  ;;  %v15165_v6 = vrot.slane %v8146_v41, %v16982_v14  ;;  %v8170_v53 = vrot.slane %v10484_v36, %v16982_v14  ;;  %v8193_v49 = vunpack.i.h.s16 %v8018_v63 }
 0x8df   : > { %v8122_v32 = vrot.slane %v10482_v31, %v16982_v14  ;;  %v8067_v20 = vcombine.high %v15100_v12, %v15100_v12  ;;  %v8099_v28 = vcombine.high %v8098_v13, %v8098_v13  ;;  %v15186_v43 = vrot.slane %v8098_v13, %v16982_v14 }
 0x8e0   : > { %8676 = vrot.lane.b32.xlu0 %v15158_v16, %s11395_s17  ;;  %v15191_v39 = vrot.slane %v10437_v24, %v15097_v61  ;;  %v8197_v15 = vunpack.i.h.s16 %v15135_v8  ;;  %v15195_v57 = vrot.slane %v8147_v47, %v16982_v14  ;;  %v15199_v63 = vcombine.high %v15165_v6, %v15165_v6 }
 0x8e1   : > { %v15202_v12 = vrot.slane %v8255_v7, %v15097_v61  ;;  %v8215_v27 = vunpack.i.h.s16 %v15145_v25  ;;  %v8171_v50 = vcombine.high %v8170_v53, %v8170_v53  ;;  %v15206_v59 = vrot.slane %v8170_v53, %v16982_v14 }
 0x8e2   : > { %8678 = vrot.lane.b32.xlu1 %v15172_v60, %s11395_s17  ;;  %v8123_v18 = vcombine.high %v8122_v32, %v8122_v32  ;;  %v8211_v41 = vunpack.i.h.s16 %v8067_v20  ;;  %v15211_v40 = vrot.slane %v8122_v32, %v16982_v14  ;;  %v8257_v33 = vpack.i.b16 %v8193_v49, %v8193_v49 }
 0x8e3   : > { %v10439_v36 = vpack.i.b16 %v15135_v8, %v15135_v8  ;;  %v8217_v31 = vunpack.i.h.s16 %v15147_v26  ;;  %v15217_v42 = vrot.slane %v8099_v28, %v16982_v14  ;;  %v15221_v55 = vcombine.high %v15186_v43, %v15186_v43 }
 0x8e4   : > { %8684 = vrot.lane.b32.xlu0 %v15175_v30, %s11395_s17  ;;  %v8261_v22 = vpack.i.b16 %v8197_v15, %v8197_v15  ;;  %v10448_v13 = vpack.i.b16 %v15145_v25, %v15145_v25  ;;  %v10446_v24 = vpack.i.b16 %v8067_v20, %v8067_v20  ;;  %v8279_v47 = vpack.i.b16 %v8215_v27, %v8215_v27 }
 0x8e5   : > { %v10449_v8 = vpack.i.b16 %v15147_v26, %v15147_v26  ;;  %v8019_v7 = vcombine.high %v15122_v62, %v15122_v62  ;;  %v15232_v53 = vrot.slane %v8171_v50, %v16982_v14  ;;  %v15236_v32 = vcombine.high %v15206_v59, %v15206_v59 }
 0x8e6   : > { %8686 = vrot.lane.b32.xlu1 %v15178_v38, %s11395_s17  ;;  %v15239_v49 = vrot.slane %v8123_v18, %v16982_v14  ;;  %v8275_v20 = vpack.i.b16 %v8211_v41, %v8211_v41  ;;  %v15245_v26 = vcombine.high %v15211_v40, %v15211_v40  ;;  %v15248_v62 = vrot.slane %v8257_v33, %v15097_v61 }
 0x8e7   : > { %v15251_v28 = vrot.slane %v10439_v36, %v15097_v61  ;;  %v8281_v15 = vpack.i.b16 %v8217_v31, %v8217_v31  ;;  %v15256_v27 = vrot.slane %v8261_v22, %v15097_v61  ;;  %v15259_v50 = vrot.slane %v10448_v13, %v15097_v61 }
 0x8e8   : > { %8640 = vrot.lane.b32.xlu0 %v15181_v35, %s11395_s17  ;;  %v8199_v18 = vunpack.i.h.s16 %v15152_v54  ;;  %v10459_v41 = vpack.i.b16 %v15165_v6, %v15165_v6  ;;  %v15265_v33 = vrot.slane %v10446_v24, %v15097_v61  ;;  %v15268_v36 = vrot.slane %v8279_v47, %v15097_v61 }
 0x8e9   : > { %16984 = vst [vmem:[#allocation104_spill] sm:$0xff] %v15256_v27  ;;  %16985 = vst [vmem:[#allocation107_spill] sm:$0xff] %v15259_v50  ;;  %v15271_v31 = vrot.slane %v10449_v8, %v15097_v61  ;;  %v10438_v34 = vpack.i.b16 %v8019_v7, %v8019_v7  ;;  %v15276_v22 = vrot.slane %v8275_v20, %v15097_v61  ;;  %v8195_v13 = vunpack.i.h.s16 %v8019_v7 }
 0x8ea   : > { %8642 = vrot.lane.b32.xlu1 %v15202_v12, %s11395_s17  ;;  %16986 = vst [vmem:[#allocation112_spill] sm:$0xff] %v15265_v33  ;;  %16987 = vst [vmem:[#allocation106_spill] sm:$0xff] %v15268_v36  ;;  %v15281_v24 = vrot.slane %v10459_v41, %v15097_v61  ;;  %v15284_v47 = vrot.slane %v8281_v15, %v15097_v61  ;;  %v8237_v51 = vunpack.i.h.s16 %v15165_v6  ;;  %v8221_v41 = vunpack.i.h.s16 %v15186_v43 }
 0x8eb   : > { %16988 = vst [vmem:[#allocation46_spill] sm:$0xff] %v15271_v31  ;;  %16989 = vst [vmem:[#allocation44_spill] sm:$0xff] %v15276_v22  ;;  %v10451_v29 = vpack.i.b16 %v15186_v43, %v15186_v43  ;;  %v15292_v7 = vpack.i.b16 %v8199_v18, %v8199_v18  ;;  %v15296_v20 = vcombine.high %v15145_v25, %v15145_v25  ;;  %v8239_v58 = vunpack.i.h.s16 %v15195_v57 }
 0x8ec   : > { %8644 = vrot.lane.b32.xlu0 %v15191_v39, %s11395_s17  ;;  %16990 = vst [vmem:[#allocation109_spill] sm:$0xff] %v15284_v47  ;;  %v10460_v15 = vpack.i.b16 %v15195_v57, %v15195_v57  ;;  %v15302_v8 = vrot.slane %v10438_v34, %v15097_v61  ;;  %v8301_v6 = vpack.i.b16 %v8237_v51, %v8237_v51  ;;  %v8223_v9 = vunpack.i.h.s16 %v15217_v42 }
 0x8ed   : > { %v15305_v10 = vrot.slane %v10451_v29, %v15097_v61  ;;  %v15310_v18 = vpack.i.b16 %v8195_v13, %v8195_v13  ;;  %v8285_v25 = vpack.i.b16 %v8221_v41, %v8221_v41  ;;  %v10461_v52 = vpack.i.b16 %v15199_v63, %v15199_v63 }
 0x8ee   : > { %8646 = vrot.lane.b32.xlu1 %v15248_v62, %s11395_s17  ;;  %16991 = vst [vmem:[#allocation108_spill] sm:$0xff] %v15302_v8  ;;  %v15313_v43 = vrot.slane %v10460_v15, %v15097_v61  ;;  %v15318_v34 = vrot.slane %v8301_v6, %v15097_v61  ;;  %v8303_v51 = vpack.i.b16 %v8239_v58, %v8239_v58  ;;  %v8241_v29 = vunpack.i.h.s16 %v15199_v63 }
 0x8ef   : > { %v10463_v37 = vpack.i.b16 %v15206_v59, %v15206_v59  ;;  %v15326_v13 = vrot.slane %v8285_v25, %v15097_v61  ;;  %v15329_v41 = vrot.slane %v10461_v52, %v15097_v61  ;;  %v8245_v15 = vunpack.i.h.s16 %v15206_v59 }
 0x8f0   : > { %8652 = vrot.lane.b32.xlu0 %v15251_v28, %s11395_s17  ;;  %v10452_v6 = vpack.i.b16 %v15217_v42, %v15217_v42  ;;  %v15335_v58 = vrot.slane %v8303_v51, %v15097_v61  ;;  %v8305_v63 = vpack.i.b16 %v8241_v29, %v8241_v29  ;;  %v10453_v59 = vpack.i.b16 %v15221_v55, %v15221_v55 }
 0x8f1   : > { %v15338_v0 = vrot.slane %v10463_v37, %v15097_v61  ;;  %v8309_v25 = vpack.i.b16 %v8245_v15, %v8245_v15  ;;  %v8225_v4 = vunpack.i.h.s16 %v15221_v55  ;;  %v8287_v29 = vpack.i.b16 %v8223_v9, %v8223_v9 }
 0x8f2   : > { %8654 = vrot.lane.b32.xlu1 %v15256_v27, %s11395_s17  ;;  %v15344_v52 = vrot.slane %v10452_v6, %v15097_v61  ;;  %v15350_v51 = vrot.slane %v8305_v63, %v15097_v61  ;;  %v10455_v37 = vpack.i.b16 %v15211_v40, %v15211_v40  ;;  %v8229_v46 = vunpack.i.h.s16 %v15211_v40 }
 0x8f3   : > { %v15358_v15 = vrot.slane %v8309_v25, %v15097_v61  ;;  %v15361_v6 = vrot.slane %v10453_v59, %v15097_v61  ;;  %v8289_v3 = vpack.i.b16 %v8225_v4, %v8225_v4  ;;  %v8163_v55 = vcombine.high %v15195_v57, %v15195_v57 }
 0x8f4   : > { %8680 = vrot.lane.b32.xlu0 %v15265_v33, %s11395_s17  ;;  %v15366_v9 = vrot.slane %v8287_v29, %v15097_v61  ;;  %v15369_v63 = vrot.slane %v10455_v37, %v15097_v61  ;;  %v8293_v40 = vpack.i.b16 %v8229_v46, %v8229_v46  ;;  %v10464_v45 = vpack.i.b16 %v15232_v53, %v15232_v53 }
 0x8f5   : > { %v15376_v25 = vrot.slane %v8289_v3, %v15097_v61  ;;  %v10462_v4 = vpack.i.b16 %v8163_v55, %v8163_v55  ;;  %v8243_v59 = vunpack.i.h.s16 %v8163_v55  ;;  %v8247_v57 = vunpack.i.h.s16 %v15232_v53 }
 0x8f6   : > { %8682 = vrot.lane.b32.xlu1 %v15276_v22, %s11395_s17  ;;  %v15380_v29 = vrot.slane %v8293_v40, %v15097_v61  ;;  %v15383_v37 = vrot.slane %v10464_v45, %v15097_v61  ;;  %v10465_v46 = vpack.i.b16 %v15236_v32, %v15236_v32  ;;  %v8249_v48 = vunpack.i.h.s16 %v15236_v32 }
 0x8f7   : > { %v15391_v3 = vrot.slane %v10462_v4, %v15097_v61  ;;  %v8307_v55 = vpack.i.b16 %v8243_v59, %v8243_v59  ;;  %v8311_v2 = vpack.i.b16 %v8247_v57, %v8247_v57  ;;  %v8115_v40 = vcombine.high %v15217_v42, %v15217_v42 }
 0x8f8   : > { %8688 = vrot.lane.b32.xlu0 %v15259_v50, %s11395_s17  ;;  %v15396_v11 = vrot.slane %v10465_v46, %v15097_v61  ;;  %v8313_v45 = vpack.i.b16 %v8249_v48, %v8249_v48  ;;  %v10456_v50 = vpack.i.b16 %v15239_v49, %v15239_v49  ;;  %v8231_v32 = vunpack.i.h.s16 %v15239_v49 }
 0x8f9   : > { %v15404_v4 = vrot.slane %v8307_v55, %v15097_v61  ;;  %v15407_v59 = vrot.slane %v8311_v2, %v15097_v61  ;;  %v10454_v57 = vpack.i.b16 %v8115_v40, %v8115_v40  ;;  %v8227_v42 = vunpack.i.h.s16 %v8115_v40 }
 0x8fa   : > { %8690 = vrot.lane.b32.xlu1 %v15268_v36, %s11395_s17  ;;  %v15410_v46 = vrot.slane %v8313_v45, %v15097_v61  ;;  %v15413_v48 = vrot.slane %v10456_v50, %v15097_v61  ;;  %v8295_v36 = vpack.i.b16 %v8231_v32, %v8231_v32  ;;  %v10457_v22 = vpack.i.b16 %v15245_v26, %v15245_v26 }
 0x8fb   : > { %v15420_v55 = vrot.slane %v10454_v57, %v15097_v61  ;;  %v8291_v2 = vpack.i.b16 %v8227_v42, %v8227_v42  ;;  %v8187_v40 = vcombine.high %v15232_v53, %v15232_v53  ;;  %v15427_v50 = vrot.slane %v15310_v18, %v15097_v61 }
 0x8fc   : > { %8692 = vrot.lane.b32.xlu0 %v15271_v31, %s11395_s17  ;;  %v8233_v31 = vunpack.i.h.s16 %v15245_v26  ;;  %v15430_v45 = vrot.slane %v8295_v36, %v15097_v61  ;;  %v15433_v32 = vrot.slane %v10457_v22, %v15097_v61  ;;  %v8139_v57 = vcombine.high %v15239_v49, %v15239_v49 }
 0x8fd   : > { %16992 = vst [vmem:[#allocation51_spill] sm:$0xff] %v15427_v50  ;;  %v15440_v26 = vrot.slane %v8291_v2, %v15097_v61  ;;  %v10466_v42 = vpack.i.b16 %v8187_v40, %v8187_v40  ;;  %v10441_v18 = vpack.i.b16 %v15162_v5, %v15162_v5  ;;  %v16995_v49 = vpack.i.b16 %v15152_v54, %v15152_v54 }
 0x8fe   : > { %8694 = vrot.lane.b32.xlu1 %v15284_v47, %s11395_s17  ;;  %16993 = vst [vmem:[#allocation70_spill] sm:$0xff] %v15430_v45  ;;  %16994 = vst [vmem:[#allocation68_spill] sm:$0xff] %v15433_v32  ;;  %v8297_v53 = vpack.i.b16 %v8233_v31, %v8233_v31  ;;  %v8251_v47 = vunpack.i.h.s16 %v8187_v40  ;;  %v10458_v36 = vpack.i.b16 %v8139_v57, %v8139_v57  ;;  %v8235_v33 = vunpack.i.h.s16 %v8139_v57 }
 0x8ff   : > { %v15450_v22 = vrot.slane %v16995_v49, %v15097_v61  ;;  %v15456_v31 = vrot.slane %v10466_v42, %v15097_v61  ;;  %v15468_v49 = vrot.slane %v15292_v7, %v15097_v61  ;;  %v10450_v7 = vpack.i.b16 %v15296_v20, %v15296_v20 }
 0x900   : > { %8648 = vrot.lane.b32.xlu0 %v15302_v8, %s11395_s17  ;;  %v15453_v2 = vrot.slane %v8297_v53, %v15097_v61  ;;  %v8315_v40 = vpack.i.b16 %v8251_v47, %v8251_v47  ;;  %v16997_v8 = vunpack.i.h.s16 %v15162_v5  ;;  %v15462_v27 = vrot.slane %v10458_v36, %v15097_v61 }
 0x901   : > { %16996 = vst [vmem:[#allocation77_spill] sm:$0xff] %v15456_v31  ;;  %v8219_v53 = vunpack.i.h.s16 %v15296_v20  ;;  %v8043_v47 = vcombine.high %v15152_v54, %v15152_v54 }
 0x902   : > { %8650 = vrot.lane.b32.xlu1 %v15427_v50, %s11395_s17  ;;  %v8265_v57 = vpack.i.b16 %v16997_v8, %v16997_v8  ;;  %16998 = vst [vmem:[#allocation85_spill] sm:$0xff] %v15462_v27  ;;  %v8299_v50 = vpack.i.b16 %v8235_v33, %v8235_v33  ;;  %v15474_v5 = vrot.slane %v8315_v40, %v15097_v61 }
 0x903   : > { %v15482_v33 = vrot.slane %v10441_v18, %v15097_v61  ;;  %v8283_v42 = vpack.i.b16 %v8219_v53, %v8219_v53  ;;  %v8203_v36 = vunpack.i.h.s16 %v8043_v47  ;;  %v10442_v40 = vpack.i.b16 %v8043_v47, %v8043_v47 }
 0x904   : > { %8656 = vrot.lane.b32.xlu0 %v15450_v22, %s11395_s17  ;;  %16999 = vst [vmem:[#allocation87_spill] sm:$0xff] %v15474_v5  ;;  %v15477_v8 = vrot.slane %v8299_v50, %v15097_v61  ;;  %v15489_v54 = vrot.slane %v8265_v57, %v15097_v61  ;;  %v15494_v50 = vrot.slane %v10450_v7, %v15097_v61 }
 0x905   : > { %v15499_v20 = vrot.slane %v8283_v42, %v15097_v61  ;;  %v8267_v18 = vpack.i.b16 %v8203_v36, %v8203_v36  ;;  %v15504_v57 = vrot.slane %v10442_v40, %v15097_v61 }
 0x906   : > { %17000 = vst [vmem:[#allocation90_spill] sm:$0xff] %v15477_v8  ;;  %8658 = vrot.lane.b32.xlu1 %v15468_v49, %s11395_s17 }
 0x907   : > { %v15509_v53 = vrot.slane %v8267_v18, %v15097_v61 }
 0x908   : > { %8660 = vrot.lane.b32.xlu0 %v15482_v33, %s11395_s17 }
 0x90a   : > { %8662 = vrot.lane.b32.xlu1 %v15489_v54, %s11395_s17 }
 0x90c   : > { %8696 = vrot.lane.b32.xlu0 %v15494_v50, %s11395_s17 }
 0x90e   : > { %8698 = vrot.lane.b32.xlu1 %v15499_v20, %s11395_s17 }
 0x910   : > { %8664 = vrot.lane.b32.xlu0 %v15504_v57, %s11395_s17 }
 0x912   : > { %8666 = vrot.lane.b32.xlu1 %v15509_v53, %s11395_s17 }
 0x914   : > { %8732 = vrot.lane.b32.xlu0 %v15281_v24, %s11395_s17 }
 0x916   : > { %8734 = vrot.lane.b32.xlu1 %v15318_v34, %s11395_s17 }
 0x918   : > { %8700 = vrot.lane.b32.xlu0 %v15305_v10, %s11395_s17 }
 0x91a   : > { %8702 = vrot.lane.b32.xlu1 %v15326_v13, %s11395_s17 }
 0x91c   : > { %8736 = vrot.lane.b32.xlu0 %v15313_v43, %s11395_s17 }
 0x91e   : > { %8738 = vrot.lane.b32.xlu1 %v15335_v58, %s11395_s17 }
 0x920   : > { %8740 = vrot.lane.b32.xlu0 %v15329_v41, %s11395_s17 }
 0x922   : > { %8742 = vrot.lane.b32.xlu1 %v15350_v51, %s11395_s17 }
 0x924   : > { %8748 = vrot.lane.b32.xlu0 %v15338_v0, %s11395_s17 }
 0x926   : > { %8750 = vrot.lane.b32.xlu1 %v15358_v15, %s11395_s17 }
 0x928   : > { %8704 = vrot.lane.b32.xlu0 %v15344_v52, %s11395_s17 }
 0x92a   : > { %8706 = vrot.lane.b32.xlu1 %v15366_v9, %s11395_s17 }
 0x92c   : > { %8708 = vrot.lane.b32.xlu0 %v15361_v6, %s11395_s17 }
 0x92e   : > { %8710 = vrot.lane.b32.xlu1 %v15376_v25, %s11395_s17 }
 0x930   : > { %8716 = vrot.lane.b32.xlu0 %v15369_v63, %s11395_s17 }
 0x932   : > { %8718 = vrot.lane.b32.xlu1 %v15380_v29, %s11395_s17 }
 0x934   : > { %8744 = vrot.lane.b32.xlu0 %v15391_v3, %s11395_s17 }
 0x936   : > { %8746 = vrot.lane.b32.xlu1 %v15404_v4, %s11395_s17 }
 0x938   : > { %8752 = vrot.lane.b32.xlu0 %v15383_v37, %s11395_s17 }
 0x93a   : > { %8754 = vrot.lane.b32.xlu1 %v15407_v59, %s11395_s17 }
 0x93c   : > { %8756 = vrot.lane.b32.xlu0 %v15396_v11, %s11395_s17 }
 0x93e   : > { %8758 = vrot.lane.b32.xlu1 %v15410_v46, %s11395_s17 }
 0x940   : > { %8712 = vrot.lane.b32.xlu0 %v15420_v55, %s11395_s17 }
 0x942   : > { %8714 = vrot.lane.b32.xlu1 %v15440_v26, %s11395_s17 }
 0x944   : > { %8720 = vrot.lane.b32.xlu0 %v15413_v48, %s11395_s17 }
 0x946   : > { %v8669_v61 = vpop.permute.xlu0 %8668  ;;  %8722 = vrot.lane.b32.xlu1 %v15430_v45, %s11395_s17 }
 0x947   : > { %v8844_v7 = vsel %vm11698_vm5, %v15104_v1, %v8669_v61 }
 0x948   : > { %v8671_v47 = vpop.permute.xlu1 %8670  ;;  %8724 = vrot.lane.b32.xlu0 %v15433_v32, %s11395_s17 }
 0x949   : > { %v8845_v42 = vsel %vm11698_vm5, %v15109_v23, %v8671_v47 }
 0x94a   : > { %v9280_v36 = vcombine.low %v8844_v7, %v8845_v42  ;;  %v8637_v40 = vpop.permute.xlu0 %8636  ;;  %8726 = vrot.lane.b32.xlu1 %v15453_v2, %s11395_s17 }
 0x94b   : > { %v8828_v32 = vsel %vm11698_vm5, %v15117_v21, %v8637_v40 }
 0x94c   : > { %v8639_v18 = vpop.permute.xlu1 %8638  ;;  %8760 = vrot.lane.b32.xlu0 %v15456_v31, %s11395_s17 }
 0x94d   : > { %v8829_v1 = vsel %vm11698_vm5, %v15127_v19, %v8639_v18  ;;  %v9290_v19 = vrot.slane %v9280_v36, %v16982_v14 }
 0x94e   : > { %v9084_v61 = vcombine.low %v8828_v32, %v8829_v1  ;;  %v8673_v45 = vpop.permute.xlu0 %8672  ;;  %8762 = vrot.lane.b32.xlu1 %v15474_v5, %s11395_s17 }
 0x94f   : > { %v8846_v47 = vsel %vm11698_vm5, %v15132_v56, %v8673_v45 }
 0x950   : > { %v8675_v23 = vpop.permute.xlu1 %8674  ;;  %8728 = vrot.lane.b32.xlu0 %v15462_v27, %s11395_s17 }
 0x951   : > { %v8847_v21 = vsel %vm11698_vm5, %v15142_v44, %v8675_v23 }
 0x952   : > { %v9281_v40 = vcombine.low %v8846_v47, %v8847_v21  ;;  %v8677_v31 = vpop.permute.xlu0 %8676  ;;  %8730 = vrot.lane.b32.xlu1 %v15477_v8, %s11395_s17  ;;  %s11330_s17 = sshll.u32 %s11396_s20, 4  ;;  %s11331_s17 = int_to_ptr.vmem [resolvable:$false] %s11330_s17 }
 0x953   : > { %v8848_v56 = vsel %vm11698_vm5, %v15158_v16, %v8677_v31 }
 0x954   : > { %v9297_v18 = vrot.slane %v9281_v40, %v16982_v14  ;;  %v8679_v5 = vpop.permute.xlu1 %8678  ;;  %8988 = vrot.lane.b32.xlu0 %v8844_v7, %s11393_s16 }
 0x955   : > { %v8849_v44 = vsel %vm11698_vm5, %v15172_v60, %v8679_v5 }
 0x956   : > { %v9312_v45 = vcombine.low %v9290_v19, %v9297_v18  ;;  %v9282_v23 = vcombine.low %v8848_v56, %v8849_v44  ;;  %v8685_v27 = vpop.permute.xlu0 %8684  ;;  %8990 = vrot.lane.b32.xlu1 %v8845_v42, %s11393_s16  ;;  %v17001_v19 = vld [vmem:[#allocation104_spill] sm:$0xff] }
 0x957   : > { %v8852_v7 = vsel %vm11698_vm5, %v15175_v30, %v8685_v27 }
 0x958   : > { %v8687_v8 = vpop.permute.xlu1 %8686  ;;  %8956 = vrot.lane.b32.xlu0 %v8828_v32, %s11393_s16 }
 0x959   : > { %v8853_v16 = vsel %vm11698_vm5, %v15178_v38, %v8687_v8  ;;  %v15622_v38 = vrot.slane %v9084_v61, %v16982_v14 }
 0x95a   : > { %v9378_v31 = vcombine.low %v8852_v7, %v8853_v16  ;;  %v8641_v36 = vpop.permute.xlu0 %8640  ;;  %8958 = vrot.lane.b32.xlu1 %v8829_v1, %s11393_s16 }
 0x95b   : > { %v8830_v5 = vsel %vm11698_vm5, %v15181_v35, %v8641_v36  ;;  %v17002_v36 = vld [vmem:[#allocation112_spill] sm:$0xff] }
 0x95c   : > { %v8643_v60 = vpop.permute.xlu1 %8642  ;;  %8992 = vrot.lane.b32.xlu0 %v8846_v47, %s11393_s16 }
 0x95d   : > { %v8831_v32 = vsel %vm11698_vm5, %v15202_v12, %v8643_v60 }
 0x95e   : > { %v9085_v30 = vcombine.low %v8830_v5, %v8831_v32  ;;  %v8645_v27 = vpop.permute.xlu0 %8644  ;;  %8994 = vrot.lane.b32.xlu1 %v8847_v21, %s11393_s16 }
 0x95f   : > { %v8832_v35 = vsel %vm11698_vm5, %v15191_v39, %v8645_v27  ;;  %v9304_v27 = vrot.slane %v9282_v23, %v16982_v14  ;;  %v15664_v23 = vrot.slane %v9312_v45, %v16982_v14 }
 0x960   : > { %v15625_v8 = vrot.slane %v9085_v30, %v16982_v14  ;;  %v8647_v42 = vpop.permute.xlu1 %8646  ;;  %8996 = vrot.lane.b32.xlu0 %v8848_v56, %s11393_s16 }
 0x961   : > { %v8833_v12 = vsel %vm11698_vm5, %v15248_v62, %v8647_v42  ;;  %v17005_v42 = vld [vmem:[#allocation106_spill] sm:$0xff] }
 0x962   : > { %v9116_v1 = vcombine.low %v15622_v38, %v15625_v8  ;;  %v9086_v47 = vcombine.low %v8832_v35, %v8833_v12  ;;  %v8653_v61 = vpop.permute.xlu0 %8652  ;;  %8998 = vrot.lane.b32.xlu1 %v8849_v44, %s11393_s16 }
 0x963   : > { %v8836_v40 = vsel %vm11698_vm5, %v15251_v28, %v8653_v61 }
 0x964   : > { %v8655_v21 = vpop.permute.xlu1 %8654  ;;  %9004 = vrot.lane.b32.xlu0 %v8852_v7, %s11393_s16  ;;  %v17003_v7 = vld [vmem:[#allocation44_spill] sm:$0xff] }
 0x965   : > { %v8837_v39 = vsel %vm11698_vm5, %v17001_v19, %v8655_v21 }
 0x966   : > { %v9182_v18 = vcombine.low %v8836_v40, %v8837_v39  ;;  %v8681_v62 = vpop.permute.xlu0 %8680  ;;  %9006 = vrot.lane.b32.xlu1 %v8853_v16, %s11393_s16 }
 0x967   : > { %v8850_v44 = vsel %vm11698_vm5, %v17002_v36, %v8681_v62 }
 0x968   : > { %v8683_v56 = vpop.permute.xlu1 %8682  ;;  %8960 = vrot.lane.b32.xlu0 %v8830_v5, %s11393_s16  ;;  %v17004_v5 = vld [vmem:[#allocation107_spill] sm:$0xff] }
 0x969   : > { %v8851_v60 = vsel %vm11698_vm5, %v17003_v7, %v8683_v56  ;;  %v17006_v7 = vld [vmem:[#allocation46_spill] sm:$0xff] }
 0x96a   : > { %v9283_v28 = vcombine.low %v8850_v44, %v8851_v60  ;;  %v8689_v30 = vpop.permute.xlu0 %8688  ;;  %8962 = vrot.lane.b32.xlu1 %v8831_v32, %s11393_s16  ;;  %v9388_v32 = vrot.slane %v9378_v31, %v16982_v14 }
 0x96b   : > { %v8854_v8 = vsel %vm11698_vm5, %v17004_v5, %v8689_v30  ;;  %v17007_v30 = vld [vmem:[#allocation109_spill] sm:$0xff] }
 0x96c   : > { %v9311_v38 = vrot.slane %v9283_v28, %v16982_v14  ;;  %v8691_v16 = vpop.permute.xlu1 %8690  ;;  %8964 = vrot.lane.b32.xlu0 %v8832_v35, %s11393_s16 }
 0x96d   : > { %v8855_v61 = vsel %vm11698_vm5, %v17005_v42, %v8691_v16  ;;  %v17009_v42 = vld [vmem:[#allocation51_spill] sm:$0xff] }
 0x96e   : > { %v9313_v21 = vcombine.low %v9304_v27, %v9311_v38  ;;  %v9379_v19 = vcombine.low %v8854_v8, %v8855_v61  ;;  %v8693_v62 = vpop.permute.xlu0 %8692  ;;  %8966 = vrot.lane.b32.xlu1 %v8833_v12, %s11393_s16 }
 0x96f   : > { %v8856_v28 = vsel %vm11698_vm5, %v17006_v7, %v8693_v62 }
 0x970   : > { %v15668_v35 = vrot.slane %v9313_v21, %v16982_v14  ;;  %v9395_v56 = vrot.slane %v9379_v19, %v16982_v14  ;;  %v8695_v36 = vpop.permute.xlu1 %8694  ;;  %8972 = vrot.lane.b32.xlu0 %v8836_v40, %s11393_s16  ;;  %v17008_v40 = vld [vmem:[#allocation108_spill] sm:$0xff] }
 0x971   : > { %v8857_v12 = vsel %vm11698_vm5, %v17007_v30, %v8695_v36 }
 0x972   : > { %v9410_v45 = vcombine.low %v9388_v32, %v9395_v56  ;;  %v9380_v27 = vcombine.low %v8856_v28, %v8857_v12  ;;  %v8649_v38 = vpop.permute.xlu0 %8648  ;;  %8974 = vrot.lane.b32.xlu1 %v8837_v39, %s11393_s16  ;;  %v9328_v31 = vcombine.low %v15664_v23, %v15668_v35  ;;  %v9108_v39 = vrot.slane %v9086_v47, %v16982_v14 }
 0x973   : > { %v8834_v5 = vsel %vm11698_vm5, %v17008_v40, %v8649_v38  ;;  %v15700_v47 = vrot.slane %v9116_v1, %v16982_v14 }
 0x974   : > { %9000 = vrot.lane.b32.xlu0 %v8850_v44, %s11393_s16  ;;  %v8651_v16 = vpop.permute.xlu1 %8650 }
 0x975   : > { %v8835_v21 = vsel %vm11698_vm5, %v17009_v42, %v8651_v16 }
 0x976   : > { %v9087_v19 = vcombine.low %v8834_v5, %v8835_v21  ;;  %v8657_v62 = vpop.permute.xlu0 %8656  ;;  %9002 = vrot.lane.b32.xlu1 %v8851_v60, %s11393_s16  ;;  %v9192_v60 = vrot.slane %v9182_v18, %v16982_v14 }
 0x977   : > { %v8838_v56 = vsel %vm11698_vm5, %v15450_v22, %v8657_v62 }
 0x978   : > { %v9115_v32 = vrot.slane %v9087_v19, %v16982_v14  ;;  %9008 = vrot.lane.b32.xlu0 %v8854_v8, %s11393_s16  ;;  %v8659_v44 = vpop.permute.xlu1 %8658 }
 0x979   : > { %v8839_v36 = vsel %vm11698_vm5, %v15468_v49, %v8659_v44 }
 0x97a   : > { %v9117_v7 = vcombine.low %v9108_v39, %v9115_v32  ;;  %v9183_v30 = vcombine.low %v8838_v56, %v8839_v36  ;;  %v8661_v38 = vpop.permute.xlu0 %8660  ;;  %9010 = vrot.lane.b32.xlu1 %v8855_v61, %s11393_s16 }
 0x97b   : > { %v8840_v49 = vsel %vm11698_vm5, %v15482_v33, %v8661_v38 }
 0x97c   : > { %v15704_v8 = vrot.slane %v9117_v7, %v16982_v14  ;;  %v9199_v16 = vrot.slane %v9183_v30, %v16982_v14  ;;  %9012 = vrot.lane.b32.xlu0 %v8856_v28, %s11393_s16  ;;  %v8663_v22 = vpop.permute.xlu1 %8662 }
 0x97d   : > { %v8841_v61 = vsel %vm11698_vm5, %v15489_v54, %v8663_v22 }
 0x97e   : > { %v9214_v1 = vcombine.low %v9192_v60, %v9199_v16  ;;  %v9184_v40 = vcombine.low %v8840_v49, %v8841_v61  ;;  %v8697_v42 = vpop.permute.xlu0 %8696  ;;  %9014 = vrot.lane.b32.xlu1 %v8857_v12, %s11393_s16  ;;  %v9132_v18 = vcombine.low %v15700_v47, %v15704_v8  ;;  %v9402_v12 = vrot.slane %v9380_v27, %v16982_v14 }
 0x97f   : > { %v8858_v19 = vsel %vm11698_vm5, %v15494_v50, %v8697_v42  ;;  %v15736_v27 = vrot.slane %v9410_v45, %v16982_v14 }
 0x980   : > { %8968 = vrot.lane.b32.xlu0 %v8834_v5, %s11393_s16  ;;  %v8699_v28 = vpop.permute.xlu1 %8698  ;;  %v15760_v22 = vrot.slane %v9214_v1, %v16982_v14 }
 0x981   : > { %v8859_v33 = vsel %vm11698_vm5, %v15499_v20, %v8699_v28 }
 0x982   : > { %v9381_v54 = vcombine.low %v8858_v19, %v8859_v33  ;;  %v8665_v62 = vpop.permute.xlu0 %8664  ;;  %8970 = vrot.lane.b32.xlu1 %v8835_v21, %s11393_s16  ;;  %v9206_v21 = vrot.slane %v9184_v40, %v16982_v14 }
 0x983   : > { %v8842_v32 = vsel %vm11698_vm5, %v15504_v57, %v8665_v62 }
 0x984   : > { %v9409_v39 = vrot.slane %v9381_v54, %v16982_v14  ;;  %8976 = vrot.lane.b32.xlu0 %v8838_v56, %s11393_s16  ;;  %v8667_v5 = vpop.permute.xlu1 %8666 }
 0x985   : > { %v8843_v50 = vsel %vm11698_vm5, %v15509_v53, %v8667_v5 }
 0x986   : > { %v9411_v20 = vcombine.low %v9402_v12, %v9409_v39  ;;  %v9185_v44 = vcombine.low %v8842_v32, %v8843_v50  ;;  %v8733_v7 = vpop.permute.xlu0 %8732  ;;  %8978 = vrot.lane.b32.xlu1 %v8839_v36, %s11393_s16 }
 0x987   : > { %v15747_v53 = vsel %vm11698_vm5, %v15281_v24, %v8733_v7 }
 0x988   : > { %v15740_v56 = vrot.slane %v9411_v20, %v16982_v14  ;;  %v9213_v30 = vrot.slane %v9185_v44, %v16982_v14  ;;  %8980 = vrot.lane.b32.xlu0 %v8840_v49, %s11393_s16  ;;  %v8735_v57 = vpop.permute.xlu1 %8734 }
 0x989   : > { %v15752_v45 = vsel %vm11698_vm5, %v15318_v34, %v8735_v57 }
 0x98a   : > { %v9215_v36 = vcombine.low %v9206_v21, %v9213_v30  ;;  %v9672_v38 = vcombine.low %v15747_v53, %v15752_v45  ;;  %v8701_v60 = vpop.permute.xlu0 %8700  ;;  %8982 = vrot.lane.b32.xlu1 %v8841_v61, %s11393_s16  ;;  %v9426_v16 = vcombine.low %v15736_v27, %v15740_v56 }
 0x98b   : > { %v15769_v49 = vsel %vm11698_vm5, %v15305_v10, %v8701_v60 }
 0x98c   : > { %v15763_v24 = vrot.slane %v9215_v36, %v16982_v14  ;;  %9016 = vrot.lane.b32.xlu0 %v8858_v19, %s11393_s16  ;;  %v8703_v34 = vpop.permute.xlu1 %8702  ;;  %v9682_v8 = vrot.slane %v9672_v38, %v16982_v14 }
 0x98d   : > { %v15774_v61 = vsel %vm11698_vm5, %v15326_v13, %v8703_v34 }
 0x98e   : > { %v9476_v1 = vcombine.low %v15769_v49, %v15774_v61  ;;  %v8737_v40 = vpop.permute.xlu0 %8736  ;;  %9018 = vrot.lane.b32.xlu1 %v8859_v33, %s11393_s16  ;;  %v9230_v42 = vcombine.low %v15760_v22, %v15763_v24 }
 0x98f   : > { %v15806_v5 = vsel %vm11698_vm5, %v15313_v43, %v8737_v40 }
 0x990   : > { %8984 = vrot.lane.b32.xlu0 %v8842_v32, %s11393_s16  ;;  %v8739_v28 = vpop.permute.xlu1 %8738 }
 0x992   : > { %v8741_v19 = vpop.permute.xlu0 %8740  ;;  %8986 = vrot.lane.b32.xlu1 %v8843_v50, %s11393_s16 }
 0x993   : > { %v15820_v50 = vsel %vm11698_vm5, %v15329_v41, %v8741_v19 }
 0x994   : > { %9052 = vrot.lane.b32.xlu0 %v15747_v53, %s11393_s16  ;;  %v8743_v10 = vpop.permute.xlu1 %8742 }
 0x995   : > { %v15827_v20 = vsel %vm11698_vm5, %v15350_v51, %v8743_v10 }
 0x996   : > { %v8749_v13 = vpop.permute.xlu0 %8748  ;;  %9054 = vrot.lane.b32.xlu1 %v15752_v45, %s11393_s16  ;;  %v9486_v45 = vrot.slane %v9476_v1, %v16982_v14 }
 0x997   : > { %v15792_v54 = vsel %vm11698_vm5, %v15338_v0, %v8749_v13 }
 0x998   : > { %9020 = vrot.lane.b32.xlu0 %v15769_v49, %s11393_s16  ;;  %v8751_v33 = vpop.permute.xlu1 %8750 }
 0x999   : > { %v15797_v62 = vsel %vm11698_vm5, %v15358_v15, %v8751_v33  ;;  %v15813_v15 = vsel %vm11698_vm5, %v15335_v58, %v8739_v28 }
 0x99a   : > { %v9770_v12 = vcombine.low %v15792_v54, %v15797_v62  ;;  %v8705_v39 = vpop.permute.xlu0 %8704  ;;  %9022 = vrot.lane.b32.xlu1 %v15774_v61, %s11393_s16 }
 0x99b   : > { %v15838_v41 = vsel %vm11698_vm5, %v15344_v52, %v8705_v39 }
 0x99c   : > { %9056 = vrot.lane.b32.xlu0 %v15806_v5, %s11393_s16  ;;  %v8707_v0 = vpop.permute.xlu1 %8706 }
 0x99d   : > { %v15845_v21 = vsel %vm11698_vm5, %v15366_v9, %v8707_v0 }
 0x99e   : > { %v8709_v32 = vpop.permute.xlu0 %8708  ;;  %9058 = vrot.lane.b32.xlu1 %v15813_v15, %s11393_s16 }
 0x99f   : > { %v15852_v57 = vsel %vm11698_vm5, %v15361_v6, %v8709_v32 }
 0x9a0   : > { %9060 = vrot.lane.b32.xlu0 %v15820_v50, %s11393_s16  ;;  %v8711_v43 = vpop.permute.xlu1 %8710 }
 0x9a1   : > { %v15859_v36 = vsel %vm11698_vm5, %v15376_v25, %v8711_v43 }
 0x9a2   : > { %v8717_v58 = vpop.permute.xlu0 %8716  ;;  %9062 = vrot.lane.b32.xlu1 %v15827_v20, %s11393_s16 }
 0x9a3   : > { %v15866_v60 = vsel %vm11698_vm5, %v15369_v63, %v8717_v58  ;;  %v17010_v58 = vld [vmem:[#allocation70_spill] sm:$0xff] }
 0x9a4   : > { %9068 = vrot.lane.b32.xlu0 %v15792_v54, %s11393_s16  ;;  %v8719_v44 = vpop.permute.xlu1 %8718 }
 0x9a5   : > { %v15873_v34 = vsel %vm11698_vm5, %v15380_v29, %v8719_v44 }
 0x9a6   : > { %v8745_v7 = vpop.permute.xlu0 %8744  ;;  %9070 = vrot.lane.b32.xlu1 %v15797_v62, %s11393_s16  ;;  %v9574_v38 = vcombine.low %v15866_v60, %v15873_v34 }
 0x9a7   : > { %v8882_v40 = vsel %vm11698_vm5, %v15391_v3, %v8745_v7  ;;  %v17011_v7 = vld [vmem:[#allocation68_spill] sm:$0xff] }
 0x9a8   : > { %9024 = vrot.lane.b32.xlu0 %v15838_v41, %s11393_s16  ;;  %v8747_v51 = vpop.permute.xlu1 %8746 }
 0x9a9   : > { %v8883_v28 = vsel %vm11698_vm5, %v15404_v4, %v8747_v51 }
 0x9aa   : > { %v8753_v30 = vpop.permute.xlu0 %8752  ;;  %9026 = vrot.lane.b32.xlu1 %v15845_v21, %s11393_s16 }
 0x9ab   : > { %v15888_v29 = vsel %vm11698_vm5, %v15383_v37, %v8753_v30 }
 0x9ac   : > { %9028 = vrot.lane.b32.xlu0 %v15852_v57, %s11393_s16  ;;  %v8755_v52 = vpop.permute.xlu1 %8754 }
 0x9ad   : > { %v15895_v3 = vsel %vm11698_vm5, %v15407_v59, %v8755_v52  ;;  %v17012_v52 = vld [vmem:[#allocation85_spill] sm:$0xff] }
 0x9ae   : > { %v8757_v9 = vpop.permute.xlu0 %8756  ;;  %9030 = vrot.lane.b32.xlu1 %v15859_v36, %s11393_s16 }
 0x9af   : > { %v15902_v4 = vsel %vm11698_vm5, %v15396_v11, %v8757_v9 }
 0x9b0   : > { %9036 = vrot.lane.b32.xlu0 %v15866_v60, %s11393_s16  ;;  %v8759_v6 = vpop.permute.xlu1 %8758 }
 0x9b1   : > { %v15909_v33 = vsel %vm11698_vm5, %v15410_v46, %v8759_v6 }
 0x9b2   : > { %v8713_v25 = vpop.permute.xlu0 %8712  ;;  %9038 = vrot.lane.b32.xlu1 %v15873_v34, %s11393_s16  ;;  %v9772_v49 = vcombine.low %v15902_v4, %v15909_v33  ;;  %v9584_v34 = vrot.slane %v9574_v38, %v16982_v14 }
 0x9b3   : > { %v8866_v39 = vsel %vm11698_vm5, %v15420_v55, %v8713_v25  ;;  %v17013_v25 = vld [vmem:[#allocation90_spill] sm:$0xff] }
 0x9b4   : > { %9064 = vrot.lane.b32.xlu0 %v8882_v40, %s11393_s16  ;;  %v8715_v63 = vpop.permute.xlu1 %8714  ;;  %v9794_v27 = vrot.slane %v9772_v49, %v16982_v14 }
 0x9b5   : > { %v8867_v0 = vsel %vm11698_vm5, %v15440_v26, %v8715_v63 }
 0x9b6   : > { %v8721_v19 = vpop.permute.xlu0 %8720  ;;  %9066 = vrot.lane.b32.xlu1 %v8883_v28, %s11393_s16 }
 0x9b7   : > { %v8870_v46 = vsel %vm11698_vm5, %v15413_v48, %v8721_v19 }
 0x9b8   : > { %9072 = vrot.lane.b32.xlu0 %v15888_v29, %s11393_s16  ;;  %v8723_v10 = vpop.permute.xlu1 %8722 }
 0x9b9   : > { %v8871_v55 = vsel %vm11698_vm5, %v17010_v58, %v8723_v10  ;;  %v9675_v58 = vcombine.low %v8882_v40, %v8883_v28  ;;  %v9479_v40 = vcombine.low %v8866_v39, %v8867_v0 }
 0x9ba   : > { %v8725_v13 = vpop.permute.xlu0 %8724  ;;  %9074 = vrot.lane.b32.xlu1 %v15895_v3, %s11393_s16  ;;  %v9575_v22 = vcombine.low %v8870_v46, %v8871_v55 }
 0x9bb   : > { %v8872_v26 = vsel %vm11698_vm5, %v17011_v7, %v8725_v13  ;;  %v9703_v17 = vrot.slane %v9675_v58, %v16982_v14 }
 0x9bc   : > { %9076 = vrot.lane.b32.xlu0 %v15902_v4, %s11393_s16  ;;  %v8727_v37 = vpop.permute.xlu1 %8726  ;;  %v9591_v61 = vrot.slane %v9575_v22, %v16982_v14 }
 0x9bd   : > { %v8873_v48 = vsel %vm11698_vm5, %v15453_v2, %v8727_v37  ;;  %v17014_v2 = vld [vmem:[#allocation77_spill] sm:$0xff]  ;;  %v17015_v37 = vld [vmem:[#allocation87_spill] sm:$0xff] }
 0x9be   : > { %v8761_v59 = vpop.permute.xlu0 %8760  ;;  %9078 = vrot.lane.b32.xlu1 %v15909_v33, %s11393_s16  ;;  %v9576_v24 = vcombine.low %v8872_v26, %v8873_v48  ;;  %v9606_v56 = vcombine.low %v9584_v34, %v9591_v61 }
 0x9bf   : > { %v8890_v10 = vsel %vm11698_vm5, %v17014_v2, %v8761_v59 }
 0x9c0   : > { %9032 = vrot.lane.b32.xlu0 %v8866_v39, %s11393_s16  ;;  %v8763_v11 = vpop.permute.xlu1 %8762  ;;  %v9598_v1 = vrot.slane %v9576_v24, %v16982_v14 }
 0x9c2   : > { %v8729_v32 = vpop.permute.xlu0 %8728  ;;  %9034 = vrot.lane.b32.xlu1 %v8867_v0, %s11393_s16 }
 0x9c3   : > { %v8874_v9 = vsel %vm11698_vm5, %v17012_v52, %v8729_v32  ;;  %v8891_v32 = vsel %vm11698_vm5, %v17015_v37, %v8763_v11  ;;  %v9674_v52 = vcombine.low %v15820_v50, %v15827_v20  ;;  %v9478_v50 = vcombine.low %v15852_v57, %v15859_v36 }
 0x9c4   : > { %9040 = vrot.lane.b32.xlu0 %v8870_v46, %s11393_s16  ;;  %v8731_v43 = vpop.permute.xlu1 %8730  ;;  %v9507_v20 = vrot.slane %v9479_v40, %v16982_v14  ;;  %v9773_v46 = vcombine.low %v8890_v10, %v8891_v32 }
 0x9c5   : > { %v8875_v63 = vsel %vm11698_vm5, %v17013_v25, %v8731_v43  ;;  %v9673_v43 = vcombine.low %v15806_v5, %v15813_v15  ;;  %v9477_v5 = vcombine.low %v15838_v41, %v15845_v21  ;;  %v9696_v15 = vrot.slane %v9674_v52, %v16982_v14 }
 0x9c6   : > { %v15928_v44 = vpop.permute.xlu0 %8988  ;;  %9042 = vrot.lane.b32.xlu1 %v8871_v55, %s11393_s16  ;;  %v9577_v41 = vcombine.low %v8874_v9, %v8875_v63  ;;  %v9500_v36 = vrot.slane %v9478_v50, %v16982_v14 }
 0x9c7   : > { %v9689_v11 = vrot.slane %v9673_v43, %v16982_v14  ;;  %v9493_v57 = vrot.slane %v9477_v5, %v16982_v14 }
 0x9c8   : > { %9044 = vrot.lane.b32.xlu0 %v8872_v26, %s11393_s16  ;;  %v15935_v51 = vpop.permute.xlu1 %8990  ;;  %v9509_v0 = vcombine.low %v9500_v36, %v9507_v20  ;;  %v9605_v55 = vrot.slane %v9577_v41, %v16982_v14 }
 0x9c9   : > { %v9704_v39 = vcombine.low %v9682_v8, %v9689_v11  ;;  %v9508_v35 = vcombine.low %v9486_v45, %v9493_v57  ;;  %v9329_v2 = vcombine.low %v15928_v44, %v15935_v51 }
 0x9ca   : > { %v15940_v30 = vpop.permute.xlu0 %8956  ;;  %9046 = vrot.lane.b32.xlu1 %v8873_v48, %s11393_s16  ;;  %v9523_v48 = vrot.slane %v9509_v0, %v16982_v14 }
 0x9cb   : > { %v9712_v23 = vrot.slane %v9704_v39, %v16982_v14  ;;  %v9516_v25 = vrot.slane %v9508_v35, %v16982_v14  ;;  %v9339_v51 = vrot.slane %v9329_v2, %v16982_v14 }
 0x9cc   : > { %9048 = vrot.lane.b32.xlu0 %v8874_v9, %s11393_s16  ;;  %v15947_v6 = vpop.permute.xlu1 %8958  ;;  %v9801_v9 = vrot.slane %v9773_v46, %v16982_v14 }
 0x9cd   : > { %v9133_v36 = vcombine.low %v15940_v30, %v15947_v6 }
 0x9ce   : > { %v15952_v19 = vpop.permute.xlu0 %8992  ;;  %9050 = vrot.lane.b32.xlu1 %v8875_v63, %s11393_s16 }
 0x9cf   : > { %v9143_v0 = vrot.slane %v9133_v36, %v16982_v14 }
 0x9d0   : > { %9080 = vrot.lane.b32.xlu0 %v8890_v10, %s11393_s16  ;;  %v15959_v13 = vpop.permute.xlu1 %8994  ;;  %v9780_v10 = vrot.slane %v9770_v12, %v16982_v14 }
 0x9d1   : > { %v9330_v33 = vcombine.low %v15952_v19, %v15959_v13  ;;  %v9803_v19 = vcombine.low %v9794_v27, %v9801_v9 }
 0x9d2   : > { %v15964_v7 = vpop.permute.xlu0 %8996  ;;  %9082 = vrot.lane.b32.xlu1 %v8891_v32, %s11393_s16  ;;  %v9524_v32 = vcombine.low %v9516_v25, %v9523_v48  ;;  %s431_s16 = sand.u32 1, %s11380_s26  }
 0x9d3   : > { %v9346_v58 = vrot.slane %v9330_v33, %v16982_v14  ;;  %v9817_v62 = vrot.slane %v9803_v19, %v16982_v14  ;;  %s10124_s21 = sshll.u32 %s431_s16, 8 }
 0x9d4   : > { %9868 = vrot.lane.b32.xlu0 %v9132_v18, %s11391_s27  ;;  %v15975_v59 = vpop.permute.xlu1 %8998  ;;  %v9705_v18 = vcombine.low %v9696_v15, %v9703_v17  ;;  %v9614_v17 = vrot.slane %v9606_v56, %v16982_v14  ;;  %s16131_s14 = scalar_lea.vmem [#allocation2], %s10124_s21  ;;  %s11332_s21 = scalar_lea.vmem %s11331_s17, 8192 }
 0x9d5   : > { %v9331_v43 = vcombine.low %v15964_v7, %v15975_v59  ;;  %v9361_v11 = vcombine.low %v9339_v51, %v9346_v58  ;;  %s10058_s22 = sshll.u32 %s16131_s14, 4  ;;  %s16217_s22 = int_to_ptr.vmem [resolvable:$true] %s10058_s22 }
 0x9d6   : > { %v15978_v28 = vpop.permute.xlu0 %9004  ;;  %s11326_s15 = scalar_lea.vmem %s16217_s22, 4096  ;;  %p11333_p0 = scmp.lt.s32.totalorder %s16217_s22, %s11331_s17 }
 0x9d7   : > { %v9353_v5 = vrot.slane %v9331_v43, %v16982_v14  ;;  %v9369_v20 = vrot.slane %v9361_v11, %v16982_v14  ;;  %p11327_p11 = scmp.ne.s32.totalorder %s16217_s22, %s11326_s15  ;;  %p11334_p1 = scmp.lt.s32.totalorder %s11332_s21, %s11326_s15 }
 0x9d8   : > { %9872 = vrot.lane.b32.xlu0 %v9230_v42, %s11391_s27  ;;  %v15990_v47 = vpop.permute.xlu1 %9006  ;;  %v9719_v42 = vrot.slane %v9705_v18, %v16982_v14 }
 0x9d9   : > { %v9427_v61 = vcombine.low %v15978_v28, %v15990_v47  ;;  %p11328_p12 = pnand %p11327_p11, %p11507_p5  ;;  %p11335_p2 = por %p11334_p1, %p11333_p0 }
 0x9da   : > { %v15997_v21 = vpop.permute.xlu0 %8960  ;;  %v9720_v4 = vcombine.low %v9712_v23, %v9719_v42 }
 0x9db   : > { %p11329_p13 = pneg %p11328_p12 }
 0x9dc   : > { %9876 = vrot.lane.b32.xlu0 %v9328_v31, %s11391_s27  ;;  %v16005_v53 = vpop.permute.xlu1 %8962  ;;  %v9771_v31 = vcombine.low %v15888_v29, %v15895_v3  ;;  %v9607_v29 = vcombine.low %v9598_v1, %v9605_v55 }
 0x9dd   : > { %v9134_v41 = vcombine.low %v15997_v21, %v16005_v53  ;;  %p11336_p3 = pnand %p11335_p2, %p11329_p13 }
 0x9de   : > { %v16015_v26 = vpop.permute.xlu0 %8964  ;;  %v9787_v63 = vrot.slane %v9771_v31, %v16982_v14  ;;  %v9621_v13 = vrot.slane %v9607_v29, %v16982_v14 }
 0x9df   : > { %v9150_v45 = vrot.slane %v9134_v41, %v16982_v14 }
 0x9e0   : > { %9880 = vrot.lane.b32.xlu0 %v9426_v16, %s11391_s27  ;;  %v8967_v60 = vpop.permute.xlu1 %8966  ;;  %v9802_v52 = vcombine.low %v9780_v10, %v9787_v63  ;;  %v9622_v40 = vcombine.low %v9614_v17, %v9621_v13 }
 0x9e1   : > { %v9135_v38 = vcombine.low %v16015_v26, %v8967_v60  ;;  %v9165_v46 = vcombine.low %v9143_v0, %v9150_v45 }
 0x9e2   : > { %v16031_v3 = vpop.permute.xlu0 %8972  ;;  %v9810_v7 = vrot.slane %v9802_v52, %v16982_v14 }
 0x9e3   : > { %v9157_v55 = vrot.slane %v9135_v38, %v16982_v14  ;;  %v9173_v49 = vrot.slane %v9165_v46, %v16982_v14 }
 0x9e4   : > { %9892 = vrot.lane.b32.xlu0 %v9720_v4, %s11391_s27  ;;  %v16039_v16 = vpop.permute.xlu1 %8974  ;;  %v9818_v18 = vcombine.low %v9810_v7, %v9817_v62  ;;  %v9437_v4 = vrot.slane %v9427_v61, %v16982_v14 }
 0x9e5   : > { %v9231_v25 = vcombine.low %v16031_v3, %v16039_v16 }
 0x9e6   : > { %v9001_v37 = vpop.permute.xlu0 %9000 }
 0x9e7   : > { %v9241_v13 = vrot.slane %v9231_v25, %v16982_v14 }
 0x9e8   : > { %9884 = vrot.lane.b32.xlu0 %v9524_v32, %s11391_s27  ;;  %v9003_v44 = vpop.permute.xlu1 %9002 }
 0x9e9   : > { %v9332_v54 = vcombine.low %v9001_v37, %v9003_v44 }
 0x9ea   : > { %v9009_v12 = vpop.permute.xlu0 %9008 }
 0x9eb   : > { %v9360_v15 = vrot.slane %v9332_v54, %v16982_v14 }
 0x9ec   : > { %9888 = vrot.lane.b32.xlu0 %v9622_v40, %s11391_s27  ;;  %v9011_v59 = vpop.permute.xlu1 %9010 }
 0x9ed   : > { %v9362_v50 = vcombine.low %v9353_v5, %v9360_v15  ;;  %v9428_v6 = vcombine.low %v9009_v12, %v9011_v59 }
 0x9ee   : > { %v9013_v8 = vpop.permute.xlu0 %9012 }
 0x9ef   : > { %v9376_v39 = vrot.slane %v9362_v50, %v16982_v14  ;;  %v9444_v34 = vrot.slane %v9428_v6, %v16982_v14 }
 0x9f0   : > { %9896 = vrot.lane.b32.xlu0 %v9818_v18, %s11391_s27  ;;  %v9015_v57 = vpop.permute.xlu1 %9014 }
 0x9f1   : > { %v9377_v22 = vcombine.low %v9369_v20, %v9376_v39  ;;  %v9429_v9 = vcombine.low %v9013_v8, %v9015_v57  ;;  %v9459_v27 = vcombine.low %v9437_v4, %v9444_v34 }
 0x9f2   : > { %v8969_v24 = vpop.permute.xlu0 %8968 }
 0x9f3   : > { %9878 = vrot.lane.b32.xlu1 %v9377_v22, %s11391_s27  ;;  %v9451_v28 = vrot.slane %v9429_v9, %v16982_v14  ;;  %v9467_v58 = vrot.slane %v9459_v27, %v16982_v14 }
 0x9f4   : > { %v8971_v42 = vpop.permute.xlu1 %8970 }
 0x9f5   : > { %v9136_v21 = vcombine.low %v8969_v24, %v8971_v42 }
 0x9f6   : > { %v8977_v53 = vpop.permute.xlu0 %8976 }
 0x9f7   : > { %v9164_v23 = vrot.slane %v9136_v21, %v16982_v14 }
 0x9f8   : > { %v8979_v35 = vpop.permute.xlu1 %8978 }
 0x9f9   : > { %v9166_v30 = vcombine.low %v9157_v55, %v9164_v23  ;;  %v9232_v29 = vcombine.low %v8977_v53, %v8979_v35 }
 0x9fa   : > { %v8981_v31 = vpop.permute.xlu0 %8980 }
 0x9fb   : > { %v9180_v26 = vrot.slane %v9166_v30, %v16982_v14  ;;  %v9248_v47 = vrot.slane %v9232_v29, %v16982_v14 }
 0x9fc   : > { %v8983_v1 = vpop.permute.xlu1 %8982 }
 0x9fd   : > { %v9181_v60 = vcombine.low %v9173_v49, %v9180_v26  ;;  %v9233_v2 = vcombine.low %v8981_v31, %v8983_v1  ;;  %v9263_v52 = vcombine.low %v9241_v13, %v9248_v47 }
 0x9fe   : > { %v9017_v48 = vpop.permute.xlu0 %9016 }
 0x9ff   : > { %9870 = vrot.lane.b32.xlu1 %v9181_v60, %s11391_s27  ;;  %v9255_v3 = vrot.slane %v9233_v2, %v16982_v14  ;;  %v9271_v12 = vrot.slane %v9263_v52, %v16982_v14 }
 0xa00   : > { %v9019_v33 = vpop.permute.xlu1 %9018 }
 0xa01   : > { %v9430_v63 = vcombine.low %v9017_v48, %v9019_v33 }
 0xa02   : > { %v8985_v56 = vpop.permute.xlu0 %8984 }
 0xa03   : > { %v9458_v10 = vrot.slane %v9430_v63, %v16982_v14 }
 0xa04   : > { %v8987_v19 = vpop.permute.xlu1 %8986 }
 0xa05   : > { %v9460_v37 = vcombine.low %v9451_v28, %v9458_v10  ;;  %v9234_v32 = vcombine.low %v8985_v56, %v8987_v19 }
 0xa06   : > { %v9053_v43 = vpop.permute.xlu0 %9052 }
 0xa07   : > { %v9474_v16 = vrot.slane %v9460_v37, %v16982_v14  ;;  %v9262_v17 = vrot.slane %v9234_v32, %v16982_v14 }
 0xa08   : > { %v9055_v44 = vpop.permute.xlu1 %9054 }
 0xa09   : > { %v9264_v51 = vcombine.low %v9255_v3, %v9262_v17  ;;  %v9475_v54 = vcombine.low %v9467_v58, %v9474_v16  ;;  %v9721_v45 = vcombine.low %v9053_v43, %v9055_v44 }
 0xa0a   : > { %v9021_v62 = vpop.permute.xlu0 %9020 }
 0xa0b   : > { %v9278_v40 = vrot.slane %v9264_v51, %v16982_v14  ;;  %9882 = vrot.lane.b32.xlu1 %v9475_v54, %s11391_s27  ;;  %v9731_v53 = vrot.slane %v9721_v45, %v16982_v14  ;;  %v17016_v45 = vld [vmem:[#allocation25_spill] sm:$0xff] }
 0xa0c   : > { %v9023_v11 = vpop.permute.xlu1 %9022 }
 0xa0d   : > { %v9279_v5 = vcombine.low %v9271_v12, %v9278_v40  ;;  %v9525_v34 = vcombine.low %v9021_v62, %v9023_v11 }
 0xa0e   : > { %v9057_v15 = vpop.permute.xlu0 %9056 }
 0xa0f   : > { %9874 = vrot.lane.b32.xlu1 %v9279_v5, %s11391_s27  ;;  %v9535_v25 = vrot.slane %v9525_v34, %v16982_v14 }
 0xa10   : > { %v9059_v7 = vpop.permute.xlu1 %9058 }
 0xa11   : > { %v9722_v22 = vcombine.low %v9057_v15, %v9059_v7 }
 0xa12   : > { %v9061_v59 = vpop.permute.xlu0 %9060 }
 0xa13   : > { %v9738_v42 = vrot.slane %v9722_v22, %v16982_v14 }
 0xa14   : > { %v9063_v50 = vpop.permute.xlu1 %9062 }
 0xa15   : > { %v9723_v0 = vcombine.low %v9061_v59, %v9063_v50  ;;  %v9753_v23 = vcombine.low %v9731_v53, %v9738_v42 }
 0xa16   : > { %v16093_v8 = vpop.permute.xlu0 %9068 }
 0xa17   : > { %v9745_v35 = vrot.slane %v9723_v0, %v16982_v14  ;;  %v9761_v26 = vrot.slane %v9753_v23, %v16982_v14 }
 0xa18   : > { %v16095_v18 = vpop.permute.xlu1 %9070 }
 0xa19   : > { %v9819_v51 = vcombine.low %v16093_v8, %v16095_v18 }
 0xa1a   : > { %v9025_v20 = vpop.permute.xlu0 %9024 }
 0xa1b   : > { %v9829_v50 = vrot.slane %v9819_v51, %v16982_v14 }
 0xa1c   : > { %v9027_v41 = vpop.permute.xlu1 %9026 }
 0xa1d   : > { %v9526_v61 = vcombine.low %v9025_v20, %v9027_v41 }
 0xa1e   : > { %v9029_v39 = vpop.permute.xlu0 %9028 }
 0xa1f   : > { %v9542_v29 = vrot.slane %v9526_v61, %v16982_v14 }
 0xa20   : > { %v9031_v57 = vpop.permute.xlu1 %9030 }
 0xa21   : > { %v9527_v4 = vcombine.low %v9029_v39, %v9031_v57  ;;  %v9557_v56 = vcombine.low %v9535_v25, %v9542_v29 }
 0xa22   : > { %v9037_v36 = vpop.permute.xlu0 %9036 }
 0xa23   : > { %v9549_v28 = vrot.slane %v9527_v4, %v16982_v14  ;;  %v9565_v13 = vrot.slane %v9557_v56, %v16982_v14  ;;  %v17019_v4 = vld [vmem:[#allocation72_spill] sm:$0xff] }
 0xa24   : > { %v9039_v24 = vpop.permute.xlu1 %9038 }
 0xa25   : > { %v9623_v43 = vcombine.low %v9037_v36, %v9039_v24 }
 0xa26   : > { %v9065_v38 = vpop.permute.xlu0 %9064 }
 0xa27   : > { %v9633_v62 = vrot.slane %v9623_v43, %v16982_v14 }
 0xa28   : > { %v9067_v21 = vpop.permute.xlu1 %9066 }
 0xa29   : > { %v9724_v46 = vcombine.low %v9065_v38, %v9067_v21 }
 0xa2a   : > { %v9073_v55 = vpop.permute.xlu0 %9072 }
 0xa2b   : > { %v9752_v30 = vrot.slane %v9724_v46, %v16982_v14 }
 0xa2c   : > { %v9075_v6 = vpop.permute.xlu1 %9074 }
 0xa2d   : > { %v9754_v31 = vcombine.low %v9745_v35, %v9752_v30  ;;  %v9820_v3 = vcombine.low %v9073_v55, %v9075_v6  ;;  %v17017_v30 = vld [vmem:[#allocation69_spill] sm:$0xff] }
 0xa2e   : > { %v9077_v49 = vpop.permute.xlu0 %9076 }
 0xa2f   : > { %v9768_v1 = vrot.slane %v9754_v31, %v16982_v14  ;;  %v9836_v40 = vrot.slane %v9820_v3, %v16982_v14 }
 0xa30   : > { %v9079_v60 = vpop.permute.xlu1 %9078 }
 0xa31   : > { %v9769_v48 = vcombine.low %v9761_v26, %v9768_v1  ;;  %v9821_v11 = vcombine.low %v9077_v49, %v9079_v60  ;;  %v9851_v8 = vcombine.low %v9829_v50, %v9836_v40  ;;  %v17018_v1 = vld [vmem:[#allocation73_spill] sm:$0xff] }
 0xa32   : > { %v9033_v9 = vpop.permute.xlu0 %9032 }
 0xa33   : > { %9894 = vrot.lane.b32.xlu1 %v9769_v48, %s11391_s27  ;;  %v9843_v18 = vrot.slane %v9821_v11, %v16982_v14  ;;  %v9859_v23 = vrot.slane %v9851_v8, %v16982_v14 }
 0xa34   : > { %v9035_v33 = vpop.permute.xlu1 %9034 }
 0xa35   : > { %v9528_v63 = vcombine.low %v9033_v9, %v9035_v33 }
 0xa36   : > { %v9041_v27 = vpop.permute.xlu0 %9040 }
 0xa37   : > { %v9556_v47 = vrot.slane %v9528_v63, %v16982_v14 }
 0xa38   : > { %v9043_v2 = vpop.permute.xlu1 %9042 }
 0xa39   : > { %v9558_v10 = vcombine.low %v9549_v28, %v9556_v47  ;;  %v9624_v32 = vcombine.low %v9041_v27, %v9043_v2  ;;  %v17020_v28 = vld [vmem:[#allocation19_spill] sm:$0xff] }
 0xa3a   : > { %v9045_v19 = vpop.permute.xlu0 %9044 }
 0xa3b   : > { %v9572_v37 = vrot.slane %v9558_v10, %v16982_v14  ;;  %v9640_v17 = vrot.slane %v9624_v32, %v16982_v14 }
 0xa3c   : > { %v9047_v58 = vpop.permute.xlu1 %9046 }
 0xa3d   : > { %v9573_v52 = vcombine.low %v9565_v13, %v9572_v37  ;;  %v9625_v44 = vcombine.low %v9045_v19, %v9047_v58  ;;  %v9655_v15 = vcombine.low %v9633_v62, %v9640_v17  ;;  %v17021_v37 = vld [vmem:[#allocation13_spill] sm:$0xff] }
 0xa3e   : > { %v9049_v16 = vpop.permute.xlu0 %9048 }
 0xa3f   : > { %9886 = vrot.lane.b32.xlu1 %v9573_v52, %s11391_s27  ;;  %v9647_v7 = vrot.slane %v9625_v44, %v16982_v14  ;;  %v9663_v36 = vrot.slane %v9655_v15, %v16982_v14 }
 0xa40   : > { %v9051_v54 = vpop.permute.xlu1 %9050 }
 0xa41   : > { %v9626_v12 = vcombine.low %v9049_v16, %v9051_v54  ;;  %v17022_v16 = vld [vmem:[#allocation75_spill] sm:$0xff] }
 0xa42   : > { %v9081_v5 = vpop.permute.xlu0 %9080 }
 0xa43   : > { %v9654_v59 = vrot.slane %v9626_v12, %v16982_v14  ;;  %v17023_v12 = vld [vmem:[#allocation35_spill] sm:$0xff] }
 0xa44   : > { %v9083_v20 = vpop.permute.xlu1 %9082 }
 0xa45   : > { %v9656_v41 = vcombine.low %v9647_v7, %v9654_v59  ;;  %v9822_v39 = vcombine.low %v9081_v5, %v9083_v20  ;;  %v17024_v59 = vld [vmem:[#allocation71_spill] sm:$0xff] }
 0xa46   : > { %v9869_v57 = vpop.permute.xlu0 %9868 }
 0xa47   : > { %v9670_v22 = vrot.slane %v9656_v41, %v16982_v14  ;;  %v9850_v24 = vrot.slane %v9822_v39, %v16982_v14  ;;  %v9902_v38 = vsel %vm914_vm7, %v17016_v45, %v9869_v57 }
 0xa48   : > { %v9948_v42 = vsel %vm2039_vm9, %v9902_v38, 0  ;;  %v17026_v38 = vld [vmem:[#allocation78_spill] sm:$0xff] }
 0xa49   : > { %v9852_v0 = vcombine.low %v9843_v18, %v9850_v24  ;;  %v9980_v21 = vunpack.c.l.bf16 %v9948_v42  ;;  %v9981_v53 = vunpack.c.h.bf16 %v9948_v42  ;;  %v9671_v46 = vcombine.low %v9663_v36, %v9670_v22  ;;  %v17025_v18 = vld [vmem:[#allocation26_spill] sm:$0xff] }
 0xa4a   : > { %v9873_v55 = vpop.permute.xlu0 %9872 }
 0xa4b   : > { %v9866_v35 = vrot.slane %v9852_v0, %v16982_v14  ;;  %10012 = vst [vmem:[%s16131_s14] sm:$0xff] %v9980_v21  ;;  %10013 = vst [vmem:[%s16131_s14 + $0x8] sm:$0xff] %v9981_v53  ;;  %v9908_v6 = vsel %vm914_vm7, %v17017_v30, %v9873_v55  ;;  %9890 = vrot.lane.b32.xlu1 %v9671_v46, %s11391_s27  ;;  %v17027_v55 = vld [vmem:[#allocation30_spill] sm:$0xff] }
 0xa4c   : > { %v9952_v31 = vsel %vm2039_vm9, %v9908_v6, 0 }
 0xa4d   : > { %v9984_v49 = vunpack.c.l.bf16 %v9952_v31  ;;  %v9985_v26 = vunpack.c.h.bf16 %v9952_v31  ;;  %v9867_v14 = vcombine.low %v9859_v23, %v9866_v35 }
 0xa4e   : > { %v9877_v61 = vpop.permute.xlu0 %9876 }
 0xa4f   : > { %10016 = vst [vmem:[%s16131_s14 + $0x20] sm:$0xff] %v9984_v49  ;;  %10017 = vst [vmem:[%s16131_s14 + $0x28] sm:$0xff] %v9985_v26  ;;  %v9914_v60 = vsel %vm914_vm7, %v17018_v1, %v9877_v61  ;;  %9898 = vrot.lane.b32.xlu1 %v9867_v14, %s11391_s27  ;;  %v17028_v49 = vld [vmem:[#allocation14_spill] sm:$0xff]  ;;  %s10485_s27 = sshll.u32 %s11490_s29, 12  ;;  %s16223_s29 = scalar_lea.sflag [#allocation3], %s431_s16 }
 0xa50   : > { %v9956_v34 = vsel %vm2039_vm9, %v9914_v60, 0  ;;  %s16215_s30 = scalar_lea.hbm %s16277_s13, %s10485_s27 }
 0xa51   : > { %v9988_v48 = vunpack.c.l.bf16 %v9956_v34  ;;  %v9989_v9 = vunpack.c.h.bf16 %v9956_v34  ;;  %v17029_v34 = vld [vmem:[#allocation15_spill] sm:$0xff] }
 0xa52   : > { %v9881_v29 = vpop.permute.xlu0 %9880 }
 0xa53   : > { %10020 = vst [vmem:[%s16131_s14 + $0x40] sm:$0xff] %v9988_v48  ;;  %10021 = vst [vmem:[%s16131_s14 + $0x48] sm:$0xff] %v9989_v9  ;;  %v9920_v33 = vsel %vm914_vm7, %v17019_v4, %v9881_v29 }
 0xa54   : > { %v9960_v25 = vsel %vm2039_vm9, %v9920_v33, 0 }
 0xa55   : > { %v9992_v63 = vunpack.c.l.bf16 %v9960_v25  ;;  %v9993_v27 = vunpack.c.h.bf16 %v9960_v25  ;;  %v17030_v25 = vld [vmem:[#allocation74_spill] sm:$0xff] }
 0xa56   : > { %v9893_v56 = vpop.permute.xlu0 %9892 }
 0xa57   : > { %10024 = vst [vmem:[%s16131_s14 + $0x60] sm:$0xff] %v9992_v63  ;;  %10025 = vst [vmem:[%s16131_s14 + $0x68] sm:$0xff] %v9993_v27  ;;  %v9938_v47 = vsel %vm914_vm7, %v17020_v28, %v9893_v56 }
 0xa58   : > { %v9972_v2 = vsel %vm2039_vm9, %v9938_v47, 0 }
 0xa59   : > { %v10004_v10 = vunpack.c.l.bf16 %v9972_v2  ;;  %v10005_v19 = vunpack.c.h.bf16 %v9972_v2  ;;  %v17031_v2 = vld [vmem:[#allocation66_spill] sm:$0xff] }
 0xa5a   : > { %v9885_v13 = vpop.permute.xlu0 %9884 }
 0xa5b   : > { %10036 = vst [vmem:[%s16131_s14 + $0xc0] sm:$0xff] %v10004_v10  ;;  %10037 = vst [vmem:[%s16131_s14 + $0xc8] sm:$0xff] %v10005_v19  ;;  %v9926_v32 = vsel %vm914_vm7, %v17021_v37, %v9885_v13 }
 0xa5c   : > { %v9964_v58 = vsel %vm2039_vm9, %v9926_v32, 0 }
 0xa5d   : > { %v9996_v43 = vunpack.c.l.bf16 %v9964_v58  ;;  %v9997_v52 = vunpack.c.h.bf16 %v9964_v58 }
 0xa5e   : > { %v9889_v3 = vpop.permute.xlu0 %9888 }
 0xa5f   : > { %10028 = vst [vmem:[%s16131_s14 + $0x80] sm:$0xff] %v9996_v43  ;;  %10029 = vst [vmem:[%s16131_s14 + $0x88] sm:$0xff] %v9997_v52  ;;  %v9932_v17 = vsel %vm914_vm7, %v17022_v16, %v9889_v3 }
 0xa60   : > { %v9968_v44 = vsel %vm2039_vm9, %v9932_v17, 0 }
 0xa61   : > { %v10000_v51 = vunpack.c.l.bf16 %v9968_v44  ;;  %v10001_v54 = vunpack.c.h.bf16 %v9968_v44 }
 0xa62   : > { %v9897_v62 = vpop.permute.xlu0 %9896 }
 0xa63   : > { %10032 = vst [vmem:[%s16131_s14 + $0xa0] sm:$0xff] %v10000_v51  ;;  %10033 = vst [vmem:[%s16131_s14 + $0xa8] sm:$0xff] %v10001_v54  ;;  %v9944_v40 = vsel %vm914_vm7, %v17023_v12, %v9897_v62 }
 0xa64   : > { %v9976_v11 = vsel %vm2039_vm9, %v9944_v40, 0 }
 0xa65   : > { %v10008_v5 = vunpack.c.l.bf16 %v9976_v11  ;;  %v10009_v15 = vunpack.c.h.bf16 %v9976_v11  ;;  %v9879_v7 = vpop.permute.xlu1 %9878 }
 0xa66   : > { %v9917_v50 = vsel %vm914_vm7, %v17024_v59, %v9879_v7 }
 0xa67   : > { %10040 = vst [vmem:[%s16131_s14 + $0xe0] sm:$0xff] %v10008_v5  ;;  %10041 = vst [vmem:[%s16131_s14 + $0xe8] sm:$0xff] %v10009_v15  ;;  %v9958_v20 = vsel %vm2039_vm9, %v9917_v50, 0 }
 0xa68   : > { %v9990_v41 = vunpack.c.l.bf16 %v9958_v20  ;;  %v9991_v39 = vunpack.c.h.bf16 %v9958_v20 }
 0xa6a   : > { %10022 = vst [vmem:[%s16131_s14 + $0x50] sm:$0xff] %v9990_v41  ;;  %10023 = vst [vmem:[%s16131_s14 + $0x58] sm:$0xff] %v9991_v39 }
 0xa71   : > { %v9871_v8 = vpop.permute.xlu1 %9870 }
 0xa72   : > { %v9905_v57 = vsel %vm914_vm7, %v17025_v18, %v9871_v8 }
 0xa73   : > { %v9950_v36 = vsel %vm2039_vm9, %v9905_v57, 0 }
 0xa74   : > { %v9982_v22 = vunpack.c.l.bf16 %v9950_v36  ;;  %v9983_v24 = vunpack.c.h.bf16 %v9950_v36 }
 0xa76   : > { %10014 = vst [vmem:[%s16131_s14 + $0x10] sm:$0xff] %v9982_v22  ;;  %10015 = vst [vmem:[%s16131_s14 + $0x18] sm:$0xff] %v9983_v24 }
 0xa7d   : > { %v9883_v45 = vpop.permute.xlu1 %9882 }
 0xa7e   : > { %v9923_v42 = vsel %vm914_vm7, %v17026_v38, %v9883_v45 }
 0xa7f   : > { %v9962_v0 = vsel %vm2039_vm9, %v9923_v42, 0 }
 0xa80   : > { %v9994_v21 = vunpack.c.l.bf16 %v9962_v0  ;;  %v9995_v53 = vunpack.c.h.bf16 %v9962_v0 }
 0xa81   : > { %v9875_v46 = vpop.permute.xlu1 %9874 }
 0xa82   : > { %10026 = vst [vmem:[%s16131_s14 + $0x70] sm:$0xff] %v9994_v21  ;;  %10027 = vst [vmem:[%s16131_s14 + $0x78] sm:$0xff] %v9995_v53  ;;  %v9911_v23 = vsel %vm914_vm7, %v17027_v55, %v9875_v46 }
 0xa83   : > { %v9954_v35 = vsel %vm2039_vm9, %v9911_v23, 0 }
 0xa84   : > { %v9986_v30 = vunpack.c.l.bf16 %v9954_v35  ;;  %v9987_v6 = vunpack.c.h.bf16 %v9954_v35 }
 0xa86   : > { %10018 = vst [vmem:[%s16131_s14 + $0x30] sm:$0xff] %v9986_v30  ;;  %10019 = vst [vmem:[%s16131_s14 + $0x38] sm:$0xff] %v9987_v6 }
 0xaa5   : > { %v9895_v31 = vpop.permute.xlu1 %9894 }
 0xaa6   : > { %v9941_v26 = vsel %vm914_vm7, %v17028_v49, %v9895_v31 }
 0xaa7   : > { %v9974_v14 = vsel %vm2039_vm9, %v9941_v26, 0 }
 0xaa8   : > { %v10006_v61 = vunpack.c.l.bf16 %v9974_v14  ;;  %v10007_v1 = vunpack.c.h.bf16 %v9974_v14 }
 0xaaa   : > { %10038 = vst [vmem:[%s16131_s14 + $0xd0] sm:$0xff] %v10006_v61  ;;  %10039 = vst [vmem:[%s16131_s14 + $0xd8] sm:$0xff] %v10007_v1 }
 0xab1   : > { %v9887_v60 = vpop.permute.xlu1 %9886 }
 0xab2   : > { %v9929_v48 = vsel %vm914_vm7, %v17029_v34, %v9887_v60 }
 0xab3   : > { %v9966_v9 = vsel %vm2039_vm9, %v9929_v48, 0 }
 0xab4   : > { %v9998_v29 = vunpack.c.l.bf16 %v9966_v9  ;;  %v9999_v4 = vunpack.c.h.bf16 %v9966_v9 }
 0xab6   : > { %10030 = vst [vmem:[%s16131_s14 + $0x90] sm:$0xff] %v9998_v29  ;;  %10031 = vst [vmem:[%s16131_s14 + $0x98] sm:$0xff] %v9999_v4 }
 0xabd   : > { %v9891_v33 = vpop.permute.xlu1 %9890 }
 0xabe   : > { %v9935_v63 = vsel %vm914_vm7, %v17030_v25, %v9891_v33 }
 0xabf   : > { %v9970_v27 = vsel %vm2039_vm9, %v9935_v63, 0 }
 0xac0   : > { %v10002_v56 = vunpack.c.l.bf16 %v9970_v27  ;;  %v10003_v28 = vunpack.c.h.bf16 %v9970_v27 }
 0xac1   : > { %v9899_v47 = vpop.permute.xlu1 %9898 }
 0xac2   : > { %10034 = vst [vmem:[%s16131_s14 + $0xb0] sm:$0xff] %v10002_v56  ;;  %10035 = vst [vmem:[%s16131_s14 + $0xb8] sm:$0xff] %v10003_v28  ;;  %v9947_v10 = vsel %vm914_vm7, %v17031_v2, %v9899_v47 }
 0xac3   : > { %v9978_v19 = vsel %vm2039_vm9, %v9947_v10, 0 }
 0xac4   : > { %v10010_v13 = vunpack.c.l.bf16 %v9978_v19  ;;  %v10011_v37 = vunpack.c.h.bf16 %v9978_v19 }
 0xac6   : > { %10042 = vst [vmem:[%s16131_s14 + $0xf0] sm:$0xff] %v10010_v13  ;;  %10043 = vst [vmem:[%s16131_s14 + $0xf8] sm:$0xff] %v10011_v37 }
 0xac7   : > { %11339 = shalt.err (!%p11336_p3)
}
 0xac8   : > { %s11340_s16 = scalar_lea.hbm %s16215_s30, 4096  ;;  %s11344_s23 = scalar_lea.hbm %s16277_s13, 8192 }
 0xac9   : > { %p11341_p4 = scmp.ne.s32.totalorder %s16215_s30, %s11340_s16  ;;  %p11345_p9 = scmp.lt.u32.totalorder %s16215_s30, %s16277_s13 }
 0xaca   : > { %p11346_p10 = scmp.lt.u32.totalorder %s11344_s23, %s11340_s16  ;;  %p11348_p12 = scmp.lt.u32.totalorder %s11340_s16, %s16215_s30 }
 0xacb   : > { %p11342_p7 = pnand %p11341_p4, %p11507_p5 }
 0xacc   : > { %p11347_p11 = por %p11346_p10, %p11345_p9 }
 0xacd   : > { %p11343_p8 = pneg %p11342_p7 }
 0xace   : > { %p11349_p13 = por %p11348_p12, %p11347_p11 }
 0xad0   : > { %p11350_p0 = pnand %p11349_p13, %p11343_p8 }
 0xad2   : > { %11353 = shalt.err (!%p11350_p0)
}
 0xad3   : > { %s11397_s15 = smov 128   ;;  %s11398_s17 = smov 8  }
 0xad4   : > { %11175 = dma.vmem_to_hbm [thread:$0]  (%p11507_p5), %s16217_s22, 4096, %s16215_s30, %s16223_s29, %s11397_s15, %s11397_s15, %s11398_s17  }
 0xad5 PF: > { %p11181_p1 = scmp.ge.s32.totalorder %s11388_s28, 2  ;;  %s10073_s21 = sand.u32 1, %s11376_s25  }
 0xad6   : > { %s10074_s16 = scalar_lea.sflag [#allocation3], %s10073_s21 }
 0xad7   : > { %p11178_p2 = pnand %p11181_p1, %p11511_p6 }
 0xad9   : > { %11371 = dma.done.wait (!%p11178_p2), %s10074_s16, 4096  }
 0xada   : > { %11373 = vsyncadd (!%p11178_p2), %s10074_s16, 4294963200  ;;  %s17032_s28 = sld [smem:[#allocation6_spill]]  ;;  %s17033_s14 = sld [smem:[#allocation5_spill]] }
 0xadb   : > { %s17034_s27 = sld [smem:[#allocation7_spill]]  ;;  %s17035_s25 = smov %s11380_s26 }
 0xae0   : > { %p23_p3 = scmp.ge.s32.totalorder %s17032_s28, 4   ;;  %s17036_s26 = smov %s17033_s14 }
 0xae2   :  { %25 = sbr.rel (!%p23_p3) target bundleno = 3 (0x3), region = 107 }
 0xae9   :  { %10079 = vsyncpa [#allocation3], 1 }
 0xaea   :  { %10081 = vsyncpa [#allocation3 + $0x1], 1 }

</bundles_post_ra>
